<compile_context>
chip_gen: v5e
topology: v5e:2x2
jax: 0.10.0
libtpu: 0.0.40
codegen_flags: <defaults>
</compile_context>

<pallas_src>
import jax
import jax.numpy as jnp
from jax import lax
from jax.experimental import pallas as pl
from jax.experimental.pallas import tpu as pltpu

K_PIXELS = 20                       # hard-coded k in AttackPGDL0.forward: project_L0_box(dx, 20, ...)
_HI = jax.lax.Precision.HIGHEST
_LANES = 128                        # vreg lane width: channel blocks & class dim padded to this
_NEG_BIAS = -1e9                    # bias of padded classes -> softmax weight exactly 0 in f32


# --------------------------------------------------------------------------- helpers
def _oddeven_merge_sort_network(n):
    """Batcher odd-even merge-sort comparator list for power-of-two n (19 pairs for n=8)."""
    assert n > 0 and (n & (n - 1)) == 0, "sorting network requires power-of-two width"
    pairs = []

    def merge(lo, m, r):
        step = r * 2
        if step < m:
            merge(lo, m, step)
            merge(lo + r, m, step)
            pairs.extend((i, i + r) for i in range(lo + r, lo + m - r, step))
        else:
            pairs.append((lo, lo + r))

    def sort(lo, m):
        if m > 1:
            h = m // 2
            sort(lo, h)
            sort(lo + h, h)
            merge(lo, m, 1)

    sort(0, n)
    return pairs


# --------------------------------------------------------------------------- kernels
def _logits_kernel(x_ref, w_ref, b_ref, o_ref):
    # logits = flatten(x) @ W + b     (N, D) @ (D, KP) + (1, KP)   (KP lane-dense)
    o_ref[...] = (
        jnp.dot(x_ref[...], w_ref[...], precision=_HI,
                preferred_element_type=jnp.float32)
        + b_ref[...]
    )


def make_pgd_l0_kernel(*, num_steps, step_size, epsilon, random_start,
                       N, H, W, C, k, hwp):
    """Fused PGD-L0 attack: all `num_steps` iterations (grad step + project_L0_box +
    clamp) plus the final logits, in a single kernel on (N, C*hwp) lane-padded views."""
    # torch: p3.view(p2.shape[0]=H, N*W)[:, -k]  ->  with N == H this picks, per image n,
    # sorted(diff[n, h_star, :])[j_star]  (the (j_star+1)-th smallest of spatial row h_star).
    idx = N * W - k
    h_star, j_star = idx // W, idx % W
    col0 = h_star * W
    net = _oddeven_merge_sort_network(W)        # 19 compare-exchanges for W=8

    def kernel(x0_ref, w_ref, b_ref, onehot_ref, rand_ref, noise_ref,
               logits_ref, xadv_ref):
        x0 = x0_ref[...]                     # (N, C*hwp)  CHW-flattened, 128-aligned blocks
        lb = -x0                             # computed once, reused every step
        ub = 1.0 - x0
        w = w_ref[...]                       # (C*hwp, KP)  zero rows at padded lanes/classes
        b = b_ref[...]                       # (1, KP)      -1e9 at padded classes
        onehot = onehot_ref[...]             # (N, KP)

        def csum(a):                         # channel sum: (rows, C*hwp) -> (rows, hwp)
            s = a[:, 0:hwp]
            for c in range(1, C):            # 128-aligned full-vreg slices -> plain VPU adds
                s = s + a[:, c * hwp:(c + 1) * hwp]
            return s

        def project_clamp(x):
            dx = x - x0                                            # (N, C*hwp)
            p1 = csum(dx * dx)                                     # (N, hwp)
            q = jnp.minimum(ub - dx, dx - lb)                      # (N, C*hwp)
            qmin = jnp.min(q, axis=0, keepdims=True)               # (1, C*hwp) torch.min(.,0)
            p2 = csum(qmin * qmin)                                 # (1, hwp)
            diff = p1 - p2                                         # (N, hwp)

            # Order statistic sorted(diff[:, col0:col0+W])[j_star] via a Batcher sorting
            # network on (N,1) columns: no 3-D broadcast relayout, no XLU reduce.
            cols = [diff[:, col0 + j: col0 + j + 1] for j in range(W)]
            for (i, j) in net:
                lo = jnp.minimum(cols[i], cols[j])
                hi = jnp.maximum(cols[i], cols[j])
                cols[i], cols[j] = lo, hi
            thr = cols[j_star]                                     # (N, 1)
            mask = diff >= thr                                     # (N, hwp) bool

            # Box term with where-selects (compare+select, no float casts / mask muls).
            in_box = jnp.logical_and(lb <= dx, dx <= ub)
            xb = (jnp.where(in_box, dx, 0.0)
                  + jnp.where(dx > lb, lb, 0.0)
                  + jnp.where(ub > dx, ub, 0.0))

            # Apply the (N, hwp) mask per 128-aligned channel block (no lane-axis
            # mask tiling at sub-vreg offsets); the final concat is aligned vreg copies.
            blocks = []
            for c in range(C):
                sl = slice(c * hwp, (c + 1) * hwp)
                xc = jnp.where(mask, x0[:, sl] + xb[:, sl], x0[:, sl])
                blocks.append(jnp.clip(xc, 0.0, 1.0))
            return jnp.concatenate(blocks, axis=-1)

        def grad_step(x, noise):
            logits = jnp.dot(x, w, precision=_HI,
                             preferred_element_type=jnp.float32) + b        # (N, KP)
            m = jnp.max(logits, axis=-1, keepdims=True)
            e = jnp.exp(logits - m)                                         # padded cls -> 0
            p = e / jnp.sum(e, axis=-1, keepdims=True)                      # softmax (exact div)
            g = p - onehot                                                  # d(sum CE)/dlogits
            grad = lax.dot_general(g, w, (((1,), (1,)), ((), ())),          # g @ w.T -> (N, C*hwp)
                                   precision=_HI,
                                   preferred_element_type=jnp.float32)
            grad = grad / (1e-10 + jnp.sum(jnp.abs(grad), axis=-1, keepdims=True))
            return x + (noise - 0.5) * 1e-12 + step_size * grad + epsilon

        x = x0
        if random_start:
            x = x + rand_ref[...]
        # Whole PGD loop fused inside this single pallas_call.  num_steps is a small
        # static Python int, so the loop is statically unrolled in-kernel.
        # (If num_steps ever grows beyond ~8, switch to lax.fori_loop to bound live ranges.)
        for i in range(num_steps):
            if i > 0:
                x = grad_step(x, noise_ref[i - 1])     # static leading-axis index
            x = project_clamp(x)

        logits_ref[...] = jnp.dot(x, w, precision=_HI,
                                  preferred_element_type=jnp.float32) + b
        xadv_ref[...] = x

    return kernel


# --------------------------------------------------------------------------- forward
def attack_pgd_l0_forward(inputs, targets, w, b, config, mode, rand_noise, step_noises):
    """Pallas port of AttackPGDL0.forward.  inputs: NHWC f32, targets: (N,) int."""
    assert config['loss_func'] == 'xent', 'Use cross-entropy as loss function.'
    N, H, W_, C = inputs.shape
    HW = H * W_
    D = HW * C
    K = w.shape[1]
    KP = max(_LANES, ((K + _LANES - 1) // _LANES) * _LANES)        # class dim padded to 128
    HWP = ((HW + _LANES - 1) // _LANES) * _LANES                   # per-channel block -> 128
    DP = C * HWP
    vmem = pl.BlockSpec(memory_space=pltpu.MemorySpace.VMEM)

    # Class-dim padding: zero weight columns, -1e9 padded biases (softmax weight -> 0).
    w_kpad = jnp.pad(w, ((0, 0), (0, KP - K)))
    b_kpad = jnp.concatenate(
        [b.reshape(1, K), jnp.full((1, KP - K), _NEG_BIAS, jnp.float32)], axis=-1)

    if not mode:
        logits = pl.pallas_call(
            _logits_kernel,
            out_shape=jax.ShapeDtypeStruct((N, KP), jnp.float32),
            in_specs=[vmem] * 3,
            out_specs=vmem,
        )(inputs.reshape(N, D), w_kpad, b_kpad)
        return logits[:, :K], inputs

    num_steps = config['num_steps']
    assert N == H, "project_L0_box (as written in torch) requires batch == H"
    assert N * W_ > K_PIXELS

    # One-time host-side layout prep: NHWC -> (.., C*HWP), each HW block zero-padded to 128.
    def to_chw_pad(a):
        lead = a.shape[:-3]
        x = jnp.moveaxis(a, -1, -3).reshape(lead + (C, HW))
        x = jnp.pad(x, [(0, 0)] * (len(lead) + 1) + [(0, HWP - HW)])
        return x.reshape(lead + (C * HWP,))

    x0 = to_chw_pad(inputs)                                               # (N, DP)
    rand = to_chw_pad(rand_noise)                                         # (N, DP)
    if num_steps > 1:
        noises = to_chw_pad(jnp.stack(step_noises[:num_steps - 1], axis=0))   # (S, N, DP)
    else:
        noises = jnp.zeros((1, N, DP), jnp.float32)

    # W rows: HWC -> CHW order, zero rows for padded HW lanes, zero cols for padded classes.
    w_chw = jnp.transpose(w.reshape(HW, C, K), (1, 0, 2))                 # (C, HW, K)
    w_chw = jnp.pad(w_chw, ((0, 0), (0, HWP - HW), (0, KP - K)))          # (C, HWP, KP)
    w_pad = w_chw.reshape(DP, KP)
    onehot = jax.nn.one_hot(targets, KP, dtype=jnp.float32)               # (N, KP)

    kernel = make_pgd_l0_kernel(
        num_steps=num_steps, step_size=config['step_size'], epsilon=config['epsilon'],
        random_start=config['random_start'], N=N, H=H, W=W_, C=C, k=K_PIXELS, hwp=HWP)

    logits, x_chw = pl.pallas_call(
        kernel,
        out_shape=(jax.ShapeDtypeStruct((N, KP), jnp.float32),
                   jax.ShapeDtypeStruct((N, DP), jnp.float32)),
        in_specs=[vmem] * 6,
        out_specs=(vmem, vmem),
    )(x0, w_pad, b_kpad, onehot, rand, noises)

    # Strip padded lanes / classes and restore NHWC (one-time, after the fused loop).
    x_adv = jnp.transpose(
        x_chw.reshape(N, C, HWP)[:, :, :HW].reshape(N, C, H, W_), (0, 2, 3, 1))
    return logits[:, :K], x_adv


# --------------------------------------------------------------------------- pure-JAX reference
def _project_l0_box_ref(dx, k, lb, ub):
    p1 = jnp.sum(dx ** 2, axis=-1)
    p2 = jnp.min(jnp.minimum(ub - dx, dx - lb), axis=0)       # torch.min(., 0).values
    p2 = jnp.sum(p2 ** 2, axis=-1)
    p3 = jnp.sort(p1 - p2, axis=-1).reshape(p2.shape[0], -1)[:, -k]
    xb = dx * ((lb <= dx) & (dx <= ub)) + lb * (dx > lb) + ub * (ub > dx)
    mask = ((p1 - p2) >= p3.reshape(-1, 1, 1))[..., None]
    return xb * mask


def attack_pgd_l0_forward_ref(inputs, targets, w, b, config, mode, rand_noise, step_noises):
    N, H, W_, C = inputs.shape
    D = H * W_ * C
    K = w.shape[1]

    def model_logits(x):
        return jnp.dot(x.reshape(N, D), w, precision=_HI) + b

    if not mode:
        return model_logits(inputs), inputs
    onehot = jax.nn.one_hot(targets, K, dtype=jnp.float32)
    x = inputs
    if config['random_start']:
        x = x + rand_noise
    for i in range(config['num_steps']):
        if i > 0:
            p = jax.nn.softmax(model_logits(x), axis=-1)
            grad = jnp.dot(p - onehot, w.T, precision=_HI).reshape(N, H, W_, C)
            grad = grad / (1e-10 + jnp.sum(jnp.abs(grad), axis=(1, 2, 3), keepdims=True))
            x = x + (step_noises[i - 1] - 0.5) * 1e-12 + config['step_size'] * grad + config['epsilon']
        dx = x - inputs
        x = inputs + _project_l0_box_ref(dx, K_PIXELS, -inputs, 1.0 - inputs)
        x = jnp.clip(x, 0.0, 1.0)
    return model_logits(x), x


# --------------------------------------------------------------------------- main
if __name__ == "__main__":
    key = jax.random.PRNGKey(0)
    N, H, W, C, NUM_CLASSES = 8, 8, 8, 4, 10    # batch == H (needed by the torch code)
    D = H * W * C
    config = dict(random_start=True, step_size=0.05, epsilon=0.1,
                  num_steps=3, loss_func='xent')
    mode = True

    k_in, k_tg, k_w, k_b, k_rs, k_ns = jax.random.split(key, 6)
    inputs = jax.random.uniform(k_in, (N, H, W, C), jnp.float32)          # images in [0, 1]
    targets = jax.random.randint(k_tg, (N,), 0, NUM_CLASSES)
    w = 0.05 * jax.random.normal(k_w, (D, NUM_CLASSES), jnp.float32)      # synthetic linear model
    b = 0.01 * jax.random.normal(k_b, (NUM_CLASSES,), jnp.float32)

    eps = config['epsilon']
    rand_noise = jax.random.uniform(k_rs, (N, H, W, C), jnp.float32, -eps, eps)
    step_noises = [jax.random.uniform(kk, (N, H, W, C), jnp.float32)
                   for kk in jax.random.split(k_ns, config['num_steps'] - 1)]

    # jit the whole forward (config/mode closed over) so the one-time layout prep
    # (padding / transposes / W permute / noise stacking) fuses with the pallas_call
    # and is not re-executed as separate XLA ops per invocation.
    fwd = jax.jit(lambda inp, tgt, ww, bb, rn, sn:
                  attack_pgd_l0_forward(inp, tgt, ww, bb, config, mode, rn, sn))
    logits, x_adv = fwd(inputs, targets, w, b, rand_noise, step_noises)
    jax.block_until_ready((logits, x_adv))

    logits_ref, x_ref_ = attack_pgd_l0_forward_ref(
        inputs, targets, w, b, config, mode, rand_noise, step_noises)

    assert logits.shape == (N, NUM_CLASSES) and x_adv.shape == (N, H, W, C)
    assert bool(jnp.all(jnp.isfinite(logits))) and bool(jnp.all(jnp.isfinite(x_adv)))
    err_x = float(jnp.max(jnp.abs(x_adv - x_ref_)))
    err_l = float(jnp.max(jnp.abs(logits - logits_ref)))
    assert err_x < 2e-3, f"x_adv max abs err {err_x}"
    assert err_l < 2e-3, f"logits max abs err {err_l}"
    print("KERNEL_OK")
</pallas_src>

<mosaic_0001>
module attributes {stable_mosaic.version = 11 : i64} {
  func.func @kernel(%arg0: memref<8x512xf32, #tpu.memory_space<vmem>>, %arg1: memref<512x128xf32, #tpu.memory_space<vmem>>, %arg2: memref<1x128xf32, #tpu.memory_space<vmem>>, %arg3: memref<8x128xf32, #tpu.memory_space<vmem>>, %arg4: memref<8x512xf32, #tpu.memory_space<vmem>>, %arg5: memref<2x8x512xf32, #tpu.memory_space<vmem>>, %arg6: memref<8x128xf32, #tpu.memory_space<vmem>>, %arg7: memref<8x512xf32, #tpu.memory_space<vmem>>) attributes {dimension_semantics = [], scalar_prefetch = 0 : i64, scratch_operands = 0 : i64, tpu.core_type = #tpu.core_type<tc>} {
    %c0 = arith.constant 0 : index
    %c0_0 = arith.constant 0 : index
    %0 = vector.load %arg0[%c0, %c0_0] : memref<8x512xf32, #tpu.memory_space<vmem>>, vector<8x512xf32>
    %cst = arith.constant 0.000000e+00 : f32
    %1 = vector.broadcast %cst : f32 to vector<8x512xf32>
    %2 = arith.subf %1, %0 : vector<8x512xf32>
    %cst_1 = arith.constant 1.000000e+00 : f32
    %3 = vector.broadcast %cst_1 : f32 to vector<8x512xf32>
    %4 = arith.subf %3, %0 : vector<8x512xf32>
    %c0_2 = arith.constant 0 : index
    %c0_3 = arith.constant 0 : index
    %5 = vector.load %arg1[%c0_2, %c0_3] : memref<512x128xf32, #tpu.memory_space<vmem>>, vector<512x128xf32>
    %c0_4 = arith.constant 0 : index
    %c0_5 = arith.constant 0 : index
    %6 = vector.load %arg2[%c0_4, %c0_5] : memref<1x128xf32, #tpu.memory_space<vmem>>, vector<1x128xf32>
    %c0_6 = arith.constant 0 : index
    %c0_7 = arith.constant 0 : index
    %7 = vector.load %arg3[%c0_6, %c0_7] : memref<8x128xf32, #tpu.memory_space<vmem>>, vector<8x128xf32>
    %c0_8 = arith.constant 0 : index
    %c0_9 = arith.constant 0 : index
    %8 = vector.load %arg4[%c0_8, %c0_9] : memref<8x512xf32, #tpu.memory_space<vmem>>, vector<8x512xf32>
    %9 = arith.addf %0, %8 : vector<8x512xf32>
    %10 = arith.subf %9, %0 : vector<8x512xf32>
    %11 = arith.mulf %10, %10 : vector<8x512xf32>
    %12 = vector.extract_strided_slice %11 {offsets = [0, 0], sizes = [8, 128], strides = [1, 1]} : vector<8x512xf32> to vector<8x128xf32>
    %13 = vector.extract_strided_slice %11 {offsets = [0, 128], sizes = [8, 128], strides = [1, 1]} : vector<8x512xf32> to vector<8x128xf32>
    %14 = arith.addf %12, %13 : vector<8x128xf32>
    %15 = vector.extract_strided_slice %11 {offsets = [0, 256], sizes = [8, 128], strides = [1, 1]} : vector<8x512xf32> to vector<8x128xf32>
    %16 = arith.addf %14, %15 : vector<8x128xf32>
    %17 = vector.extract_strided_slice %11 {offsets = [0, 384], sizes = [8, 128], strides = [1, 1]} : vector<8x512xf32> to vector<8x128xf32>
    %18 = arith.addf %16, %17 : vector<8x128xf32>
    %19 = arith.subf %4, %10 : vector<8x512xf32>
    %20 = arith.subf %10, %2 : vector<8x512xf32>
    %21 = arith.minimumf %19, %20 : vector<8x512xf32>
    %cst_10 = arith.constant dense<0x7F800000> : vector<512xf32>
    %22 = vector.multi_reduction <minimumf>, %21, %cst_10 [0] : vector<8x512xf32> to vector<512xf32>
    %23 = vector.shape_cast %22 : vector<512xf32> to vector<1x512xf32>
    %24 = arith.mulf %23, %23 : vector<1x512xf32>
    %25 = vector.extract_strided_slice %24 {offsets = [0, 0], sizes = [1, 128], strides = [1, 1]} : vector<1x512xf32> to vector<1x128xf32>
    %26 = vector.extract_strided_slice %24 {offsets = [0, 128], sizes = [1, 128], strides = [1, 1]} : vector<1x512xf32> to vector<1x128xf32>
    %27 = arith.addf %25, %26 : vector<1x128xf32>
    %28 = vector.extract_strided_slice %24 {offsets = [0, 256], sizes = [1, 128], strides = [1, 1]} : vector<1x512xf32> to vector<1x128xf32>
    %29 = arith.addf %27, %28 : vector<1x128xf32>
    %30 = vector.extract_strided_slice %24 {offsets = [0, 384], sizes = [1, 128], strides = [1, 1]} : vector<1x512xf32> to vector<1x128xf32>
    %31 = arith.addf %29, %30 : vector<1x128xf32>
    %32 = vector.broadcast %31 : vector<1x128xf32> to vector<8x128xf32>
    %33 = arith.subf %18, %32 : vector<8x128xf32>
    %34 = vector.extract_strided_slice %33 {offsets = [0, 40], sizes = [8, 1], strides = [1, 1]} : vector<8x128xf32> to vector<8x1xf32>
    %35 = vector.extract_strided_slice %33 {offsets = [0, 41], sizes = [8, 1], strides = [1, 1]} : vector<8x128xf32> to vector<8x1xf32>
    %36 = vector.extract_strided_slice %33 {offsets = [0, 42], sizes = [8, 1], strides = [1, 1]} : vector<8x128xf32> to vector<8x1xf32>
    %37 = vector.extract_strided_slice %33 {offsets = [0, 43], sizes = [8, 1], strides = [1, 1]} : vector<8x128xf32> to vector<8x1xf32>
    %38 = vector.extract_strided_slice %33 {offsets = [0, 44], sizes = [8, 1], strides = [1, 1]} : vector<8x128xf32> to vector<8x1xf32>
    %39 = vector.extract_strided_slice %33 {offsets = [0, 45], sizes = [8, 1], strides = [1, 1]} : vector<8x128xf32> to vector<8x1xf32>
    %40 = vector.extract_strided_slice %33 {offsets = [0, 46], sizes = [8, 1], strides = [1, 1]} : vector<8x128xf32> to vector<8x1xf32>
    %41 = vector.extract_strided_slice %33 {offsets = [0, 47], sizes = [8, 1], strides = [1, 1]} : vector<8x128xf32> to vector<8x1xf32>
    %42 = arith.minimumf %34, %35 : vector<8x1xf32>
    %43 = arith.maximumf %34, %35 : vector<8x1xf32>
    %44 = arith.minimumf %36, %37 : vector<8x1xf32>
    %45 = arith.maximumf %36, %37 : vector<8x1xf32>
    %46 = arith.minimumf %42, %44 : vector<8x1xf32>
    %47 = arith.maximumf %42, %44 : vector<8x1xf32>
    %48 = arith.minimumf %43, %45 : vector<8x1xf32>
    %49 = arith.maximumf %43, %45 : vector<8x1xf32>
    %50 = arith.minimumf %48, %47 : vector<8x1xf32>
    %51 = arith.maximumf %48, %47 : vector<8x1xf32>
    %52 = arith.minimumf %38, %39 : vector<8x1xf32>
    %53 = arith.maximumf %38, %39 : vector<8x1xf32>
    %54 = arith.minimumf %40, %41 : vector<8x1xf32>
    %55 = arith.maximumf %40, %41 : vector<8x1xf32>
    %56 = arith.minimumf %52, %54 : vector<8x1xf32>
    %57 = arith.maximumf %52, %54 : vector<8x1xf32>
    %58 = arith.minimumf %53, %55 : vector<8x1xf32>
    %59 = arith.maximumf %53, %55 : vector<8x1xf32>
    %60 = arith.minimumf %58, %57 : vector<8x1xf32>
    %61 = arith.maximumf %58, %57 : vector<8x1xf32>
    %62 = arith.maximumf %46, %56 : vector<8x1xf32>
    %63 = arith.minimumf %51, %61 : vector<8x1xf32>
    %64 = arith.maximumf %63, %62 : vector<8x1xf32>
    %65 = arith.maximumf %50, %60 : vector<8x1xf32>
    %66 = arith.minimumf %49, %59 : vector<8x1xf32>
    %67 = arith.minimumf %66, %65 : vector<8x1xf32>
    %68 = arith.maximumf %67, %64 : vector<8x1xf32>
    %69 = vector.broadcast %68 : vector<8x1xf32> to vector<8x128xf32>
    %70 = arith.cmpf oge, %33, %69 : vector<8x128xf32>
    %71 = arith.cmpf ole, %2, %10 : vector<8x512xf32>
    %72 = arith.cmpf ole, %10, %4 : vector<8x512xf32>
    %73 = arith.andi %71, %72 : vector<8x512xi1>
    %cst_11 = arith.constant 0.000000e+00 : f32
    %74 = vector.broadcast %cst_11 : f32 to vector<8x512xf32>
    %75 = arith.select %73, %10, %74 : vector<8x512xi1>, vector<8x512xf32>
    %76 = arith.cmpf ogt, %10, %2 : vector<8x512xf32>
    %cst_12 = arith.constant 0.000000e+00 : f32
    %77 = vector.broadcast %cst_12 : f32 to vector<8x512xf32>
    %78 = arith.select %76, %2, %77 : vector<8x512xi1>, vector<8x512xf32>
    %79 = arith.addf %75, %78 : vector<8x512xf32>
    %80 = arith.cmpf ogt, %4, %10 : vector<8x512xf32>
    %cst_13 = arith.constant 0.000000e+00 : f32
    %81 = vector.broadcast %cst_13 : f32 to vector<8x512xf32>
    %82 = arith.select %80, %4, %81 : vector<8x512xi1>, vector<8x512xf32>
    %83 = arith.addf %79, %82 : vector<8x512xf32>
    %84 = vector.extract_strided_slice %0 {offsets = [0, 0], sizes = [8, 128], strides = [1, 1]} : vector<8x512xf32> to vector<8x128xf32>
    %85 = vector.extract_strided_slice %83 {offsets = [0, 0], sizes = [8, 128], strides = [1, 1]} : vector<8x512xf32> to vector<8x128xf32>
    %86 = arith.addf %84, %85 : vector<8x128xf32>
    %87 = vector.extract_strided_slice %0 {offsets = [0, 0], sizes = [8, 128], strides = [1, 1]} : vector<8x512xf32> to vector<8x128xf32>
    %88 = arith.select %70, %86, %87 : vector<8x128xi1>, vector<8x128xf32>
    %cst_14 = arith.constant 0.000000e+00 : f32
    %cst_15 = arith.constant 1.000000e+00 : f32
    %89 = vector.broadcast %cst_14 : f32 to vector<8x128xf32>
    %90 = arith.maximumf %89, %88 : vector<8x128xf32>
    %91 = vector.broadcast %cst_15 : f32 to vector<8x128xf32>
    %92 = arith.minimumf %91, %90 : vector<8x128xf32>
    %93 = vector.extract_strided_slice %0 {offsets = [0, 128], sizes = [8, 128], strides = [1, 1]} : vector<8x512xf32> to vector<8x128xf32>
    %94 = vector.extract_strided_slice %83 {offsets = [0, 128], sizes = [8, 128], strides = [1, 1]} : vector<8x512xf32> to vector<8x128xf32>
    %95 = arith.addf %93, %94 : vector<8x128xf32>
    %96 = vector.extract_strided_slice %0 {offsets = [0, 128], sizes = [8, 128], strides = [1, 1]} : vector<8x512xf32> to vector<8x128xf32>
    %97 = arith.select %70, %95, %96 : vector<8x128xi1>, vector<8x128xf32>
    %cst_16 = arith.constant 0.000000e+00 : f32
    %cst_17 = arith.constant 1.000000e+00 : f32
    %98 = vector.broadcast %cst_16 : f32 to vector<8x128xf32>
    %99 = arith.maximumf %98, %97 : vector<8x128xf32>
    %100 = vector.broadcast %cst_17 : f32 to vector<8x128xf32>
    %101 = arith.minimumf %100, %99 : vector<8x128xf32>
    %102 = vector.extract_strided_slice %0 {offsets = [0, 256], sizes = [8, 128], strides = [1, 1]} : vector<8x512xf32> to vector<8x128xf32>
    %103 = vector.extract_strided_slice %83 {offsets = [0, 256], sizes = [8, 128], strides = [1, 1]} : vector<8x512xf32> to vector<8x128xf32>
    %104 = arith.addf %102, %103 : vector<8x128xf32>
    %105 = vector.extract_strided_slice %0 {offsets = [0, 256], sizes = [8, 128], strides = [1, 1]} : vector<8x512xf32> to vector<8x128xf32>
    %106 = arith.select %70, %104, %105 : vector<8x128xi1>, vector<8x128xf32>
    %cst_18 = arith.constant 0.000000e+00 : f32
    %cst_19 = arith.constant 1.000000e+00 : f32
    %107 = vector.broadcast %cst_18 : f32 to vector<8x128xf32>
    %108 = arith.maximumf %107, %106 : vector<8x128xf32>
    %109 = vector.broadcast %cst_19 : f32 to vector<8x128xf32>
    %110 = arith.minimumf %109, %108 : vector<8x128xf32>
    %111 = vector.extract_strided_slice %0 {offsets = [0, 384], sizes = [8, 128], strides = [1, 1]} : vector<8x512xf32> to vector<8x128xf32>
    %112 = vector.extract_strided_slice %83 {offsets = [0, 384], sizes = [8, 128], strides = [1, 1]} : vector<8x512xf32> to vector<8x128xf32>
    %113 = arith.addf %111, %112 : vector<8x128xf32>
    %114 = vector.extract_strided_slice %0 {offsets = [0, 384], sizes = [8, 128], strides = [1, 1]} : vector<8x512xf32> to vector<8x128xf32>
    %115 = arith.select %70, %113, %114 : vector<8x128xi1>, vector<8x128xf32>
    %cst_20 = arith.constant 0.000000e+00 : f32
    %cst_21 = arith.constant 1.000000e+00 : f32
    %116 = vector.broadcast %cst_20 : f32 to vector<8x128xf32>
    %117 = arith.maximumf %116, %115 : vector<8x128xf32>
    %118 = vector.broadcast %cst_21 : f32 to vector<8x128xf32>
    %119 = arith.minimumf %118, %117 : vector<8x128xf32>
    %120 = tpu.concatenate %92, %101, %110, %119 in 1 : vector<8x128xf32>, vector<8x128xf32>, vector<8x128xf32>, vector<8x128xf32> -> vector<8x512xf32>
    %c0_22 = arith.constant 0 : index
    %c0_23 = arith.constant 0 : index
    %c0_24 = arith.constant 0 : index
    %121 = vector.load %arg5[%c0_22, %c0_23, %c0_24] : memref<2x8x512xf32, #tpu.memory_space<vmem>>, vector<1x8x512xf32>
    %122 = vector.shape_cast %121 : vector<1x8x512xf32> to vector<8x512xf32>
    %cst_25 = arith.constant dense<0.000000e+00> : vector<8x128xf32>
    %123 = tpu.matmul %120, %5, %cst_25 {dimension_numbers = #tpu.dot_dimension_numbers<[1], [0], [0], [1], [0, 0, 1, 1], [], []>, precision = #tpu.contract_precision<fp32>} : vector<8x512xf32>, vector<512x128xf32>, vector<8x128xf32> -> vector<8x128xf32>
    %124 = vector.broadcast %6 : vector<1x128xf32> to vector<8x128xf32>
    %125 = arith.addf %123, %124 : vector<8x128xf32>
    %cst_26 = arith.constant dense<0xFF800000> : vector<8xf32>
    %126 = vector.multi_reduction <maximumf>, %125, %cst_26 [1] : vector<8x128xf32> to vector<8xf32>
    %127 = vector.shape_cast %126 : vector<8xf32> to vector<8x1xf32>
    %128 = vector.broadcast %127 : vector<8x1xf32> to vector<8x128xf32>
    %129 = arith.subf %125, %128 : vector<8x128xf32>
    %130 = math.exp %129 : vector<8x128xf32>
    %cst_27 = arith.constant dense<0.000000e+00> : vector<8xf32>
    %131 = vector.multi_reduction <add>, %130, %cst_27 [1] : vector<8x128xf32> to vector<8xf32>
    %132 = vector.shape_cast %131 : vector<8xf32> to vector<8x1xf32>
    %133 = vector.broadcast %132 : vector<8x1xf32> to vector<8x128xf32>
    %134 = arith.divf %130, %133 : vector<8x128xf32>
    %135 = arith.subf %134, %7 : vector<8x128xf32>
    %cst_28 = arith.constant dense<0.000000e+00> : vector<8x512xf32>
    %136 = tpu.matmul %135, %5, %cst_28 {dimension_numbers = #tpu.dot_dimension_numbers<[1], [1], [0], [0], [0, 0, 1, 0], [], []>, precision = #tpu.contract_precision<fp32>} : vector<8x128xf32>, vector<512x128xf32>, vector<8x512xf32> -> vector<8x512xf32>
    %137 = math.absf %136 : vector<8x512xf32>
    %cst_29 = arith.constant dense<0.000000e+00> : vector<8xf32>
    %138 = vector.multi_reduction <add>, %137, %cst_29 [1] : vector<8x512xf32> to vector<8xf32>
    %139 = vector.shape_cast %138 : vector<8xf32> to vector<8x1xf32>
    %cst_30 = arith.constant 1.000000e-10 : f32
    %140 = vector.broadcast %cst_30 : f32 to vector<8x1xf32>
    %141 = arith.addf %140, %139 : vector<8x1xf32>
    %142 = vector.broadcast %141 : vector<8x1xf32> to vector<8x512xf32>
    %143 = arith.divf %136, %142 : vector<8x512xf32>
    %cst_31 = arith.constant 5.000000e-01 : f32
    %144 = vector.broadcast %cst_31 : f32 to vector<8x512xf32>
    %145 = arith.subf %122, %144 : vector<8x512xf32>
    %cst_32 = arith.constant 9.99999996E-13 : f32
    %146 = vector.broadcast %cst_32 : f32 to vector<8x512xf32>
    %147 = arith.mulf %145, %146 : vector<8x512xf32>
    %148 = arith.addf %120, %147 : vector<8x512xf32>
    %cst_33 = arith.constant 5.000000e-02 : f32
    %149 = vector.broadcast %cst_33 : f32 to vector<8x512xf32>
    %150 = arith.mulf %149, %143 : vector<8x512xf32>
    %151 = arith.addf %148, %150 : vector<8x512xf32>
    %cst_34 = arith.constant 1.000000e-01 : f32
    %152 = vector.broadcast %cst_34 : f32 to vector<8x512xf32>
    %153 = arith.addf %151, %152 : vector<8x512xf32>
    %154 = arith.subf %153, %0 : vector<8x512xf32>
    %155 = arith.mulf %154, %154 : vector<8x512xf32>
    %156 = vector.extract_strided_slice %155 {offsets = [0, 0], sizes = [8, 128], strides = [1, 1]} : vector<8x512xf32> to vector<8x128xf32>
    %157 = vector.extract_strided_slice %155 {offsets = [0, 128], sizes = [8, 128], strides = [1, 1]} : vector<8x512xf32> to vector<8x128xf32>
    %158 = arith.addf %156, %157 : vector<8x128xf32>
    %159 = vector.extract_strided_slice %155 {offsets = [0, 256], sizes = [8, 128], strides = [1, 1]} : vector<8x512xf32> to vector<8x128xf32>
    %160 = arith.addf %158, %159 : vector<8x128xf32>
    %161 = vector.extract_strided_slice %155 {offsets = [0, 384], sizes = [8, 128], strides = [1, 1]} : vector<8x512xf32> to vector<8x128xf32>
    %162 = arith.addf %160, %161 : vector<8x128xf32>
    %163 = arith.subf %4, %154 : vector<8x512xf32>
    %164 = arith.subf %154, %2 : vector<8x512xf32>
    %165 = arith.minimumf %163, %164 : vector<8x512xf32>
    %cst_35 = arith.constant dense<0x7F800000> : vector<512xf32>
    %166 = vector.multi_reduction <minimumf>, %165, %cst_35 [0] : vector<8x512xf32> to vector<512xf32>
    %167 = vector.shape_cast %166 : vector<512xf32> to vector<1x512xf32>
    %168 = arith.mulf %167, %167 : vector<1x512xf32>
    %169 = vector.extract_strided_slice %168 {offsets = [0, 0], sizes = [1, 128], strides = [1, 1]} : vector<1x512xf32> to vector<1x128xf32>
    %170 = vector.extract_strided_slice %168 {offsets = [0, 128], sizes = [1, 128], strides = [1, 1]} : vector<1x512xf32> to vector<1x128xf32>
    %171 = arith.addf %169, %170 : vector<1x128xf32>
    %172 = vector.extract_strided_slice %168 {offsets = [0, 256], sizes = [1, 128], strides = [1, 1]} : vector<1x512xf32> to vector<1x128xf32>
    %173 = arith.addf %171, %172 : vector<1x128xf32>
    %174 = vector.extract_strided_slice %168 {offsets = [0, 384], sizes = [1, 128], strides = [1, 1]} : vector<1x512xf32> to vector<1x128xf32>
    %175 = arith.addf %173, %174 : vector<1x128xf32>
    %176 = vector.broadcast %175 : vector<1x128xf32> to vector<8x128xf32>
    %177 = arith.subf %162, %176 : vector<8x128xf32>
    %178 = vector.extract_strided_slice %177 {offsets = [0, 40], sizes = [8, 1], strides = [1, 1]} : vector<8x128xf32> to vector<8x1xf32>
    %179 = vector.extract_strided_slice %177 {offsets = [0, 41], sizes = [8, 1], strides = [1, 1]} : vector<8x128xf32> to vector<8x1xf32>
    %180 = vector.extract_strided_slice %177 {offsets = [0, 42], sizes = [8, 1], strides = [1, 1]} : vector<8x128xf32> to vector<8x1xf32>
    %181 = vector.extract_strided_slice %177 {offsets = [0, 43], sizes = [8, 1], strides = [1, 1]} : vector<8x128xf32> to vector<8x1xf32>
    %182 = vector.extract_strided_slice %177 {offsets = [0, 44], sizes = [8, 1], strides = [1, 1]} : vector<8x128xf32> to vector<8x1xf32>
    %183 = vector.extract_strided_slice %177 {offsets = [0, 45], sizes = [8, 1], strides = [1, 1]} : vector<8x128xf32> to vector<8x1xf32>
    %184 = vector.extract_strided_slice %177 {offsets = [0, 46], sizes = [8, 1], strides = [1, 1]} : vector<8x128xf32> to vector<8x1xf32>
    %185 = vector.extract_strided_slice %177 {offsets = [0, 47], sizes = [8, 1], strides = [1, 1]} : vector<8x128xf32> to vector<8x1xf32>
    %186 = arith.minimumf %178, %179 : vector<8x1xf32>
    %187 = arith.maximumf %178, %179 : vector<8x1xf32>
    %188 = arith.minimumf %180, %181 : vector<8x1xf32>
    %189 = arith.maximumf %180, %181 : vector<8x1xf32>
    %190 = arith.minimumf %186, %188 : vector<8x1xf32>
    %191 = arith.maximumf %186, %188 : vector<8x1xf32>
    %192 = arith.minimumf %187, %189 : vector<8x1xf32>
    %193 = arith.maximumf %187, %189 : vector<8x1xf32>
    %194 = arith.minimumf %192, %191 : vector<8x1xf32>
    %195 = arith.maximumf %192, %191 : vector<8x1xf32>
    %196 = arith.minimumf %182, %183 : vector<8x1xf32>
    %197 = arith.maximumf %182, %183 : vector<8x1xf32>
    %198 = arith.minimumf %184, %185 : vector<8x1xf32>
    %199 = arith.maximumf %184, %185 : vector<8x1xf32>
    %200 = arith.minimumf %196, %198 : vector<8x1xf32>
    %201 = arith.maximumf %196, %198 : vector<8x1xf32>
    %202 = arith.minimumf %197, %199 : vector<8x1xf32>
    %203 = arith.maximumf %197, %199 : vector<8x1xf32>
    %204 = arith.minimumf %202, %201 : vector<8x1xf32>
    %205 = arith.maximumf %202, %201 : vector<8x1xf32>
    %206 = arith.maximumf %190, %200 : vector<8x1xf32>
    %207 = arith.minimumf %195, %205 : vector<8x1xf32>
    %208 = arith.maximumf %207, %206 : vector<8x1xf32>
    %209 = arith.maximumf %194, %204 : vector<8x1xf32>
    %210 = arith.minimumf %193, %203 : vector<8x1xf32>
    %211 = arith.minimumf %210, %209 : vector<8x1xf32>
    %212 = arith.maximumf %211, %208 : vector<8x1xf32>
    %213 = vector.broadcast %212 : vector<8x1xf32> to vector<8x128xf32>
    %214 = arith.cmpf oge, %177, %213 : vector<8x128xf32>
    %215 = arith.cmpf ole, %2, %154 : vector<8x512xf32>
    %216 = arith.cmpf ole, %154, %4 : vector<8x512xf32>
    %217 = arith.andi %215, %216 : vector<8x512xi1>
    %cst_36 = arith.constant 0.000000e+00 : f32
    %218 = vector.broadcast %cst_36 : f32 to vector<8x512xf32>
    %219 = arith.select %217, %154, %218 : vector<8x512xi1>, vector<8x512xf32>
    %220 = arith.cmpf ogt, %154, %2 : vector<8x512xf32>
    %cst_37 = arith.constant 0.000000e+00 : f32
    %221 = vector.broadcast %cst_37 : f32 to vector<8x512xf32>
    %222 = arith.select %220, %2, %221 : vector<8x512xi1>, vector<8x512xf32>
    %223 = arith.addf %219, %222 : vector<8x512xf32>
    %224 = arith.cmpf ogt, %4, %154 : vector<8x512xf32>
    %cst_38 = arith.constant 0.000000e+00 : f32
    %225 = vector.broadcast %cst_38 : f32 to vector<8x512xf32>
    %226 = arith.select %224, %4, %225 : vector<8x512xi1>, vector<8x512xf32>
    %227 = arith.addf %223, %226 : vector<8x512xf32>
    %228 = vector.extract_strided_slice %0 {offsets = [0, 0], sizes = [8, 128], strides = [1, 1]} : vector<8x512xf32> to vector<8x128xf32>
    %229 = vector.extract_strided_slice %227 {offsets = [0, 0], sizes = [8, 128], strides = [1, 1]} : vector<8x512xf32> to vector<8x128xf32>
    %230 = arith.addf %228, %229 : vector<8x128xf32>
    %231 = vector.extract_strided_slice %0 {offsets = [0, 0], sizes = [8, 128], strides = [1, 1]} : vector<8x512xf32> to vector<8x128xf32>
    %232 = arith.select %214, %230, %231 : vector<8x128xi1>, vector<8x128xf32>
    %cst_39 = arith.constant 0.000000e+00 : f32
    %cst_40 = arith.constant 1.000000e+00 : f32
    %233 = vector.broadcast %cst_39 : f32 to vector<8x128xf32>
    %234 = arith.maximumf %233, %232 : vector<8x128xf32>
    %235 = vector.broadcast %cst_40 : f32 to vector<8x128xf32>
    %236 = arith.minimumf %235, %234 : vector<8x128xf32>
    %237 = vector.extract_strided_slice %0 {offsets = [0, 128], sizes = [8, 128], strides = [1, 1]} : vector<8x512xf32> to vector<8x128xf32>
    %238 = vector.extract_strided_slice %227 {offsets = [0, 128], sizes = [8, 128], strides = [1, 1]} : vector<8x512xf32> to vector<8x128xf32>
    %239 = arith.addf %237, %238 : vector<8x128xf32>
    %240 = vector.extract_strided_slice %0 {offsets = [0, 128], sizes = [8, 128], strides = [1, 1]} : vector<8x512xf32> to vector<8x128xf32>
    %241 = arith.select %214, %239, %240 : vector<8x128xi1>, vector<8x128xf32>
    %cst_41 = arith.constant 0.000000e+00 : f32
    %cst_42 = arith.constant 1.000000e+00 : f32
    %242 = vector.broadcast %cst_41 : f32 to vector<8x128xf32>
    %243 = arith.maximumf %242, %241 : vector<8x128xf32>
    %244 = vector.broadcast %cst_42 : f32 to vector<8x128xf32>
    %245 = arith.minimumf %244, %243 : vector<8x128xf32>
    %246 = vector.extract_strided_slice %0 {offsets = [0, 256], sizes = [8, 128], strides = [1, 1]} : vector<8x512xf32> to vector<8x128xf32>
    %247 = vector.extract_strided_slice %227 {offsets = [0, 256], sizes = [8, 128], strides = [1, 1]} : vector<8x512xf32> to vector<8x128xf32>
    %248 = arith.addf %246, %247 : vector<8x128xf32>
    %249 = vector.extract_strided_slice %0 {offsets = [0, 256], sizes = [8, 128], strides = [1, 1]} : vector<8x512xf32> to vector<8x128xf32>
    %250 = arith.select %214, %248, %249 : vector<8x128xi1>, vector<8x128xf32>
    %cst_43 = arith.constant 0.000000e+00 : f32
    %cst_44 = arith.constant 1.000000e+00 : f32
    %251 = vector.broadcast %cst_43 : f32 to vector<8x128xf32>
    %252 = arith.maximumf %251, %250 : vector<8x128xf32>
    %253 = vector.broadcast %cst_44 : f32 to vector<8x128xf32>
    %254 = arith.minimumf %253, %252 : vector<8x128xf32>
    %255 = vector.extract_strided_slice %0 {offsets = [0, 384], sizes = [8, 128], strides = [1, 1]} : vector<8x512xf32> to vector<8x128xf32>
    %256 = vector.extract_strided_slice %227 {offsets = [0, 384], sizes = [8, 128], strides = [1, 1]} : vector<8x512xf32> to vector<8x128xf32>
    %257 = arith.addf %255, %256 : vector<8x128xf32>
    %258 = vector.extract_strided_slice %0 {offsets = [0, 384], sizes = [8, 128], strides = [1, 1]} : vector<8x512xf32> to vector<8x128xf32>
    %259 = arith.select %214, %257, %258 : vector<8x128xi1>, vector<8x128xf32>
    %cst_45 = arith.constant 0.000000e+00 : f32
    %cst_46 = arith.constant 1.000000e+00 : f32
    %260 = vector.broadcast %cst_45 : f32 to vector<8x128xf32>
    %261 = arith.maximumf %260, %259 : vector<8x128xf32>
    %262 = vector.broadcast %cst_46 : f32 to vector<8x128xf32>
    %263 = arith.minimumf %262, %261 : vector<8x128xf32>
    %264 = tpu.concatenate %236, %245, %254, %263 in 1 : vector<8x128xf32>, vector<8x128xf32>, vector<8x128xf32>, vector<8x128xf32> -> vector<8x512xf32>
    %c1 = arith.constant 1 : index
    %c0_47 = arith.constant 0 : index
    %c0_48 = arith.constant 0 : index
    %265 = vector.load %arg5[%c1, %c0_47, %c0_48] : memref<2x8x512xf32, #tpu.memory_space<vmem>>, vector<1x8x512xf32>
    %266 = vector.shape_cast %265 : vector<1x8x512xf32> to vector<8x512xf32>
    %cst_49 = arith.constant dense<0.000000e+00> : vector<8x128xf32>
    %267 = tpu.matmul %264, %5, %cst_49 {dimension_numbers = #tpu.dot_dimension_numbers<[1], [0], [0], [1], [0, 0, 1, 1], [], []>, precision = #tpu.contract_precision<fp32>} : vector<8x512xf32>, vector<512x128xf32>, vector<8x128xf32> -> vector<8x128xf32>
    %268 = vector.broadcast %6 : vector<1x128xf32> to vector<8x128xf32>
    %269 = arith.addf %267, %268 : vector<8x128xf32>
    %cst_50 = arith.constant dense<0xFF800000> : vector<8xf32>
    %270 = vector.multi_reduction <maximumf>, %269, %cst_50 [1] : vector<8x128xf32> to vector<8xf32>
    %271 = vector.shape_cast %270 : vector<8xf32> to vector<8x1xf32>
    %272 = vector.broadcast %271 : vector<8x1xf32> to vector<8x128xf32>
    %273 = arith.subf %269, %272 : vector<8x128xf32>
    %274 = math.exp %273 : vector<8x128xf32>
    %cst_51 = arith.constant dense<0.000000e+00> : vector<8xf32>
    %275 = vector.multi_reduction <add>, %274, %cst_51 [1] : vector<8x128xf32> to vector<8xf32>
    %276 = vector.shape_cast %275 : vector<8xf32> to vector<8x1xf32>
    %277 = vector.broadcast %276 : vector<8x1xf32> to vector<8x128xf32>
    %278 = arith.divf %274, %277 : vector<8x128xf32>
    %279 = arith.subf %278, %7 : vector<8x128xf32>
    %cst_52 = arith.constant dense<0.000000e+00> : vector<8x512xf32>
    %280 = tpu.matmul %279, %5, %cst_52 {dimension_numbers = #tpu.dot_dimension_numbers<[1], [1], [0], [0], [0, 0, 1, 0], [], []>, precision = #tpu.contract_precision<fp32>} : vector<8x128xf32>, vector<512x128xf32>, vector<8x512xf32> -> vector<8x512xf32>
    %281 = math.absf %280 : vector<8x512xf32>
    %cst_53 = arith.constant dense<0.000000e+00> : vector<8xf32>
    %282 = vector.multi_reduction <add>, %281, %cst_53 [1] : vector<8x512xf32> to vector<8xf32>
    %283 = vector.shape_cast %282 : vector<8xf32> to vector<8x1xf32>
    %cst_54 = arith.constant 1.000000e-10 : f32
    %284 = vector.broadcast %cst_54 : f32 to vector<8x1xf32>
    %285 = arith.addf %284, %283 : vector<8x1xf32>
    %286 = vector.broadcast %285 : vector<8x1xf32> to vector<8x512xf32>
    %287 = arith.divf %280, %286 : vector<8x512xf32>
    %cst_55 = arith.constant 5.000000e-01 : f32
    %288 = vector.broadcast %cst_55 : f32 to vector<8x512xf32>
    %289 = arith.subf %266, %288 : vector<8x512xf32>
    %cst_56 = arith.constant 9.99999996E-13 : f32
    %290 = vector.broadcast %cst_56 : f32 to vector<8x512xf32>
    %291 = arith.mulf %289, %290 : vector<8x512xf32>
    %292 = arith.addf %264, %291 : vector<8x512xf32>
    %cst_57 = arith.constant 5.000000e-02 : f32
    %293 = vector.broadcast %cst_57 : f32 to vector<8x512xf32>
    %294 = arith.mulf %293, %287 : vector<8x512xf32>
    %295 = arith.addf %292, %294 : vector<8x512xf32>
    %cst_58 = arith.constant 1.000000e-01 : f32
    %296 = vector.broadcast %cst_58 : f32 to vector<8x512xf32>
    %297 = arith.addf %295, %296 : vector<8x512xf32>
    %298 = arith.subf %297, %0 : vector<8x512xf32>
    %299 = arith.mulf %298, %298 : vector<8x512xf32>
    %300 = vector.extract_strided_slice %299 {offsets = [0, 0], sizes = [8, 128], strides = [1, 1]} : vector<8x512xf32> to vector<8x128xf32>
    %301 = vector.extract_strided_slice %299 {offsets = [0, 128], sizes = [8, 128], strides = [1, 1]} : vector<8x512xf32> to vector<8x128xf32>
    %302 = arith.addf %300, %301 : vector<8x128xf32>
    %303 = vector.extract_strided_slice %299 {offsets = [0, 256], sizes = [8, 128], strides = [1, 1]} : vector<8x512xf32> to vector<8x128xf32>
    %304 = arith.addf %302, %303 : vector<8x128xf32>
    %305 = vector.extract_strided_slice %299 {offsets = [0, 384], sizes = [8, 128], strides = [1, 1]} : vector<8x512xf32> to vector<8x128xf32>
    %306 = arith.addf %304, %305 : vector<8x128xf32>
    %307 = arith.subf %4, %298 : vector<8x512xf32>
    %308 = arith.subf %298, %2 : vector<8x512xf32>
    %309 = arith.minimumf %307, %308 : vector<8x512xf32>
    %cst_59 = arith.constant dense<0x7F800000> : vector<512xf32>
    %310 = vector.multi_reduction <minimumf>, %309, %cst_59 [0] : vector<8x512xf32> to vector<512xf32>
    %311 = vector.shape_cast %310 : vector<512xf32> to vector<1x512xf32>
    %312 = arith.mulf %311, %311 : vector<1x512xf32>
    %313 = vector.extract_strided_slice %312 {offsets = [0, 0], sizes = [1, 128], strides = [1, 1]} : vector<1x512xf32> to vector<1x128xf32>
    %314 = vector.extract_strided_slice %312 {offsets = [0, 128], sizes = [1, 128], strides = [1, 1]} : vector<1x512xf32> to vector<1x128xf32>
    %315 = arith.addf %313, %314 : vector<1x128xf32>
    %316 = vector.extract_strided_slice %312 {offsets = [0, 256], sizes = [1, 128], strides = [1, 1]} : vector<1x512xf32> to vector<1x128xf32>
    %317 = arith.addf %315, %316 : vector<1x128xf32>
    %318 = vector.extract_strided_slice %312 {offsets = [0, 384], sizes = [1, 128], strides = [1, 1]} : vector<1x512xf32> to vector<1x128xf32>
    %319 = arith.addf %317, %318 : vector<1x128xf32>
    %320 = vector.broadcast %319 : vector<1x128xf32> to vector<8x128xf32>
    %321 = arith.subf %306, %320 : vector<8x128xf32>
    %322 = vector.extract_strided_slice %321 {offsets = [0, 40], sizes = [8, 1], strides = [1, 1]} : vector<8x128xf32> to vector<8x1xf32>
    %323 = vector.extract_strided_slice %321 {offsets = [0, 41], sizes = [8, 1], strides = [1, 1]} : vector<8x128xf32> to vector<8x1xf32>
    %324 = vector.extract_strided_slice %321 {offsets = [0, 42], sizes = [8, 1], strides = [1, 1]} : vector<8x128xf32> to vector<8x1xf32>
    %325 = vector.extract_strided_slice %321 {offsets = [0, 43], sizes = [8, 1], strides = [1, 1]} : vector<8x128xf32> to vector<8x1xf32>
    %326 = vector.extract_strided_slice %321 {offsets = [0, 44], sizes = [8, 1], strides = [1, 1]} : vector<8x128xf32> to vector<8x1xf32>
    %327 = vector.extract_strided_slice %321 {offsets = [0, 45], sizes = [8, 1], strides = [1, 1]} : vector<8x128xf32> to vector<8x1xf32>
    %328 = vector.extract_strided_slice %321 {offsets = [0, 46], sizes = [8, 1], strides = [1, 1]} : vector<8x128xf32> to vector<8x1xf32>
    %329 = vector.extract_strided_slice %321 {offsets = [0, 47], sizes = [8, 1], strides = [1, 1]} : vector<8x128xf32> to vector<8x1xf32>
    %330 = arith.minimumf %322, %323 : vector<8x1xf32>
    %331 = arith.maximumf %322, %323 : vector<8x1xf32>
    %332 = arith.minimumf %324, %325 : vector<8x1xf32>
    %333 = arith.maximumf %324, %325 : vector<8x1xf32>
    %334 = arith.minimumf %330, %332 : vector<8x1xf32>
    %335 = arith.maximumf %330, %332 : vector<8x1xf32>
    %336 = arith.minimumf %331, %333 : vector<8x1xf32>
    %337 = arith.maximumf %331, %333 : vector<8x1xf32>
    %338 = arith.minimumf %336, %335 : vector<8x1xf32>
    %339 = arith.maximumf %336, %335 : vector<8x1xf32>
    %340 = arith.minimumf %326, %327 : vector<8x1xf32>
    %341 = arith.maximumf %326, %327 : vector<8x1xf32>
    %342 = arith.minimumf %328, %329 : vector<8x1xf32>
    %343 = arith.maximumf %328, %329 : vector<8x1xf32>
    %344 = arith.minimumf %340, %342 : vector<8x1xf32>
    %345 = arith.maximumf %340, %342 : vector<8x1xf32>
    %346 = arith.minimumf %341, %343 : vector<8x1xf32>
    %347 = arith.maximumf %341, %343 : vector<8x1xf32>
    %348 = arith.minimumf %346, %345 : vector<8x1xf32>
    %349 = arith.maximumf %346, %345 : vector<8x1xf32>
    %350 = arith.maximumf %334, %344 : vector<8x1xf32>
    %351 = arith.minimumf %339, %349 : vector<8x1xf32>
    %352 = arith.maximumf %351, %350 : vector<8x1xf32>
    %353 = arith.maximumf %338, %348 : vector<8x1xf32>
    %354 = arith.minimumf %337, %347 : vector<8x1xf32>
    %355 = arith.minimumf %354, %353 : vector<8x1xf32>
    %356 = arith.maximumf %355, %352 : vector<8x1xf32>
    %357 = vector.broadcast %356 : vector<8x1xf32> to vector<8x128xf32>
    %358 = arith.cmpf oge, %321, %357 : vector<8x128xf32>
    %359 = arith.cmpf ole, %2, %298 : vector<8x512xf32>
    %360 = arith.cmpf ole, %298, %4 : vector<8x512xf32>
    %361 = arith.andi %359, %360 : vector<8x512xi1>
    %cst_60 = arith.constant 0.000000e+00 : f32
    %362 = vector.broadcast %cst_60 : f32 to vector<8x512xf32>
    %363 = arith.select %361, %298, %362 : vector<8x512xi1>, vector<8x512xf32>
    %364 = arith.cmpf ogt, %298, %2 : vector<8x512xf32>
    %cst_61 = arith.constant 0.000000e+00 : f32
    %365 = vector.broadcast %cst_61 : f32 to vector<8x512xf32>
    %366 = arith.select %364, %2, %365 : vector<8x512xi1>, vector<8x512xf32>
    %367 = arith.addf %363, %366 : vector<8x512xf32>
    %368 = arith.cmpf ogt, %4, %298 : vector<8x512xf32>
    %cst_62 = arith.constant 0.000000e+00 : f32
    %369 = vector.broadcast %cst_62 : f32 to vector<8x512xf32>
    %370 = arith.select %368, %4, %369 : vector<8x512xi1>, vector<8x512xf32>
    %371 = arith.addf %367, %370 : vector<8x512xf32>
    %372 = vector.extract_strided_slice %0 {offsets = [0, 0], sizes = [8, 128], strides = [1, 1]} : vector<8x512xf32> to vector<8x128xf32>
    %373 = vector.extract_strided_slice %371 {offsets = [0, 0], sizes = [8, 128], strides = [1, 1]} : vector<8x512xf32> to vector<8x128xf32>
    %374 = arith.addf %372, %373 : vector<8x128xf32>
    %375 = vector.extract_strided_slice %0 {offsets = [0, 0], sizes = [8, 128], strides = [1, 1]} : vector<8x512xf32> to vector<8x128xf32>
    %376 = arith.select %358, %374, %375 : vector<8x128xi1>, vector<8x128xf32>
    %cst_63 = arith.constant 0.000000e+00 : f32
    %cst_64 = arith.constant 1.000000e+00 : f32
    %377 = vector.broadcast %cst_63 : f32 to vector<8x128xf32>
    %378 = arith.maximumf %377, %376 : vector<8x128xf32>
    %379 = vector.broadcast %cst_64 : f32 to vector<8x128xf32>
    %380 = arith.minimumf %379, %378 : vector<8x128xf32>
    %381 = vector.extract_strided_slice %0 {offsets = [0, 128], sizes = [8, 128], strides = [1, 1]} : vector<8x512xf32> to vector<8x128xf32>
    %382 = vector.extract_strided_slice %371 {offsets = [0, 128], sizes = [8, 128], strides = [1, 1]} : vector<8x512xf32> to vector<8x128xf32>
    %383 = arith.addf %381, %382 : vector<8x128xf32>
    %384 = vector.extract_strided_slice %0 {offsets = [0, 128], sizes = [8, 128], strides = [1, 1]} : vector<8x512xf32> to vector<8x128xf32>
    %385 = arith.select %358, %383, %384 : vector<8x128xi1>, vector<8x128xf32>
    %cst_65 = arith.constant 0.000000e+00 : f32
    %cst_66 = arith.constant 1.000000e+00 : f32
    %386 = vector.broadcast %cst_65 : f32 to vector<8x128xf32>
    %387 = arith.maximumf %386, %385 : vector<8x128xf32>
    %388 = vector.broadcast %cst_66 : f32 to vector<8x128xf32>
    %389 = arith.minimumf %388, %387 : vector<8x128xf32>
    %390 = vector.extract_strided_slice %0 {offsets = [0, 256], sizes = [8, 128], strides = [1, 1]} : vector<8x512xf32> to vector<8x128xf32>
    %391 = vector.extract_strided_slice %371 {offsets = [0, 256], sizes = [8, 128], strides = [1, 1]} : vector<8x512xf32> to vector<8x128xf32>
    %392 = arith.addf %390, %391 : vector<8x128xf32>
    %393 = vector.extract_strided_slice %0 {offsets = [0, 256], sizes = [8, 128], strides = [1, 1]} : vector<8x512xf32> to vector<8x128xf32>
    %394 = arith.select %358, %392, %393 : vector<8x128xi1>, vector<8x128xf32>
    %cst_67 = arith.constant 0.000000e+00 : f32
    %cst_68 = arith.constant 1.000000e+00 : f32
    %395 = vector.broadcast %cst_67 : f32 to vector<8x128xf32>
    %396 = arith.maximumf %395, %394 : vector<8x128xf32>
    %397 = vector.broadcast %cst_68 : f32 to vector<8x128xf32>
    %398 = arith.minimumf %397, %396 : vector<8x128xf32>
    %399 = vector.extract_strided_slice %0 {offsets = [0, 384], sizes = [8, 128], strides = [1, 1]} : vector<8x512xf32> to vector<8x128xf32>
    %400 = vector.extract_strided_slice %371 {offsets = [0, 384], sizes = [8, 128], strides = [1, 1]} : vector<8x512xf32> to vector<8x128xf32>
    %401 = arith.addf %399, %400 : vector<8x128xf32>
    %402 = vector.extract_strided_slice %0 {offsets = [0, 384], sizes = [8, 128], strides = [1, 1]} : vector<8x512xf32> to vector<8x128xf32>
    %403 = arith.select %358, %401, %402 : vector<8x128xi1>, vector<8x128xf32>
    %cst_69 = arith.constant 0.000000e+00 : f32
    %cst_70 = arith.constant 1.000000e+00 : f32
    %404 = vector.broadcast %cst_69 : f32 to vector<8x128xf32>
    %405 = arith.maximumf %404, %403 : vector<8x128xf32>
    %406 = vector.broadcast %cst_70 : f32 to vector<8x128xf32>
    %407 = arith.minimumf %406, %405 : vector<8x128xf32>
    %408 = tpu.concatenate %380, %389, %398, %407 in 1 : vector<8x128xf32>, vector<8x128xf32>, vector<8x128xf32>, vector<8x128xf32> -> vector<8x512xf32>
    %cst_71 = arith.constant dense<0.000000e+00> : vector<8x128xf32>
    %409 = tpu.matmul %408, %5, %cst_71 {dimension_numbers = #tpu.dot_dimension_numbers<[1], [0], [0], [1], [0, 0, 1, 1], [], []>, precision = #tpu.contract_precision<fp32>} : vector<8x512xf32>, vector<512x128xf32>, vector<8x128xf32> -> vector<8x128xf32>
    %410 = vector.broadcast %6 : vector<1x128xf32> to vector<8x128xf32>
    %411 = arith.addf %409, %410 : vector<8x128xf32>
    %c0_72 = arith.constant 0 : index
    %c0_73 = arith.constant 0 : index
    %412 = vector.load %arg6[%c0_72, %c0_73] : memref<8x128xf32, #tpu.memory_space<vmem>>, vector<8x128xf32>
    tpu.vector_store %arg6[%c0_72, %c0_73], %411 {strides = array<i32>} : memref<8x128xf32, #tpu.memory_space<vmem>>, vector<8x128xf32>,
    %c0_74 = arith.constant 0 : index
    %c0_75 = arith.constant 0 : index
    %413 = vector.load %arg7[%c0_74, %c0_75] : memref<8x512xf32, #tpu.memory_space<vmem>>, vector<8x512xf32>
    tpu.vector_store %arg7[%c0_74, %c0_75], %408 {strides = array<i32>} : memref<8x512xf32, #tpu.memory_space<vmem>>, vector<8x512xf32>,
    return
  }
}

</mosaic_0001>

<bundles_post_ra>
// kernel: _lambda_.1
= control target key start
LH: loop header
LB: loop body
LE: loop exit
PB: predicated region body
PF: predicated region fallthrough
CT: control target
= control target key end

     0   :  { %s11384_s0 = inlined_call_operand.vmem [shape: f32[8,512], index: 0, kind: input, shape index: {}]   ;;  %s11385_s1 = inlined_call_operand.vmem [shape: f32[512,128], index: 1, kind: input, shape index: {}]   ;;  %s11386_s2 = inlined_call_operand.vmem [shape: f32[1,128], index: 2, kind: input, shape index: {}]   ;;  %s11387_s3 = inlined_call_operand.vmem [shape: f32[8,128], index: 3, kind: input, shape index: {}]   ;;  %s11388_s4 = inlined_call_operand.vmem [shape: f32[8,512], index: 4, kind: input, shape index: {}]   ;;  %s11389_s5 = inlined_call_operand.vmem [shape: f32[2,8,512], index: 5, kind: input, shape index: {}]   ;;  %s11390_s6 = inlined_call_operand.hbm [shape: f32[8,128], index: 6, kind: output, shape index: {0}]   ;;  %s11391_s7 = inlined_call_operand.vmem [shape: f32[8,512], index: 7, kind: output, shape index: {1}]  }
   0x1   :  { %v7718_v0 = vld [vmem:[%s11384_s0] sm:$0xff]  ;;  %v7723_v1 = vld [vmem:[%s11384_s0 + $0x8] sm:$0xff]  ;;  %v28_v2 = vld [vmem:[%s11384_s0 + $0x10] sm:$0xff] }
   0x2   :  { %12095 = vst [vmem:[#allocation5_spill] sm:$0xff] %v7718_v0  ;;  %v29_v3 = vld [vmem:[%s11384_s0 + $0x18] sm:$0xff]  ;;  %v104_v4 = vld [vmem:[%s11388_s4] sm:$0xff]  ;;  %v7735_v5 = vsub.f32 0.0, %v7718_v0  ;;  %v7738_v6 = vsub.f32 0.0, %v7723_v1  ;;  %v105_v7 = vld [vmem:[%s11388_s4 + $0x8] sm:$0xff] }
   0x3   :  { %12096 = vst [vmem:[#allocation6_spill] sm:$0xff] %v7723_v1  ;;  %v106_v8 = vld [vmem:[%s11388_s4 + $0x10] sm:$0xff]  ;;  %v7747_v9 = vsub.f32 1.0, %v7718_v0  ;;  %v107_v10 = vld [vmem:[%s11388_s4 + $0x18] sm:$0xff]  ;;  %v108_v11 = vadd.f32 %v104_v4, %v7718_v0  ;;  %v109_v12 = vadd.f32 %v105_v7, %v7723_v1 }
   0x4   :  { %12097 = vst [vmem:[#allocation7_spill] sm:$0xff] %v7735_v5  ;;  %v110_v13 = vadd.f32 %v106_v8, %v28_v2 }
   0x5   :  { %12098 = vst [vmem:[#allocation8_spill] sm:$0xff] %v7738_v6 }
   0x6   :  { %12099 = vst [vmem:[#allocation9_spill] sm:$0xff] %v7747_v9 }
   0x7   :  { %13 = vsyncpa [#allocation3], 0  ;;  %v7755_v14 = vsub.f32 1.0, %v7723_v1  ;;  %v7757_v15 = vsub.f32 1.0, %v28_v2  ;;  %v7759_v16 = vsub.f32 1.0, %v29_v3  ;;  %v111_v17 = vadd.f32 %v107_v10, %v29_v3  ;;  %s7670_s4 = smov 127  }
   0x8   :  { %v7761_v18 = vsub.f32 0.0, %v28_v2  ;;  %v7764_v19 = vsub.f32 %v108_v11, %v7718_v0  ;;  %v7767_v20 = vsub.f32 %v109_v12, %v7723_v1  ;;  %v7769_v21 = vsub.f32 %v110_v13, %v28_v2  ;;  %s7671_s17 = smov 126   ;;  %s7672_s18 = smov 124   ;;  %v65_v1 = vld [vmem:[%s11385_s1 + $0xd8] sm:$0xff] }
   0x9   :  { %12100 = vst [vmem:[#allocation10_spill] sm:$0xff] %v7755_v14  ;;  %v7771_v22 = vsub.f32 0.0, %v29_v3  ;;  %v7773_v23 = vsub.f32 %v111_v17, %v29_v3 }
   0xa   :  { %12101 = vst [vmem:[#allocation11_spill] sm:$0xff] %v7757_v15  ;;  %v123_v24 = vsub.f32 %v7747_v9, %v7764_v19  ;;  %v124_v25 = vsub.f32 %v7755_v14, %v7767_v20  ;;  %v125_v26 = vsub.f32 %v7757_v15, %v7769_v21  ;;  %v127_v28 = vsub.f32 %v7764_v19, %v7735_v5 }
   0xb   :  { %12102 = vst [vmem:[#allocation12_spill] sm:$0xff] %v7759_v16  ;;  %v126_v27 = vsub.f32 %v7759_v16, %v7773_v23  ;;  %v128_v29 = vsub.f32 %v7767_v20, %v7738_v6  ;;  %v129_v30 = vsub.f32 %v7769_v21, %v7761_v18  ;;  %v130_v31 = vsub.f32 %v7773_v23, %v7771_v22 }
   0xc   :  { %12103 = vst [vmem:[#allocation13_spill] sm:$0xff] %v7761_v18  ;;  %v131_v32 = vmin.f32 %v123_v24, %v127_v28  ;;  %v116_v43 = vmul.f32 %v7764_v19, %v7764_v19  ;;  %v117_v45 = vmul.f32 %v7767_v20, %v7767_v20  ;;  %v118_v53 = vmul.f32 %v7769_v21, %v7769_v21 }
   0xd   :  { %12104 = vst [vmem:[#allocation14_spill] sm:$0xff] %v7764_v19  ;;  %v132_v33 = vmin.f32 %v124_v25, %v128_v29  ;;  %v133_v34 = vmin.f32 %v125_v26, %v129_v30  ;;  %v134_v35 = vmin.f32 %v126_v27, %v130_v31  ;;  %v119_v63 = vmul.f32 %v7773_v23, %v7773_v23 }
   0xe   :  { %12105 = vst [vmem:[#allocation15_spill] sm:$0xff] %v7767_v20  ;;  %v135_v36 = vrot.slane %v131_v32, 4  ;;  %v120_v55 = vadd.f32 %v117_v45, %v116_v43  ;;  %v50_v43 = vld [vmem:[%s11385_s1 + $0x60] sm:$0xff]  ;;  %v48_v45 = vld [vmem:[%s11385_s1 + $0x50] sm:$0xff] }
   0xf   :  { %12106 = vst [vmem:[#allocation16_spill] sm:$0xff] %v7769_v21  ;;  %v141_v37 = vrot.slane %v132_v33, 4  ;;  %v147_v38 = vrot.slane %v133_v34, 4  ;;  %v153_v39 = vrot.slane %v134_v35, 4 }
  0x10   :  { %12107 = vst [vmem:[#allocation17_spill] sm:$0xff] %v7771_v22  ;;  %v136_v40 = vmin.f32 %v131_v32, %v135_v36  ;;  %v121_v3 = vadd.f32 %v120_v55, %v118_v53  ;;  %v7673_v36 = vmov 40  }
  0x11   :  { %12108 = vst [vmem:[#allocation18_spill] sm:$0xff] %v7773_v23  ;;  %v142_v41 = vmin.f32 %v132_v33, %v141_v37  ;;  %v148_v42 = vmin.f32 %v133_v34, %v147_v38  ;;  %v154_v44 = vmin.f32 %v134_v35, %v153_v39  ;;  %7616 = vset.pattern.permute.xlu1 %v7673_v36  ;;  %v53_v37 = vld [vmem:[%s11385_s1 + $0x78] sm:$0xff]  ;;  %v52_v38 = vld [vmem:[%s11385_s1 + $0x70] sm:$0xff]  ;;  %v51_v39 = vld [vmem:[%s11385_s1 + $0x68] sm:$0xff] }
  0x12   :  { %v137_v46 = vrot.slane %v136_v40, 2  ;;  %v122_v12 = vadd.f32 %v121_v3, %v119_v63  ;;  %7617 = vset.pattern.permute.xlu0 %v7673_v36 }
  0x13   :  { %v143_v47 = vrot.slane %v142_v41, 2  ;;  %v149_v48 = vrot.slane %v148_v42, 2  ;;  %v155_v49 = vrot.slane %v154_v44, 2 }
  0x14   :  { %v138_v50 = vmin.f32 %v136_v40, %v137_v46  ;;  %v7832_v40 = vand.u32 4294901760, %v53_v37  ;;  %v7847_v46 = vand.u32 4294901760, %v50_v43 }
  0x15   :  { %v144_v51 = vmin.f32 %v142_v41, %v143_v47  ;;  %v150_v52 = vmin.f32 %v148_v42, %v149_v48  ;;  %v156_v54 = vmin.f32 %v154_v44, %v155_v49  ;;  %v7834_v41 = vand.u32 4294901760, %v52_v38  ;;  %v49_v44 = vld [vmem:[%s11385_s1 + $0x58] sm:$0xff]  ;;  %v47_v49 = vld [vmem:[%s11385_s1 + $0x48] sm:$0xff] }
  0x16   :  { %v139_v56 = vrot.slane %v138_v50, 1  ;;  %12110 = vst [vmem:[#allocation20_spill] sm:$0xff] %v7832_v40  ;;  %v7836_v42 = vand.u32 4294901760, %v51_v39  ;;  %v7849_v47 = vand.u32 4294901760, %v49_v44  ;;  %v7851_v48 = vand.u32 4294901760, %v48_v45  ;;  %476 = vmatpush.msra.mxu3 %v7832_v40  ;;  %280 = vmatpush.msra.mxu0 %v7832_v40 }
  0x17   :  { %v145_v57 = vrot.slane %v144_v51, 1  ;;  %v151_v58 = vrot.slane %v150_v52, 1  ;;  %v157_v59 = vrot.slane %v156_v54, 1  ;;  %12111 = vst [vmem:[#allocation21_spill] sm:$0xff] %v7834_v41  ;;  %v7867_v53 = vand.u32 4294901760, %v47_v49 }
  0x18   :  { %v140_v60 = vmin.f32 %v138_v50, %v139_v56  ;;  %12112 = vst [vmem:[#allocation22_spill] sm:$0xff] %v7836_v42  ;;  %v7857_v50 = vsub.f32 %v53_v37, %v7832_v40  ;;  %v7873_v55 = vsub.f32 %v50_v43, %v7847_v46  ;;  %v7876_v56 = vsub.f32 %v49_v44, %v7849_v47  ;;  %v40_v43 = vld [vmem:[%s11385_s1 + $0x10] sm:$0xff] }
  0x19   :  { %v146_v61 = vmin.f32 %v144_v51, %v145_v57  ;;  %v152_v62 = vmin.f32 %v150_v52, %v151_v58  ;;  %v158_v2 = vmin.f32 %v156_v54, %v157_v59  ;;  %12113 = vst [vmem:[#allocation23_spill] sm:$0xff] %v7847_v46  ;;  %v7860_v51 = vsub.f32 %v52_v38, %v7834_v41  ;;  %v46_v54 = vld [vmem:[%s11385_s1 + $0x40] sm:$0xff] }
  0x1a   :  { %v159_v4 = vmul.f32 %v140_v60, %v140_v60  ;;  %12114 = vst [vmem:[#allocation24_spill] sm:$0xff] %v7849_v47  ;;  %v7863_v52 = vsub.f32 %v51_v39, %v7836_v42  ;;  %v7879_v57 = vand.u32 4294901760, %v7857_v50  ;;  %423 = vmatpush.msra.mxu2 %v7857_v50  ;;  %478 = vmatpush.msra.mxu3 %v7834_v41 }
  0x1b   :  { %v160_v7 = vmul.f32 %v146_v61, %v146_v61  ;;  %v161_v8 = vmul.f32 %v152_v62, %v152_v62  ;;  %v162_v10 = vmul.f32 %v158_v2, %v158_v2  ;;  %12115 = vst [vmem:[#allocation25_spill] sm:$0xff] %v7851_v48  ;;  %v7882_v58 = vand.u32 4294901760, %v7860_v51  ;;  %282 = vmatpush.msra.mxu0 %v7834_v41 }
  0x1c   :  { %12116 = vst [vmem:[#allocation26_spill] sm:$0xff] %v7857_v50  ;;  %v7886_v59 = vand.u32 4294901760, %v7863_v52  ;;  %v7890_v60 = vsub.f32 %v48_v45, %v7851_v48  ;;  %v7893_v61 = vand.u32 4294901760, %v7873_v55  ;;  %v7896_v62 = vand.u32 4294901760, %v7876_v56  ;;  %426 = vmatpush.msra.mxu2 %v7860_v51  ;;  %480 = vmatpush.msra.mxu3 %v7836_v42 }
  0x1d   :  { %v163_v11 = vadd.f32 %v160_v7, %v159_v4  ;;  %12117 = vst [vmem:[#allocation27_spill] sm:$0xff] %v7860_v51  ;;  %v7900_v63 = vsub.f32 %v47_v49, %v7867_v53  ;;  %v7902_v2 = vand.u32 4294901760, %v46_v54  ;;  %v323_v3 = vsub.f32 %v7857_v50, %v7879_v57  ;;  %284 = vmatpush.msra.mxu0 %v7836_v42  ;;  %v67_v50 = vld [vmem:[%s11385_s1 + $0xe8] sm:$0xff] }
  0x1e   :  { %12118 = vst [vmem:[#allocation28_spill] sm:$0xff] %v7863_v52  ;;  %v329_v4 = vsub.f32 %v7860_v51, %v7882_v58  ;;  %v335_v7 = vsub.f32 %v7863_v52, %v7886_v59  ;;  %429 = vmatpush.msra.mxu2 %v7863_v52  ;;  %482 = vmatpush.msra.mxu3 %v7847_v46  ;;  %v8073_v18 = vand.u32 4294901760, %v67_v50 }
  0x1f   :  { %v164_v13 = vadd.f32 %v163_v11, %v161_v8  ;;  %12119 = vst [vmem:[#allocation29_spill] sm:$0xff] %v7867_v53  ;;  %v7914_v8 = vsub.f32 %v46_v54, %v7902_v2  ;;  %v44_v11 = vld [vmem:[%s11385_s1 + $0x30] sm:$0xff]  ;;  %286 = vmatpush.msra.mxu0 %v7847_v46 }
  0x20   :  { %12120 = vst [vmem:[#allocation30_spill] sm:$0xff] %v7873_v55  ;;  %v7951_v36 = vand.u32 4294901760, %v335_v7  ;;  %432 = vmatpush.msra.mxu2 %v7873_v55  ;;  %v7956_v38 = vand.u32 4294901760, %v44_v11  ;;  %484 = vmatpush.msra.mxu3 %v7849_v47 }
  0x21   :  { %v165_v17 = vadd.f32 %v164_v13, %v162_v10  ;;  %12121 = vst [vmem:[#allocation31_spill] sm:$0xff] %v7876_v56  ;;  %v45_v10 = vld [vmem:[%s11385_s1 + $0x38] sm:$0xff]  ;;  %v7965_v44 = vand.u32 4294901760, %v7914_v8  ;;  %288 = vmatpush.msra.mxu0 %v7849_v47 }
  0x22   :  { %12122 = vst [vmem:[#allocation32_spill] sm:$0xff] %v7879_v57  ;;  %v7954_v37 = vand.u32 4294901760, %v45_v10  ;;  %435 = vmatpush.msra.mxu2 %v7876_v56  ;;  %v7982_v7 = vsub.f32 %v44_v11, %v7956_v38  ;;  %486 = vmatpush.msra.mxu3 %v7851_v48 }
  0x23   :  { %v7799_v24 = vsub.f32 %v122_v12, %v165_v17  ;;  %12123 = vst [vmem:[#allocation33_spill] sm:$0xff] %v7882_v58  ;;  %v43_v12 = vld [vmem:[%s11385_s1 + $0x28] sm:$0xff]  ;;  %v7927_v17 = vand.u32 4294901760, %v323_v3  ;;  %290 = vmatpush.msra.mxu0 %v7851_v48 }
  0x24   :  { %12124 = vst [vmem:[#allocation34_spill] sm:$0xff] %v7886_v59  ;;  %v7958_v39 = vand.u32 4294901760, %v43_v12  ;;  %438 = vmatpush.msra.mxu2 %v7890_v60  ;;  %488 = vmatpush.msra.mxu3 %v7867_v53  ;;  %v8018_v51 = vand.u32 4294901760, %v7982_v7 }
  0x25   :  { %12109 = vst [vmem:[#allocation19_spill] sm:$0xff] %v7799_v24  ;;  %168 = vrot.lane.b32.xlu0 %v7799_v24, %s7670_s4  ;;  %325 = vmatpush.msra.mxu1 %v7927_v17 }
  0x26   :  { %12125 = vst [vmem:[#allocation35_spill] sm:$0xff] %v7890_v60  ;;  %292 = vmatpush.msra.mxu0 %v7867_v53  ;;  %441 = vmatpush.msra.mxu2 %v7900_v63 }
  0x27   :  { %12126 = vst [vmem:[#allocation36_spill] sm:$0xff] %v7893_v61  ;;  %490 = vmatpush.msra.mxu3 %v7902_v2 }
  0x28   :  { %12127 = vst [vmem:[#allocation37_spill] sm:$0xff] %v7896_v62  ;;  %294 = vmatpush.msra.mxu0 %v7902_v2  ;;  %444 = vmatpush.msra.mxu2 %v7914_v8 }
  0x29   :  { %12128 = vst [vmem:[#allocation38_spill] sm:$0xff] %v7900_v63  ;;  %492 = vmatpush.msra.mxu3 %v7954_v37 }
  0x2a   :  { %12129 = vst [vmem:[#allocation39_spill] sm:$0xff] %v7902_v2  ;;  %296 = vmatpush.msra.mxu0 %v7954_v37 }
  0x2b   :  { %12130 = vst [vmem:[#allocation40_spill] sm:$0xff] %v7914_v8  ;;  %494 = vmatpush.msra.mxu3 %v7956_v38 }
  0x2c   :  { %12131 = vst [vmem:[#allocation41_spill] sm:$0xff] %v7927_v17  ;;  %298 = vmatpush.msra.mxu0 %v7956_v38 }
  0x2d   :  { %12135 = vst [vmem:[#allocation45_spill] sm:$0xff] %v7951_v36  ;;  %496 = vmatpush.msra.mxu3 %v7958_v39 }
  0x2e   :  { %12136 = vst [vmem:[#allocation46_spill] sm:$0xff] %v7954_v37  ;;  %300 = vmatpush.msra.mxu0 %v7958_v39 }
  0x2f   :  { %12137 = vst [vmem:[#allocation47_spill] sm:$0xff] %v7956_v38 }
  0x30   :  { %12138 = vst [vmem:[#allocation48_spill] sm:$0xff] %v7958_v39 }
  0x31   :  { %12139 = vst [vmem:[#allocation49_spill] sm:$0xff] %v7965_v44 }
  0x32   :  { %12144 = vst [vmem:[#allocation54_spill] sm:$0xff] %v7982_v7 }
  0x33   :  { %12152 = vst [vmem:[#allocation62_spill] sm:$0xff] %v8018_v51 }
  0x34   :  { %12163 = vst [vmem:[#allocation73_spill] sm:$0xff] %v8073_v18 }
  0x97   :  { %v169_v25 = vpop.permute.xlu0 %168 }
  0x98   :  { %v171_v26 = vmin.f32 %v7799_v24, %v169_v25  ;;  %v172_v27 = vmax.f32 %v7799_v24, %v169_v25  ;;  %v7929_v25 = vand.u32 4294901760, %v329_v4  ;;  %v7979_v4 = vsub.f32 %v45_v10, %v7954_v37 }
  0x9a   :  { %180 = vrot.lane.b32.xlu1 %v172_v27, %s7671_s17  ;;  %174 = vrot.lane.b32.xlu0 %v171_v26, %s7671_s17  ;;  %12132 = vst [vmem:[#allocation42_spill] sm:$0xff] %v7929_v25  ;;  %v7998_v11 = vand.u32 4294901760, %v7979_v4 }
  0x9b   :  { %331 = vmatpush.msra.mxu1 %v7929_v25  ;;  %12143 = vst [vmem:[#allocation53_spill] sm:$0xff] %v7979_v4  ;;  %v38_v25 = vld [vmem:[%s11385_s1] sm:$0xff]  ;;  %447 = vmatpush.msra.mxu2 %v7979_v4 }
  0x9c   :  { %12148 = vst [vmem:[#allocation58_spill] sm:$0xff] %v7998_v11  ;;  %v371_v22 = vsub.f32 %v7979_v4, %v7998_v11 }
  0x9d   :  { %337 = vmatpush.msra.mxu1 %v7951_v36  ;;  %450 = vmatpush.msra.mxu2 %v7982_v7 }
 0x10c   :  { %v181_v28 = vpop.permute.xlu1 %180  ;;  %v175_v29 = vpop.permute.xlu0 %174 }
 0x10d   :  { %v183_v30 = vmin.f32 %v172_v27, %v181_v28  ;;  %v7807_v31 = vmax.f32 %v172_v27, %v181_v28  ;;  %v7809_v32 = vmin.f32 %v171_v26, %v175_v29  ;;  %v178_v33 = vmax.f32 %v171_v26, %v175_v29  ;;  %v42_v28 = vld [vmem:[%s11385_s1 + $0x20] sm:$0xff]  ;;  %v41_v29 = vld [vmem:[%s11385_s1 + $0x18] sm:$0xff] }
 0x10e   :  { %v341_v26 = vsub.f32 %v7873_v55, %v7893_v61  ;;  %v7935_v27 = vand.u32 4294901760, %v7890_v60  ;;  %v7968_v45 = vand.u32 4294901760, %v42_v28  ;;  %v7970_v49 = vand.u32 4294901760, %v41_v29 }
 0x10f   :  { %204 = vrot.lane.b32.xlu0 %v7807_v31, %s7672_s18  ;;  %188 = vrot.lane.b32.xlu1 %v7809_v32, %s7672_s18  ;;  %v7815_v34 = vmax.f32 %v183_v30, %v178_v33  ;;  %v7819_v35 = vmin.f32 %v183_v30, %v178_v33  ;;  %v347_v30 = vsub.f32 %v7876_v56, %v7896_v62  ;;  %v7947_v33 = vand.u32 4294901760, %v7900_v63  ;;  %v39_v56 = vld [vmem:[%s11385_s1 + $0x8] sm:$0xff] }
 0x110   :  { %12133 = vst [vmem:[#allocation43_spill] sm:$0xff] %v7935_v27  ;;  %v7973_v54 = vand.u32 4294901760, %v341_v26  ;;  %v353_v3 = vsub.f32 %v7890_v60, %v7935_v27  ;;  %v7987_v55 = vsub.f32 %v43_v12, %v7958_v39  ;;  %v7989_v26 = vand.u32 4294901760, %v40_v43  ;;  %498 = vmatpush.msra.mxu3 %v7968_v45  ;;  %302 = vmatpush.msra.mxu0 %v7968_v45 }
 0x111   :  { %193 = vrot.lane.b32.xlu2 %v7815_v34, %s7672_s18  ;;  %12134 = vst [vmem:[#allocation44_spill] sm:$0xff] %v7947_v33  ;;  %v7992_v52 = vand.u32 4294901760, %v347_v30  ;;  %v359_v10 = vsub.f32 %v7900_v63, %v7947_v33  ;;  %v365_v12 = vsub.f32 %v7914_v8, %v7965_v44  ;;  %v8008_v30 = vsub.f32 %v42_v28, %v7968_v45  ;;  %v69_v63 = vld [vmem:[%s11385_s1 + $0xf8] sm:$0xff] }
 0x112   :  { %12140 = vst [vmem:[#allocation50_spill] sm:$0xff] %v7968_v45  ;;  %v8011_v36 = vsub.f32 %v41_v29, %v7970_v49  ;;  %343 = vmatpush.msra.mxu1 %v7973_v54  ;;  %v8014_v60 = vand.u32 4294901760, %v353_v3  ;;  %v8025_v28 = vand.u32 4294901760, %v7987_v55  ;;  %v8029_v29 = vsub.f32 %v40_v43, %v7989_v26  ;;  %453 = vmatpush.msra.mxu2 %v7987_v55 }
 0x113   :  { %12141 = vst [vmem:[#allocation51_spill] sm:$0xff] %v7970_v49  ;;  %v8031_v3 = vand.u32 4294901760, %v39_v56  ;;  %v8045_v43 = vand.u32 4294901760, %v359_v10  ;;  %v8050_v23 = vand.u32 4294901760, %v365_v12  ;;  %v8054_v15 = vand.u32 4294901760, %v8008_v30  ;;  %v66_v10 = vld [vmem:[%s11385_s1 + $0xe0] sm:$0xff]  ;;  %500 = vmatpush.msra.mxu3 %v7970_v49  ;;  %304 = vmatpush.msra.mxu0 %v7970_v49 }
 0x114   :  { %12142 = vst [vmem:[#allocation52_spill] sm:$0xff] %v7973_v54  ;;  %v68_v54 = vld [vmem:[%s11385_s1 + $0xf0] sm:$0xff]  ;;  %349 = vmatpush.msra.mxu1 %v7992_v52  ;;  %v377_v12 = vsub.f32 %v7982_v7, %v8018_v51  ;;  %v8069_v8 = vand.u32 4294901760, %v69_v63  ;;  %v383_v24 = vsub.f32 %v7987_v55, %v8025_v28  ;;  %v8099_v14 = vand.u32 4294901760, %v66_v10  ;;  %456 = vmatpush.msra.mxu2 %v8008_v30 }
 0x115   :  { %12145 = vst [vmem:[#allocation55_spill] sm:$0xff] %v7987_v55  ;;  %v8084_v4 = vsub.f32 %v39_v56, %v8031_v3  ;;  %v389_v56 = vsub.f32 %v8008_v30, %v8054_v15  ;;  %502 = vmatpush.msra.mxu3 %v7989_v26  ;;  %306 = vmatpush.msra.mxu0 %v7989_v26 }
 0x116   :  { %12146 = vst [vmem:[#allocation56_spill] sm:$0xff] %v7989_v26  ;;  %355 = vmatpush.msra.mxu1 %v8014_v60  ;;  %v8139_v55 = vand.u32 4294901760, %v383_v24  ;;  %459 = vmatpush.msra.mxu2 %v8011_v36 }
 0x117   :  { %12147 = vst [vmem:[#allocation57_spill] sm:$0xff] %v7992_v52  ;;  %v8071_v52 = vand.u32 4294901760, %v68_v54  ;;  %504 = vmatpush.msra.mxu3 %v8031_v3  ;;  %308 = vmatpush.msra.mxu0 %v8031_v3 }
 0x118   :  { %12149 = vst [vmem:[#allocation59_spill] sm:$0xff] %v8008_v30  ;;  %361 = vmatpush.msra.mxu1 %v8045_v43  ;;  %v62_v30 = vld [vmem:[%s11385_s1 + $0xc0] sm:$0xff]  ;;  %462 = vmatpush.msra.mxu2 %v8029_v29 }
 0x119   :  { %199 = vrot.lane.b32.xlu2 %v7819_v35, %s7672_s18  ;;  %12150 = vst [vmem:[#allocation60_spill] sm:$0xff] %v8011_v36  ;;  %v8097_v0 = vsub.f32 %v68_v54, %v8071_v52 }
 0x11a   :  { %12151 = vst [vmem:[#allocation61_spill] sm:$0xff] %v8014_v60  ;;  %v8081_v60 = vand.u32 4294901760, %v8029_v29  ;;  %367 = vmatpush.msra.mxu1 %v8050_v23  ;;  %465 = vmatpush.msra.mxu2 %v8084_v4 }
 0x11b   :  { %12153 = vst [vmem:[#allocation63_spill] sm:$0xff] %v8025_v28 }
 0x11c   :  { %12154 = vst [vmem:[#allocation64_spill] sm:$0xff] %v8029_v29 }
 0x11d   :  { %12155 = vst [vmem:[#allocation65_spill] sm:$0xff] %v8031_v3 }
 0x11e   :  { %12156 = vst [vmem:[#allocation66_spill] sm:$0xff] %v8045_v43  ;;  %v8114_v43 = vand.u32 4294901760, %v377_v12  ;;  %v8133_v12 = vand.u32 4294901760, %v8097_v0 }
 0x11f   :  { %12157 = vst [vmem:[#allocation67_spill] sm:$0xff] %v8050_v23  ;;  %v8129_v23 = vand.u32 4294901760, %v8084_v4 }
 0x120   :  { %12158 = vst [vmem:[#allocation68_spill] sm:$0xff] %v8054_v15 }
 0x121   :  { %12161 = vst [vmem:[#allocation71_spill] sm:$0xff] %v8069_v8 }
 0x122   :  { %12162 = vst [vmem:[#allocation72_spill] sm:$0xff] %v8071_v52 }
 0x123   :  { %12164 = vst [vmem:[#allocation74_spill] sm:$0xff] %v8081_v60 }
 0x124   :  { %12165 = vst [vmem:[#allocation75_spill] sm:$0xff] %v8084_v4 }
 0x125   :  { %12168 = vst [vmem:[#allocation78_spill] sm:$0xff] %v8097_v0 }
 0x126   :  { %12169 = vst [vmem:[#allocation79_spill] sm:$0xff] %v8099_v14 }
 0x127   :  { %12171 = vst [vmem:[#allocation81_spill] sm:$0xff] %v8114_v43 }
 0x128   :  { %12175 = vst [vmem:[#allocation85_spill] sm:$0xff] %v8129_v23 }
 0x129   :  { %12176 = vst [vmem:[#allocation86_spill] sm:$0xff] %v8133_v12 }
 0x12a   :  { %12177 = vst [vmem:[#allocation87_spill] sm:$0xff] %v8139_v55 }
 0x16b   :  { %v7925_v13 = vpop.permute.xlu2 %193 }
 0x16c   :  { %v196_v17 = vmin.f32 %v7815_v34, %v7925_v13  ;;  %v8058_v34 = vand.u32 4294901760, %v8011_v36  ;;  %v8060_v13 = vand.u32 4294901760, %v38_v25 }
 0x16e   :  { %12159 = vst [vmem:[#allocation69_spill] sm:$0xff] %v8058_v34  ;;  %v395_v6 = vsub.f32 %v8011_v36, %v8058_v34  ;;  %v8118_v20 = vsub.f32 %v38_v25, %v8060_v13  ;;  %v63_v25 = vld [vmem:[%s11385_s1 + $0xc8] sm:$0xff]  ;;  %v61_v36 = vld [vmem:[%s11385_s1 + $0xb8] sm:$0xff]  ;;  %506 = vmatpush.msra.mxu3 %v8060_v13  ;;  %310 = vmatpush.msra.mxu0 %v8060_v13 }
 0x16f   :  { %12160 = vst [vmem:[#allocation70_spill] sm:$0xff] %v8060_v13 }
 0x170   :  { %12172 = vst [vmem:[#allocation82_spill] sm:$0xff] %v8118_v20  ;;  %468 = vmatpush.msra.mxu2 %v8118_v20  ;;  %517 = vmatpush.msrb.mxu0 %v7879_v57 }
 0x172   :  { %621 = vmatpush.msrb.mxu2 %v8069_v8  ;;  %521 = vmatpush.msrb.mxu0 %v7882_v58 }
 0x173   :  { %v200_v16 = vpop.permute.xlu2 %199 }
 0x174   :  { %v202_v21 = vmax.f32 %v7819_v35, %v200_v16  ;;  %v8090_v16 = vand.u32 4294901760, %v371_v22  ;;  %v8094_v35 = vsub.f32 %v69_v63, %v8069_v8  ;;  %v8108_v22 = vsub.f32 %v67_v50, %v8073_v18  ;;  %v64_v63 = vld [vmem:[%s11385_s1 + $0xd0] sm:$0xff]  ;;  %623 = vmatpush.msrb.mxu2 %v8071_v52  ;;  %525 = vmatpush.msrb.mxu0 %v7886_v59 }
 0x175   :  { %v8123_v50 = vand.u32 4294901760, %v65_v1 }
 0x176   :  { %12166 = vst [vmem:[#allocation76_spill] sm:$0xff] %v8090_v16  ;;  %v8121_v9 = vand.u32 4294901760, %v8094_v35  ;;  %373 = vmatpush.msra.mxu1 %v8090_v16  ;;  %v8154_v16 = vand.u32 4294901760, %v8108_v22  ;;  %625 = vmatpush.msrb.mxu2 %v8073_v18 }
 0x177   :  { %12167 = vst [vmem:[#allocation77_spill] sm:$0xff] %v8094_v35  ;;  %529 = vmatpush.msrb.mxu0 %v7893_v61  ;;  %v54_v61 = vld [vmem:[%s11385_s1 + $0x80] sm:$0xff] }
 0x178   :  { %12170 = vst [vmem:[#allocation80_spill] sm:$0xff] %v8108_v22  ;;  %v664_v24 = vsub.f32 %v8094_v35, %v8121_v9  ;;  %379 = vmatpush.msra.mxu1 %v8114_v43  ;;  %v407_v35 = vsub.f32 %v8084_v4, %v8129_v23  ;;  %v8190_v43 = vand.u32 4294901760, %v62_v30  ;;  %627 = vmatpush.msrb.mxu2 %v8099_v14  ;;  %v8404_v57 = vand.u32 4294901760, %v54_v61 }
 0x179   :  { %12173 = vst [vmem:[#allocation83_spill] sm:$0xff] %v8121_v9  ;;  %533 = vmatpush.msrb.mxu0 %v7896_v62 }
 0x17a   :  { %12174 = vst [vmem:[#allocation84_spill] sm:$0xff] %v8123_v50  ;;  %385 = vmatpush.msra.mxu1 %v8139_v55  ;;  %v8214_v55 = vand.u32 4294901760, %v407_v35  ;;  %629 = vmatpush.msrb.mxu2 %v8123_v50 }
 0x17b   :  { %12180 = vst [vmem:[#allocation90_spill] sm:$0xff] %v8154_v16  ;;  %537 = vmatpush.msrb.mxu0 %v7935_v27 }
 0x17c   :  { %12188 = vst [vmem:[#allocation98_spill] sm:$0xff] %v8190_v43 }
 0x17d   :  { %12194 = vst [vmem:[#allocation104_spill] sm:$0xff] %v8214_v55  ;;  %541 = vmatpush.msrb.mxu0 %v7947_v33 }
 0x17e   :  { %12230 = vst [vmem:[#allocation139_spill] sm:$0xff] %v8404_v57 }
 0x17f   :  { %545 = vmatpush.msrb.mxu0 %v7965_v44 }
 0x181   :  { %v189_v54 = vpop.permute.xlu1 %188  ;;  %v205_v7 = vpop.permute.xlu0 %204  ;;  %549 = vmatpush.msrb.mxu0 %v7998_v11 }
 0x182   :  { %v191_v5 = vmax.f32 %v7809_v32, %v189_v54  ;;  %v207_v19 = vmin.f32 %v7807_v31, %v205_v7  ;;  %v401_v31 = vsub.f32 %v8029_v29, %v8081_v60  ;;  %v8145_v32 = vsub.f32 %v66_v10, %v8099_v14  ;;  %v60_v29 = vld [vmem:[%s11385_s1 + $0xb0] sm:$0xff] }
 0x183   :  { %v8147_v7 = vand.u32 4294901760, %v64_v63  ;;  %v8160_v10 = vand.u32 4294901760, %v389_v56  ;;  %v670_v56 = vsub.f32 %v8097_v0, %v8133_v12  ;;  %v8195_v12 = vand.u32 4294901760, %v664_v24  ;;  %553 = vmatpush.msrb.mxu0 %v8018_v51 }
 0x184   :  { %12178 = vst [vmem:[#allocation88_spill] sm:$0xff] %v8145_v32  ;;  %v197_v54 = vmax.f32 %v196_v17, %v191_v5  ;;  %v208_v45 = vmin.f32 %v207_v19, %v202_v21  ;;  %v8164_v5 = vand.u32 4294901760, %v8118_v20  ;;  %v8167_v19 = vsub.f32 %v65_v1, %v8123_v50 }
 0x185   :  { %12179 = vst [vmem:[#allocation89_spill] sm:$0xff] %v8147_v7  ;;  %v8169_v21 = vand.u32 4294901760, %v63_v25  ;;  %v8181_v1 = vand.u32 4294901760, %v395_v6  ;;  %v8192_v0 = vand.u32 4294901760, %v401_v31  ;;  %v676_v6 = vsub.f32 %v8108_v22, %v8154_v16  ;;  %391 = vmatpush.msra.mxu1 %v8160_v10  ;;  %666 = vmatpush.msrb.mxu3 %v8195_v12 }
 0x186   :  { %12181 = vst [vmem:[#allocation91_spill] sm:$0xff] %v8160_v10  ;;  %v209_v17 = vmax.f32 %v208_v45, %v197_v54  ;;  %v8185_v45 = vand.u32 4294901760, %v8145_v32  ;;  %v8188_v54 = vsub.f32 %v64_v63, %v8147_v7  ;;  %v413_v63 = vsub.f32 %v8118_v20, %v8164_v5  ;;  %631 = vmatpush.msrb.mxu2 %v8147_v7 }
 0x187   :  { %12182 = vst [vmem:[#allocation92_spill] sm:$0xff] %v8164_v5  ;;  %v8207_v31 = vand.u32 4294901760, %v8167_v19  ;;  %v8210_v24 = vsub.f32 %v63_v25, %v8169_v21  ;;  %v8218_v10 = vand.u32 4294901760, %v670_v56  ;;  %397 = vmatpush.msra.mxu1 %v8181_v1  ;;  %v8228_v22 = vsub.f32 %v62_v30, %v8190_v43  ;;  %557 = vmatpush.msrb.mxu0 %v8025_v28 }
 0x188   :  { %12183 = vst [vmem:[#allocation93_spill] sm:$0xff] %v8167_v19  ;;  %212 = vperm.xlu1 %7616, %v209_v17   ;;  %v8212_v17 = vand.u32 4294901760, %v61_v36  ;;  %v682_v4 = vsub.f32 %v8145_v32, %v8185_v45  ;;  %v8225_v25 = vand.u32 4294901760, %v8188_v54  ;;  %v8230_v35 = vand.u32 4294901760, %v60_v29  ;;  %633 = vmatpush.msrb.mxu2 %v8169_v21 }
 0x189   :  { %12184 = vst [vmem:[#allocation94_spill] sm:$0xff] %v8169_v21  ;;  %v8234_v56 = vand.u32 4294901760, %v676_v6  ;;  %403 = vmatpush.msra.mxu1 %v8192_v0  ;;  %v8237_v20 = vand.u32 4294901760, %v413_v63  ;;  %v8243_v30 = vand.u32 4294901760, %v8210_v24  ;;  %672 = vmatpush.msrb.mxu3 %v8218_v10 }
 0x18a   :  { %12185 = vst [vmem:[#allocation95_spill] sm:$0xff] %v8181_v1  ;;  %v688_v1 = vsub.f32 %v8167_v19, %v8207_v31  ;;  %v8246_v32 = vsub.f32 %v61_v36, %v8212_v17  ;;  %v8252_v6 = vand.u32 4294901760, %v682_v4  ;;  %v694_v63 = vsub.f32 %v8188_v54, %v8225_v25  ;;  %635 = vmatpush.msrb.mxu2 %v8190_v43 }
 0x18b   :  { %12186 = vst [vmem:[#allocation96_spill] sm:$0xff] %v8185_v45  ;;  %409 = vmatpush.msra.mxu1 %v8214_v55  ;;  %678 = vmatpush.msrb.mxu3 %v8234_v56  ;;  %v700_v4 = vsub.f32 %v8210_v24, %v8243_v30 }
 0x18c   :  { %12187 = vst [vmem:[#allocation97_spill] sm:$0xff] %v8188_v54  ;;  %v8266_v36 = vand.u32 4294901760, %v688_v1  ;;  %637 = vmatpush.msrb.mxu2 %v8212_v17  ;;  %561 = vmatpush.msrb.mxu0 %v8054_v15 }
 0x18d   :  { %12189 = vst [vmem:[#allocation99_spill] sm:$0xff] %v8192_v0  ;;  %v8260_v0 = vsub.f32 %v60_v29, %v8230_v35  ;;  %415 = vmatpush.msra.mxu1 %v8237_v20  ;;  %684 = vmatpush.msrb.mxu3 %v8252_v6  ;;  %v8277_v29 = vand.u32 4294901760, %v694_v63  ;;  %v8288_v58 = vand.u32 4294901760, %v700_v4 }
 0x18e   :  { %12190 = vst [vmem:[#allocation100_spill] sm:$0xff] %v8195_v12  ;;  %v8257_v12 = vand.u32 4294901760, %v8228_v22  ;;  %639 = vmatpush.msrb.mxu2 %v8230_v35  ;;  %565 = vmatpush.msrb.mxu0 %v8058_v34  ;;  %v58_v34 = vld [vmem:[%s11385_s1 + $0xa0] sm:$0xff] }
 0x18f   :  { %12191 = vst [vmem:[#allocation101_spill] sm:$0xff] %v8207_v31  ;;  %584 = vmatpush.msrb.mxu1 %v7832_v40  ;;  %690 = vmatpush.msrb.mxu3 %v8266_v36  ;;  %v8345_v15 = vand.u32 4294901760, %v58_v34 }
 0x190   :  { %12192 = vst [vmem:[#allocation102_spill] sm:$0xff] %v8210_v24  ;;  %v706_v1 = vsub.f32 %v8228_v22, %v8257_v12  ;;  %569 = vmatpush.msrb.mxu0 %v8081_v60 }
 0x191   :  { %12193 = vst [vmem:[#allocation103_spill] sm:$0xff] %v8212_v17  ;;  %586 = vmatpush.msrb.mxu1 %v7834_v41  ;;  %696 = vmatpush.msrb.mxu3 %v8277_v29  ;;  %v8360_v51 = vsub.f32 %v58_v34, %v8345_v15  ;;  %v55_v34 = vld [vmem:[%s11385_s1 + $0x88] sm:$0xff] }
 0x192   :  { %12195 = vst [vmem:[#allocation105_spill] sm:$0xff] %v8218_v10  ;;  %v8271_v10 = vand.u32 4294901760, %v8246_v32  ;;  %573 = vmatpush.msrb.mxu0 %v8129_v23  ;;  %v57_v23 = vld [vmem:[%s11385_s1 + $0x98] sm:$0xff]  ;;  %v8387_v27 = vand.u32 4294901760, %v55_v34 }
 0x193   :  { %12196 = vst [vmem:[#allocation106_spill] sm:$0xff] %v8225_v25  ;;  %588 = vmatpush.msrb.mxu1 %v7836_v42  ;;  %702 = vmatpush.msrb.mxu3 %v8288_v58  ;;  %v8357_v28 = vand.u32 4294901760, %v57_v23  ;;  %v8369_v11 = vand.u32 4294901760, %v8360_v51  ;;  %v12246_v42 = vld [vmem:[#allocation6_spill] sm:$0xff] }
 0x194   :  { %12197 = vst [vmem:[#allocation107_spill] sm:$0xff] %v8228_v22  ;;  %v712_v63 = vsub.f32 %v8246_v32, %v8271_v10  ;;  %577 = vmatpush.msrb.mxu0 %v8164_v5 }
 0x195   :  { %12198 = vst [vmem:[#allocation108_spill] sm:$0xff] %v8230_v35  ;;  %590 = vmatpush.msrb.mxu1 %v7847_v46  ;;  %v8374_v44 = vsub.f32 %v57_v23, %v8357_v28  ;;  %v730_v33 = vsub.f32 %v8360_v51, %v8369_v11 }
 0x196   :  { %12199 = vst [vmem:[#allocation109_spill] sm:$0xff] %v8234_v56  ;;  %v8282_v56 = vand.u32 4294901760, %v8260_v0  ;;  %v8304_v4 = vand.u32 4294901760, %v712_v63 }
 0x197   :  { %12200 = vst [vmem:[#allocation110_spill] sm:$0xff] %v8237_v20  ;;  %592 = vmatpush.msrb.mxu1 %v7849_v47  ;;  %v8393_v23 = vand.u32 4294901760, %v730_v33  ;;  %v8419_v20 = vsub.f32 %v54_v61, %v8404_v57  ;;  %v12239_v61 = vld [vmem:[#allocation7_spill] sm:$0xff]  ;;  %v12245_v47 = vld [vmem:[#allocation5_spill] sm:$0xff] }
 0x198   :  { %12201 = vst [vmem:[#allocation111_spill] sm:$0xff] %v8243_v30 }
 0x199   :  { %12202 = vst [vmem:[#allocation112_spill] sm:$0xff] %v8246_v32  ;;  %594 = vmatpush.msrb.mxu1 %v7851_v48 }
 0x19a   :  { %12203 = vst [vmem:[#allocation113_spill] sm:$0xff] %v8252_v6  ;;  %v8296_v6 = vand.u32 4294901760, %v706_v1  ;;  %v59_v1 = vld [vmem:[%s11385_s1 + $0xa8] sm:$0xff] }
 0x19b   :  { %12204 = vst [vmem:[#allocation114_spill] sm:$0xff] %v8257_v12  ;;  %596 = vmatpush.msrb.mxu1 %v7867_v53  ;;  %v8321_v63 = vand.u32 4294901760, %v59_v1 }
 0x19c   :  { %12205 = vst [vmem:[#allocation115_spill] sm:$0xff] %v8260_v0  ;;  %708 = vmatpush.msrb.mxu3 %v8296_v6 }
 0x19d   :  { %12206 = vst [vmem:[#allocation116_spill] sm:$0xff] %v8266_v36  ;;  %v718_v36 = vsub.f32 %v8260_v0, %v8282_v56  ;;  %598 = vmatpush.msrb.mxu1 %v7902_v2  ;;  %641 = vmatpush.msrb.mxu2 %v8321_v63  ;;  %v8348_v60 = vsub.f32 %v59_v1, %v8321_v63 }
 0x19e   :  { %12207 = vst [vmem:[#allocation117_spill] sm:$0xff] %v8271_v10  ;;  %714 = vmatpush.msrb.mxu3 %v8304_v4 }
 0x19f   :  { %12208 = vst [vmem:[#allocation118_spill] sm:$0xff] %v8277_v29  ;;  %v8313_v29 = vand.u32 4294901760, %v718_v36  ;;  %600 = vmatpush.msrb.mxu1 %v7954_v37  ;;  %v12215_v36 = vld [vmem:[#allocation50_spill] sm:$0xff]  ;;  %643 = vmatpush.msrb.mxu2 %v8345_v15  ;;  %v8355_v5 = vand.u32 4294901760, %v8348_v60 }
 0x1a0   :  { %12209 = vst [vmem:[#allocation119_spill] sm:$0xff] %v8282_v56 }
 0x1a1   :  { %12210 = vst [vmem:[#allocation120_spill] sm:$0xff] %v8288_v58  ;;  %720 = vmatpush.msrb.mxu3 %v8313_v29  ;;  %602 = vmatpush.msrb.mxu1 %v7956_v38  ;;  %v724_v1 = vsub.f32 %v8348_v60, %v8355_v5  ;;  %v8385_v58 = vand.u32 4294901760, %v8374_v44 }
 0x1a2   :  { %12211 = vst [vmem:[#allocation121_spill] sm:$0xff] %v8296_v6  ;;  %645 = vmatpush.msrb.mxu2 %v8357_v28 }
 0x1a3   :  { %12212 = vst [vmem:[#allocation122_spill] sm:$0xff] %v8304_v4  ;;  %604 = vmatpush.msrb.mxu1 %v7958_v39  ;;  %v8379_v6 = vand.u32 4294901760, %v724_v1  ;;  %v736_v1 = vsub.f32 %v8374_v44, %v8385_v58  ;;  %v12244_v39 = vld [vmem:[#allocation10_spill] sm:$0xff] }
 0x1a4   :  { %12213 = vst [vmem:[#allocation123_spill] sm:$0xff] %v8313_v29  ;;  %v56_v29 = vld [vmem:[%s11385_s1 + $0x90] sm:$0xff] }
 0x1a5   :  { %12214 = vst [vmem:[#allocation124_spill] sm:$0xff] %v8321_v63  ;;  %606 = vmatpush.msrb.mxu1 %v12215_v36  ;;  %v8371_v4 = vand.u32 4294901760, %v56_v29  ;;  %726 = vmatpush.msrb.mxu3 %v8379_v6  ;;  %v8410_v33 = vand.u32 4294901760, %v736_v1  ;;  %v8427_v1 = vand.u32 4294901760, %v8419_v20  ;;  %v12243_v36 = vld [vmem:[#allocation8_spill] sm:$0xff] }
 0x1a6   :  { %12216 = vst [vmem:[#allocation125_spill] sm:$0xff] %v8345_v15 }
 0x1a7   :  { %608 = vmatpush.msrb.mxu1 %v7970_v49  ;;  %12217 = vst [vmem:[#allocation126_spill] sm:$0xff] %v8348_v60  ;;  %647 = vmatpush.msrb.mxu2 %v8371_v4  ;;  %v8390_v62 = vsub.f32 %v56_v29, %v8371_v4  ;;  %v8407_v29 = vsub.f32 %v55_v34, %v8387_v27  ;;  %v12240_v49 = vld [vmem:[#allocation9_spill] sm:$0xff] }
 0x1a8   :  { %12218 = vst [vmem:[#allocation127_spill] sm:$0xff] %v8355_v5  ;;  %732 = vmatpush.msrb.mxu3 %v8393_v23  ;;  %v754_v55 = vsub.f32 %v8419_v20, %v8427_v1 }
 0x1a9   :  { %610 = vmatpush.msrb.mxu1 %v7989_v26  ;;  %12219 = vst [vmem:[#allocation128_spill] sm:$0xff] %v8357_v28  ;;  %649 = vmatpush.msrb.mxu2 %v8387_v27  ;;  %v8402_v59 = vand.u32 4294901760, %v8390_v62  ;;  %v12238_v26 = vld [vmem:[#allocation14_spill] sm:$0xff] }
 0x1aa   :  { %12220 = vst [vmem:[#allocation129_spill] sm:$0xff] %v8360_v51  ;;  %738 = vmatpush.msrb.mxu3 %v8410_v33  ;;  %vm216_vm0 = vcmp.le.f32.partialorder %v12239_v61, %v12238_v26  ;;  %vm220_vm1 = vcmp.le.f32.partialorder %v12238_v26, %v12240_v49  ;;  %vm232_vm6 = vcmp.gt.f32.partialorder %v12238_v26, %v12239_v61 }
 0x1ab   :  { %612 = vmatpush.msrb.mxu1 %v8031_v3  ;;  %12221 = vst [vmem:[#allocation130_spill] sm:$0xff] %v8369_v11  ;;  %651 = vmatpush.msrb.mxu2 %v8404_v57  ;;  %vm224_vm4 = vmand %vm216_vm0, %vm220_vm1  ;;  %vm244_vm8 = vcmp.gt.f32.partialorder %v12240_v49, %v12238_v26 }
 0x1ac   :  { %12222 = vst [vmem:[#allocation131_spill] sm:$0xff] %v8371_v4  ;;  %v248_v37 = vsel %vm244_vm8, %v12240_v49, 0.0 }
 0x1ad   :  { %614 = vmatpush.msrb.mxu1 %v8060_v13  ;;  %12223 = vst [vmem:[#allocation132_spill] sm:$0xff] %v8374_v44  ;;  %v8416_v13 = vand.u32 4294901760, %v8407_v29 }
 0x1ae   :  { %12224 = vst [vmem:[#allocation133_spill] sm:$0xff] %v8379_v6  ;;  %v742_v6 = vsub.f32 %v8390_v62, %v8402_v59 }
 0x1af   :  { %12225 = vst [vmem:[#allocation134_spill] sm:$0xff] %v8385_v58  ;;  %v748_v34 = vsub.f32 %v8407_v29, %v8416_v13 }
 0x1b0   :  { %12226 = vst [vmem:[#allocation135_spill] sm:$0xff] %v8387_v27  ;;  %v8422_v3 = vand.u32 4294901760, %v742_v6  ;;  %v8439_v6 = vand.u32 4294901760, %v754_v55 }
 0x1b1   :  { %12227 = vst [vmem:[#allocation136_spill] sm:$0xff] %v8390_v62 }
 0x1b2   :  { %12228 = vst [vmem:[#allocation137_spill] sm:$0xff] %v8393_v23  ;;  %744 = vmatpush.msrb.mxu3 %v8422_v3  ;;  %v8430_v23 = vand.u32 4294901760, %v748_v34  ;;  %v228_v34 = vsel %vm224_vm4, %v12238_v26, 0.0 }
 0x1b3   :  { %12229 = vst [vmem:[#allocation138_spill] sm:$0xff] %v8402_v59 }
 0x1b4   :  { %12231 = vst [vmem:[#allocation140_spill] sm:$0xff] %v8407_v29  ;;  %750 = vmatpush.msrb.mxu3 %v8430_v23 }
 0x1b5   :  { %12232 = vst [vmem:[#allocation141_spill] sm:$0xff] %v8410_v33  ;;  %v12242_v33 = vld [vmem:[#allocation15_spill] sm:$0xff] }
 0x1b6   :  { %12233 = vst [vmem:[#allocation142_spill] sm:$0xff] %v8416_v13  ;;  %vm217_vm2 = vcmp.le.f32.partialorder %v12243_v36, %v12242_v33  ;;  %vm221_vm3 = vcmp.le.f32.partialorder %v12242_v33, %v12244_v39  ;;  %756 = vmatpush.msrb.mxu3 %v8439_v6  ;;  %vm233_vm7 = vcmp.gt.f32.partialorder %v12242_v33, %v12243_v36 }
 0x1b7   :  { %12234 = vst [vmem:[#allocation143_spill] sm:$0xff] %v8419_v20  ;;  %vm225_vm5 = vmand %vm217_vm2, %vm221_vm3  ;;  %vm245_vm9 = vcmp.gt.f32.partialorder %v12244_v39, %v12242_v33 }
 0x1b8   :  { %12235 = vst [vmem:[#allocation144_spill] sm:$0xff] %v8422_v3  ;;  %v229_v55 = vsel %vm225_vm5, %v12242_v33, 0.0  ;;  %v237_v3 = vsel %vm233_vm7, %v12243_v36, 0.0  ;;  %v249_v2 = vsel %vm245_vm9, %v12244_v39, 0.0  ;;  %v12247_v36 = vld [vmem:[#allocation19_spill] sm:$0xff] }
 0x1b9   :  { %12236 = vst [vmem:[#allocation145_spill] sm:$0xff] %v8427_v1  ;;  %v241_v38 = vadd.f32 %v237_v3, %v229_v55 }
 0x1ba   :  { %12237 = vst [vmem:[#allocation146_spill] sm:$0xff] %v8430_v23  ;;  %v236_v23 = vsel %vm232_vm6, %v12239_v61, 0.0 }
 0x1bb   :  { %12241 = vst [vmem:[#allocation14_spill] sm:$0xff] %v8439_v6  ;;  %v240_v6 = vadd.f32 %v236_v23, %v228_v34  ;;  %v253_v48 = vadd.f32 %v249_v2, %v241_v38 }
 0x1bd   :  { %v252_v53 = vadd.f32 %v248_v37, %v240_v6  ;;  %v260_v61 = vadd.f32 %v253_v48, %v12246_v42  ;;  %v12250_v6 = vld [vmem:[#allocation86_spill] sm:$0xff] }
 0x1bf   :  { %v256_v46 = vadd.f32 %v252_v53, %v12245_v47 }
 0x1fa   :  { %v8462_v41 = vpop.permute.xlu1 %212 }
 0x1fb   :  { %vm215_vm10 = vcmp.ge.f32.partialorder %v12247_v36, %v8462_v41 }
 0x1fc   :  { %v257_v26 = vsel %vm215_vm10, %v256_v46, %v12245_v47  ;;  %v261_v37 = vsel %vm215_vm10, %v260_v61, %v12246_v42 }
 0x1fd   :  { %v258_v2 = vmax.f32 %v257_v26, 0.0  ;;  %v262_v38 = vmax.f32 %v261_v37, 0.0  ;;  %v12251_v26 = vld [vmem:[#allocation77_spill] sm:$0xff] }
 0x1ff   :  { %v8474_v53 = vmin.f32 %v258_v2, 1.0  ;;  %v8476_v48 = vmin.f32 %v262_v38, 1.0  ;;  %v12252_v2 = vld [vmem:[#allocation78_spill] sm:$0xff]  ;;  %v85_v38 = vld [vmem:[%s11385_s1 + $0x178] sm:$0xff] }
 0x201   :  { %12248 = vst [vmem:[#allocation15_spill] sm:$0xff] %v8474_v53  ;;  %v8479_v3 = vand.u32 4294901760, %v8476_v48  ;;  %v311_v23 = vand.u32 4294901760, %v8474_v53 }
 0x202   :  { %12249 = vst [vmem:[#allocation5_spill] sm:$0xff] %v8476_v48 }
 0x203   :  { %v8484_v33 = vsub.f32 %v8476_v48, %v8479_v3  ;;  %417 = vmatmul.f32.vlgmr.msra.gmra.mxu1 %v311_v23  ;;  %v312_v46 = vsub.f32 %v8474_v53, %v311_v23 }
 0x204   :  { %817 = vmatpush.msra.mxu1 %v8069_v8 }
 0x205   :  { %v11592_v42 = vand.u32 4294901760, %v8484_v33  ;;  %471 = vmatmul.f32.vlgmr.msra.gmra.mxu2 %v312_v46  ;;  %v313_v47 = vand.u32 4294901760, %v312_v46 }
 0x206   :  { %819 = vmatpush.msra.mxu1 %v8071_v52  ;;  %858 = vmatpush.msra.mxu2 %v8121_v9 }
 0x207   :  { %510 = vmatmul.f32.vlgmr.msra.gmra.mxu3 %v313_v47  ;;  %v314_v61 = vsub.f32 %v312_v46, %v313_v47  ;;  %v655_v34 = vsub.f32 %v8484_v33, %v11592_v42  ;;  %v12253_v46 = vld [vmem:[#allocation80_spill] sm:$0xff]  ;;  %v84_v47 = vld [vmem:[%s11385_s1 + $0x170] sm:$0xff] }
 0x208   :  { %821 = vmatpush.msra.mxu1 %v8073_v18  ;;  %862 = vmatpush.msra.mxu2 %v12250_v6  ;;  %v82_v42 = vld [vmem:[%s11385_s1 + $0x160] sm:$0xff] }
 0x209   :  { %925 = vmatpush.msra.mxu3 %v8069_v8  ;;  %v315_v55 = vand.u32 4294901760, %v314_v61  ;;  %v656_v37 = vand.u32 4294901760, %v655_v34  ;;  %v12254_v61 = vld [vmem:[#allocation88_spill] sm:$0xff]  ;;  %v8520_v34 = vand.u32 4294901760, %v85_v38  ;;  %v8552_v53 = vand.u32 4294901760, %v82_v42 }
 0x20a   :  { %823 = vmatpush.msra.mxu1 %v8099_v14  ;;  %866 = vmatpush.msra.mxu2 %v8154_v16 }
 0x20b   :  { %927 = vmatpush.msra.mxu3 %v8071_v52  ;;  %316 = vmatmul.f32.vlgmr.msra.gmra.mxu0 %v315_v55  ;;  %12255 = vst [vmem:[#allocation6_spill] sm:$0xff] %v8520_v34  ;;  %v83_v55 = vld [vmem:[%s11385_s1 + $0x168] sm:$0xff]  ;;  %v8538_v39 = vsub.f32 %v85_v38, %v8520_v34 }
 0x20c   :  { %616 = vmatmul.f32.vlgmr.msrb.gmra.mxu1 %v311_v23  ;;  %764 = vmatpush.msra.mxu0 %v12251_v26  ;;  %v8540_v49 = vand.u32 4294901760, %v83_v55  ;;  %12260 = vst [vmem:[#allocation150_spill] sm:$0xff] %v8552_v53 }
 0x20d   :  { %825 = vmatpush.msra.mxu1 %v8123_v50  ;;  %870 = vmatpush.msra.mxu2 %v8185_v45  ;;  %12257 = vst [vmem:[#allocation147_spill] sm:$0xff] %v8538_v39  ;;  %v8559_v38 = vand.u32 4294901760, %v8538_v39 }
 0x20e   :  { %929 = vmatpush.msra.mxu3 %v8073_v18  ;;  %657 = vmatmul.f32.vlgmr.msrb.gmra.mxu2 %v656_v37  ;;  %v8528_v37 = vand.u32 4294901760, %v84_v47  ;;  %12258 = vst [vmem:[#allocation148_spill] sm:$0xff] %v8540_v49 }
 0x20f   :  { %767 = vmatpush.msra.mxu0 %v12252_v2  ;;  %827 = vmatpush.msra.mxu1 %v8147_v7  ;;  %12261 = vst [vmem:[#allocation151_spill] sm:$0xff] %v8559_v38 }
 0x210   :  { %874 = vmatpush.msra.mxu2 %v8207_v31  ;;  %931 = vmatpush.msra.mxu3 %v8099_v14  ;;  %12256 = vst [vmem:[#allocation19_spill] sm:$0xff] %v8528_v37  ;;  %v8550_v48 = vsub.f32 %v84_v47, %v8528_v37  ;;  %v80_v47 = vld [vmem:[%s11385_s1 + $0x150] sm:$0xff] }
 0x211   :  { %758 = vmatmul.f32.vlgmr.msrb.gmra.mxu3 %v8479_v3  ;;  %770 = vmatpush.msra.mxu0 %v12253_v46  ;;  %v77_v46 = vld [vmem:[%s11385_s1 + $0x138] sm:$0xff] }
 0x212   :  { %829 = vmatpush.msra.mxu1 %v8169_v21  ;;  %878 = vmatpush.msra.mxu2 %v8225_v25  ;;  %12259 = vst [vmem:[#allocation149_spill] sm:$0xff] %v8550_v48  ;;  %v12271_v25 = vld [vmem:[#allocation13_spill] sm:$0xff] }
 0x213   :  { %933 = vmatpush.msra.mxu3 %v8123_v50  ;;  %773 = vmatpush.msra.mxu0 %v12254_v61  ;;  %v12272_v61 = vld [vmem:[#allocation11_spill] sm:$0xff] }
 0x214   :  { %831 = vmatpush.msra.mxu1 %v8190_v43  ;;  %882 = vmatpush.msra.mxu2 %v8243_v30 }
 0x215   :  { %935 = vmatpush.msra.mxu3 %v8147_v7  ;;  %579 = vmatmul.f32.vlgmr.msrb.gmra.mxu0 %v311_v23  ;;  %v81_v23 = vld [vmem:[%s11385_s1 + $0x158] sm:$0xff]  ;;  %v99_v7 = vld [vmem:[%s11385_s1 + $0x1e8] sm:$0xff] }
 0x216   :  { %776 = vmatpush.msra.mxu0 %v8167_v19  ;;  %833 = vmatpush.msra.mxu1 %v8212_v17  ;;  %v12270_v19 = vld [vmem:[#allocation16_spill] sm:$0xff] }
 0x217   :  { %886 = vmatpush.msra.mxu2 %v8257_v12  ;;  %937 = vmatpush.msra.mxu3 %v8169_v21  ;;  %v8564_v12 = vand.u32 4294901760, %v81_v23  ;;  %vm218_vm11 = vcmp.le.f32.partialorder %v12271_v25, %v12270_v19  ;;  %vm222_vm12 = vcmp.le.f32.partialorder %v12270_v19, %v12272_v61  ;;  %vm234_vm13 = vcmp.gt.f32.partialorder %v12270_v19, %v12271_v25 }
 0x218   :  { %779 = vmatpush.msra.mxu0 %v8188_v54  ;;  %835 = vmatpush.msra.mxu1 %v8230_v35  ;;  %v78_v54 = vld [vmem:[%s11385_s1 + $0x140] sm:$0xff]  ;;  %vm8626_vm14 = vmand %vm218_vm11, %vm222_vm12  ;;  %vm246_vm15 = vcmp.gt.f32.partialorder %v12272_v61, %v12270_v19 }
 0x219   :  { %890 = vmatpush.msra.mxu2 %v8271_v10  ;;  %939 = vmatpush.msra.mxu3 %v8190_v43  ;;  %v8562_v10 = vsub.f32 %v83_v55, %v8540_v49  ;;  %12263 = vst [vmem:[#allocation153_spill] sm:$0xff] %v8564_v12  ;;  %v8577_v55 = vand.u32 4294901760, %v8550_v48  ;;  %v8614_v31 = vand.u32 4294901760, %v78_v54  ;;  %v230_v6 = vsel %vm8626_vm14, %v12270_v19, 0.0 }
 0x21a   :  { %782 = vmatpush.msra.mxu0 %v8210_v24  ;;  %837 = vmatpush.msra.mxu1 %v8321_v63  ;;  %v8580_v24 = vsub.f32 %v82_v42, %v8552_v53 }
 0x21b   :  { %894 = vmatpush.msra.mxu2 %v8282_v56  ;;  %941 = vmatpush.msra.mxu3 %v8212_v17  ;;  %12262 = vst [vmem:[#allocation152_spill] sm:$0xff] %v8562_v10  ;;  %v79_v56 = vld [vmem:[%s11385_s1 + $0x148] sm:$0xff]  ;;  %v8594_v42 = vand.u32 4294901760, %v8562_v10  ;;  %v8656_v26 = vsub.f32 %v78_v54, %v8614_v31 }
 0x21c   :  { %785 = vmatpush.msra.mxu0 %v8228_v22  ;;  %839 = vmatpush.msra.mxu1 %v8345_v15  ;;  %12264 = vst [vmem:[#allocation154_spill] sm:$0xff] %v8577_v55  ;;  %v8584_v22 = vand.u32 4294901760, %v80_v47  ;;  %v8599_v30 = vand.u32 4294901760, %v79_v56 }
 0x21d   :  { %898 = vmatpush.msra.mxu2 %v8355_v5  ;;  %943 = vmatpush.msra.mxu3 %v8230_v35  ;;  %12265 = vst [vmem:[#allocation155_spill] sm:$0xff] %v8580_v24  ;;  %v1005_v5 = vsub.f32 %v8538_v39, %v8559_v38  ;;  %v1017_v2 = vsub.f32 %v8562_v10, %v8594_v42  ;;  %v12321_v35 = vld [vmem:[#allocation12_spill] sm:$0xff] }
 0x21e   :  { %788 = vmatpush.msra.mxu0 %v8246_v32  ;;  %841 = vmatpush.msra.mxu1 %v8357_v28  ;;  %12266 = vst [vmem:[#allocation156_spill] sm:$0xff] %v8584_v22  ;;  %v8597_v32 = vsub.f32 %v81_v23, %v8564_v12  ;;  %v1011_v23 = vsub.f32 %v8550_v48, %v8577_v55 }
 0x21f   :  { %902 = vmatpush.msra.mxu2 %v8369_v11  ;;  %945 = vmatpush.msra.mxu3 %v8321_v63  ;;  %12267 = vst [vmem:[#allocation157_spill] sm:$0xff] %v8594_v42  ;;  %v8612_v11 = vand.u32 4294901760, %v8580_v24  ;;  %v8632_v45 = vand.u32 4294901760, %v1005_v5  ;;  %v8640_v16 = vsub.f32 %v79_v56, %v8599_v30  ;;  %v12320_v63 = vld [vmem:[#allocation17_spill] sm:$0xff] }
 0x220   :  { %12268 = vst [vmem:[#allocation158_spill] sm:$0xff] %v8597_v32  ;;  %791 = vmatpush.msra.mxu0 %v8260_v0  ;;  %843 = vmatpush.msra.mxu1 %v8371_v4  ;;  %v8651_v5 = vand.u32 4294901760, %v1011_v23  ;;  %v238_v23 = vsel %vm234_vm13, %v12271_v25, 0.0  ;;  %v8680_v0 = vand.u32 4294901760, %v1017_v2 }
 0x221   :  { %12269 = vst [vmem:[#allocation159_spill] sm:$0xff] %v8599_v30  ;;  %906 = vmatpush.msra.mxu2 %v8385_v58  ;;  %947 = vmatpush.msra.mxu3 %v8345_v15  ;;  %v8624_v58 = vsub.f32 %v80_v47, %v8584_v22  ;;  %v76_v47 = vld [vmem:[%s11385_s1 + $0x130] sm:$0xff]  ;;  %v1023_v56 = vsub.f32 %v8580_v24, %v8612_v11 }
 0x222   :  { %12273 = vst [vmem:[#allocation16_spill] sm:$0xff] %v8612_v11  ;;  %794 = vmatpush.msra.mxu0 %v8348_v60  ;;  %845 = vmatpush.msra.mxu1 %v8387_v27  ;;  %v8637_v60 = vand.u32 4294901760, %v8597_v32  ;;  %v8674_v9 = vand.u32 4294901760, %v76_v47  ;;  %v242_v2 = vadd.f32 %v238_v23, %v230_v6 }
 0x223   :  { %12274 = vst [vmem:[#allocation160_spill] sm:$0xff] %v8614_v31  ;;  %910 = vmatpush.msra.mxu2 %v8402_v59  ;;  %949 = vmatpush.msra.mxu3 %v8357_v28  ;;  %v8647_v59 = vand.u32 4294901760, %v77_v46  ;;  %v8672_v54 = vand.u32 4294901760, %v8624_v58  ;;  %v8702_v28 = vand.u32 4294901760, %v8656_v26 }
 0x224   :  { %12275 = vst [vmem:[#allocation161_spill] sm:$0xff] %v8624_v58  ;;  %797 = vmatpush.msra.mxu0 %v8360_v51  ;;  %847 = vmatpush.msra.mxu1 %v8404_v57  ;;  %v75_v51 = vld [vmem:[%s11385_s1 + $0x128] sm:$0xff]  ;;  %v1029_v25 = vsub.f32 %v8597_v32, %v8637_v60 }
 0x225   :  { %12278 = vst [vmem:[#allocation162_spill] sm:$0xff] %v8632_v45  ;;  %914 = vmatpush.msra.mxu2 %v8416_v13  ;;  %951 = vmatpush.msra.mxu3 %v8371_v4  ;;  %v12284_v13 = vand.u32 4294901760, %v8484_v33  ;;  %v8699_v4 = vand.u32 4294901760, %v1023_v56  ;;  %v1035_v6 = vsub.f32 %v8624_v58, %v8672_v54  ;;  %v8716_v56 = vsub.f32 %v76_v47, %v8674_v9 }
 0x226   :  { %12279 = vst [vmem:[#allocation163_spill] sm:$0xff] %v8637_v60  ;;  %800 = vmatpush.msra.mxu0 %v8374_v44  ;;  %1007 = vmatpush.msrb.mxu1 %v8632_v45  ;;  %v74_v44 = vld [vmem:[%s11385_s1 + $0x120] sm:$0xff]  ;;  %v8693_v45 = vsub.f32 %v77_v46, %v8647_v59  ;;  %v250_v46 = vsel %vm246_vm15, %v12272_v61, 0.0  ;;  %v72_v61 = vld [vmem:[%s11385_s1 + $0x110] sm:$0xff] }
 0x227   :  { %12280 = vst [vmem:[#allocation164_spill] sm:$0xff] %v8640_v16  ;;  %851 = vmatmul.f32.vlgmr.msra.gmra.mxu1 %v12284_v13  ;;  %918 = vmatpush.msra.mxu2 %v8427_v1  ;;  %v8685_v13 = vand.u32 4294901760, %v8640_v16  ;;  %v8695_v1 = vand.u32 4294901760, %v75_v51  ;;  %v8718_v23 = vand.u32 4294901760, %v74_v44 }
 0x228   :  { %12281 = vst [vmem:[#allocation165_spill] sm:$0xff] %v8647_v59  ;;  %953 = vmatpush.msra.mxu3 %v8387_v27  ;;  %920 = vmatmul.f32.vlgmr.msra.gmra.mxu2 %v8479_v3  ;;  %v73_v27 = vld [vmem:[%s11385_s1 + $0x118] sm:$0xff]  ;;  %v8732_v47 = vand.u32 4294901760, %v8693_v45 }
 0x229   :  { %12282 = vst [vmem:[#allocation166_spill] sm:$0xff] %v8651_v5  ;;  %1013 = vmatpush.msrb.mxu1 %v8651_v5  ;;  %1105 = vmatpush.msrb.mxu2 %v8538_v39  ;;  %v8722_v5 = vand.u32 4294901760, %v1029_v25  ;;  %v1041_v19 = vsub.f32 %v8640_v16, %v8685_v13  ;;  %v254_v25 = vadd.f32 %v250_v46, %v242_v2  ;;  %v8756_v46 = vand.u32 4294901760, %v72_v61 }
 0x22a   :  { %12283 = vst [vmem:[#allocation167_spill] sm:$0xff] %v8656_v26  ;;  %803 = vmatpush.msra.mxu0 %v8390_v62  ;;  %955 = vmatpush.msra.mxu3 %v8404_v57  ;;  %v1047_v39 = vsub.f32 %v8656_v26, %v8702_v28  ;;  %v8751_v62 = vand.u32 4294901760, %v8716_v56  ;;  %v8754_v2 = vsub.f32 %v74_v44, %v8718_v23 }
 0x22b   :  { %12285 = vst [vmem:[#allocation168_spill] sm:$0xff] %v8672_v54  ;;  %957 = vmatmul.f32.vlgmr.msra.gmra.mxu3 %v8479_v3  ;;  %1019 = vmatpush.msrb.mxu1 %v8680_v0  ;;  %v8735_v3 = vsub.f32 %v75_v51, %v8695_v1  ;;  %v8748_v51 = vand.u32 4294901760, %v1035_v6  ;;  %v1053_v44 = vsub.f32 %v8693_v45, %v8732_v47 }
 0x22c   :  { %12286 = vst [vmem:[#allocation169_spill] sm:$0xff] %v8674_v9  ;;  %1108 = vmatpush.msrb.mxu2 %v8550_v48  ;;  %1158 = vmatpush.msrb.mxu3 %v8520_v34  ;;  %v71_v48 = vld [vmem:[%s11385_s1 + $0x108] sm:$0xff]  ;;  %v8792_v57 = vsub.f32 %v72_v61, %v8756_v46 }
 0x22d   :  { %12287 = vst [vmem:[#allocation170_spill] sm:$0xff] %v8680_v0  ;;  %v8737_v0 = vand.u32 4294901760, %v73_v27  ;;  %806 = vmatpush.msra.mxu0 %v8407_v29  ;;  %1025 = vmatpush.msrb.mxu1 %v8699_v4  ;;  %v8770_v6 = vand.u32 4294901760, %v8735_v3 }
 0x22e   :  { %12288 = vst [vmem:[#allocation171_spill] sm:$0xff] %v8685_v13  ;;  %1111 = vmatpush.msrb.mxu2 %v8562_v10  ;;  %1160 = vmatpush.msrb.mxu3 %v8528_v37  ;;  %v70_v10 = vld [vmem:[%s11385_s1 + $0x100] sm:$0xff] }
 0x22f   :  { %12289 = vst [vmem:[#allocation172_spill] sm:$0xff] %v8693_v45  ;;  %809 = vmatpush.msra.mxu0 %v8419_v20  ;;  %1031 = vmatpush.msrb.mxu1 %v8722_v5  ;;  %v8773_v20 = vsub.f32 %v73_v27, %v8737_v0  ;;  %v1059_v27 = vsub.f32 %v8716_v56, %v8751_v62 }
 0x230   :  { %12290 = vst [vmem:[#allocation173_spill] sm:$0xff] %v8695_v1  ;;  %812 = vmatmul.f32.vlgmr.msra.gmra.mxu0 %v8484_v33  ;;  %1114 = vmatpush.msrb.mxu2 %v8580_v24  ;;  %v8782_v33 = vand.u32 4294901760, %v1047_v39  ;;  %v8789_v24 = vand.u32 4294901760, %v8754_v2  ;;  %v8800_v39 = vand.u32 4294901760, %v1053_v44 }
 0x231   :  { %12291 = vst [vmem:[#allocation174_spill] sm:$0xff] %v8699_v4  ;;  %v8760_v4 = vand.u32 4294901760, %v1041_v19  ;;  %v7631_v19 = vld [vmem:[%s11384_s0 + $0x10] sm:$0xff]  ;;  %962 = vmatpush.msrb.mxu0 %v8520_v34  ;;  %1162 = vmatpush.msrb.mxu3 %v8540_v49  ;;  %v8817_v44 = vand.u32 4294901760, %v1059_v27 }
 0x232   :  { %12292 = vst [vmem:[#allocation175_spill] sm:$0xff] %v8702_v28  ;;  %v264_v29 = vadd.f32 %v7631_v19, %v254_v25  ;;  %1037 = vmatpush.msrb.mxu1 %v8748_v51  ;;  %1117 = vmatpush.msrb.mxu2 %v8597_v32  ;;  %v8794_v25 = vand.u32 4294901760, %v70_v10  ;;  %v8805_v32 = vand.u32 4294901760, %v8773_v20 }
 0x233   :  { %12293 = vst [vmem:[#allocation176_spill] sm:$0xff] %v8716_v56  ;;  %964 = vmatpush.msrb.mxu0 %v8528_v37  ;;  %1164 = vmatpush.msrb.mxu3 %v8552_v53 }
 0x234   :  { %12294 = vst [vmem:[#allocation177_spill] sm:$0xff] %v8718_v23  ;;  %1043 = vmatpush.msrb.mxu1 %v8760_v4  ;;  %1120 = vmatpush.msrb.mxu2 %v8624_v58  ;;  %v265_v15 = vsel %vm215_vm10, %v264_v29, %v7631_v19  ;;  %v8825_v58 = vsub.f32 %v70_v10, %v8794_v25  ;;  %v101_v29 = vld [vmem:[%s11385_s1 + $0x1f8] sm:$0xff] }
 0x235   :  { %12295 = vst [vmem:[#allocation178_spill] sm:$0xff] %v8722_v5  ;;  %v8775_v5 = vand.u32 4294901760, %v71_v48  ;;  %966 = vmatpush.msrb.mxu0 %v8540_v49  ;;  %1166 = vmatpush.msrb.mxu3 %v8564_v12  ;;  %v266_v19 = vmax.f32 %v265_v15, 0.0  ;;  %v100_v15 = vld [vmem:[%s11385_s1 + $0x1f0] sm:$0xff]  ;;  %v8859_v17 = vand.u32 4294901760, %v101_v29 }
 0x236   :  { %12296 = vst [vmem:[#allocation179_spill] sm:$0xff] %v8732_v47  ;;  %1049 = vmatpush.msrb.mxu1 %v8782_v33  ;;  %1123 = vmatpush.msrb.mxu2 %v8640_v16  ;;  %v12319_v16 = vld [vmem:[#allocation18_spill] sm:$0xff]  ;;  %v8877_v21 = vand.u32 4294901760, %v100_v15 }
 0x237   :  { %12297 = vst [vmem:[#allocation180_spill] sm:$0xff] %v8735_v3  ;;  %v8808_v61 = vsub.f32 %v71_v48, %v8775_v5  ;;  %v8822_v48 = vand.u32 4294901760, %v8792_v57  ;;  %968 = vmatpush.msrb.mxu0 %v8552_v53  ;;  %1168 = vmatpush.msrb.mxu3 %v8584_v22  ;;  %vm219_vm0 = vcmp.le.f32.partialorder %v12320_v63, %v12319_v16 }
 0x238   :  { %12298 = vst [vmem:[#allocation181_spill] sm:$0xff] %v8737_v0  ;;  %1055 = vmatpush.msrb.mxu1 %v8800_v39  ;;  %1126 = vmatpush.msrb.mxu2 %v8656_v26  ;;  %vm223_vm1 = vcmp.le.f32.partialorder %v12319_v16, %v12321_v35  ;;  %v8857_v26 = vand.u32 4294901760, %v8825_v58  ;;  %vm235_vm2 = vcmp.gt.f32.partialorder %v12319_v16, %v12320_v63 }
 0x239   :  { %12299 = vst [vmem:[#allocation182_spill] sm:$0xff] %v8748_v51  ;;  %v1065_v51 = vsub.f32 %v8735_v3, %v8770_v6  ;;  %v8839_v10 = vand.u32 4294901760, %v8808_v61  ;;  %970 = vmatpush.msrb.mxu0 %v8564_v12  ;;  %1170 = vmatpush.msrb.mxu3 %v8599_v30  ;;  %vm8865_vm3 = vmand %vm219_vm0, %vm223_vm1  ;;  %vm247_vm4 = vcmp.gt.f32.partialorder %v12321_v35, %v12319_v16 }
 0x23a   :  { %12300 = vst [vmem:[#allocation183_spill] sm:$0xff] %v8751_v62  ;;  %1061 = vmatpush.msrb.mxu1 %v8817_v44  ;;  %1129 = vmatpush.msrb.mxu2 %v8693_v45  ;;  %v231_v50 = vsel %vm8865_vm3, %v12319_v16, 0.0  ;;  %v251_v52 = vsel %vm247_vm4, %v12321_v35, 0.0  ;;  %v95_v16 = vld [vmem:[%s11385_s1 + $0x1c8] sm:$0xff] }
 0x23b   :  { %12301 = vst [vmem:[#allocation184_spill] sm:$0xff] %v8754_v2  ;;  %v8834_v27 = vand.u32 4294901760, %v1065_v51  ;;  %972 = vmatpush.msrb.mxu0 %v8584_v22  ;;  %1172 = vmatpush.msrb.mxu3 %v8614_v31  ;;  %v1089_v43 = vsub.f32 %v8808_v61, %v8839_v10 }
 0x23c   :  { %12302 = vst [vmem:[#allocation185_spill] sm:$0xff] %v8756_v46  ;;  %1132 = vmatpush.msrb.mxu2 %v8716_v56  ;;  %v98_v56 = vld [vmem:[%s11385_s1 + $0x1e0] sm:$0xff] }
 0x23d   :  { %12303 = vst [vmem:[#allocation186_spill] sm:$0xff] %v8760_v4  ;;  %v1071_v4 = vsub.f32 %v8754_v2, %v8789_v24  ;;  %1067 = vmatpush.msrb.mxu1 %v8834_v27  ;;  %974 = vmatpush.msrb.mxu0 %v8599_v30  ;;  %v8924_v14 = vand.u32 4294901760, %v98_v56 }
 0x23e   :  { %12304 = vst [vmem:[#allocation187_spill] sm:$0xff] %v8770_v6  ;;  %1174 = vmatpush.msrb.mxu3 %v8647_v59  ;;  %1135 = vmatpush.msrb.mxu2 %v8735_v3  ;;  %v8920_v3 = vsub.f32 %v100_v15, %v8877_v21 }
 0x23f   :  { %12305 = vst [vmem:[#allocation188_spill] sm:$0xff] %v8773_v20  ;;  %v8852_v51 = vand.u32 4294901760, %v1071_v4  ;;  %v8869_v4 = vmin.f32 %v266_v19, 1.0  ;;  %976 = vmatpush.msrb.mxu0 %v8614_v31 }
 0x240   :  { %12306 = vst [vmem:[#allocation189_spill] sm:$0xff] %v8775_v5  ;;  %1176 = vmatpush.msrb.mxu3 %v8674_v9  ;;  %1138 = vmatpush.msrb.mxu2 %v8754_v2 }
 0x241   :  { %12307 = vst [vmem:[#allocation190_spill] sm:$0xff] %v8782_v33  ;;  %v1077_v33 = vsub.f32 %v8773_v20, %v8805_v32  ;;  %1073 = vmatpush.msrb.mxu1 %v8852_v51  ;;  %978 = vmatpush.msrb.mxu0 %v8647_v59 }
 0x242   :  { %12308 = vst [vmem:[#allocation191_spill] sm:$0xff] %v8789_v24  ;;  %1178 = vmatpush.msrb.mxu3 %v8695_v1  ;;  %1141 = vmatpush.msrb.mxu2 %v8773_v20 }
 0x243   :  { %12309 = vst [vmem:[#allocation192_spill] sm:$0xff] %v8792_v57  ;;  %v8873_v45 = vand.u32 4294901760, %v1077_v33  ;;  %v1095_v33 = vsub.f32 %v8825_v58, %v8857_v26  ;;  %980 = vmatpush.msrb.mxu0 %v8674_v9 }
 0x244   :  { %12310 = vst [vmem:[#allocation193_spill] sm:$0xff] %v8794_v25  ;;  %1180 = vmatpush.msrb.mxu3 %v8718_v23  ;;  %1144 = vmatpush.msrb.mxu2 %v8792_v57 }
 0x245   :  { %12311 = vst [vmem:[#allocation194_spill] sm:$0xff] %v8800_v39  ;;  %v1083_v39 = vsub.f32 %v8792_v57, %v8822_v48  ;;  %1079 = vmatpush.msrb.mxu1 %v8873_v45  ;;  %982 = vmatpush.msrb.mxu0 %v8695_v1  ;;  %v94_v57 = vld [vmem:[%s11385_s1 + $0x1c0] sm:$0xff] }
 0x246   :  { %12312 = vst [vmem:[#allocation195_spill] sm:$0xff] %v8805_v32  ;;  %1182 = vmatpush.msrb.mxu3 %v8737_v0  ;;  %1147 = vmatpush.msrb.mxu2 %v8808_v61  ;;  %v8996_v8 = vand.u32 4294901760, %v94_v57 }
 0x247   :  { %12313 = vst [vmem:[#allocation196_spill] sm:$0xff] %v8808_v61  ;;  %v8886_v19 = vand.u32 4294901760, %v1083_v39  ;;  %v239_v39 = vsel %vm235_vm2, %v12320_v63, 0.0  ;;  %v8917_v63 = vand.u32 4294901760, %v8869_v4  ;;  %984 = vmatpush.msrb.mxu0 %v8718_v23  ;;  %v93_v61 = vld [vmem:[%s11385_s1 + $0x1b8] sm:$0xff] }
 0x248   :  { %12314 = vst [vmem:[#allocation197_spill] sm:$0xff] %v8817_v44  ;;  %v8914_v44 = vand.u32 4294901760, %v1089_v43  ;;  %v243_v18 = vadd.f32 %v239_v39, %v231_v50  ;;  %v8931_v43 = vand.u32 4294901760, %v1095_v33  ;;  %v8952_v39 = vand.u32 4294901760, %v8920_v3  ;;  %1184 = vmatpush.msrb.mxu3 %v8756_v46  ;;  %1150 = vmatpush.msrb.mxu2 %v8825_v58 }
 0x249   :  { %12315 = vst [vmem:[#allocation198_spill] sm:$0xff] %v8822_v48  ;;  %1085 = vmatpush.msrb.mxu1 %v8886_v19  ;;  %v994_v33 = vsub.f32 %v8869_v4, %v8917_v63  ;;  %986 = vmatpush.msrb.mxu0 %v8737_v0 }
 0x24a   :  { %12316 = vst [vmem:[#allocation199_spill] sm:$0xff] %v8825_v58  ;;  %v255_v35 = vadd.f32 %v251_v52, %v243_v18  ;;  %v8979_v52 = vand.u32 4294901760, %v95_v16  ;;  %v7632_v58 = vld [vmem:[%s11384_s0 + $0x18] sm:$0xff]  ;;  %1186 = vmatpush.msrb.mxu3 %v8775_v5  ;;  %1303 = vmatpush.msra.mxu2 %v8859_v17 }
 0x24b   :  { %12317 = vst [vmem:[#allocation200_spill] sm:$0xff] %v8834_v27  ;;  %v8891_v27 = vsub.f32 %v101_v29, %v8859_v17  ;;  %v97_v29 = vld [vmem:[%s11385_s1 + $0x1d8] sm:$0xff]  ;;  %1091 = vmatpush.msrb.mxu1 %v8914_v44  ;;  %1153 = vmatmul.f32.vlgmr.msrb.gmra.mxu2 %v994_v33 }
 0x24c   :  { %12318 = vst [vmem:[#allocation201_spill] sm:$0xff] %v8839_v10  ;;  %v8936_v2 = vand.u32 4294901760, %v97_v29  ;;  %v268_v40 = vadd.f32 %v7632_v58, %v255_v35  ;;  %v9015_v35 = vsub.f32 %v95_v16, %v8979_v52  ;;  %988 = vmatpush.msrb.mxu0 %v8756_v46  ;;  %1188 = vmatpush.msrb.mxu3 %v8794_v25 }
 0x24d   :  { %12322 = vst [vmem:[#allocation18_spill] sm:$0xff] %v8852_v51  ;;  %v8905_v51 = vand.u32 4294901760, %v99_v7  ;;  %v8934_v15 = vand.u32 4294901760, %v8891_v27  ;;  %1097 = vmatpush.msrb.mxu1 %v8931_v43  ;;  %1305 = vmatpush.msra.mxu2 %v8877_v21 }
 0x24e   :  { %12323 = vst [vmem:[#allocation202_spill] sm:$0xff] %v8857_v26  ;;  %1099 = vmatmul.f32.vlgmr.msrb.gmra.mxu1 %v8917_v63  ;;  %v9017_v26 = vand.u32 4294901760, %v93_v61  ;;  %990 = vmatpush.msrb.mxu0 %v8775_v5  ;;  %v9052_v41 = vand.u32 4294901760, %v9015_v35 }
 0x24f   :  { %12324 = vst [vmem:[#allocation203_spill] sm:$0xff] %v8859_v17  ;;  %v8945_v50 = vsub.f32 %v99_v7, %v8905_v51  ;;  %v8962_v7 = vsub.f32 %v98_v56, %v8924_v14  ;;  %v995_v56 = vand.u32 4294901760, %v994_v33  ;;  %1266 = vmatpush.msra.mxu1 %v8520_v34  ;;  %v92_v34 = vld [vmem:[%s11385_s1 + $0x1b0] sm:$0xff]  ;;  %1307 = vmatpush.msra.mxu2 %v8905_v51 }
 0x250   :  { %12327 = vst [vmem:[#allocation204_spill] sm:$0xff] %v8869_v4  ;;  %v1346_v4 = vsub.f32 %v8891_v27, %v8934_v15  ;;  %992 = vmatpush.msrb.mxu0 %v8794_v25 }
 0x251   :  { %12328 = vst [vmem:[#allocation205_spill] sm:$0xff] %v8873_v45  ;;  %v96_v45 = vld [vmem:[%s11385_s1 + $0x1d0] sm:$0xff]  ;;  %v8977_v18 = vand.u32 4294901760, %v8945_v50  ;;  %v8994_v20 = vand.u32 4294901760, %v8962_v7  ;;  %1268 = vmatpush.msra.mxu1 %v8528_v37  ;;  %v996_v10 = vsub.f32 %v994_v33, %v995_v56  ;;  %v91_v37 = vld [vmem:[%s11385_s1 + $0x1a8] sm:$0xff]  ;;  %1192 = vmatmul.f32.vlgmr.msrb.gmra.mxu3 %v995_v56  ;;  %v269_v33 = vsel %vm215_vm10, %v268_v40, %v7632_v58 }
 0x252   :  { %12329 = vst [vmem:[#allocation206_spill] sm:$0xff] %v8877_v21  ;;  %v9055_v40 = vsub.f32 %v93_v61, %v9017_v26  ;;  %v9057_v58 = vand.u32 4294901760, %v91_v37  ;;  %1309 = vmatpush.msra.mxu2 %v8924_v14  ;;  %1199 = vmatpush.msra.mxu0 %v8559_v38 }
 0x253   :  { %12330 = vst [vmem:[#allocation207_spill] sm:$0xff] %v8886_v19  ;;  %v8954_v19 = vand.u32 4294901760, %v96_v45  ;;  %1270 = vmatpush.msra.mxu1 %v8540_v49  ;;  %v1364_v16 = vsub.f32 %v8962_v7, %v8994_v20  ;;  %v997_v36 = vand.u32 4294901760, %v996_v10 }
 0x254   :  { %12331 = vst [vmem:[#allocation208_spill] sm:$0xff] %v8891_v27  ;;  %v1358_v27 = vsub.f32 %v8945_v50, %v8977_v18  ;;  %1311 = vmatpush.msra.mxu2 %v8936_v2  ;;  %1203 = vmatpush.msra.mxu0 %v8577_v55 }
 0x255   :  { %12332 = vst [vmem:[#allocation209_spill] sm:$0xff] %v8905_v51  ;;  %1272 = vmatpush.msra.mxu1 %v8552_v53  ;;  %v9068_v61 = vand.u32 4294901760, %v1364_v16  ;;  %998 = vmatmul.f32.vlgmr.msrb.gmra.mxu0 %v997_v36  ;;  %v9089_v16 = vand.u32 4294901760, %v9055_v40 }
 0x256   :  { %12333 = vst [vmem:[#allocation210_spill] sm:$0xff] %v8914_v44  ;;  %v8969_v44 = vsub.f32 %v97_v29, %v8936_v2  ;;  %v1352_v29 = vsub.f32 %v8920_v3, %v8952_v39  ;;  %1313 = vmatpush.msra.mxu2 %v8954_v19  ;;  %1207 = vmatpush.msra.mxu0 %v8594_v42 }
 0x257   :  { %12334 = vst [vmem:[#allocation211_spill] sm:$0xff] %v8920_v3  ;;  %1274 = vmatpush.msra.mxu1 %v8564_v12  ;;  %v88_v12 = vld [vmem:[%s11385_s1 + $0x190] sm:$0xff] }
 0x258   :  { %12335 = vst [vmem:[#allocation212_spill] sm:$0xff] %v8924_v14  ;;  %v9005_v3 = vand.u32 4294901760, %v8969_v44  ;;  %1315 = vmatpush.msra.mxu2 %v8979_v52  ;;  %1211 = vmatpush.msra.mxu0 %v8612_v11 }
 0x259   :  { %12336 = vst [vmem:[#allocation213_spill] sm:$0xff] %v8931_v43  ;;  %v8986_v43 = vsub.f32 %v96_v45, %v8954_v19  ;;  %v9002_v45 = vand.u32 4294901760, %v1346_v4  ;;  %v9021_v4 = vand.u32 4294901760, %v1352_v29  ;;  %v90_v29 = vld [vmem:[%s11385_s1 + $0x1a0] sm:$0xff]  ;;  %1276 = vmatpush.msra.mxu1 %v8584_v22 }
 0x25a   :  { %12337 = vst [vmem:[#allocation214_spill] sm:$0xff] %v8934_v15  ;;  %v1370_v56 = vsub.f32 %v8969_v44, %v9005_v3  ;;  %v9076_v10 = vand.u32 4294901760, %v90_v29  ;;  %1317 = vmatpush.msra.mxu2 %v8996_v8  ;;  %1215 = vmatpush.msra.mxu0 %v8637_v60 }
 0x25b   :  { %12338 = vst [vmem:[#allocation215_spill] sm:$0xff] %v8936_v2  ;;  %1348 = vmatpush.msra.mxu3 %v9002_v45  ;;  %1278 = vmatpush.msra.mxu1 %v8599_v30 }
 0x25c   :  { %12339 = vst [vmem:[#allocation216_spill] sm:$0xff] %v8945_v50  ;;  %v9033_v50 = vsub.f32 %v94_v57, %v8996_v8  ;;  %v9049_v57 = vand.u32 4294901760, %v1358_v27  ;;  %v89_v27 = vld [vmem:[%s11385_s1 + $0x198] sm:$0xff]  ;;  %1319 = vmatpush.msra.mxu2 %v9017_v26  ;;  %1219 = vmatpush.msra.mxu0 %v8672_v54 }
 0x25d   :  { %12340 = vst [vmem:[#allocation217_spill] sm:$0xff] %v8952_v39  ;;  %v9024_v39 = vand.u32 4294901760, %v8986_v43  ;;  %1354 = vmatpush.msra.mxu3 %v9021_v4  ;;  %v9094_v36 = vand.u32 4294901760, %v89_v27  ;;  %1280 = vmatpush.msra.mxu1 %v8614_v31 }
 0x25e   :  { %12341 = vst [vmem:[#allocation218_spill] sm:$0xff] %v8954_v19  ;;  %v9071_v53 = vand.u32 4294901760, %v9033_v50  ;;  %1223 = vmatpush.msra.mxu0 %v8685_v13 }
 0x25f   :  { %12342 = vst [vmem:[#allocation219_spill] sm:$0xff] %v8962_v7  ;;  %1360 = vmatpush.msra.mxu3 %v9049_v57  ;;  %1282 = vmatpush.msra.mxu1 %v8647_v59 }
 0x260   :  { %12343 = vst [vmem:[#allocation220_spill] sm:$0xff] %v8969_v44  ;;  %1227 = vmatpush.msra.mxu0 %v8702_v28 }
 0x261   :  { %12344 = vst [vmem:[#allocation221_spill] sm:$0xff] %v8977_v18  ;;  %v9035_v18 = vand.u32 4294901760, %v92_v34  ;;  %1366 = vmatpush.msra.mxu3 %v9068_v61  ;;  %1284 = vmatpush.msra.mxu1 %v8674_v9 }
 0x262   :  { %12345 = vst [vmem:[#allocation222_spill] sm:$0xff] %v8979_v52  ;;  %1231 = vmatpush.msra.mxu0 %v8732_v47 }
 0x263   :  { %12346 = vst [vmem:[#allocation223_spill] sm:$0xff] %v8986_v43  ;;  %v9074_v49 = vsub.f32 %v92_v34, %v9035_v18  ;;  %v1382_v34 = vsub.f32 %v9015_v35, %v9052_v41  ;;  %1286 = vmatpush.msra.mxu1 %v8695_v1  ;;  %1321 = vmatpush.msra.mxu2 %v9035_v18 }
 0x264   :  { %12347 = vst [vmem:[#allocation224_spill] sm:$0xff] %v8994_v20  ;;  %1235 = vmatpush.msra.mxu0 %v8751_v62 }
 0x265   :  { %12348 = vst [vmem:[#allocation225_spill] sm:$0xff] %v8996_v8  ;;  %v9105_v38 = vand.u32 4294901760, %v9074_v49  ;;  %1288 = vmatpush.msra.mxu1 %v8718_v23  ;;  %1323 = vmatpush.msra.mxu2 %v9057_v58 }
 0x266   :  { %12349 = vst [vmem:[#allocation226_spill] sm:$0xff] %v9002_v45  ;;  %v1376_v45 = vsub.f32 %v8986_v43, %v9024_v39  ;;  %v9079_v43 = vand.u32 4294901760, %v1370_v56  ;;  %1239 = vmatpush.msra.mxu0 %v8770_v6 }
 0x267   :  { %12350 = vst [vmem:[#allocation227_spill] sm:$0xff] %v9005_v3  ;;  %1290 = vmatpush.msra.mxu1 %v8737_v0  ;;  %1325 = vmatpush.msra.mxu2 %v9076_v10 }
 0x268   :  { %12351 = vst [vmem:[#allocation228_spill] sm:$0xff] %v9015_v35  ;;  %v9098_v56 = vand.u32 4294901760, %v1376_v45  ;;  %v9110_v35 = vand.u32 4294901760, %v88_v12  ;;  %v87_v45 = vld [vmem:[%s11385_s1 + $0x188] sm:$0xff]  ;;  %1372 = vmatpush.msra.mxu3 %v9079_v43  ;;  %1243 = vmatpush.msra.mxu0 %v8789_v24 }
 0x269   :  { %12352 = vst [vmem:[#allocation229_spill] sm:$0xff] %v9017_v26  ;;  %1292 = vmatpush.msra.mxu1 %v8756_v46  ;;  %1327 = vmatpush.msra.mxu2 %v9094_v36 }
 0x26a   :  { %12353 = vst [vmem:[#allocation230_spill] sm:$0xff] %v9021_v4  ;;  %v270_v4 = vmax.f32 %v269_v33, 0.0  ;;  %v9092_v33 = vsub.f32 %v91_v37, %v9057_v58  ;;  %v9108_v37 = vsub.f32 %v90_v29, %v9076_v10  ;;  %v1394_v29 = vsub.f32 %v9055_v40, %v9089_v16  ;;  %1378 = vmatpush.msra.mxu3 %v9098_v56 }
 0x26b   :  { %12354 = vst [vmem:[#allocation231_spill] sm:$0xff] %v9024_v39  ;;  %v9148_v30 = vsub.f32 %v88_v12, %v9110_v35  ;;  %1294 = vmatpush.msra.mxu1 %v8775_v5  ;;  %1329 = vmatpush.msra.mxu2 %v9110_v35 }
 0x26c   :  { %12355 = vst [vmem:[#allocation232_spill] sm:$0xff] %v9033_v50  ;;  %v9115_v22 = vmin.f32 %v270_v4, 1.0  ;;  %v9126_v55 = vand.u32 4294901760, %v9092_v33  ;;  %v86_v4 = vld [vmem:[%s11385_s1 + $0x180] sm:$0xff]  ;;  %v9145_v42 = vand.u32 4294901760, %v9108_v37  ;;  %1247 = vmatpush.msra.mxu0 %v8805_v32 }
 0x26d   :  { %12356 = vst [vmem:[#allocation233_spill] sm:$0xff] %v9035_v18  ;;  %v9155_v11 = vand.u32 4294901760, %v86_v4  ;;  %v9178_v60 = vand.u32 4294901760, %v9148_v30  ;;  %1296 = vmatpush.msra.mxu1 %v8794_v25 }
 0x26e   :  { %12357 = vst [vmem:[#allocation234_spill] sm:$0xff] %v9049_v57  ;;  %v1388_v57 = vsub.f32 %v9033_v50, %v9071_v53  ;;  %v9129_v50 = vsub.f32 %v89_v27, %v9094_v36  ;;  %v1400_v27 = vsub.f32 %v9074_v49, %v9105_v38  ;;  %v9151_v31 = vand.u32 4294901760, %v9115_v22  ;;  %1298 = vmatmul.f32.vlgmr.msra.gmra.mxu1 %v8917_v63 }
 0x26f   :  { %12358 = vst [vmem:[#allocation235_spill] sm:$0xff] %v9052_v41  ;;  %1499 = vmatpush.msrb.mxu1 %v8859_v17  ;;  %1251 = vmatpush.msra.mxu0 %v8822_v48 }
 0x270   :  { %12359 = vst [vmem:[#allocation236_spill] sm:$0xff] %v9055_v40  ;;  %v9164_v12 = vand.u32 4294901760, %v9129_v50  ;;  %v9182_v9 = vsub.f32 %v9115_v22, %v9151_v31 }
 0x271   :  { %12360 = vst [vmem:[#allocation237_spill] sm:$0xff] %v9057_v58  ;;  %1501 = vmatpush.msrb.mxu1 %v8877_v21 }
 0x272   :  { %12361 = vst [vmem:[#allocation238_spill] sm:$0xff] %v9068_v61  ;;  %v9121_v61 = vand.u32 4294901760, %v1382_v34  ;;  %v9140_v34 = vand.u32 4294901760, %v1388_v57  ;;  %v9159_v57 = vand.u32 4294901760, %v1394_v29  ;;  %v1412_v29 = vsub.f32 %v9108_v37, %v9145_v42 }
 0x273   :  { %12362 = vst [vmem:[#allocation239_spill] sm:$0xff] %v9071_v53  ;;  %1503 = vmatpush.msrb.mxu1 %v8905_v51 }
 0x274   :  { %12363 = vst [vmem:[#allocation240_spill] sm:$0xff] %v9074_v49  ;;  %1384 = vmatpush.msra.mxu3 %v9121_v61 }
 0x275   :  { %12364 = vst [vmem:[#allocation241_spill] sm:$0xff] %v9076_v10  ;;  %1505 = vmatpush.msrb.mxu1 %v8924_v14 }
 0x276   :  { %12365 = vst [vmem:[#allocation242_spill] sm:$0xff] %v9079_v43  ;;  %v9136_v43 = vand.u32 4294901760, %v87_v45  ;;  %1390 = vmatpush.msra.mxu3 %v9140_v34 }
 0x277   :  { %12366 = vst [vmem:[#allocation243_spill] sm:$0xff] %v9089_v16  ;;  %1507 = vmatpush.msrb.mxu1 %v8936_v2 }
 0x278   :  { %12367 = vst [vmem:[#allocation244_spill] sm:$0xff] %v9092_v33  ;;  %v9169_v59 = vsub.f32 %v87_v45, %v9136_v43  ;;  %v9187_v45 = vsub.f32 %v86_v4, %v9155_v11  ;;  %1396 = vmatpush.msra.mxu3 %v9159_v57  ;;  %v9202_v4 = vand.u32 4294901760, %v1412_v29  ;;  %1331 = vmatpush.msra.mxu2 %v9136_v43 }
 0x279   :  { %12368 = vst [vmem:[#allocation245_spill] sm:$0xff] %v9094_v36  ;;  %1509 = vmatpush.msrb.mxu1 %v8954_v19 }
 0x27a   :  { %12369 = vst [vmem:[#allocation246_spill] sm:$0xff] %v9098_v56  ;;  %v1406_v56 = vsub.f32 %v9092_v33, %v9126_v55  ;;  %v9210_v13 = vand.u32 4294901760, %v9187_v45  ;;  %1333 = vmatpush.msra.mxu2 %v9155_v11 }
 0x27b   :  { %12370 = vst [vmem:[#allocation247_spill] sm:$0xff] %v9105_v38  ;;  %1511 = vmatpush.msrb.mxu1 %v8979_v52 }
 0x27c   :  { %12371 = vst [vmem:[#allocation248_spill] sm:$0xff] %v9108_v37  ;;  %1540 = vmatpush.msrb.mxu2 %v8934_v15 }
 0x27d   :  { %12372 = vst [vmem:[#allocation249_spill] sm:$0xff] %v9110_v35  ;;  %1513 = vmatpush.msrb.mxu1 %v8996_v8 }
 0x27e   :  { %12373 = vst [vmem:[#allocation250_spill] sm:$0xff] %v9115_v22  ;;  %v9198_v22 = vand.u32 4294901760, %v9169_v59 }
 0x27f   :  { %12374 = vst [vmem:[#allocation251_spill] sm:$0xff] %v9121_v61  ;;  %v9173_v61 = vand.u32 4294901760, %v1400_v27  ;;  %v9191_v27 = vand.u32 4294901760, %v1406_v56  ;;  %v1424_v56 = vsub.f32 %v9148_v30, %v9178_v60  ;;  %1515 = vmatpush.msrb.mxu1 %v9017_v26 }
 0x280   :  { %12375 = vst [vmem:[#allocation252_spill] sm:$0xff] %v9126_v55  ;;  %v1430_v29 = vsub.f32 %v9169_v59, %v9198_v22 }
 0x281   :  { %12376 = vst [vmem:[#allocation253_spill] sm:$0xff] %v9129_v50  ;;  %1402 = vmatpush.msra.mxu3 %v9173_v61  ;;  %1517 = vmatpush.msrb.mxu1 %v9035_v18 }
 0x282   :  { %12377 = vst [vmem:[#allocation254_spill] sm:$0xff] %v9136_v43 }
 0x283   :  { %12378 = vst [vmem:[#allocation255_spill] sm:$0xff] %v9140_v34  ;;  %v1418_v34 = vsub.f32 %v9129_v50, %v9164_v12  ;;  %1408 = vmatpush.msra.mxu3 %v9191_v27  ;;  %1519 = vmatpush.msrb.mxu1 %v9057_v58 }
 0x284   :  { %12379 = vst [vmem:[#allocation256_spill] sm:$0xff] %v9145_v42 }
 0x285   :  { %12380 = vst [vmem:[#allocation257_spill] sm:$0xff] %v9148_v30  ;;  %v9214_v28 = vand.u32 4294901760, %v1418_v34  ;;  %1414 = vmatpush.msra.mxu3 %v9202_v4  ;;  %v12394_v34 = vand.u32 4294901760, %v9182_v9  ;;  %1521 = vmatpush.msrb.mxu1 %v9076_v10 }
 0x286   :  { %12381 = vst [vmem:[#allocation258_spill] sm:$0xff] %v9155_v11 }
 0x287   :  { %12382 = vst [vmem:[#allocation259_spill] sm:$0xff] %v9159_v57  ;;  %v9222_v57 = vand.u32 4294901760, %v1424_v56  ;;  %1420 = vmatpush.msra.mxu3 %v9214_v28  ;;  %v9235_v56 = vand.u32 4294901760, %v1430_v29  ;;  %v12399_v29 = vld [vmem:[#allocation221_spill] sm:$0xff]  ;;  %1523 = vmatpush.msrb.mxu1 %v9094_v36 }
 0x288   :  { %12383 = vst [vmem:[#allocation260_spill] sm:$0xff] %v9164_v12 }
 0x289   :  { %12384 = vst [vmem:[#allocation261_spill] sm:$0xff] %v9169_v59  ;;  %1426 = vmatpush.msra.mxu3 %v9222_v57  ;;  %1525 = vmatpush.msrb.mxu1 %v9110_v35 }
 0x28a   :  { %12385 = vst [vmem:[#allocation262_spill] sm:$0xff] %v9173_v61  ;;  %v1436_v61 = vsub.f32 %v9187_v45, %v9210_v13 }
 0x28b   :  { %12386 = vst [vmem:[#allocation263_spill] sm:$0xff] %v9178_v60  ;;  %1432 = vmatpush.msra.mxu3 %v9235_v56  ;;  %1527 = vmatpush.msrb.mxu1 %v9136_v43 }
 0x28c   :  { %12387 = vst [vmem:[#allocation264_spill] sm:$0xff] %v9187_v45 }
 0x28d   :  { %12388 = vst [vmem:[#allocation265_spill] sm:$0xff] %v9191_v27  ;;  %v1337_v27 = vsub.f32 %v9182_v9, %v12394_v34  ;;  %1529 = vmatpush.msrb.mxu1 %v9155_v11 }
 0x28e   :  { %12389 = vst [vmem:[#allocation266_spill] sm:$0xff] %v9198_v22 }
 0x28f   :  { %12390 = vst [vmem:[#allocation267_spill] sm:$0xff] %v9202_v4  ;;  %v1338_v34 = vand.u32 4294901760, %v1337_v27  ;;  %v9241_v4 = vand.u32 4294901760, %v1436_v61  ;;  %v12397_v61 = vld [vmem:[#allocation217_spill] sm:$0xff] }
 0x290   :  { %12391 = vst [vmem:[#allocation268_spill] sm:$0xff] %v9210_v13  ;;  %1544 = vmatpush.msrb.mxu2 %v12397_v61  ;;  %v12398_v27 = vld [vmem:[#allocation201_spill] sm:$0xff]  ;;  %v12402_v61 = vld [vmem:[#allocation211_spill] sm:$0xff] }
 0x291   :  { %12392 = vst [vmem:[#allocation269_spill] sm:$0xff] %v9214_v28  ;;  %1339 = vmatmul.f32.vlgmr.msra.gmra.mxu2 %v1338_v34  ;;  %1438 = vmatpush.msra.mxu3 %v9241_v4  ;;  %v12400_v34 = vld [vmem:[#allocation202_spill] sm:$0xff] }
 0x292   :  { %12393 = vst [vmem:[#allocation270_spill] sm:$0xff] %v9222_v57  ;;  %1440 = vmatmul.f32.vlgmr.msra.gmra.mxu3 %v9151_v31  ;;  %1255 = vmatpush.msra.mxu0 %v12398_v27 }
 0x293   :  { %12395 = vst [vmem:[#allocation271_spill] sm:$0xff] %v9235_v56  ;;  %1607 = vmatpush.msrb.mxu3 %v8859_v17  ;;  %1548 = vmatpush.msrb.mxu2 %v12399_v29  ;;  %v12403_v29 = vld [vmem:[#allocation216_spill] sm:$0xff] }
 0x294   :  { %12396 = vst [vmem:[#allocation272_spill] sm:$0xff] %v9241_v4  ;;  %1259 = vmatpush.msra.mxu0 %v12400_v34  ;;  %v12401_v4 = vld [vmem:[#allocation208_spill] sm:$0xff] }
 0x295   :  { %1609 = vmatpush.msrb.mxu3 %v8877_v21  ;;  %1261 = vmatmul.f32.vlgmr.msra.gmra.mxu0 %v8917_v63  ;;  %v12404_v63 = vld [vmem:[#allocation223_spill] sm:$0xff] }
 0x296   :  { %1552 = vmatpush.msrb.mxu2 %v8994_v20  ;;  %1446 = vmatpush.msrb.mxu0 %v12401_v4  ;;  %v12462_v20 = vld [vmem:[#allocation33_spill] sm:$0xff]  ;;  %v12473_v4 = vld [vmem:[#allocation94_spill] sm:$0xff] }
 0x297   :  { %1611 = vmatpush.msrb.mxu3 %v8905_v51 }
 0x298   :  { %1556 = vmatpush.msrb.mxu2 %v9005_v3  ;;  %1449 = vmatpush.msrb.mxu0 %v12402_v61  ;;  %v12456_v3 = vld [vmem:[#allocation70_spill] sm:$0xff]  ;;  %v12464_v61 = vld [vmem:[#allocation79_spill] sm:$0xff] }
 0x299   :  { %1613 = vmatpush.msrb.mxu3 %v8924_v14 }
 0x29a   :  { %1560 = vmatpush.msrb.mxu2 %v9024_v39  ;;  %1452 = vmatpush.msrb.mxu0 %v12403_v29  ;;  %v418_v39 = vpop.f32.mrf.mxu1  ;;  %v472_v29 = vpop.f32.mrf.mxu2 }
 0x29b   :  { %1615 = vmatpush.msrb.mxu3 %v8936_v2 }
 0x29c   :  { %1564 = vmatpush.msrb.mxu2 %v9052_v41  ;;  %1455 = vmatpush.msrb.mxu0 %v8962_v7  ;;  %v12405_v41 = vld [vmem:[#allocation228_spill] sm:$0xff]  ;;  %v12455_v7 = vld [vmem:[#allocation71_spill] sm:$0xff] }
 0x29d   :  { %1617 = vmatpush.msrb.mxu3 %v8954_v19 }
 0x29e   :  { %1568 = vmatpush.msrb.mxu2 %v9071_v53  ;;  %1458 = vmatpush.msrb.mxu0 %v8969_v44  ;;  %v12406_v53 = vld [vmem:[#allocation232_spill] sm:$0xff]  ;;  %v12453_v44 = vld [vmem:[#allocation110_spill] sm:$0xff] }
 0x29f   :  { %1619 = vmatpush.msrb.mxu3 %v8979_v52 }
 0x2a0   :  { %1572 = vmatpush.msrb.mxu2 %v9089_v16  ;;  %1461 = vmatpush.msrb.mxu0 %v12404_v63  ;;  %v12448_v16 = vld [vmem:[#allocation64_spill] sm:$0xff]  ;;  %v12452_v63 = vld [vmem:[#allocation65_spill] sm:$0xff] }
 0x2a1   :  { %1621 = vmatpush.msrb.mxu3 %v8996_v8 }
 0x2a2   :  { %1576 = vmatpush.msrb.mxu2 %v9105_v38  ;;  %1464 = vmatpush.msrb.mxu0 %v12405_v41  ;;  %v12442_v38 = vld [vmem:[#allocation59_spill] sm:$0xff]  ;;  %v12450_v41 = vld [vmem:[#allocation104_spill] sm:$0xff] }
 0x2a3   :  { %1623 = vmatpush.msrb.mxu3 %v9017_v26 }
 0x2a4   :  { %1580 = vmatpush.msrb.mxu2 %v9126_v55  ;;  %1467 = vmatpush.msrb.mxu0 %v12406_v53  ;;  %v12436_v55 = vld [vmem:[#allocation54_spill] sm:$0xff]  ;;  %v12445_v53 = vld [vmem:[#allocation60_spill] sm:$0xff] }
 0x2a5   :  { %1625 = vmatpush.msrb.mxu3 %v9035_v18 }
 0x2a6   :  { %1584 = vmatpush.msrb.mxu2 %v9145_v42  ;;  %1470 = vmatpush.msrb.mxu0 %v9055_v40  ;;  %v12430_v42 = vld [vmem:[#allocation40_spill] sm:$0xff]  ;;  %v12439_v40 = vld [vmem:[#allocation55_spill] sm:$0xff] }
 0x2a7   :  { %1627 = vmatpush.msrb.mxu3 %v9057_v58 }
 0x2a8   :  { %1588 = vmatpush.msrb.mxu2 %v9164_v12  ;;  %1473 = vmatpush.msrb.mxu0 %v9074_v49  ;;  %v12407_v12 = vand.u32 4294901760, %v9182_v9  ;;  %v12433_v49 = vld [vmem:[#allocation53_spill] sm:$0xff] }
 0x2a9   :  { %1629 = vmatpush.msrb.mxu3 %v9076_v10 }
 0x2aa   :  { %1592 = vmatpush.msrb.mxu2 %v9178_v60  ;;  %1476 = vmatpush.msrb.mxu0 %v9092_v33  ;;  %v12408_v60 = vld [vmem:[#allocation41_spill] sm:$0xff]  ;;  %v12427_v33 = vld [vmem:[#allocation38_spill] sm:$0xff] }
 0x2ab   :  { %1631 = vmatpush.msrb.mxu3 %v9094_v36  ;;  %1533 = vmatmul.f32.vlgmr.msrb.gmra.mxu1 %v12407_v12  ;;  %v12410_v12 = vld [vmem:[#allocation20_spill] sm:$0xff] }
 0x2ac   :  { %1596 = vmatpush.msrb.mxu2 %v9198_v22  ;;  %1479 = vmatpush.msrb.mxu0 %v9108_v37  ;;  %v12409_v22 = vld [vmem:[#allocation26_spill] sm:$0xff]  ;;  %v12424_v37 = vld [vmem:[#allocation35_spill] sm:$0xff] }
 0x2ad   :  { %1633 = vmatpush.msrb.mxu3 %v9110_v35  ;;  %1712 = vmatpush.xpose.msra.mxu1 %v12408_v60  ;;  %v12413_v60 = vld [vmem:[#allocation21_spill] sm:$0xff] }
 0x2ae   :  { %1600 = vmatpush.msrb.mxu2 %v9210_v13  ;;  %1482 = vmatpush.msrb.mxu0 %v9129_v50  ;;  %v12411_v13 = vld [vmem:[#allocation42_spill] sm:$0xff]  ;;  %v12412_v50 = vld [vmem:[#allocation27_spill] sm:$0xff] }
 0x2af   :  { %1635 = vmatpush.msrb.mxu3 %v9136_v43  ;;  %1602 = vmatmul.f32.vlgmr.msrb.gmra.mxu2 %v9151_v31 }
 0x2b0   :  { %1485 = vmatpush.msrb.mxu0 %v9148_v30  ;;  %1810 = vmatpush.xpose.msra.mxu2 %v12409_v22  ;;  %v12414_v30 = vld [vmem:[#allocation45_spill] sm:$0xff]  ;;  %v12417_v22 = vld [vmem:[#allocation52_spill] sm:$0xff] }
 0x2b1   :  { %1637 = vmatpush.msrb.mxu3 %v9155_v11  ;;  %1718 = vmatpush.xpose.msra.mxu1 %v12411_v13  ;;  %v12418_v13 = vld [vmem:[#allocation30_spill] sm:$0xff] }
 0x2b2   :  { %1639 = vmatmul.f32.vlgmr.msrb.gmra.mxu3 %v9151_v31  ;;  %1488 = vmatpush.msrb.mxu0 %v9169_v59  ;;  %v12415_v31 = vld [vmem:[#allocation28_spill] sm:$0xff]  ;;  %v12416_v59 = vld [vmem:[#allocation22_spill] sm:$0xff] }
 0x2b3   :  { %1863 = vmatpush.xpose.msra.mxu3 %v12410_v12 }
 0x2b4   :  { %1491 = vmatpush.msrb.mxu0 %v9187_v45  ;;  %1813 = vmatpush.xpose.msra.mxu2 %v12412_v50  ;;  %v12420_v45 = vld [vmem:[#allocation57_spill] sm:$0xff]  ;;  %v12421_v50 = vld [vmem:[#allocation31_spill] sm:$0xff] }
 0x2b5   :  { %1494 = vmatmul.f32.vlgmr.msrb.gmra.mxu0 %v9182_v9  ;;  %1724 = vmatpush.xpose.msra.mxu1 %v12414_v30  ;;  %v12419_v9 = vld [vmem:[#allocation23_spill] sm:$0xff]  ;;  %v12422_v30 = vld [vmem:[#allocation24_spill] sm:$0xff] }
 0x2b6   :  { %1667 = vmatpush.xpose.msra.mxu0 %v12410_v12 }
 0x2b7   :  { %1865 = vmatpush.xpose.msra.mxu3 %v12413_v60 }
 0x2b8   :  { %1816 = vmatpush.xpose.msra.mxu2 %v12415_v31  ;;  %v12423_v31 = vld [vmem:[#allocation61_spill] sm:$0xff] }
 0x2b9   :  { %1730 = vmatpush.xpose.msra.mxu1 %v12417_v22  ;;  %v12425_v22 = vld [vmem:[#allocation25_spill] sm:$0xff] }
 0x2ba   :  { %1669 = vmatpush.xpose.msra.mxu0 %v12413_v60 }
 0x2bb   :  { %1867 = vmatpush.xpose.msra.mxu3 %v12416_v59 }
 0x2bc   :  { %1819 = vmatpush.xpose.msra.mxu2 %v12418_v13  ;;  %v12426_v13 = vld [vmem:[#allocation66_spill] sm:$0xff] }
 0x2bd   :  { %1736 = vmatpush.xpose.msra.mxu1 %v12420_v45  ;;  %v12428_v45 = vld [vmem:[#allocation29_spill] sm:$0xff] }
 0x2be   :  { %1671 = vmatpush.xpose.msra.mxu0 %v12416_v59 }
 0x2bf   :  { %1869 = vmatpush.xpose.msra.mxu3 %v12419_v9 }
 0x2c0   :  { %1822 = vmatpush.xpose.msra.mxu2 %v12421_v50  ;;  %v12429_v50 = vld [vmem:[#allocation67_spill] sm:$0xff] }
 0x2c1   :  { %1742 = vmatpush.xpose.msra.mxu1 %v12423_v31  ;;  %v12431_v31 = vld [vmem:[#allocation39_spill] sm:$0xff] }
 0x2c2   :  { %1673 = vmatpush.xpose.msra.mxu0 %v12419_v9 }
 0x2c3   :  { %1871 = vmatpush.xpose.msra.mxu3 %v12422_v30 }
 0x2c4   :  { %1825 = vmatpush.xpose.msra.mxu2 %v12424_v37  ;;  %v12432_v37 = vld [vmem:[#allocation76_spill] sm:$0xff] }
 0x2c5   :  { %1748 = vmatpush.xpose.msra.mxu1 %v12426_v13  ;;  %v12434_v13 = vld [vmem:[#allocation46_spill] sm:$0xff] }
 0x2c6   :  { %1675 = vmatpush.xpose.msra.mxu0 %v12422_v30 }
 0x2c7   :  { %1873 = vmatpush.xpose.msra.mxu3 %v12425_v22 }
 0x2c8   :  { %1828 = vmatpush.xpose.msra.mxu2 %v12427_v33  ;;  %v12435_v33 = vld [vmem:[#allocation81_spill] sm:$0xff] }
 0x2c9   :  { %1754 = vmatpush.xpose.msra.mxu1 %v12429_v50  ;;  %v12437_v50 = vld [vmem:[#allocation47_spill] sm:$0xff] }
 0x2ca   :  { %1677 = vmatpush.xpose.msra.mxu0 %v12425_v22 }
 0x2cb   :  { %1875 = vmatpush.xpose.msra.mxu3 %v12428_v45 }
 0x2cc   :  { %1831 = vmatpush.xpose.msra.mxu2 %v12430_v42  ;;  %v12438_v42 = vld [vmem:[#allocation87_spill] sm:$0xff] }
 0x2cd   :  { %1760 = vmatpush.xpose.msra.mxu1 %v12432_v37  ;;  %v12440_v37 = vld [vmem:[#allocation48_spill] sm:$0xff] }
 0x2ce   :  { %1679 = vmatpush.xpose.msra.mxu0 %v12428_v45 }
 0x2cf   :  { %1877 = vmatpush.xpose.msra.mxu3 %v12431_v31 }
 0x2d0   :  { %1834 = vmatpush.xpose.msra.mxu2 %v12433_v49  ;;  %v12441_v49 = vld [vmem:[#allocation91_spill] sm:$0xff] }
 0x2d1   :  { %1766 = vmatpush.xpose.msra.mxu1 %v12435_v33  ;;  %v12443_v33 = vld [vmem:[#allocation50_spill] sm:$0xff] }
 0x2d2   :  { %1681 = vmatpush.xpose.msra.mxu0 %v12431_v31 }
 0x2d3   :  { %1879 = vmatpush.xpose.msra.mxu3 %v12434_v13 }
 0x2d4   :  { %1837 = vmatpush.xpose.msra.mxu2 %v12436_v55  ;;  %v12444_v55 = vld [vmem:[#allocation95_spill] sm:$0xff] }
 0x2d5   :  { %1772 = vmatpush.xpose.msra.mxu1 %v12438_v42  ;;  %v12446_v42 = vld [vmem:[#allocation51_spill] sm:$0xff] }
 0x2d6   :  { %1683 = vmatpush.xpose.msra.mxu0 %v12434_v13 }
 0x2d7   :  { %1881 = vmatpush.xpose.msra.mxu3 %v12437_v50 }
 0x2d8   :  { %1840 = vmatpush.xpose.msra.mxu2 %v12439_v40  ;;  %v12447_v40 = vld [vmem:[#allocation99_spill] sm:$0xff] }
 0x2d9   :  { %1778 = vmatpush.xpose.msra.mxu1 %v12441_v49  ;;  %v12449_v49 = vld [vmem:[#allocation56_spill] sm:$0xff] }
 0x2da   :  { %1685 = vmatpush.xpose.msra.mxu0 %v12437_v50 }
 0x2db   :  { %1883 = vmatpush.xpose.msra.mxu3 %v12440_v37 }
 0x2dc   :  { %1843 = vmatpush.xpose.msra.mxu2 %v12442_v38  ;;  %v7618_v38 = vld [vmem:[%s11386_s2] ss:$0 sm:$0xff] }
 0x2dd   :  { %1784 = vmatpush.xpose.msra.mxu1 %v12444_v55  ;;  %v317_v55 = vpop.f32.mrf.mxu0 }
 0x2de   :  { %1687 = vmatpush.xpose.msra.mxu0 %v12440_v37 }
 0x2df   :  { %1885 = vmatpush.xpose.msra.mxu3 %v12443_v33 }
 0x2e0   :  { %1846 = vmatpush.xpose.msra.mxu2 %v12445_v53  ;;  %v12451_v53 = vld [vmem:[#allocation75_spill] sm:$0xff] }
 0x2e1   :  { %1790 = vmatpush.xpose.msra.mxu1 %v12447_v40  ;;  %v318_v40 = vadd.f32 %v7618_v38, %v317_v55  ;;  %v12458_v38 = vld [vmem:[#allocation72_spill] sm:$0xff] }
 0x2e2   :  { %1689 = vmatpush.xpose.msra.mxu0 %v12443_v33 }
 0x2e3   :  { %1887 = vmatpush.xpose.msra.mxu3 %v12446_v42 }
 0x2e4   :  { %1849 = vmatpush.xpose.msra.mxu2 %v12448_v16  ;;  %v12454_v16 = vld [vmem:[#allocation82_spill] sm:$0xff] }
 0x2e5   :  { %1796 = vmatpush.xpose.msra.mxu1 %v12450_v41  ;;  %v419_v41 = vadd.f32 %v418_v39, %v318_v40  ;;  %v12461_v39 = vld [vmem:[#allocation73_spill] sm:$0xff] }
 0x2e6   :  { %1691 = vmatpush.xpose.msra.mxu0 %v12446_v42 }
 0x2e7   :  { %1889 = vmatpush.xpose.msra.mxu3 %v12449_v49  ;;  %v473_v55 = vadd.f32 %v472_v29, %v419_v41  ;;  %v12465_v29 = vld [vmem:[#allocation34_spill] sm:$0xff] }
 0x2e8   :  { %1852 = vmatpush.xpose.msra.mxu2 %v12451_v53  ;;  %v12457_v53 = vld [vmem:[#allocation100_spill] sm:$0xff] }
 0x2e9   :  { %1802 = vmatpush.xpose.msra.mxu1 %v12453_v44  ;;  %v12459_v44 = vld [vmem:[#allocation32_spill] sm:$0xff] }
 0x2ea   :  { %1693 = vmatpush.xpose.msra.mxu0 %v12449_v49 }
 0x2eb   :  { %1891 = vmatpush.xpose.msra.mxu3 %v12452_v63 }
 0x2ec   :  { %1855 = vmatpush.xpose.msra.mxu2 %v12454_v16  ;;  %v12460_v16 = vld [vmem:[#allocation105_spill] sm:$0xff] }
 0x2ed   :  { %1971 = vmatpush.xpose.msrb.mxu1 %v12410_v12  ;;  %v511_v12 = vpop.f32.mrf.mxu3 }
 0x2ee   :  { %1695 = vmatpush.xpose.msra.mxu0 %v12452_v63  ;;  %v512_v40 = vadd.f32 %v511_v12, %v473_v55  ;;  %v12468_v55 = vld [vmem:[#allocation36_spill] sm:$0xff] }
 0x2ef   :  { %1893 = vmatpush.xpose.msra.mxu3 %v12456_v3 }
 0x2f0   :  { %2008 = vmatpush.xpose.msrb.mxu2 %v12455_v7 }
 0x2f1   :  { %1973 = vmatpush.xpose.msrb.mxu1 %v12413_v60  ;;  %v580_v60 = vpop.f32.mrf.mxu0 }
 0x2f2   :  { %1697 = vmatpush.xpose.msra.mxu0 %v12456_v3  ;;  %v581_v41 = vadd.f32 %v580_v60, %v512_v40  ;;  %v12471_v40 = vld [vmem:[#allocation37_spill] sm:$0xff] }
 0x2f3   :  { %2053 = vmatpush.xpose.msrb.mxu3 %v12457_v53  ;;  %v12463_v53 = vld [vmem:[#allocation109_spill] sm:$0xff] }
 0x2f4   :  { %2010 = vmatpush.xpose.msrb.mxu2 %v12458_v38 }
 0x2f5   :  { %1975 = vmatpush.xpose.msrb.mxu1 %v12416_v59  ;;  %v12467_v59 = vld [vmem:[#allocation84_spill] sm:$0xff] }
 0x2f6   :  { %1904 = vmatpush.xpose.msrb.mxu0 %v12459_v44  ;;  %v12466_v44 = vld [vmem:[#allocation113_spill] sm:$0xff] }
 0x2f7   :  { %2059 = vmatpush.xpose.msrb.mxu3 %v12460_v16  ;;  %v617_v16 = vpop.f32.mrf.mxu1 }
 0x2f8   :  { %2012 = vmatpush.xpose.msrb.mxu2 %v12461_v39  ;;  %v618_v12 = vadd.f32 %v617_v16, %v581_v41  ;;  %v12474_v41 = vld [vmem:[#allocation43_spill] sm:$0xff] }
 0x2f9   :  { %1977 = vmatpush.xpose.msrb.mxu1 %v12419_v9  ;;  %v12470_v9 = vld [vmem:[#allocation89_spill] sm:$0xff] }
 0x2fa   :  { %1908 = vmatpush.xpose.msrb.mxu0 %v12462_v20  ;;  %v12469_v20 = vld [vmem:[#allocation116_spill] sm:$0xff] }
 0x2fb   :  { %2065 = vmatpush.xpose.msrb.mxu3 %v12463_v53  ;;  %v658_v53 = vpop.f32.mrf.mxu2 }
 0x2fc   :  { %2014 = vmatpush.xpose.msrb.mxu2 %v12464_v61  ;;  %v659_v60 = vadd.f32 %v658_v53, %v618_v12  ;;  %v12477_v53 = vld [vmem:[#allocation44_spill] sm:$0xff] }
 0x2fd   :  { %1979 = vmatpush.xpose.msrb.mxu1 %v12422_v30  ;;  %v813_v30 = vpop.f32.mrf.mxu0 }
 0x2fe   :  { %1912 = vmatpush.xpose.msrb.mxu0 %v12465_v29  ;;  %v12472_v29 = vld [vmem:[#allocation118_spill] sm:$0xff] }
 0x2ff   :  { %2071 = vmatpush.xpose.msrb.mxu3 %v12466_v44  ;;  %v759_v44 = vpop.f32.mrf.mxu3  ;;  %v852_v12 = vpop.f32.mrf.mxu1 }
 0x300   :  { %2016 = vmatpush.xpose.msrb.mxu2 %v12467_v59  ;;  %v760_v16 = vadd.f32 %v759_v44, %v659_v60  ;;  %v12480_v44 = vld [vmem:[#allocation49_spill] sm:$0xff] }
 0x301   :  { %1981 = vmatpush.xpose.msrb.mxu1 %v12425_v22  ;;  %v12476_v22 = vld [vmem:[#allocation98_spill] sm:$0xff] }
 0x302   :  { %1916 = vmatpush.xpose.msrb.mxu0 %v12468_v55  ;;  %v12475_v55 = vld [vmem:[#allocation120_spill] sm:$0xff] }
 0x303   :  { %2077 = vmatpush.xpose.msrb.mxu3 %v12469_v20  ;;  %v814_v20 = vadd.f32 %v813_v30, %v760_v16  ;;  %v921_v60 = vpop.f32.mrf.mxu2  ;;  %v12482_v16 = vld [vmem:[#allocation108_spill] sm:$0xff] }
 0x304   :  { %2018 = vmatpush.xpose.msrb.mxu2 %v12470_v9 }
 0x305   :  { %1983 = vmatpush.xpose.msrb.mxu1 %v12428_v45  ;;  %v12479_v45 = vld [vmem:[#allocation103_spill] sm:$0xff] }
 0x306   :  { %1920 = vmatpush.xpose.msrb.mxu0 %v12471_v40  ;;  %v12478_v40 = vld [vmem:[#allocation121_spill] sm:$0xff] }
 0x307   :  { %2083 = vmatpush.xpose.msrb.mxu3 %v12472_v29  ;;  %v853_v29 = vadd.f32 %v852_v12, %v814_v20  ;;  %v12485_v12 = vld [vmem:[#allocation124_spill] sm:$0xff] }
 0x308   :  { %2020 = vmatpush.xpose.msrb.mxu2 %v12473_v4 }
 0x309   :  { %1985 = vmatpush.xpose.msrb.mxu1 %v12431_v31  ;;  %v922_v30 = vadd.f32 %v921_v60, %v853_v29  ;;  %v999_v31 = vpop.f32.mrf.mxu0  ;;  %v1100_v29 = vpop.f32.mrf.mxu1  ;;  %v12488_v60 = vld [vmem:[#allocation125_spill] sm:$0xff] }
 0x30a   :  { %1924 = vmatpush.xpose.msrb.mxu0 %v12474_v41  ;;  %v12481_v41 = vld [vmem:[#allocation122_spill] sm:$0xff] }
 0x30b   :  { %2089 = vmatpush.xpose.msrb.mxu3 %v12475_v55  ;;  %v12483_v55 = vld [vmem:[#allocation58_spill] sm:$0xff] }
 0x30c   :  { %2022 = vmatpush.xpose.msrb.mxu2 %v12476_v22 }
 0x30d   :  { %1987 = vmatpush.xpose.msrb.mxu1 %v12434_v13  ;;  %v12486_v13 = vld [vmem:[#allocation62_spill] sm:$0xff] }
 0x30e   :  { %1928 = vmatpush.xpose.msrb.mxu0 %v12477_v53  ;;  %v958_v53 = vpop.f32.mrf.mxu3 }
 0x30f   :  { %2095 = vmatpush.xpose.msrb.mxu3 %v12478_v40  ;;  %v12484_v40 = vld [vmem:[#allocation123_spill] sm:$0xff]  ;;  %v959_v20 = vadd.f32 %v958_v53, %v922_v30  ;;  %v1154_v53 = vpop.f32.mrf.mxu2  ;;  %v12491_v30 = vld [vmem:[#allocation128_spill] sm:$0xff] }
 0x310   :  { %2024 = vmatpush.xpose.msrb.mxu2 %v12479_v45 }
 0x311   :  { %1989 = vmatpush.xpose.msrb.mxu1 %v12437_v50  ;;  %v12489_v50 = vld [vmem:[#allocation63_spill] sm:$0xff] }
 0x312   :  { %1932 = vmatpush.xpose.msrb.mxu0 %v12480_v44  ;;  %v1000_v44 = vadd.f32 %v999_v31, %v959_v20  ;;  %v12492_v20 = vld [vmem:[#allocation68_spill] sm:$0xff] }
 0x313   :  { %2101 = vmatpush.xpose.msrb.mxu3 %v12481_v41  ;;  %v12487_v41 = vld [vmem:[#allocation133_spill] sm:$0xff] }
 0x314   :  { %2026 = vmatpush.xpose.msrb.mxu2 %v12482_v16 }
 0x315   :  { %1991 = vmatpush.xpose.msrb.mxu1 %v12440_v37  ;;  %v12490_v37 = vld [vmem:[#allocation137_spill] sm:$0xff] }
 0x316   :  { %1936 = vmatpush.xpose.msrb.mxu0 %v12483_v55  ;;  %v1101_v55 = vadd.f32 %v1100_v29, %v1000_v44  ;;  %v12495_v29 = vld [vmem:[#allocation69_spill] sm:$0xff] }
 0x317   :  { %2107 = vmatpush.xpose.msrb.mxu3 %v12484_v40  ;;  %v1262_v40 = vpop.f32.mrf.mxu0 }
 0x318   :  { %2028 = vmatpush.xpose.msrb.mxu2 %v12485_v12  ;;  %v1155_v31 = vadd.f32 %v1154_v53, %v1101_v55  ;;  %v12498_v55 = vld [vmem:[#allocation74_spill] sm:$0xff]  ;;  %v1299_v53 = vpop.f32.mrf.mxu1 }
 0x319   :  { %1993 = vmatpush.xpose.msrb.mxu1 %v12443_v33  ;;  %v12494_v33 = vld [vmem:[#allocation131_spill] sm:$0xff] }
 0x31a   :  { %1940 = vmatpush.xpose.msrb.mxu0 %v12486_v13  ;;  %v12493_v13 = vld [vmem:[#allocation141_spill] sm:$0xff] }
 0x31b   :  { %2113 = vmatpush.xpose.msrb.mxu3 %v12487_v41  ;;  %v1193_v41 = vpop.f32.mrf.mxu3 }
 0x31c   :  { %2030 = vmatpush.xpose.msrb.mxu2 %v12488_v60  ;;  %v1194_v44 = vadd.f32 %v1193_v41, %v1155_v31  ;;  %v12501_v41 = vld [vmem:[#allocation85_spill] sm:$0xff]  ;;  %v1340_v31 = vpop.f32.mrf.mxu2 }
 0x31d   :  { %1995 = vmatpush.xpose.msrb.mxu1 %v12446_v42  ;;  %v12497_v42 = vld [vmem:[#allocation135_spill] sm:$0xff] }
 0x31e   :  { %1944 = vmatpush.xpose.msrb.mxu0 %v12489_v50  ;;  %v12496_v50 = vld [vmem:[#allocation144_spill] sm:$0xff] }
 0x31f   :  { %2119 = vmatpush.xpose.msrb.mxu3 %v12490_v37  ;;  %v1263_v37 = vadd.f32 %v1262_v40, %v1194_v44 }
 0x320   :  { %2032 = vmatpush.xpose.msrb.mxu2 %v12491_v30 }
 0x321   :  { %1997 = vmatpush.xpose.msrb.mxu1 %v12449_v49  ;;  %v12500_v49 = vld [vmem:[#allocation139_spill] sm:$0xff] }
 0x322   :  { %1948 = vmatpush.xpose.msrb.mxu0 %v12492_v20  ;;  %v12499_v20 = vld [vmem:[#allocation146_spill] sm:$0xff] }
 0x323   :  { %2125 = vmatpush.xpose.msrb.mxu3 %v12493_v13  ;;  %v1300_v13 = vadd.f32 %v1299_v53, %v1263_v37  ;;  %v1441_v40 = vpop.f32.mrf.mxu3 }
 0x324   :  { %2034 = vmatpush.xpose.msrb.mxu2 %v12494_v33 }
 0x325   :  { %1999 = vmatpush.xpose.msrb.mxu1 %v12452_v63  ;;  %v1341_v63 = vadd.f32 %v1340_v31, %v1300_v13 }
 0x326   :  { %1952 = vmatpush.xpose.msrb.mxu0 %v12495_v29  ;;  %v12502_v29 = vld [vmem:[#allocation14_spill] sm:$0xff] }
 0x327   :  { %2131 = vmatpush.xpose.msrb.mxu3 %v12496_v50  ;;  %v12503_v50 = vld [vmem:[#allocation92_spill] sm:$0xff]  ;;  %v1442_v44 = vadd.f32 %v1441_v40, %v1341_v63 }
 0x328   :  { %2036 = vmatpush.xpose.msrb.mxu2 %v12497_v42  ;;  %v1534_v27 = vpop.f32.mrf.mxu1 }
 0x329   :  { %2001 = vmatpush.xpose.msrb.mxu1 %v12456_v3 }
 0x32a   :  { %1956 = vmatpush.xpose.msrb.mxu0 %v12498_v55 }
 0x32b   :  { %2137 = vmatpush.xpose.msrb.mxu3 %v12499_v20 }
 0x32c   :  { %2038 = vmatpush.xpose.msrb.mxu2 %v12500_v49 }
 0x32e   :  { %1960 = vmatpush.xpose.msrb.mxu0 %v12501_v41 }
 0x32f   :  { %2143 = vmatpush.xpose.msrb.mxu3 %v12502_v29  ;;  %v12564_v29 = vld [vmem:[#allocation176_spill] sm:$0xff] }
 0x332   :  { %1964 = vmatpush.xpose.msrb.mxu0 %v12503_v50  ;;  %v1495_v34 = vpop.f32.mrf.mxu0  ;;  %v1603_v3 = vpop.f32.mrf.mxu2 }
 0x333   :  { %v1496_v55 = vadd.f32 %v1495_v34, %v1442_v44 }
 0x335   :  { %v1535_v15 = vadd.f32 %v1534_v27, %v1496_v55  ;;  %v1640_v20 = vpop.f32.mrf.mxu3 }
 0x337   :  { %v1604_v11 = vadd.f32 %v1603_v3, %v1535_v15  ;;  %v103_v15 = vld [vmem:[%s11387_s3] sm:$0xff] }
 0x339   :  { %v1641_v37 = vadd.f32 %v1640_v20, %v1604_v11 }
 0x33b   :  { %1643 = vmax.xlane.f32.xlu2 %v1641_v37 }
 0x3ae   :  { %v1644_v53 = vpop.xlane.xlu2 %1643 }
 0x3af   :  { %v1645_v56 = vsub.f32 %v1641_v37, %v1644_v53  ;;  %v12504_v53 = vld [vmem:[#allocation83_spill] sm:$0xff] }
 0x3b1   :  { %v1646_v41 = vmul.f32 1.442695, %v1645_v56 }
 0x3b3   :  { %7619 = vpow2.f32 %v1646_v41 }
 0x3b9   :  { %v7620_v48 = vpop.eup %7619 }
 0x3ba   :  { %1648 = vadd.xlane.f32.xlu0 %v7620_v48 }
 0x42d   :  { %v1649_v13 = vpop.xlane.xlu0 %1648 }
 0x42e   :  { %7621 = vrcp.f32 %v1649_v13  ;;  %v1661_v40 = vand.u32 2147483648, %v1649_v13  ;;  %v1659_v27 = vand.u32 2147483647, %v1649_v13  ;;  %vm1655_vm6 = vweird.f32 %v1649_v13 }
 0x430   :  { %v1662_v11 = vor.u32 1.1754944e-38, %v1661_v40  ;;  %vm1660_vm8 = vcmp.eq.f32.partialorder %v1659_v27, 8.507059e+37  ;;  %v12507_v40 = vld [vmem:[#allocation90_spill] sm:$0xff]  ;;  %v12509_v27 = vld [vmem:[#allocation96_spill] sm:$0xff] }
 0x434   :  { %v7622_v31 = vpop.eup %7621 }
 0x435   :  { %v1651_v50 = vmul.f32 %v7622_v31, %v1649_v13  ;;  %vm1656_vm5 = vweird.f32 %v7622_v31 }
 0x436   :  { %vm1657_vm7 = vmor %vm1655_vm6, %vm1656_vm5 }
 0x437   :  { %v1652_v63 = vsub.f32 1.0, %v1651_v50 }
 0x439   :  { %v1653_v34 = vmul.f32 %v7622_v31, %v1652_v63  ;;  %v12506_v63 = vld [vmem:[#allocation77_spill] sm:$0xff] }
 0x43b   :  { %v1654_v55 = vadd.f32 %v7622_v31, %v1653_v34  ;;  %v12508_v34 = vld [vmem:[#allocation78_spill] sm:$0xff] }
 0x43d   :  { %v1658_v3 = vsel %vm1657_vm7, %v7622_v31, %v1654_v55  ;;  %v12505_v31 = vld [vmem:[#allocation86_spill] sm:$0xff]  ;;  %v12510_v55 = vld [vmem:[#allocation80_spill] sm:$0xff] }
 0x43e   :  { %v1663_v56 = vsel %vm1660_vm8, %v1662_v11, %v1658_v3  ;;  %v12511_v11 = vld [vmem:[#allocation101_spill] sm:$0xff]  ;;  %v12512_v3 = vld [vmem:[#allocation88_spill] sm:$0xff] }
 0x43f   :  { %v1664_v20 = vmul.f32 %v7620_v48, %v1663_v56  ;;  %v12514_v56 = vld [vmem:[#allocation93_spill] sm:$0xff] }
 0x441   :  { %v1665_v41 = vsub.f32 %v1664_v20, %v103_v15  ;;  %v12513_v15 = vld [vmem:[#allocation106_spill] sm:$0xff]  ;;  %v12515_v20 = vld [vmem:[#allocation111_spill] sm:$0xff] }
 0x443   :  { %v9454_v44 = vand.u32 4294901760, %v1665_v41 }
 0x445   :  { %v9457_v50 = vsub.f32 %v1665_v41, %v9454_v44  ;;  %1804 = vmatmul.f32.vlgmr.msra.gmra.mxu1 %v9454_v44  ;;  %v12516_v41 = vld [vmem:[#allocation97_spill] sm:$0xff] }
 0x446   :  { %2204 = vmatpush.xpose.msra.mxu1 %v12455_v7 }
 0x447   :  { %1858 = vmatmul.f32.vlgmr.msra.gmra.mxu2 %v9457_v50  ;;  %v9463_v37 = vand.u32 4294901760, %v9457_v50 }
 0x448   :  { %2245 = vmatpush.xpose.msra.mxu2 %v12504_v53  ;;  %v12561_v53 = vld [vmem:[#allocation172_spill] sm:$0xff] }
 0x449   :  { %1897 = vmatmul.f32.vlgmr.msra.gmra.mxu3 %v9463_v37  ;;  %v1701_v48 = vsub.f32 %v9457_v50, %v9463_v37 }
 0x44a   :  { %2206 = vmatpush.xpose.msra.mxu1 %v12458_v38  ;;  %2312 = vmatpush.xpose.msra.mxu3 %v12455_v7 }
 0x44b   :  { %v9471_v13 = vand.u32 4294901760, %v1701_v48  ;;  %v12517_v48 = vld [vmem:[#allocation114_spill] sm:$0xff] }
 0x44c   :  { %2249 = vmatpush.xpose.msra.mxu2 %v12505_v31  ;;  %v12558_v31 = vld [vmem:[#allocation167_spill] sm:$0xff] }
 0x44d   :  { %1703 = vmatmul.f32.vlgmr.msra.gmra.mxu0 %v9471_v13  ;;  %2003 = vmatmul.f32.vlgmr.msrb.gmra.mxu1 %v9454_v44 }
 0x44e   :  { %2151 = vmatpush.xpose.msra.mxu0 %v12506_v63  ;;  %2208 = vmatpush.xpose.msra.mxu1 %v12461_v39  ;;  %v12552_v63 = vld [vmem:[#allocation161_spill] sm:$0xff] }
 0x44f   :  { %2314 = vmatpush.xpose.msra.mxu3 %v12458_v38  ;;  %2044 = vmatmul.f32.vlgmr.msrb.gmra.mxu2 %v9471_v13 }
 0x450   :  { %2253 = vmatpush.xpose.msra.mxu2 %v12507_v40  ;;  %v12555_v40 = vld [vmem:[#allocation164_spill] sm:$0xff] }
 0x451   :  { %2145 = vmatmul.f32.vlgmr.msrb.gmra.mxu3 %v9454_v44 }
 0x452   :  { %2154 = vmatpush.xpose.msra.mxu0 %v12508_v34  ;;  %2210 = vmatpush.xpose.msra.mxu1 %v12464_v61  ;;  %v12548_v34 = vld [vmem:[#allocation150_spill] sm:$0xff] }
 0x453   :  { %2316 = vmatpush.xpose.msra.mxu3 %v12461_v39 }
 0x454   :  { %2257 = vmatpush.xpose.msra.mxu2 %v12509_v27  ;;  %v12550_v27 = vld [vmem:[#allocation182_spill] sm:$0xff] }
 0x455   :  { %1966 = vmatmul.f32.vlgmr.msrb.gmra.mxu0 %v9454_v44 }
 0x456   :  { %2157 = vmatpush.xpose.msra.mxu0 %v12510_v55  ;;  %2212 = vmatpush.xpose.msra.mxu1 %v12467_v59  ;;  %v12539_v55 = vld [vmem:[#allocation149_spill] sm:$0xff] }
 0x457   :  { %2318 = vmatpush.xpose.msra.mxu3 %v12464_v61 }
 0x458   :  { %2261 = vmatpush.xpose.msra.mxu2 %v12511_v11  ;;  %v12545_v11 = vld [vmem:[#allocation148_spill] sm:$0xff] }
 0x45a   :  { %2160 = vmatpush.xpose.msra.mxu0 %v12512_v3  ;;  %2214 = vmatpush.xpose.msra.mxu1 %v12470_v9  ;;  %v12518_v3 = vld [vmem:[#allocation102_spill] sm:$0xff] }
 0x45b   :  { %2320 = vmatpush.xpose.msra.mxu3 %v12467_v59 }
 0x45c   :  { %2265 = vmatpush.xpose.msra.mxu2 %v12513_v15  ;;  %v12520_v15 = vld [vmem:[#allocation107_spill] sm:$0xff] }
 0x45e   :  { %2163 = vmatpush.xpose.msra.mxu0 %v12514_v56  ;;  %2216 = vmatpush.xpose.msra.mxu1 %v12473_v4  ;;  %v12519_v56 = vld [vmem:[#allocation117_spill] sm:$0xff] }
 0x45f   :  { %2322 = vmatpush.xpose.msra.mxu3 %v12470_v9 }
 0x460   :  { %2269 = vmatpush.xpose.msra.mxu2 %v12515_v20  ;;  %v12522_v20 = vld [vmem:[#allocation112_spill] sm:$0xff] }
 0x462   :  { %2166 = vmatpush.xpose.msra.mxu0 %v12516_v41  ;;  %2218 = vmatpush.xpose.msra.mxu1 %v12476_v22  ;;  %v12521_v41 = vld [vmem:[#allocation119_spill] sm:$0xff] }
 0x463   :  { %2324 = vmatpush.xpose.msra.mxu3 %v12473_v4 }
 0x464   :  { %2273 = vmatpush.xpose.msra.mxu2 %v12517_v48  ;;  %v12524_v48 = vld [vmem:[#allocation115_spill] sm:$0xff] }
 0x466   :  { %2169 = vmatpush.xpose.msra.mxu0 %v12518_v3  ;;  %2220 = vmatpush.xpose.msra.mxu1 %v12479_v45  ;;  %v12523_v3 = vld [vmem:[#allocation127_spill] sm:$0xff] }
 0x467   :  { %2326 = vmatpush.xpose.msra.mxu3 %v12476_v22 }
 0x468   :  { %2277 = vmatpush.xpose.msra.mxu2 %v12519_v56  ;;  %v12526_v56 = vld [vmem:[#allocation126_spill] sm:$0xff] }
 0x46a   :  { %2172 = vmatpush.xpose.msra.mxu0 %v12520_v15  ;;  %2222 = vmatpush.xpose.msra.mxu1 %v12482_v16  ;;  %v12525_v15 = vld [vmem:[#allocation130_spill] sm:$0xff] }
 0x46b   :  { %2328 = vmatpush.xpose.msra.mxu3 %v12479_v45 }
 0x46c   :  { %2281 = vmatpush.xpose.msra.mxu2 %v12521_v41  ;;  %v12528_v41 = vld [vmem:[#allocation129_spill] sm:$0xff] }
 0x46e   :  { %2175 = vmatpush.xpose.msra.mxu0 %v12522_v20  ;;  %2224 = vmatpush.xpose.msra.mxu1 %v12485_v12  ;;  %v12527_v20 = vld [vmem:[#allocation134_spill] sm:$0xff] }
 0x46f   :  { %2330 = vmatpush.xpose.msra.mxu3 %v12482_v16 }
 0x470   :  { %2285 = vmatpush.xpose.msra.mxu2 %v12523_v3  ;;  %v12530_v3 = vld [vmem:[#allocation132_spill] sm:$0xff] }
 0x472   :  { %2178 = vmatpush.xpose.msra.mxu0 %v12524_v48  ;;  %2226 = vmatpush.xpose.msra.mxu1 %v12488_v60  ;;  %v12529_v48 = vld [vmem:[#allocation138_spill] sm:$0xff] }
 0x473   :  { %2332 = vmatpush.xpose.msra.mxu3 %v12485_v12 }
 0x474   :  { %2289 = vmatpush.xpose.msra.mxu2 %v12525_v15  ;;  %v12532_v15 = vld [vmem:[#allocation136_spill] sm:$0xff] }
 0x476   :  { %2181 = vmatpush.xpose.msra.mxu0 %v12526_v56  ;;  %2228 = vmatpush.xpose.msra.mxu1 %v12491_v30  ;;  %v12531_v56 = vld [vmem:[#allocation142_spill] sm:$0xff] }
 0x477   :  { %2334 = vmatpush.xpose.msra.mxu3 %v12488_v60 }
 0x478   :  { %2293 = vmatpush.xpose.msra.mxu2 %v12527_v20  ;;  %v12534_v20 = vld [vmem:[#allocation145_spill] sm:$0xff] }
 0x47a   :  { %2184 = vmatpush.xpose.msra.mxu0 %v12528_v41  ;;  %2230 = vmatpush.xpose.msra.mxu1 %v12494_v33  ;;  %v12533_v41 = vld [vmem:[#allocation162_spill] sm:$0xff] }
 0x47b   :  { %2336 = vmatpush.xpose.msra.mxu3 %v12491_v30 }
 0x47c   :  { %2297 = vmatpush.xpose.msra.mxu2 %v12529_v48  ;;  %v12535_v48 = vld [vmem:[#allocation147_spill] sm:$0xff] }
 0x47e   :  { %2187 = vmatpush.xpose.msra.mxu0 %v12530_v3  ;;  %2232 = vmatpush.xpose.msra.mxu1 %v12497_v42  ;;  %v12536_v3 = vld [vmem:[#allocation140_spill] sm:$0xff] }
 0x47f   :  { %2338 = vmatpush.xpose.msra.mxu3 %v12494_v33 }
 0x480   :  { %2301 = vmatpush.xpose.msra.mxu2 %v12531_v56  ;;  %v12537_v56 = vld [vmem:[#allocation166_spill] sm:$0xff] }
 0x482   :  { %2190 = vmatpush.xpose.msra.mxu0 %v12532_v15  ;;  %2234 = vmatpush.xpose.msra.mxu1 %v12500_v49  ;;  %v12538_v15 = vld [vmem:[#allocation6_spill] sm:$0xff] }
 0x483   :  { %2340 = vmatpush.xpose.msra.mxu3 %v12497_v42 }
 0x484   :  { %2305 = vmatpush.xpose.msra.mxu2 %v12534_v20  ;;  %v12541_v20 = vld [vmem:[#allocation170_spill] sm:$0xff] }
 0x485   :  { %2238 = vmatmul.f32.vlgmr.msra.gmra.mxu1 %v9463_v37 }
 0x486   :  { %2394 = vmatpush.xpose.msrb.mxu1 %v12533_v41  ;;  %2193 = vmatpush.xpose.msra.mxu0 %v12536_v3  ;;  %v12540_v41 = vld [vmem:[#allocation143_spill] sm:$0xff]  ;;  %v12543_v3 = vld [vmem:[#allocation152_spill] sm:$0xff] }
 0x487   :  { %2342 = vmatpush.xpose.msra.mxu3 %v12500_v49  ;;  %2307 = vmatmul.f32.vlgmr.msra.gmra.mxu2 %v9454_v44  ;;  %v12567_v49 = vld [vmem:[#allocation180_spill] sm:$0xff] }
 0x488   :  { %2492 = vmatpush.xpose.msrb.mxu2 %v12535_v48  ;;  %v12542_v48 = vld [vmem:[#allocation19_spill] sm:$0xff] }
 0x48a   :  { %2400 = vmatpush.xpose.msrb.mxu1 %v12537_v56  ;;  %2344 = vmatmul.f32.vlgmr.msra.gmra.mxu3 %v9454_v44  ;;  %v12544_v56 = vld [vmem:[#allocation174_spill] sm:$0xff] }
 0x48b   :  { %2545 = vmatpush.xpose.msrb.mxu3 %v12538_v15  ;;  %2196 = vmatpush.xpose.msra.mxu0 %v12540_v41  ;;  %v12547_v41 = vld [vmem:[#allocation178_spill] sm:$0xff] }
 0x48c   :  { %2495 = vmatpush.xpose.msrb.mxu2 %v12539_v55  ;;  %v12546_v55 = vld [vmem:[#allocation155_spill] sm:$0xff] }
 0x48e   :  { %2406 = vmatpush.xpose.msrb.mxu1 %v12541_v20  ;;  %2199 = vmatmul.f32.vlgmr.msra.gmra.mxu0 %v9457_v50  ;;  %v12549_v20 = vld [vmem:[#allocation158_spill] sm:$0xff] }
 0x48f   :  { %2349 = vmatpush.xpose.msrb.mxu0 %v12538_v15  ;;  %2547 = vmatpush.xpose.msrb.mxu3 %v12542_v48 }
 0x490   :  { %2498 = vmatpush.xpose.msrb.mxu2 %v12543_v3  ;;  %v12551_v3 = vld [vmem:[#allocation153_spill] sm:$0xff] }
 0x492   :  { %2412 = vmatpush.xpose.msrb.mxu1 %v12544_v56  ;;  %v12553_v56 = vld [vmem:[#allocation186_spill] sm:$0xff] }
 0x493   :  { %2351 = vmatpush.xpose.msrb.mxu0 %v12542_v48  ;;  %2549 = vmatpush.xpose.msrb.mxu3 %v12545_v11 }
 0x494   :  { %2501 = vmatpush.xpose.msrb.mxu2 %v12546_v55  ;;  %v12554_v55 = vld [vmem:[#allocation156_spill] sm:$0xff] }
 0x496   :  { %2418 = vmatpush.xpose.msrb.mxu1 %v12547_v41  ;;  %v12556_v41 = vld [vmem:[#allocation190_spill] sm:$0xff] }
 0x497   :  { %2353 = vmatpush.xpose.msrb.mxu0 %v12545_v11  ;;  %2551 = vmatpush.xpose.msrb.mxu3 %v12548_v34 }
 0x498   :  { %2504 = vmatpush.xpose.msrb.mxu2 %v12549_v20  ;;  %v12557_v20 = vld [vmem:[#allocation159_spill] sm:$0xff] }
 0x49a   :  { %2424 = vmatpush.xpose.msrb.mxu1 %v12550_v27  ;;  %v12559_v27 = vld [vmem:[#allocation194_spill] sm:$0xff] }
 0x49b   :  { %2355 = vmatpush.xpose.msrb.mxu0 %v12548_v34  ;;  %2553 = vmatpush.xpose.msrb.mxu3 %v12551_v3 }
 0x49c   :  { %2507 = vmatpush.xpose.msrb.mxu2 %v12552_v63  ;;  %v12560_v63 = vld [vmem:[#allocation160_spill] sm:$0xff] }
 0x49e   :  { %2430 = vmatpush.xpose.msrb.mxu1 %v12553_v56  ;;  %v12562_v56 = vld [vmem:[#allocation197_spill] sm:$0xff] }
 0x49f   :  { %2357 = vmatpush.xpose.msrb.mxu0 %v12551_v3  ;;  %2555 = vmatpush.xpose.msrb.mxu3 %v12554_v55 }
 0x4a0   :  { %2510 = vmatpush.xpose.msrb.mxu2 %v12555_v40  ;;  %v12563_v40 = vld [vmem:[#allocation165_spill] sm:$0xff] }
 0x4a2   :  { %2436 = vmatpush.xpose.msrb.mxu1 %v12556_v41  ;;  %v12565_v41 = vld [vmem:[#allocation200_spill] sm:$0xff] }
 0x4a3   :  { %2359 = vmatpush.xpose.msrb.mxu0 %v12554_v55  ;;  %2557 = vmatpush.xpose.msrb.mxu3 %v12557_v20 }
 0x4a4   :  { %2513 = vmatpush.xpose.msrb.mxu2 %v12558_v31  ;;  %v12566_v31 = vld [vmem:[#allocation169_spill] sm:$0xff] }
 0x4a6   :  { %2442 = vmatpush.xpose.msrb.mxu1 %v12559_v27  ;;  %v12568_v27 = vld [vmem:[#allocation18_spill] sm:$0xff] }
 0x4a7   :  { %2361 = vmatpush.xpose.msrb.mxu0 %v12557_v20  ;;  %2559 = vmatpush.xpose.msrb.mxu3 %v12560_v63 }
 0x4a8   :  { %2516 = vmatpush.xpose.msrb.mxu2 %v12561_v53  ;;  %v12569_v53 = vld [vmem:[#allocation184_spill] sm:$0xff] }
 0x4aa   :  { %2448 = vmatpush.xpose.msrb.mxu1 %v12562_v56  ;;  %v12570_v56 = vld [vmem:[#allocation205_spill] sm:$0xff] }
 0x4ab   :  { %2363 = vmatpush.xpose.msrb.mxu0 %v12560_v63  ;;  %2561 = vmatpush.xpose.msrb.mxu3 %v12563_v40 }
 0x4ac   :  { %2519 = vmatpush.xpose.msrb.mxu2 %v12564_v29  ;;  %v12571_v29 = vld [vmem:[#allocation188_spill] sm:$0xff] }
 0x4ae   :  { %2454 = vmatpush.xpose.msrb.mxu1 %v12565_v41  ;;  %v12572_v41 = vld [vmem:[#allocation207_spill] sm:$0xff] }
 0x4af   :  { %2365 = vmatpush.xpose.msrb.mxu0 %v12563_v40  ;;  %2563 = vmatpush.xpose.msrb.mxu3 %v12566_v31 }
 0x4b0   :  { %2522 = vmatpush.xpose.msrb.mxu2 %v12567_v49  ;;  %v12573_v49 = vld [vmem:[#allocation192_spill] sm:$0xff] }
 0x4b2   :  { %2460 = vmatpush.xpose.msrb.mxu1 %v12568_v27  ;;  %v12574_v27 = vld [vmem:[#allocation210_spill] sm:$0xff] }
 0x4b3   :  { %2367 = vmatpush.xpose.msrb.mxu0 %v12566_v31  ;;  %2565 = vmatpush.xpose.msrb.mxu3 %v8695_v1 }
 0x4b4   :  { %2525 = vmatpush.xpose.msrb.mxu2 %v12569_v53  ;;  %v12575_v53 = vld [vmem:[#allocation196_spill] sm:$0xff] }
 0x4b6   :  { %2466 = vmatpush.xpose.msrb.mxu1 %v12570_v56  ;;  %v12576_v56 = vld [vmem:[#allocation213_spill] sm:$0xff] }
 0x4b7   :  { %2369 = vmatpush.xpose.msrb.mxu0 %v8695_v1  ;;  %2567 = vmatpush.xpose.msrb.mxu3 %v8718_v23 }
 0x4b8   :  { %2528 = vmatpush.xpose.msrb.mxu2 %v12571_v29  ;;  %v12577_v29 = vld [vmem:[#allocation199_spill] sm:$0xff] }
 0x4ba   :  { %2472 = vmatpush.xpose.msrb.mxu1 %v12572_v41  ;;  %v12586_v41 = vld [vmem:[#allocation242_spill] sm:$0xff] }
 0x4bb   :  { %2371 = vmatpush.xpose.msrb.mxu0 %v8718_v23  ;;  %2569 = vmatpush.xpose.msrb.mxu3 %v8737_v0 }
 0x4bc   :  { %2531 = vmatpush.xpose.msrb.mxu2 %v12573_v49  ;;  %v12581_v49 = vld [vmem:[#allocation154_spill] sm:$0xff] }
 0x4be   :  { %2478 = vmatpush.xpose.msrb.mxu1 %v12574_v27  ;;  %v12583_v27 = vld [vmem:[#allocation157_spill] sm:$0xff] }
 0x4bf   :  { %2373 = vmatpush.xpose.msrb.mxu0 %v8737_v0  ;;  %2571 = vmatpush.xpose.msrb.mxu3 %v8756_v46 }
 0x4c0   :  { %2534 = vmatpush.xpose.msrb.mxu2 %v12575_v53  ;;  %v12578_v53 = vld [vmem:[#allocation226_spill] sm:$0xff] }
 0x4c2   :  { %2484 = vmatpush.xpose.msrb.mxu1 %v12576_v56  ;;  %v12580_v56 = vld [vmem:[#allocation230_spill] sm:$0xff] }
 0x4c3   :  { %2375 = vmatpush.xpose.msrb.mxu0 %v8756_v46  ;;  %2573 = vmatpush.xpose.msrb.mxu3 %v8775_v5 }
 0x4c4   :  { %2537 = vmatpush.xpose.msrb.mxu2 %v12577_v29  ;;  %v12579_v29 = vld [vmem:[#allocation151_spill] sm:$0xff] }
 0x4c5   :  { %2486 = vmatmul.f32.vlgmr.msrb.gmra.mxu1 %v9454_v44 }
 0x4c6   :  { %2653 = vmatpush.xpose.msra.mxu1 %v12538_v15 }
 0x4c7   :  { %2377 = vmatpush.xpose.msrb.mxu0 %v8775_v5  ;;  %2575 = vmatpush.xpose.msrb.mxu3 %v8794_v25 }
 0x4c8   :  { %2690 = vmatpush.xpose.msra.mxu2 %v8859_v17 }
 0x4c9   :  { %2540 = vmatmul.f32.vlgmr.msrb.gmra.mxu2 %v9457_v50 }
 0x4ca   :  { %2655 = vmatpush.xpose.msra.mxu1 %v12542_v48  ;;  %2579 = vmatmul.f32.vlgmr.msrb.gmra.mxu3 %v9463_v37 }
 0x4cb   :  { %2735 = vmatpush.xpose.msra.mxu3 %v12578_v53  ;;  %2379 = vmatpush.xpose.msrb.mxu0 %v8794_v25  ;;  %v12582_v53 = vld [vmem:[#allocation234_spill] sm:$0xff] }
 0x4cc   :  { %2692 = vmatpush.xpose.msra.mxu2 %v8877_v21 }
 0x4ce   :  { %2657 = vmatpush.xpose.msra.mxu1 %v12545_v11  ;;  %2385 = vmatmul.f32.vlgmr.msrb.gmra.mxu0 %v9471_v13 }
 0x4cf   :  { %2586 = vmatpush.xpose.msra.mxu0 %v12579_v29  ;;  %2741 = vmatpush.xpose.msra.mxu3 %v12580_v56  ;;  %v12584_v29 = vld [vmem:[#allocation238_spill] sm:$0xff]  ;;  %v12585_v56 = vld [vmem:[#allocation16_spill] sm:$0xff] }
 0x4d0   :  { %2694 = vmatpush.xpose.msra.mxu2 %v8905_v51 }
 0x4d2   :  { %2659 = vmatpush.xpose.msra.mxu1 %v12548_v34 }
 0x4d3   :  { %2590 = vmatpush.xpose.msra.mxu0 %v12581_v49  ;;  %2747 = vmatpush.xpose.msra.mxu3 %v12582_v53  ;;  %v12587_v49 = vld [vmem:[#allocation163_spill] sm:$0xff]  ;;  %v12588_v53 = vld [vmem:[#allocation246_spill] sm:$0xff] }
 0x4d4   :  { %2696 = vmatpush.xpose.msra.mxu2 %v8924_v14 }
 0x4d6   :  { %2661 = vmatpush.xpose.msra.mxu1 %v12551_v3 }
 0x4d7   :  { %2594 = vmatpush.xpose.msra.mxu0 %v12583_v27  ;;  %2753 = vmatpush.xpose.msra.mxu3 %v12584_v29  ;;  %v12589_v27 = vld [vmem:[#allocation251_spill] sm:$0xff] }
 0x4d8   :  { %2698 = vmatpush.xpose.msra.mxu2 %v8936_v2 }
 0x4da   :  { %2663 = vmatpush.xpose.msra.mxu1 %v12554_v55 }
 0x4db   :  { %2598 = vmatpush.xpose.msra.mxu0 %v12585_v56  ;;  %2759 = vmatpush.xpose.msra.mxu3 %v12586_v41  ;;  %v12590_v56 = vld [vmem:[#allocation171_spill] sm:$0xff] }
 0x4dc   :  { %2700 = vmatpush.xpose.msra.mxu2 %v8954_v19  ;;  %v12591_v41 = vld [vmem:[#allocation255_spill] sm:$0xff] }
 0x4de   :  { %2665 = vmatpush.xpose.msra.mxu1 %v12557_v20 }
 0x4df   :  { %2602 = vmatpush.xpose.msra.mxu0 %v12587_v49  ;;  %2765 = vmatpush.xpose.msra.mxu3 %v12588_v53  ;;  %v12592_v49 = vld [vmem:[#allocation175_spill] sm:$0xff] }
 0x4e0   :  { %2702 = vmatpush.xpose.msra.mxu2 %v8979_v52  ;;  %v12593_v53 = vld [vmem:[#allocation259_spill] sm:$0xff] }
 0x4e2   :  { %2667 = vmatpush.xpose.msra.mxu1 %v12560_v63 }
 0x4e3   :  { %2606 = vmatpush.xpose.msra.mxu0 %v8672_v54  ;;  %2771 = vmatpush.xpose.msra.mxu3 %v12589_v27  ;;  %v12594_v54 = vld [vmem:[#allocation262_spill] sm:$0xff] }
 0x4e4   :  { %2704 = vmatpush.xpose.msra.mxu2 %v8996_v8 }
 0x4e6   :  { %2669 = vmatpush.xpose.msra.mxu1 %v12563_v40 }
 0x4e7   :  { %2610 = vmatpush.xpose.msra.mxu0 %v12590_v56  ;;  %2777 = vmatpush.xpose.msra.mxu3 %v12591_v41  ;;  %v12595_v56 = vld [vmem:[#allocation265_spill] sm:$0xff] }
 0x4e8   :  { %2706 = vmatpush.xpose.msra.mxu2 %v9017_v26 }
 0x4ea   :  { %2671 = vmatpush.xpose.msra.mxu1 %v12566_v31 }
 0x4eb   :  { %2614 = vmatpush.xpose.msra.mxu0 %v12592_v49  ;;  %2783 = vmatpush.xpose.msra.mxu3 %v12593_v53  ;;  %v12596_v49 = vld [vmem:[#allocation267_spill] sm:$0xff]  ;;  %v12679_v53 = vld [vmem:[#allocation110_spill] sm:$0xff] }
 0x4ec   :  { %2708 = vmatpush.xpose.msra.mxu2 %v9035_v18 }
 0x4ee   :  { %2673 = vmatpush.xpose.msra.mxu1 %v8695_v1 }
 0x4ef   :  { %2618 = vmatpush.xpose.msra.mxu0 %v8732_v47  ;;  %2789 = vmatpush.xpose.msra.mxu3 %v12594_v54  ;;  %v12667_v47 = vld [vmem:[#allocation91_spill] sm:$0xff] }
 0x4f0   :  { %2710 = vmatpush.xpose.msra.mxu2 %v9057_v58  ;;  %v12673_v54 = vld [vmem:[#allocation99_spill] sm:$0xff] }
 0x4f2   :  { %2675 = vmatpush.xpose.msra.mxu1 %v8718_v23 }
 0x4f3   :  { %2622 = vmatpush.xpose.msra.mxu0 %v8751_v62  ;;  %2795 = vmatpush.xpose.msra.mxu3 %v12595_v56  ;;  %v12602_v62 = vld [vmem:[#allocation272_spill] sm:$0xff]  ;;  %v12664_v56 = vld [vmem:[#allocation87_spill] sm:$0xff] }
 0x4f4   :  { %2712 = vmatpush.xpose.msra.mxu2 %v9076_v10 }
 0x4f6   :  { %2677 = vmatpush.xpose.msra.mxu1 %v8737_v0 }
 0x4f7   :  { %2626 = vmatpush.xpose.msra.mxu0 %v8770_v6  ;;  %2801 = vmatpush.xpose.msra.mxu3 %v12596_v49  ;;  %v12597_v6 = vld [vmem:[#allocation198_spill] sm:$0xff]  ;;  %v12598_v49 = vld [vmem:[#allocation271_spill] sm:$0xff] }
 0x4f8   :  { %2714 = vmatpush.xpose.msra.mxu2 %v9094_v36 }
 0x4fa   :  { %2679 = vmatpush.xpose.msra.mxu1 %v8756_v46 }
 0x4fb   :  { %2630 = vmatpush.xpose.msra.mxu0 %v8789_v24  ;;  %2807 = vmatpush.xpose.msra.mxu3 %v9214_v28  ;;  %v12599_v24 = vld [vmem:[#allocation258_spill] sm:$0xff] }
 0x4fc   :  { %2716 = vmatpush.xpose.msra.mxu2 %v9110_v35  ;;  %v12600_v28 = vld [vmem:[#allocation214_spill] sm:$0xff] }
 0x4fe   :  { %2681 = vmatpush.xpose.msra.mxu1 %v8775_v5 }
 0x4ff   :  { %2634 = vmatpush.xpose.msra.mxu0 %v8805_v32  ;;  %2813 = vmatpush.xpose.msra.mxu3 %v9222_v57  ;;  %v12601_v32 = vld [vmem:[#allocation201_spill] sm:$0xff]  ;;  %v12605_v57 = vld [vmem:[#allocation208_spill] sm:$0xff] }
 0x500   :  { %2718 = vmatpush.xpose.msra.mxu2 %v9136_v43 }
 0x502   :  { %2683 = vmatpush.xpose.msra.mxu1 %v8794_v25 }
 0x503   :  { %2638 = vmatpush.xpose.msra.mxu0 %v12597_v6  ;;  %2819 = vmatpush.xpose.msra.mxu3 %v12598_v49  ;;  %v12603_v6 = vld [vmem:[#allocation217_spill] sm:$0xff]  ;;  %v12604_v49 = vld [vmem:[#allocation202_spill] sm:$0xff] }
 0x504   :  { %2720 = vmatpush.xpose.msra.mxu2 %v12599_v24 }
 0x505   :  { %2685 = vmatmul.f32.vlgmr.msra.gmra.mxu1 %v9454_v44 }
 0x506   :  { %2886 = vmatpush.xpose.msrb.mxu1 %v8859_v17 }
 0x507   :  { %2642 = vmatpush.xpose.msra.mxu0 %v12601_v32  ;;  %2825 = vmatpush.xpose.msra.mxu3 %v12602_v62  ;;  %v12606_v32 = vld [vmem:[#allocation221_spill] sm:$0xff]  ;;  %v12609_v62 = vld [vmem:[#allocation216_spill] sm:$0xff] }
 0x508   :  { %2927 = vmatpush.xpose.msrb.mxu2 %v12600_v28  ;;  %v12634_v28 = vld [vmem:[#allocation26_spill] sm:$0xff] }
 0x509   :  { %2726 = vmatmul.f32.vlgmr.msra.gmra.mxu2 %v9471_v13  ;;  %v12607_v13 = vld [vmem:[#allocation211_spill] sm:$0xff] }
 0x50a   :  { %2888 = vmatpush.xpose.msrb.mxu1 %v8877_v21  ;;  %2827 = vmatmul.f32.vlgmr.msra.gmra.mxu3 %v9454_v44 }
 0x50b   :  { %2994 = vmatpush.xpose.msrb.mxu3 %v8859_v17  ;;  %2646 = vmatpush.xpose.msra.mxu0 %v12604_v49  ;;  %v12611_v49 = vld [vmem:[#allocation219_spill] sm:$0xff] }
 0x50c   :  { %2931 = vmatpush.xpose.msrb.mxu2 %v12603_v6  ;;  %v12608_v6 = vld [vmem:[#allocation224_spill] sm:$0xff] }
 0x50e   :  { %2890 = vmatpush.xpose.msrb.mxu1 %v8905_v51  ;;  %2648 = vmatmul.f32.vlgmr.msra.gmra.mxu0 %v9454_v44 }
 0x50f   :  { %2833 = vmatpush.xpose.msrb.mxu0 %v12605_v57  ;;  %2996 = vmatpush.xpose.msrb.mxu3 %v8877_v21  ;;  %v12610_v57 = vld [vmem:[#allocation227_spill] sm:$0xff] }
 0x510   :  { %2935 = vmatpush.xpose.msrb.mxu2 %v12606_v32  ;;  %v12613_v32 = vld [vmem:[#allocation220_spill] sm:$0xff] }
 0x512   :  { %2892 = vmatpush.xpose.msrb.mxu1 %v8924_v14 }
 0x513   :  { %2836 = vmatpush.xpose.msrb.mxu0 %v12607_v13  ;;  %2998 = vmatpush.xpose.msrb.mxu3 %v8905_v51  ;;  %v12612_v13 = vld [vmem:[#allocation231_spill] sm:$0xff] }
 0x514   :  { %2939 = vmatpush.xpose.msrb.mxu2 %v12608_v6  ;;  %v12615_v6 = vld [vmem:[#allocation223_spill] sm:$0xff] }
 0x516   :  { %2894 = vmatpush.xpose.msrb.mxu1 %v8936_v2 }
 0x517   :  { %2839 = vmatpush.xpose.msrb.mxu0 %v12609_v62  ;;  %3000 = vmatpush.xpose.msrb.mxu3 %v8924_v14  ;;  %v12614_v62 = vld [vmem:[#allocation235_spill] sm:$0xff] }
 0x518   :  { %2943 = vmatpush.xpose.msrb.mxu2 %v12610_v57  ;;  %v12617_v57 = vld [vmem:[#allocation228_spill] sm:$0xff] }
 0x51a   :  { %2896 = vmatpush.xpose.msrb.mxu1 %v8954_v19 }
 0x51b   :  { %2842 = vmatpush.xpose.msrb.mxu0 %v12611_v49  ;;  %3002 = vmatpush.xpose.msrb.mxu3 %v8936_v2  ;;  %v12616_v49 = vld [vmem:[#allocation239_spill] sm:$0xff] }
 0x51c   :  { %2947 = vmatpush.xpose.msrb.mxu2 %v12612_v13  ;;  %v12619_v13 = vld [vmem:[#allocation232_spill] sm:$0xff] }
 0x51e   :  { %2898 = vmatpush.xpose.msrb.mxu1 %v8979_v52 }
 0x51f   :  { %2845 = vmatpush.xpose.msrb.mxu0 %v12613_v32  ;;  %3004 = vmatpush.xpose.msrb.mxu3 %v8954_v19  ;;  %v12618_v32 = vld [vmem:[#allocation243_spill] sm:$0xff] }
 0x520   :  { %2951 = vmatpush.xpose.msrb.mxu2 %v12614_v62  ;;  %v12621_v62 = vld [vmem:[#allocation236_spill] sm:$0xff] }
 0x522   :  { %2900 = vmatpush.xpose.msrb.mxu1 %v8996_v8 }
 0x523   :  { %2848 = vmatpush.xpose.msrb.mxu0 %v12615_v6  ;;  %3006 = vmatpush.xpose.msrb.mxu3 %v8979_v52  ;;  %v12620_v6 = vld [vmem:[#allocation247_spill] sm:$0xff] }
 0x524   :  { %2955 = vmatpush.xpose.msrb.mxu2 %v12616_v49  ;;  %v12623_v49 = vld [vmem:[#allocation240_spill] sm:$0xff] }
 0x526   :  { %2902 = vmatpush.xpose.msrb.mxu1 %v9017_v26 }
 0x527   :  { %2851 = vmatpush.xpose.msrb.mxu0 %v12617_v57  ;;  %3008 = vmatpush.xpose.msrb.mxu3 %v8996_v8  ;;  %v12622_v57 = vld [vmem:[#allocation252_spill] sm:$0xff] }
 0x528   :  { %2959 = vmatpush.xpose.msrb.mxu2 %v12618_v32  ;;  %v12625_v32 = vld [vmem:[#allocation244_spill] sm:$0xff] }
 0x52a   :  { %2904 = vmatpush.xpose.msrb.mxu1 %v9035_v18 }
 0x52b   :  { %2854 = vmatpush.xpose.msrb.mxu0 %v12619_v13  ;;  %3010 = vmatpush.xpose.msrb.mxu3 %v9017_v26  ;;  %v12624_v13 = vld [vmem:[#allocation256_spill] sm:$0xff] }
 0x52c   :  { %2963 = vmatpush.xpose.msrb.mxu2 %v12620_v6  ;;  %v12627_v6 = vld [vmem:[#allocation248_spill] sm:$0xff] }
 0x52e   :  { %2906 = vmatpush.xpose.msrb.mxu1 %v9057_v58 }
 0x52f   :  { %2857 = vmatpush.xpose.msrb.mxu0 %v12621_v62  ;;  %3012 = vmatpush.xpose.msrb.mxu3 %v9035_v18  ;;  %v12626_v62 = vld [vmem:[#allocation260_spill] sm:$0xff] }
 0x530   :  { %2967 = vmatpush.xpose.msrb.mxu2 %v12622_v57  ;;  %v12629_v57 = vld [vmem:[#allocation253_spill] sm:$0xff] }
 0x532   :  { %2908 = vmatpush.xpose.msrb.mxu1 %v9076_v10 }
 0x533   :  { %2860 = vmatpush.xpose.msrb.mxu0 %v12623_v49  ;;  %3014 = vmatpush.xpose.msrb.mxu3 %v9057_v58  ;;  %v12628_v49 = vld [vmem:[#allocation263_spill] sm:$0xff]  ;;  %v12676_v58 = vld [vmem:[#allocation104_spill] sm:$0xff] }
 0x534   :  { %2971 = vmatpush.xpose.msrb.mxu2 %v12624_v13  ;;  %v12631_v13 = vld [vmem:[#allocation257_spill] sm:$0xff] }
 0x536   :  { %2910 = vmatpush.xpose.msrb.mxu1 %v9094_v36 }
 0x537   :  { %2863 = vmatpush.xpose.msrb.mxu0 %v12625_v32  ;;  %3016 = vmatpush.xpose.msrb.mxu3 %v9076_v10  ;;  %v12630_v32 = vld [vmem:[#allocation266_spill] sm:$0xff]  ;;  %v12670_v10 = vld [vmem:[#allocation95_spill] sm:$0xff] }
 0x538   :  { %2975 = vmatpush.xpose.msrb.mxu2 %v12626_v62  ;;  %v12633_v62 = vld [vmem:[#allocation41_spill] sm:$0xff] }
 0x53a   :  { %2912 = vmatpush.xpose.msrb.mxu1 %v9110_v35 }
 0x53b   :  { %2866 = vmatpush.xpose.msrb.mxu0 %v12627_v6  ;;  %3018 = vmatpush.xpose.msrb.mxu3 %v9094_v36  ;;  %v12632_v6 = vld [vmem:[#allocation268_spill] sm:$0xff]  ;;  %v12661_v36 = vld [vmem:[#allocation81_spill] sm:$0xff] }
 0x53c   :  { %2979 = vmatpush.xpose.msrb.mxu2 %v12628_v49  ;;  %v12638_v49 = vld [vmem:[#allocation20_spill] sm:$0xff] }
 0x53e   :  { %2914 = vmatpush.xpose.msrb.mxu1 %v9136_v43 }
 0x53f   :  { %2869 = vmatpush.xpose.msrb.mxu0 %v12629_v57  ;;  %3020 = vmatpush.xpose.msrb.mxu3 %v9110_v35  ;;  %v12635_v57 = vld [vmem:[#allocation261_spill] sm:$0xff]  ;;  %v12658_v35 = vld [vmem:[#allocation76_spill] sm:$0xff] }
 0x540   :  { %2983 = vmatpush.xpose.msrb.mxu2 %v12630_v32  ;;  %v12636_v32 = vld [vmem:[#allocation42_spill] sm:$0xff] }
 0x542   :  { %2916 = vmatpush.xpose.msrb.mxu1 %v12599_v24 }
 0x543   :  { %2872 = vmatpush.xpose.msrb.mxu0 %v12631_v13  ;;  %3022 = vmatpush.xpose.msrb.mxu3 %v9136_v43  ;;  %v12637_v13 = vld [vmem:[#allocation27_spill] sm:$0xff] }
 0x544   :  { %2987 = vmatpush.xpose.msrb.mxu2 %v12632_v6  ;;  %v12639_v6 = vld [vmem:[#allocation264_spill] sm:$0xff]  ;;  %v12655_v43 = vld [vmem:[#allocation67_spill] sm:$0xff] }
 0x545   :  { %2920 = vmatmul.f32.vlgmr.msrb.gmra.mxu1 %v9463_v37  ;;  %v12642_v37 = vld [vmem:[#allocation21_spill] sm:$0xff] }
 0x546   :  { %3293 = vmatpush.msra.mxu1 %v12633_v62  ;;  %v12640_v62 = vld [vmem:[#allocation45_spill] sm:$0xff] }
 0x547   :  { %2875 = vmatpush.xpose.msrb.mxu0 %v12635_v57  ;;  %3024 = vmatpush.xpose.msrb.mxu3 %v12599_v24  ;;  %v12643_v57 = vld [vmem:[#allocation52_spill] sm:$0xff]  ;;  %v12646_v24 = vld [vmem:[#allocation57_spill] sm:$0xff] }
 0x548   :  { %3391 = vmatpush.msra.mxu2 %v12634_v28  ;;  %3299 = vmatpush.msra.mxu1 %v12636_v32  ;;  %v12641_v28 = vld [vmem:[#allocation28_spill] sm:$0xff]  ;;  %v12644_v32 = vld [vmem:[#allocation30_spill] sm:$0xff] }
 0x549   :  { %2989 = vmatmul.f32.vlgmr.msrb.gmra.mxu2 %v9454_v44 }
 0x54a   :  { %3394 = vmatpush.msra.mxu2 %v12637_v13  ;;  %3026 = vmatmul.f32.vlgmr.msrb.gmra.mxu3 %v9454_v44  ;;  %v12645_v13 = vld [vmem:[#allocation22_spill] sm:$0xff]  ;;  %v12647_v44 = vld [vmem:[#allocation31_spill] sm:$0xff] }
 0x54b   :  { %3444 = vmatpush.msra.mxu3 %v12638_v49  ;;  %2878 = vmatpush.xpose.msrb.mxu0 %v12639_v6  ;;  %v12650_v6 = vld [vmem:[#allocation35_spill] sm:$0xff] }
 0x54c   :  { %3305 = vmatpush.msra.mxu1 %v12640_v62  ;;  %3397 = vmatpush.msra.mxu2 %v12641_v28  ;;  %v12648_v62 = vld [vmem:[#allocation23_spill] sm:$0xff]  ;;  %v12649_v28 = vld [vmem:[#allocation61_spill] sm:$0xff] }
 0x54d   :  { %3446 = vmatpush.msra.mxu3 %v12642_v37 }
 0x54e   :  { %2881 = vmatmul.f32.vlgmr.msrb.gmra.mxu0 %v9457_v50  ;;  %3311 = vmatpush.msra.mxu1 %v12643_v57  ;;  %v12651_v50 = vld [vmem:[#allocation24_spill] sm:$0xff]  ;;  %v12652_v57 = vld [vmem:[#allocation66_spill] sm:$0xff] }
 0x54f   :  { %3248 = vmatpush.msra.mxu0 %v12638_v49  ;;  %3400 = vmatpush.msra.mxu2 %v12644_v32  ;;  %v12653_v32 = vld [vmem:[#allocation38_spill] sm:$0xff] }
 0x550   :  { %3448 = vmatpush.msra.mxu3 %v12645_v13  ;;  %3317 = vmatpush.msra.mxu1 %v12646_v24  ;;  %v12654_v24 = vld [vmem:[#allocation25_spill] sm:$0xff] }
 0x551   :  { %3250 = vmatpush.msra.mxu0 %v12642_v37  ;;  %3403 = vmatpush.msra.mxu2 %v12647_v44  ;;  %v12656_v44 = vld [vmem:[#allocation40_spill] sm:$0xff] }
 0x552   :  { %3450 = vmatpush.msra.mxu3 %v12648_v62  ;;  %3323 = vmatpush.msra.mxu1 %v12649_v28  ;;  %v12657_v28 = vld [vmem:[#allocation29_spill] sm:$0xff] }
 0x553   :  { %3252 = vmatpush.msra.mxu0 %v12645_v13  ;;  %3406 = vmatpush.msra.mxu2 %v12650_v6  ;;  %v12659_v6 = vld [vmem:[#allocation53_spill] sm:$0xff] }
 0x554   :  { %3452 = vmatpush.msra.mxu3 %v12651_v50  ;;  %3329 = vmatpush.msra.mxu1 %v12652_v57  ;;  %v12660_v57 = vld [vmem:[#allocation39_spill] sm:$0xff] }
 0x555   :  { %3254 = vmatpush.msra.mxu0 %v12648_v62  ;;  %3409 = vmatpush.msra.mxu2 %v12653_v32  ;;  %v12662_v32 = vld [vmem:[#allocation54_spill] sm:$0xff] }
 0x556   :  { %3454 = vmatpush.msra.mxu3 %v12654_v24  ;;  %3335 = vmatpush.msra.mxu1 %v12655_v43  ;;  %v12663_v43 = vld [vmem:[#allocation46_spill] sm:$0xff] }
 0x557   :  { %3256 = vmatpush.msra.mxu0 %v12651_v50  ;;  %3412 = vmatpush.msra.mxu2 %v12656_v44  ;;  %v12665_v44 = vld [vmem:[#allocation55_spill] sm:$0xff] }
 0x558   :  { %3456 = vmatpush.msra.mxu3 %v12657_v28  ;;  %3341 = vmatpush.msra.mxu1 %v12658_v35  ;;  %v12666_v35 = vld [vmem:[#allocation47_spill] sm:$0xff] }
 0x559   :  { %3258 = vmatpush.msra.mxu0 %v12654_v24  ;;  %3415 = vmatpush.msra.mxu2 %v12659_v6  ;;  %v12668_v6 = vld [vmem:[#allocation59_spill] sm:$0xff] }
 0x55a   :  { %3458 = vmatpush.msra.mxu3 %v12660_v57  ;;  %3347 = vmatpush.msra.mxu1 %v12661_v36  ;;  %v12669_v36 = vld [vmem:[#allocation48_spill] sm:$0xff] }
 0x55b   :  { %3260 = vmatpush.msra.mxu0 %v12657_v28  ;;  %3418 = vmatpush.msra.mxu2 %v12662_v32  ;;  %v12671_v32 = vld [vmem:[#allocation60_spill] sm:$0xff] }
 0x55c   :  { %3460 = vmatpush.msra.mxu3 %v12663_v43  ;;  %3353 = vmatpush.msra.mxu1 %v12664_v56  ;;  %v12672_v56 = vld [vmem:[#allocation50_spill] sm:$0xff] }
 0x55d   :  { %3262 = vmatpush.msra.mxu0 %v12660_v57  ;;  %3421 = vmatpush.msra.mxu2 %v12665_v44  ;;  %v12674_v44 = vld [vmem:[#allocation64_spill] sm:$0xff] }
 0x55e   :  { %3462 = vmatpush.msra.mxu3 %v12666_v35  ;;  %3359 = vmatpush.msra.mxu1 %v12667_v47  ;;  %v12675_v47 = vld [vmem:[#allocation51_spill] sm:$0xff] }
 0x55f   :  { %3264 = vmatpush.msra.mxu0 %v12663_v43  ;;  %3424 = vmatpush.msra.mxu2 %v12668_v6  ;;  %v12677_v6 = vld [vmem:[#allocation75_spill] sm:$0xff] }
 0x560   :  { %3464 = vmatpush.msra.mxu3 %v12669_v36  ;;  %3365 = vmatpush.msra.mxu1 %v12670_v10  ;;  %v12678_v10 = vld [vmem:[#allocation56_spill] sm:$0xff] }
 0x561   :  { %3266 = vmatpush.msra.mxu0 %v12666_v35  ;;  %3427 = vmatpush.msra.mxu2 %v12671_v32  ;;  %v12681_v32 = vld [vmem:[#allocation65_spill] sm:$0xff] }
 0x562   :  { %3466 = vmatpush.msra.mxu3 %v12672_v56  ;;  %3371 = vmatpush.msra.mxu1 %v12673_v54  ;;  %v12680_v54 = vld [vmem:[#allocation82_spill] sm:$0xff] }
 0x563   :  { %3268 = vmatpush.msra.mxu0 %v12669_v36  ;;  %3430 = vmatpush.msra.mxu2 %v12674_v44  ;;  %v12686_v44 = vld [vmem:[#allocation109_spill] sm:$0xff] }
 0x564   :  { %3468 = vmatpush.msra.mxu3 %v12675_v47  ;;  %3377 = vmatpush.msra.mxu1 %v12676_v58  ;;  %v12682_v58 = vld [vmem:[#allocation70_spill] sm:$0xff] }
 0x565   :  { %3270 = vmatpush.msra.mxu0 %v12672_v56  ;;  %3433 = vmatpush.msra.mxu2 %v12677_v6  ;;  %v12685_v6 = vld [vmem:[#allocation32_spill] sm:$0xff] }
 0x566   :  { %3470 = vmatpush.msra.mxu3 %v12678_v10  ;;  %3383 = vmatpush.msra.mxu1 %v12679_v53  ;;  %v12683_v53 = vld [vmem:[#allocation100_spill] sm:$0xff] }
 0x567   :  { %3272 = vmatpush.msra.mxu0 %v12675_v47  ;;  %3436 = vmatpush.msra.mxu2 %v12680_v54  ;;  %v12684_v54 = vld [vmem:[#allocation105_spill] sm:$0xff] }
 0x568   :  { %3552 = vmatpush.msrb.mxu1 %v12638_v49  ;;  %3472 = vmatpush.msra.mxu3 %v12681_v32 }
 0x569   :  { %3589 = vmatpush.msrb.mxu2 %v12455_v7  ;;  %3274 = vmatpush.msra.mxu0 %v12678_v10 }
 0x56a   :  { %3554 = vmatpush.msrb.mxu1 %v12642_v37  ;;  %3474 = vmatpush.msra.mxu3 %v12682_v58 }
 0x56b   :  { %3591 = vmatpush.msrb.mxu2 %v12458_v38  ;;  %3276 = vmatpush.msra.mxu0 %v12681_v32 }
 0x56c   :  { %3556 = vmatpush.msrb.mxu1 %v12645_v13  ;;  %3634 = vmatpush.msrb.mxu3 %v12683_v53  ;;  %v12687_v53 = vld [vmem:[#allocation33_spill] sm:$0xff] }
 0x56d   :  { %3593 = vmatpush.msrb.mxu2 %v12461_v39  ;;  %3278 = vmatpush.msra.mxu0 %v12682_v58  ;;  %v12688_v13 = vld [vmem:[#allocation113_spill] sm:$0xff] }
 0x56e   :  { %3558 = vmatpush.msrb.mxu1 %v12648_v62  ;;  %3640 = vmatpush.msrb.mxu3 %v12684_v54  ;;  %v12689_v54 = vld [vmem:[#allocation34_spill] sm:$0xff]  ;;  %v12690_v62 = vld [vmem:[#allocation116_spill] sm:$0xff] }
 0x56f   :  { %3595 = vmatpush.msrb.mxu2 %v12464_v61  ;;  %3485 = vmatpush.msrb.mxu0 %v12685_v6  ;;  %v12691_v6 = vld [vmem:[#allocation36_spill] sm:$0xff] }
 0x570   :  { %3560 = vmatpush.msrb.mxu1 %v12651_v50  ;;  %3646 = vmatpush.msrb.mxu3 %v12686_v44  ;;  %v12692_v44 = vld [vmem:[#allocation118_spill] sm:$0xff] }
 0x571   :  { %3597 = vmatpush.msrb.mxu2 %v12467_v59  ;;  %3489 = vmatpush.msrb.mxu0 %v12687_v53  ;;  %v12693_v53 = vld [vmem:[#allocation37_spill] sm:$0xff] }
 0x572   :  { %3562 = vmatpush.msrb.mxu1 %v12654_v24  ;;  %3652 = vmatpush.msrb.mxu3 %v12688_v13  ;;  %v12694_v13 = vld [vmem:[#allocation120_spill] sm:$0xff] }
 0x573   :  { %3599 = vmatpush.msrb.mxu2 %v12470_v9  ;;  %3493 = vmatpush.msrb.mxu0 %v12689_v54  ;;  %v12695_v54 = vld [vmem:[#allocation43_spill] sm:$0xff] }
 0x574   :  { %3564 = vmatpush.msrb.mxu1 %v12657_v28  ;;  %3658 = vmatpush.msrb.mxu3 %v12690_v62  ;;  %v12696_v62 = vld [vmem:[#allocation121_spill] sm:$0xff] }
 0x575   :  { %3601 = vmatpush.msrb.mxu2 %v12473_v4  ;;  %3497 = vmatpush.msrb.mxu0 %v12691_v6  ;;  %v12697_v6 = vld [vmem:[#allocation44_spill] sm:$0xff] }
 0x576   :  { %3566 = vmatpush.msrb.mxu1 %v12660_v57  ;;  %3664 = vmatpush.msrb.mxu3 %v12692_v44  ;;  %v12698_v44 = vld [vmem:[#allocation122_spill] sm:$0xff] }
 0x577   :  { %3603 = vmatpush.msrb.mxu2 %v12476_v22  ;;  %3501 = vmatpush.msrb.mxu0 %v12693_v53  ;;  %v12699_v53 = vld [vmem:[#allocation49_spill] sm:$0xff] }
 0x578   :  { %3568 = vmatpush.msrb.mxu1 %v12663_v43  ;;  %3670 = vmatpush.msrb.mxu3 %v12694_v13  ;;  %v12700_v13 = vld [vmem:[#allocation123_spill] sm:$0xff] }
 0x579   :  { %3605 = vmatpush.msrb.mxu2 %v12479_v45  ;;  %3505 = vmatpush.msrb.mxu0 %v12695_v54  ;;  %v12701_v54 = vld [vmem:[#allocation58_spill] sm:$0xff] }
 0x57a   :  { %3570 = vmatpush.msrb.mxu1 %v12666_v35  ;;  %3676 = vmatpush.msrb.mxu3 %v12696_v62  ;;  %v12702_v62 = vld [vmem:[#allocation133_spill] sm:$0xff] }
 0x57b   :  { %3607 = vmatpush.msrb.mxu2 %v12482_v16  ;;  %3509 = vmatpush.msrb.mxu0 %v12697_v6  ;;  %v12703_v6 = vld [vmem:[#allocation62_spill] sm:$0xff] }
 0x57c   :  { %3572 = vmatpush.msrb.mxu1 %v12669_v36  ;;  %3682 = vmatpush.msrb.mxu3 %v12698_v44  ;;  %v12704_v44 = vld [vmem:[#allocation137_spill] sm:$0xff]  ;;  %v1859_v36 = vpop.f32.mrf.mxu2 }
 0x57d   :  { %3609 = vmatpush.msrb.mxu2 %v12485_v12  ;;  %3513 = vmatpush.msrb.mxu0 %v12699_v53  ;;  %v12705_v53 = vld [vmem:[#allocation63_spill] sm:$0xff] }
 0x57e   :  { %3574 = vmatpush.msrb.mxu1 %v12672_v56  ;;  %3688 = vmatpush.msrb.mxu3 %v12700_v13  ;;  %v12706_v13 = vld [vmem:[#allocation141_spill] sm:$0xff]  ;;  %v1704_v56 = vpop.f32.mrf.mxu0 }
 0x57f   :  { %3611 = vmatpush.msrb.mxu2 %v12488_v60  ;;  %3517 = vmatpush.msrb.mxu0 %v12701_v54  ;;  %v12707_v54 = vld [vmem:[#allocation68_spill] sm:$0xff] }
 0x580   :  { %3576 = vmatpush.msrb.mxu1 %v12675_v47  ;;  %3694 = vmatpush.msrb.mxu3 %v12702_v62  ;;  %v12708_v62 = vld [vmem:[#allocation144_spill] sm:$0xff]  ;;  %v12712_v47 = vld [vmem:[#allocation74_spill] sm:$0xff] }
 0x581   :  { %3613 = vmatpush.msrb.mxu2 %v12491_v30  ;;  %3521 = vmatpush.msrb.mxu0 %v12703_v6  ;;  %v12709_v6 = vld [vmem:[#allocation139_spill] sm:$0xff] }
 0x582   :  { %3578 = vmatpush.msrb.mxu1 %v12678_v10  ;;  %3700 = vmatpush.msrb.mxu3 %v12704_v44  ;;  %v12710_v10 = vld [vmem:[#allocation69_spill] sm:$0xff]  ;;  %v12711_v44 = vld [vmem:[#allocation146_spill] sm:$0xff] }
 0x583   :  { %3615 = vmatpush.msrb.mxu2 %v12494_v33  ;;  %3525 = vmatpush.msrb.mxu0 %v12705_v53  ;;  %v12713_v53 = vld [vmem:[#allocation14_spill] sm:$0xff] }
 0x584   :  { %3580 = vmatpush.msrb.mxu1 %v12681_v32  ;;  %3706 = vmatpush.msrb.mxu3 %v12706_v13  ;;  %v12714_v32 = vld [vmem:[#allocation85_spill] sm:$0xff]  ;;  %v12715_v13 = vld [vmem:[#allocation92_spill] sm:$0xff]  ;;  %v2045_v43 = vpop.f32.mrf.mxu2 }
 0x585   :  { %3617 = vmatpush.msrb.mxu2 %v12497_v42  ;;  %3529 = vmatpush.msrb.mxu0 %v12707_v54  ;;  %v1805_v54 = vpop.f32.mrf.mxu1 }
 0x586   :  { %3582 = vmatpush.msrb.mxu1 %v12682_v58  ;;  %3712 = vmatpush.msrb.mxu3 %v12708_v62  ;;  %v1898_v58 = vpop.f32.mrf.mxu3  ;;  %v1967_v35 = vpop.f32.mrf.mxu0 }
 0x587   :  { %3619 = vmatpush.msrb.mxu2 %v12709_v6  ;;  %3533 = vmatpush.msrb.mxu0 %v12710_v10 }
 0x588   :  { %3718 = vmatpush.msrb.mxu3 %v12711_v44 }
 0x589   :  { %3537 = vmatpush.msrb.mxu0 %v12712_v47 }
 0x58a   :  { %3724 = vmatpush.msrb.mxu3 %v12713_v53  ;;  %v1806_v53 = vadd.f32 %v1805_v54, %v1704_v56 }
 0x58b   :  { %3541 = vmatpush.msrb.mxu0 %v12714_v32 }
 0x58c   :  { %v2308_v24 = vpop.f32.mrf.mxu2  ;;  %v1860_v41 = vadd.f32 %v1859_v36, %v1806_v53 }
 0x58d   :  { %3545 = vmatpush.msrb.mxu0 %v12715_v13  ;;  %v2004_v62 = vpop.f32.mrf.mxu1 }
 0x58e   :  { %v2146_v57 = vpop.f32.mrf.mxu3  ;;  %v2200_v28 = vpop.f32.mrf.mxu0  ;;  %v1899_v19 = vadd.f32 %v1898_v58, %v1860_v41 }
 0x58f   :  { %v2147_v47 = vadd.f32 %v2146_v57, %v2045_v43 }
 0x590   :  { %v1968_v21 = vadd.f32 %v1967_v35, %v1899_v19 }
 0x591   :  { %v2201_v49 = vadd.f32 %v2200_v28, %v2147_v47 }
 0x592   :  { %v2005_v54 = vadd.f32 %v2004_v62, %v1968_v21  ;;  %v272_v21 = vld [vmem:[%s11389_s5] sm:$0xff] }
 0x594   :  { %v2541_v18 = vpop.f32.mrf.mxu2 }
 0x595   :  { %v2239_v10 = vpop.f32.mrf.mxu1 }
 0x596   :  { %v2345_v44 = vpop.f32.mrf.mxu3  ;;  %v2386_v50 = vpop.f32.mrf.mxu0  ;;  %v2240_v26 = vadd.f32 %v2239_v10, %v2201_v49 }
 0x598   :  { %v2309_v29 = vadd.f32 %v2308_v24, %v2240_v26 }
 0x59a   :  { %v2346_v17 = vadd.f32 %v2345_v44, %v2309_v29  ;;  %v7599_v29 = vadd.f32 -0.5, %v272_v21  ;;  %v12717_v21 = vld [vmem:[#allocation5_spill] sm:$0xff] }
 0x59c   :  { %v2727_v14 = vpop.f32.mrf.mxu2 }
 0x59d   :  { %v2487_v37 = vpop.f32.mrf.mxu1 }
 0x59e   :  { %v2488_v32 = vadd.f32 %v2487_v37, %v2386_v50  ;;  %v2580_v13 = vpop.f32.mrf.mxu3  ;;  %v2649_v8 = vpop.f32.mrf.mxu0  ;;  %v3031_v37 = vand.u32 2147483647, %v2346_v17 }
 0x5a0   :  { %v2542_v27 = vadd.f32 %v2541_v18, %v2488_v32  ;;  %v3030_v32 = vand.u32 2147483647, %v2005_v54 }
 0x5a2   :  { %v2581_v2 = vadd.f32 %v2580_v13, %v2542_v27  ;;  %v3034_v24 = vadd.f32 %v3031_v37, %v3030_v32 }
 0x5a4   :  { %v2650_v25 = vadd.f32 %v2649_v8, %v2581_v2  ;;  %v273_v2 = vld [vmem:[%s11389_s5 + $0x8] sm:$0xff] }
 0x5a5   :  { %v2686_v52 = vpop.f32.mrf.mxu1  ;;  %v7600_v41 = vadd.f32 -0.5, %v273_v2 }
 0x5a6   :  { %v2828_v51 = vpop.f32.mrf.mxu3  ;;  %v2687_v28 = vadd.f32 %v2686_v52, %v2650_v25  ;;  %v275_v52 = vld [vmem:[%s11389_s5 + $0x18] sm:$0xff] }
 0x5a7   :  { %v2829_v43 = vadd.f32 %v2828_v51, %v2727_v14  ;;  %v274_v51 = vld [vmem:[%s11389_s5 + $0x10] sm:$0xff]  ;;  %v3063_v37 = vmul.f32 1e-12, %v7600_v41 }
 0x5a8   :  { %v3032_v18 = vand.u32 2147483647, %v2687_v28  ;;  %v7601_v44 = vadd.f32 -0.5, %v274_v51 }
 0x5a9   :  { %v3067_v2 = vadd.f32 %v3063_v37, %v12717_v21  ;;  %v12722_v21 = vld [vmem:[#allocation11_spill] sm:$0xff] }
 0x5aa   :  { %v3035_v27 = vadd.f32 %v3034_v24, %v3032_v18 }
 0x5c2   :  { %v2921_v56 = vpop.f32.mrf.mxu1 }
 0x5cb   :  { %v2882_v57 = vpop.f32.mrf.mxu0 }
 0x5cc   :  { %v2883_v47 = vadd.f32 %v2882_v57, %v2829_v43  ;;  %v2990_v49 = vpop.f32.mrf.mxu2  ;;  %v7602_v57 = vadd.f32 -0.5, %v275_v52 }
 0x5cd   :  { %v3027_v58 = vpop.f32.mrf.mxu3 }
 0x5ce   :  { %v2922_v36 = vadd.f32 %v2921_v56, %v2883_v47  ;;  %v3062_v56 = vmul.f32 1e-12, %v7599_v29  ;;  %v3065_v18 = vmul.f32 1e-12, %v7602_v57  ;;  %v12719_v29 = vld [vmem:[#allocation250_spill] sm:$0xff]  ;;  %v9893_v57 = vld [vmem:[%s11384_s0] sm:$0xff] }
 0x5d0   :  { %v2991_v10 = vadd.f32 %v2990_v49, %v2922_v36  ;;  %v3064_v49 = vmul.f32 1e-12, %v7601_v44  ;;  %v3069_v41 = vadd.f32 %v3065_v18, %v12719_v29  ;;  %v12725_v29 = vld [vmem:[#allocation8_spill] sm:$0xff] }
 0x5d2   :  { %v3028_v26 = vadd.f32 %v3027_v58, %v2991_v10 }
 0x5d4   :  { %v3033_v53 = vand.u32 2147483647, %v3028_v26 }
 0x5d6   :  { %v3036_v19 = vadd.f32 %v3035_v27, %v3033_v53 }
 0x5d8   :  { %3037 = vadd.xlane.f32.xlu1 %v3036_v19  ;;  %v12716_v19 = vld [vmem:[#allocation15_spill] sm:$0xff] }
 0x64b   :  { %v3038_v8 = vpop.xlane.xlu1 %3037 }
 0x64c   :  { %v3039_v14 = vadd.f32 1e-10, %v3038_v8  ;;  %v3066_v8 = vadd.f32 %v3062_v56, %v12716_v19  ;;  %v9901_v56 = vld [vmem:[%s11384_s0 + $0x8] sm:$0xff]  ;;  %v12721_v19 = vld [vmem:[#allocation10_spill] sm:$0xff] }
 0x64e   :  { %7623 = vrcp.f32 %v3039_v14  ;;  %v3051_v13 = vand.u32 2147483648, %v3039_v14  ;;  %v3049_v43 = vand.u32 2147483647, %v3039_v14  ;;  %vm3045_vm10 = vweird.f32 %v3039_v14 }
 0x650   :  { %v3052_v36 = vor.u32 1.1754944e-38, %v3051_v13  ;;  %vm3050_vm12 = vcmp.eq.f32.partialorder %v3049_v43, 8.507059e+37 }
 0x654   :  { %v7624_v62 = vpop.eup %7623 }
 0x655   :  { %v3041_v25 = vmul.f32 %v7624_v62, %v3039_v14  ;;  %vm3046_vm9 = vweird.f32 %v7624_v62 }
 0x656   :  { %vm3047_vm11 = vmor %vm3045_vm10, %vm3046_vm9 }
 0x657   :  { %v3042_v35 = vsub.f32 1.0, %v3041_v25  ;;  %v12718_v25 = vld [vmem:[#allocation204_spill] sm:$0xff] }
 0x658   :  { %v3068_v51 = vadd.f32 %v3064_v49, %v12718_v25  ;;  %v12723_v25 = vld [vmem:[#allocation12_spill] sm:$0xff] }
 0x659   :  { %v3043_v50 = vmul.f32 %v7624_v62, %v3042_v35 }
 0x65b   :  { %v3044_v47 = vadd.f32 %v7624_v62, %v3043_v50 }
 0x65d   :  { %v3048_v32 = vsel %vm3047_vm11, %v7624_v62, %v3044_v47 }
 0x65e   :  { %v3053_v10 = vsel %vm3050_vm12, %v3052_v36, %v3048_v32  ;;  %v9909_v36 = vld [vmem:[%s11384_s0 + $0x10] sm:$0xff]  ;;  %v9917_v32 = vld [vmem:[%s11384_s0 + $0x18] sm:$0xff] }
 0x65f   :  { %v3054_v58 = vmul.f32 %v3053_v10, %v2005_v54  ;;  %v3055_v24 = vmul.f32 %v3053_v10, %v2346_v17  ;;  %v3056_v53 = vmul.f32 %v3053_v10, %v2687_v28  ;;  %v3057_v27 = vmul.f32 %v3053_v10, %v3028_v26 }
 0x661   :  { %v3070_v14 = vmul.f32 0.05, %v3054_v58  ;;  %v3071_v52 = vmul.f32 0.05, %v3055_v24  ;;  %v3072_v35 = vmul.f32 0.05, %v3056_v53 }
 0x662   :  { %v3073_v13 = vmul.f32 0.05, %v3057_v27  ;;  %v12720_v24 = vld [vmem:[#allocation9_spill] sm:$0xff] }
 0x663   :  { %v3074_v62 = vadd.f32 %v3070_v14, %v3066_v8  ;;  %v3075_v44 = vadd.f32 %v3071_v52, %v3067_v2  ;;  %v3076_v50 = vadd.f32 %v3072_v35, %v3068_v51  ;;  %v12724_v52 = vld [vmem:[#allocation7_spill] sm:$0xff] }
 0x664   :  { %v3077_v43 = vadd.f32 %v3073_v13, %v3069_v41  ;;  %v12726_v13 = vld [vmem:[#allocation13_spill] sm:$0xff] }
 0x665   :  { %v3078_v54 = vadd.f32 0.1, %v3074_v62  ;;  %v3079_v17 = vadd.f32 0.1, %v3075_v44  ;;  %v3080_v28 = vadd.f32 0.1, %v3076_v50 }
 0x666   :  { %v3081_v26 = vadd.f32 0.1, %v3077_v43  ;;  %v12727_v50 = vld [vmem:[#allocation17_spill] sm:$0xff] }
 0x667   :  { %v9896_v47 = vsub.f32 %v3078_v54, %v9893_v57  ;;  %v9904_v37 = vsub.f32 %v3079_v17, %v9901_v56  ;;  %v9912_v49 = vsub.f32 %v3080_v28, %v9909_v36 }
 0x668   :  { %v9920_v18 = vsub.f32 %v3081_v26, %v9917_v32 }
 0x669   :  { %v3086_v10 = vmul.f32 %v9896_v47, %v9896_v47  ;;  %v3087_v58 = vmul.f32 %v9904_v37, %v9904_v37  ;;  %v3093_v53 = vsub.f32 %v12720_v24, %v9896_v47  ;;  %v3088_v27 = vmul.f32 %v9912_v49, %v9912_v49 }
 0x66a   :  { %v3094_v8 = vsub.f32 %v12721_v19, %v9904_v37  ;;  %v3095_v2 = vsub.f32 %v12722_v21, %v9912_v49  ;;  %v3096_v51 = vsub.f32 %v12723_v25, %v9920_v18  ;;  %v3097_v35 = vsub.f32 %v9896_v47, %v12724_v52 }
 0x66b   :  { %v3090_v14 = vadd.f32 %v3087_v58, %v3086_v10  ;;  %v3098_v41 = vsub.f32 %v9904_v37, %v12725_v29  ;;  %v3099_v62 = vsub.f32 %v9912_v49, %v12726_v13  ;;  %v3089_v44 = vmul.f32 %v9920_v18, %v9920_v18 }
 0x66c   :  { %v3100_v43 = vsub.f32 %v9920_v18, %v12727_v50  ;;  %v3101_v17 = vmin.f32 %v3093_v53, %v3097_v35  ;;  %vm3186_vm13 = vcmp.le.f32.partialorder %v12724_v52, %v9896_v47  ;;  %vm3190_vm14 = vcmp.le.f32.partialorder %v9896_v47, %v12720_v24 }
 0x66d   :  { %v3091_v54 = vadd.f32 %v3090_v14, %v3088_v27  ;;  %v3102_v28 = vmin.f32 %v3094_v8, %v3098_v41  ;;  %v3103_v26 = vmin.f32 %v3095_v2, %v3099_v62  ;;  %vm3187_vm15 = vcmp.le.f32.partialorder %v12725_v29, %v9904_v37  ;;  %vm9974_vm5 = vmand %vm3186_vm13, %vm3190_vm14 }
 0x66e   :  { %v3104_v10 = vmin.f32 %v3096_v51, %v3100_v43  ;;  %v3105_v5 = vrot.slane %v3101_v17, 4  ;;  %vm3191_vm0 = vcmp.le.f32.partialorder %v9904_v37, %v12721_v19  ;;  %vm3188_vm1 = vcmp.le.f32.partialorder %v12726_v13, %v9912_v49 }
 0x66f   :  { %v3092_v58 = vadd.f32 %v3091_v54, %v3089_v44  ;;  %v3111_v46 = vrot.slane %v3102_v28, 4  ;;  %v3117_v0 = vrot.slane %v3103_v26, 4  ;;  %vm3192_vm2 = vcmp.le.f32.partialorder %v9912_v49, %v12722_v21  ;;  %vm9978_vm6 = vmand %vm3187_vm15, %vm3191_vm0 }
 0x670   :  { %v3123_v23 = vrot.slane %v3104_v10, 4  ;;  %v3106_v1 = vmin.f32 %v3101_v17, %v3105_v5  ;;  %vm3189_vm3 = vcmp.le.f32.partialorder %v12727_v50, %v9920_v18  ;;  %vm3193_vm4 = vcmp.le.f32.partialorder %v9920_v18, %v12723_v25  ;;  %vm9982_vm7 = vmand %vm3188_vm1, %vm3192_vm2 }
 0x671   :  { %v3112_v31 = vmin.f32 %v3102_v28, %v3111_v46  ;;  %v3118_v40 = vmin.f32 %v3103_v26, %v3117_v0  ;;  %vm9986_vm8 = vmand %vm3189_vm3, %vm3193_vm4  ;;  %vm3202_vm9 = vcmp.gt.f32.partialorder %v9896_v47, %v12724_v52  ;;  %vm3203_vm10 = vcmp.gt.f32.partialorder %v9904_v37, %v12725_v29 }
 0x672   :  { %v3124_v63 = vmin.f32 %v3104_v10, %v3123_v23  ;;  %v3107_v20 = vrot.slane %v3106_v1, 2  ;;  %vm3204_vm11 = vcmp.gt.f32.partialorder %v9912_v49, %v12726_v13  ;;  %vm3205_vm12 = vcmp.gt.f32.partialorder %v9920_v18, %v12727_v50 }
 0x673   :  { %v3113_v55 = vrot.slane %v3112_v31, 2  ;;  %v3119_v3 = vrot.slane %v3118_v40, 2  ;;  %vm3214_vm13 = vcmp.gt.f32.partialorder %v12720_v24, %v9896_v47  ;;  %vm3215_vm14 = vcmp.gt.f32.partialorder %v12721_v19, %v9904_v37 }
 0x674   :  { %v3125_v34 = vrot.slane %v3124_v63, 2  ;;  %v3108_v11 = vmin.f32 %v3106_v1, %v3107_v20  ;;  %vm3216_vm15 = vcmp.gt.f32.partialorder %v12722_v21, %v9912_v49  ;;  %vm3217_vm0 = vcmp.gt.f32.partialorder %v12723_v25, %v9920_v18 }
 0x675   :  { %v3114_v48 = vmin.f32 %v3112_v31, %v3113_v55  ;;  %v3120_v27 = vmin.f32 %v3118_v40, %v3119_v3 }
 0x676   :  { %v3126_v53 = vmin.f32 %v3124_v63, %v3125_v34  ;;  %v3109_v8 = vrot.slane %v3108_v11, 1 }
 0x677   :  { %v3115_v2 = vrot.slane %v3114_v48, 1  ;;  %v3121_v51 = vrot.slane %v3120_v27, 1 }
 0x678   :  { %v3127_v14 = vrot.slane %v3126_v53, 1  ;;  %v3110_v35 = vmin.f32 %v3108_v11, %v3109_v8 }
 0x679   :  { %v3116_v41 = vmin.f32 %v3114_v48, %v3115_v2  ;;  %v3122_v62 = vmin.f32 %v3120_v27, %v3121_v51 }
 0x67a   :  { %v3128_v44 = vmin.f32 %v3126_v53, %v3127_v14  ;;  %v3129_v5 = vmul.f32 %v3110_v35, %v3110_v35 }
 0x67b   :  { %v3130_v46 = vmul.f32 %v3116_v41, %v3116_v41  ;;  %v3131_v0 = vmul.f32 %v3122_v62, %v3122_v62 }
 0x67c   :  { %v3132_v43 = vmul.f32 %v3128_v44, %v3128_v44 }
 0x67d   :  { %v3133_v23 = vadd.f32 %v3130_v46, %v3129_v5 }
 0x67f   :  { %v3134_v54 = vadd.f32 %v3133_v23, %v3131_v0  ;;  %v3198_v23 = vsel %vm9974_vm5, %v9896_v47, 0.0 }
 0x681   :  { %v3135_v17 = vadd.f32 %v3134_v54, %v3132_v43  ;;  %v3199_v43 = vsel %vm9978_vm6, %v9904_v37, 0.0  ;;  %v3200_v54 = vsel %vm9982_vm7, %v9912_v49, 0.0 }
 0x683   :  { %v9946_v28 = vsub.f32 %v3092_v58, %v3135_v17  ;;  %v3201_v17 = vsel %vm9986_vm8, %v9920_v18, 0.0 }
 0x685   :  { %3138 = vrot.lane.b32.xlu2 %v9946_v28, %s7670_s4 }
 0x6df   :  { %v3139_v1 = vpop.permute.xlu2 %3138 }
 0x6e0   :  { %v3141_v31 = vmin.f32 %v9946_v28, %v3139_v1  ;;  %v3142_v63 = vmax.f32 %v9946_v28, %v3139_v1  ;;  %v3206_v1 = vsel %vm3202_vm9, %v12724_v52, 0.0  ;;  %v12774_v52 = vld [vmem:[#allocation174_spill] sm:$0xff] }
 0x6e2   :  { %3150 = vrot.lane.b32.xlu1 %v3142_v63, %s7671_s17  ;;  %3144 = vrot.lane.b32.xlu0 %v3141_v31, %s7671_s17 }
 0x754   :  { %v3151_v40 = vpop.permute.xlu1 %3150  ;;  %v3145_v34 = vpop.permute.xlu0 %3144 }
 0x755   :  { %v3153_v55 = vmin.f32 %v3142_v63, %v3151_v40  ;;  %v3154_v11 = vmax.f32 %v3142_v63, %v3151_v40  ;;  %v3147_v3 = vmin.f32 %v3141_v31, %v3145_v34  ;;  %v3148_v20 = vmax.f32 %v3141_v31, %v3145_v34 }
 0x756   :  { %v3207_v31 = vsel %vm3203_vm10, %v12725_v29, 0.0  ;;  %v3208_v63 = vsel %vm3204_vm11, %v12726_v13, 0.0  ;;  %v3209_v40 = vsel %vm3205_vm12, %v12727_v50, 0.0  ;;  %v3210_v34 = vadd.f32 %v3206_v1, %v3198_v23  ;;  %v12738_v23 = vld [vmem:[#allocation83_spill] sm:$0xff]  ;;  %v12770_v50 = vld [vmem:[#allocation136_spill] sm:$0xff]  ;;  %v12772_v13 = vld [vmem:[#allocation149_spill] sm:$0xff] }
 0x757   :  { %v3156_v48 = vmax.f32 %v3153_v55, %v3148_v20  ;;  %3174 = vrot.lane.b32.xlu1 %v3154_v11, %s7672_s18  ;;  %3158 = vrot.lane.b32.xlu2 %v3147_v3, %s7672_s18  ;;  %v3155_v26 = vmin.f32 %v3153_v55, %v3148_v20  ;;  %v3211_v55 = vadd.f32 %v3207_v31, %v3199_v43  ;;  %v3218_v20 = vsel %vm3214_vm13, %v12720_v24, 0.0  ;;  %v12740_v31 = vld [vmem:[#allocation90_spill] sm:$0xff]  ;;  %v12773_v29 = vld [vmem:[#allocation140_spill] sm:$0xff] }
 0x758   :  { %v12778_v24 = vld [vmem:[#allocation178_spill] sm:$0xff] }
 0x759   :  { %3163 = vrot.lane.b32.xlu0 %v3156_v48, %s7672_s18 }
 0x75f   :  { %3169 = vrot.lane.b32.xlu2 %v3155_v26, %s7672_s18 }
 0x7b1   :  { %v3159_v10 = vpop.permute.xlu2 %3158 }
 0x7b2   :  { %v3161_v2 = vmax.f32 %v3147_v3, %v3159_v10  ;;  %v3213_v3 = vadd.f32 %v3209_v40, %v3201_v17  ;;  %v3221_v10 = vsel %vm3217_vm0, %v12723_v25, 0.0  ;;  %v12775_v25 = vld [vmem:[#allocation152_spill] sm:$0xff] }
 0x7b9   :  { %v3170_v58 = vpop.permute.xlu2 %3169 }
 0x7ba   :  { %v3172_v51 = vmax.f32 %v3155_v26, %v3170_v58  ;;  %v3220_v26 = vsel %vm3216_vm15, %v12722_v21, 0.0  ;;  %v3222_v58 = vadd.f32 %v3218_v20, %v3210_v34  ;;  %v12742_v34 = vld [vmem:[#allocation96_spill] sm:$0xff]  ;;  %v12746_v20 = vld [vmem:[#allocation106_spill] sm:$0xff]  ;;  %v12776_v21 = vld [vmem:[#allocation19_spill] sm:$0xff] }
 0x7bc   :  { %v3226_v37 = vadd.f32 %v9893_v57, %v3222_v58  ;;  %v12750_v58 = vld [vmem:[#allocation114_spill] sm:$0xff] }
 0x7c9   :  { %v3175_v27 = vpop.permute.xlu1 %3174 }
 0x7ca   :  { %v3177_v53 = vmin.f32 %v3154_v11, %v3175_v27  ;;  %v3212_v11 = vadd.f32 %v3208_v63, %v3200_v54  ;;  %v12739_v54 = vld [vmem:[#allocation86_spill] sm:$0xff]  ;;  %v12741_v63 = vld [vmem:[#allocation77_spill] sm:$0xff] }
 0x7cb   :  { %v3164_v8 = vpop.permute.xlu0 %3163 }
 0x7cc   :  { %v3166_v14 = vmin.f32 %v3156_v48, %v3164_v8  ;;  %v3178_v35 = vmin.f32 %v3177_v53, %v3172_v51  ;;  %v3219_v48 = vsel %vm3215_vm14, %v12721_v19, 0.0  ;;  %v3224_v47 = vadd.f32 %v3220_v26, %v3212_v11  ;;  %v12744_v11 = vld [vmem:[#allocation101_spill] sm:$0xff]  ;;  %v12748_v26 = vld [vmem:[#allocation111_spill] sm:$0xff] }
 0x7cd   :  { %v3223_v27 = vadd.f32 %v3219_v48, %v3211_v55  ;;  %v3225_v53 = vadd.f32 %v3221_v10, %v3213_v3  ;;  %v12743_v55 = vld [vmem:[#allocation78_spill] sm:$0xff]  ;;  %v12745_v3 = vld [vmem:[#allocation80_spill] sm:$0xff]  ;;  %v12749_v10 = vld [vmem:[#allocation93_spill] sm:$0xff] }
 0x7ce   :  { %v3167_v41 = vmax.f32 %v3166_v14, %v3161_v2  ;;  %v3234_v49 = vadd.f32 %v9909_v36, %v3224_v47  ;;  %v12747_v48 = vld [vmem:[#allocation88_spill] sm:$0xff]  ;;  %v12752_v47 = vld [vmem:[#allocation117_spill] sm:$0xff]  ;;  %v12777_v19 = vld [vmem:[#allocation143_spill] sm:$0xff] }
 0x7cf   :  { %v3230_v8 = vadd.f32 %v9901_v56, %v3223_v27  ;;  %v3238_v18 = vadd.f32 %v9917_v32, %v3225_v53  ;;  %v12751_v27 = vld [vmem:[#allocation97_spill] sm:$0xff]  ;;  %v12753_v53 = vld [vmem:[#allocation102_spill] sm:$0xff] }
 0x7d0   :  { %v3179_v62 = vmax.f32 %v3178_v35, %v3167_v41 }
 0x7d2   :  { %3182 = vperm.xlu0 %7617, %v3179_v62  }
 0x844   :  { %v3183_v2 = vpop.permute.xlu0 %3182 }
 0x845   :  { %vm3185_vm1 = vcmp.ge.f32.partialorder %v9946_v28, %v3183_v2  ;;  %v12758_v2 = vld [vmem:[#allocation130_spill] sm:$0xff] }
 0x846   :  { %v3227_v51 = vsel %vm3185_vm1, %v3226_v37, %v9893_v57  ;;  %v3231_v14 = vsel %vm3185_vm1, %v3230_v8, %v9901_v56  ;;  %v10034_v35 = vsel %vm3185_vm1, %v3234_v49, %v9909_v36  ;;  %v10037_v41 = vsel %vm3185_vm1, %v3238_v18, %v9917_v32  ;;  %v12754_v37 = vld [vmem:[#allocation119_spill] sm:$0xff]  ;;  %v12757_v18 = vld [vmem:[#allocation112_spill] sm:$0xff] }
 0x847   :  { %v3228_v62 = vmax.f32 %v3227_v51, 0.0  ;;  %v3232_v44 = vmax.f32 %v3231_v14, 0.0  ;;  %v12755_v8 = vld [vmem:[#allocation107_spill] sm:$0xff]  ;;  %v12760_v14 = vld [vmem:[#allocation134_spill] sm:$0xff] }
 0x848   :  { %v12756_v49 = vld [vmem:[#allocation127_spill] sm:$0xff] }
 0x849   :  { %v10039_v5 = vmin.f32 %v3228_v62, 1.0  ;;  %v10041_v46 = vmin.f32 %v3232_v44, 1.0  ;;  %v12759_v51 = vld [vmem:[#allocation115_spill] sm:$0xff]  ;;  %v12761_v62 = vld [vmem:[#allocation126_spill] sm:$0xff] }
 0x84a   :  { %v12762_v44 = vld [vmem:[#allocation138_spill] sm:$0xff] }
 0x84b   :  { %12736 = vst [vmem:[#allocation71_spill] sm:$0xff] %v10039_v5  ;;  %v10044_v0 = vand.u32 4294901760, %v10041_v46  ;;  %v3279_v28 = vand.u32 4294901760, %v10039_v5 }
 0x84c   :  { %12737 = vst [vmem:[#allocation72_spill] sm:$0xff] %v10041_v46 }
 0x84d   :  { %v10049_v57 = vsub.f32 %v10041_v46, %v10044_v0  ;;  %3385 = vmatmul.f32.vlgmr.msra.gmra.mxu1 %v3279_v28  ;;  %v3280_v56 = vsub.f32 %v10039_v5, %v3279_v28  ;;  %v12780_v46 = vld [vmem:[#allocation148_spill] sm:$0xff]  ;;  %v12781_v5 = vld [vmem:[#allocation182_spill] sm:$0xff] }
 0x84e   :  { %3785 = vmatpush.msra.mxu1 %v12455_v7 }
 0x84f   :  { %v3622_v36 = vand.u32 4294901760, %v10049_v57  ;;  %3439 = vmatmul.f32.vlgmr.msra.gmra.mxu2 %v3280_v56  ;;  %v3281_v32 = vand.u32 4294901760, %v3280_v56 }
 0x850   :  { %3787 = vmatpush.msra.mxu1 %v12458_v38  ;;  %3826 = vmatpush.msra.mxu2 %v12738_v23 }
 0x851   :  { %3478 = vmatmul.f32.vlgmr.msra.gmra.mxu3 %v3281_v32  ;;  %v3282_v43 = vsub.f32 %v3280_v56, %v3281_v32  ;;  %v3623_v17 = vsub.f32 %v10049_v57, %v3622_v36  ;;  %v12764_v56 = vld [vmem:[#allocation142_spill] sm:$0xff]  ;;  %v12765_v32 = vld [vmem:[#allocation132_spill] sm:$0xff] }
 0x852   :  { %3789 = vmatpush.msra.mxu1 %v12461_v39  ;;  %3830 = vmatpush.msra.mxu2 %v12739_v54 }
 0x853   :  { %3893 = vmatpush.msra.mxu3 %v12455_v7  ;;  %v3283_v1 = vand.u32 4294901760, %v3282_v43  ;;  %v3624_v40 = vand.u32 4294901760, %v3623_v17  ;;  %v12766_v43 = vld [vmem:[#allocation162_spill] sm:$0xff]  ;;  %v12767_v17 = vld [vmem:[#allocation145_spill] sm:$0xff] }
 0x854   :  { %3791 = vmatpush.msra.mxu1 %v12464_v61  ;;  %3834 = vmatpush.msra.mxu2 %v12740_v31 }
 0x855   :  { %3895 = vmatpush.msra.mxu3 %v12458_v38  ;;  %3284 = vmatmul.f32.vlgmr.msra.gmra.mxu0 %v3283_v1  ;;  %v12768_v1 = vld [vmem:[#allocation166_spill] sm:$0xff] }
 0x856   :  { %3584 = vmatmul.f32.vlgmr.msrb.gmra.mxu1 %v3279_v28  ;;  %3732 = vmatpush.msra.mxu0 %v12741_v63 }
 0x857   :  { %3793 = vmatpush.msra.mxu1 %v12467_v59  ;;  %3838 = vmatpush.msra.mxu2 %v12742_v34 }
 0x858   :  { %3897 = vmatpush.msra.mxu3 %v12461_v39  ;;  %3625 = vmatmul.f32.vlgmr.msrb.gmra.mxu2 %v3624_v40  ;;  %v12769_v40 = vld [vmem:[#allocation147_spill] sm:$0xff] }
 0x859   :  { %3735 = vmatpush.msra.mxu0 %v12743_v55  ;;  %3795 = vmatpush.msra.mxu1 %v12470_v9 }
 0x85a   :  { %3842 = vmatpush.msra.mxu2 %v12744_v11  ;;  %3899 = vmatpush.msra.mxu3 %v12464_v61 }
 0x85b   :  { %3726 = vmatmul.f32.vlgmr.msrb.gmra.mxu3 %v10044_v0  ;;  %3738 = vmatpush.msra.mxu0 %v12745_v3 }
 0x85c   :  { %3797 = vmatpush.msra.mxu1 %v12473_v4  ;;  %3846 = vmatpush.msra.mxu2 %v12746_v20 }
 0x85d   :  { %3901 = vmatpush.msra.mxu3 %v12467_v59  ;;  %3741 = vmatpush.msra.mxu0 %v12747_v48 }
 0x85e   :  { %3799 = vmatpush.msra.mxu1 %v12476_v22  ;;  %3850 = vmatpush.msra.mxu2 %v12748_v26 }
 0x85f   :  { %3903 = vmatpush.msra.mxu3 %v12470_v9  ;;  %3547 = vmatmul.f32.vlgmr.msrb.gmra.mxu0 %v3279_v28  ;;  %v12763_v28 = vld [vmem:[#allocation129_spill] sm:$0xff] }
 0x860   :  { %3744 = vmatpush.msra.mxu0 %v12749_v10  ;;  %3801 = vmatpush.msra.mxu1 %v12479_v45 }
 0x861   :  { %3854 = vmatpush.msra.mxu2 %v12750_v58  ;;  %3905 = vmatpush.msra.mxu3 %v12473_v4 }
 0x862   :  { %3747 = vmatpush.msra.mxu0 %v12751_v27  ;;  %3803 = vmatpush.msra.mxu1 %v12482_v16 }
 0x863   :  { %3858 = vmatpush.msra.mxu2 %v12752_v47  ;;  %3907 = vmatpush.msra.mxu3 %v12476_v22 }
 0x864   :  { %3750 = vmatpush.msra.mxu0 %v12753_v53  ;;  %3805 = vmatpush.msra.mxu1 %v12485_v12 }
 0x865   :  { %3862 = vmatpush.msra.mxu2 %v12754_v37  ;;  %3909 = vmatpush.msra.mxu3 %v12479_v45 }
 0x866   :  { %3753 = vmatpush.msra.mxu0 %v12755_v8  ;;  %3807 = vmatpush.msra.mxu1 %v12488_v60 }
 0x867   :  { %3866 = vmatpush.msra.mxu2 %v12756_v49  ;;  %3911 = vmatpush.msra.mxu3 %v12482_v16 }
 0x868   :  { %3756 = vmatpush.msra.mxu0 %v12757_v18  ;;  %3809 = vmatpush.msra.mxu1 %v12491_v30 }
 0x869   :  { %3870 = vmatpush.msra.mxu2 %v12758_v2  ;;  %3913 = vmatpush.msra.mxu3 %v12485_v12  ;;  %v12850_v2 = vld [vmem:[#allocation265_spill] sm:$0xff] }
 0x86a   :  { %3759 = vmatpush.msra.mxu0 %v12759_v51  ;;  %3811 = vmatpush.msra.mxu1 %v12494_v33 }
 0x86b   :  { %3874 = vmatpush.msra.mxu2 %v12760_v14  ;;  %3915 = vmatpush.msra.mxu3 %v12488_v60 }
 0x86c   :  { %3762 = vmatpush.msra.mxu0 %v12761_v62  ;;  %3813 = vmatpush.msra.mxu1 %v12497_v42  ;;  %v12827_v62 = vld [vmem:[#allocation154_spill] sm:$0xff] }
 0x86d   :  { %3878 = vmatpush.msra.mxu2 %v12762_v44  ;;  %3917 = vmatpush.msra.mxu3 %v12491_v30 }
 0x86e   :  { %3765 = vmatpush.msra.mxu0 %v12763_v28  ;;  %3815 = vmatpush.msra.mxu1 %v12709_v6  ;;  %v12821_v28 = vld [vmem:[#allocation209_spill] sm:$0xff] }
 0x86f   :  { %3882 = vmatpush.msra.mxu2 %v12764_v56  ;;  %3919 = vmatpush.msra.mxu3 %v12494_v33  ;;  %v12811_v56 = vld [vmem:[#allocation181_spill] sm:$0xff] }
 0x870   :  { %3819 = vmatmul.f32.vlgmr.msra.gmra.mxu1 %v3622_v36  ;;  %3768 = vmatpush.msra.mxu0 %v12765_v32  ;;  %v12771_v36 = vld [vmem:[#allocation170_spill] sm:$0xff]  ;;  %v12812_v32 = vld [vmem:[#allocation213_spill] sm:$0xff] }
 0x871   :  { %3975 = vmatpush.msrb.mxu1 %v12766_v43  ;;  %3886 = vmatpush.msra.mxu2 %v12767_v17  ;;  %v12801_v17 = vld [vmem:[#allocation180_spill] sm:$0xff]  ;;  %v12806_v43 = vld [vmem:[#allocation207_spill] sm:$0xff] }
 0x872   :  { %3921 = vmatpush.msra.mxu3 %v12497_v42  ;;  %3888 = vmatmul.f32.vlgmr.msra.gmra.mxu2 %v10044_v0 }
 0x873   :  { %3981 = vmatpush.msrb.mxu1 %v12768_v1  ;;  %4073 = vmatpush.msrb.mxu2 %v12769_v40  ;;  %v12791_v1 = vld [vmem:[#allocation167_spill] sm:$0xff]  ;;  %v12797_v40 = vld [vmem:[#allocation200_spill] sm:$0xff] }
 0x874   :  { %3771 = vmatpush.msra.mxu0 %v12770_v50  ;;  %3923 = vmatpush.msra.mxu3 %v12709_v6  ;;  %v12809_v50 = vld [vmem:[#allocation210_spill] sm:$0xff] }
 0x875   :  { %3925 = vmatmul.f32.vlgmr.msra.gmra.mxu3 %v10044_v0  ;;  %3987 = vmatpush.msrb.mxu1 %v12771_v36  ;;  %v12779_v0 = vld [vmem:[#allocation155_spill] sm:$0xff]  ;;  %v12782_v36 = vld [vmem:[#allocation158_spill] sm:$0xff] }
 0x876   :  { %4076 = vmatpush.msrb.mxu2 %v12772_v13  ;;  %4126 = vmatpush.msrb.mxu3 %v12538_v15  ;;  %v12790_v13 = vld [vmem:[#allocation194_spill] sm:$0xff] }
 0x877   :  { %3774 = vmatpush.msra.mxu0 %v12773_v29  ;;  %3993 = vmatpush.msrb.mxu1 %v12774_v52  ;;  %v12783_v52 = vld [vmem:[#allocation150_spill] sm:$0xff]  ;;  %v12794_v29 = vld [vmem:[#allocation172_spill] sm:$0xff] }
 0x878   :  { %4079 = vmatpush.msrb.mxu2 %v12775_v25  ;;  %4128 = vmatpush.msrb.mxu3 %v12776_v21  ;;  %v12784_v25 = vld [vmem:[#allocation186_spill] sm:$0xff] }
 0x879   :  { %3777 = vmatpush.msra.mxu0 %v12777_v19  ;;  %3999 = vmatpush.msrb.mxu1 %v12778_v24  ;;  %v12785_v19 = vld [vmem:[#allocation161_spill] sm:$0xff]  ;;  %v12787_v24 = vld [vmem:[#allocation190_spill] sm:$0xff] }
 0x87a   :  { %3780 = vmatmul.f32.vlgmr.msra.gmra.mxu0 %v10049_v57  ;;  %4082 = vmatpush.msrb.mxu2 %v12779_v0  ;;  %v12786_v57 = vld [vmem:[#allocation153_spill] sm:$0xff]  ;;  %v12788_v0 = vld [vmem:[#allocation164_spill] sm:$0xff] }
 0x87b   :  { %3930 = vmatpush.msrb.mxu0 %v12538_v15  ;;  %4130 = vmatpush.msrb.mxu3 %v12780_v46 }
 0x87c   :  { %4005 = vmatpush.msrb.mxu1 %v12781_v5  ;;  %4085 = vmatpush.msrb.mxu2 %v12782_v36  ;;  %v12789_v5 = vld [vmem:[#allocation156_spill] sm:$0xff]  ;;  %v3236_v36 = vmax.f32 %v10034_v35, 0.0 }
 0x87d   :  { %3932 = vmatpush.msrb.mxu0 %v12776_v21  ;;  %4132 = vmatpush.msrb.mxu3 %v12783_v52  ;;  %v12798_v35 = vld [vmem:[#allocation176_spill] sm:$0xff] }
 0x87e   :  { %4011 = vmatpush.msrb.mxu1 %v12784_v25  ;;  %4088 = vmatpush.msrb.mxu2 %v12785_v19  ;;  %v12792_v25 = vld [vmem:[#allocation159_spill] sm:$0xff]  ;;  %v12793_v19 = vld [vmem:[#allocation197_spill] sm:$0xff] }
 0x87f   :  { %3934 = vmatpush.msrb.mxu0 %v12780_v46  ;;  %4134 = vmatpush.msrb.mxu3 %v12786_v57 }
 0x880   :  { %4017 = vmatpush.msrb.mxu1 %v12787_v24  ;;  %4091 = vmatpush.msrb.mxu2 %v12788_v0  ;;  %v12795_v24 = vld [vmem:[#allocation160_spill] sm:$0xff]  ;;  %v10160_v0 = vmin.f32 %v3236_v36, 1.0 }
 0x881   :  { %3936 = vmatpush.msrb.mxu0 %v12783_v52  ;;  %4136 = vmatpush.msrb.mxu3 %v12789_v5  ;;  %v12804_v36 = vld [vmem:[#allocation184_spill] sm:$0xff] }
 0x882   :  { %4023 = vmatpush.msrb.mxu1 %v12790_v13  ;;  %4094 = vmatpush.msrb.mxu2 %v12791_v1  ;;  %12796 = vst [vmem:[#allocation73_spill] sm:$0xff] %v10160_v0  ;;  %v12799_v13 = vld [vmem:[#allocation165_spill] sm:$0xff]  ;;  %v12800_v1 = vld [vmem:[#allocation18_spill] sm:$0xff] }
 0x883   :  { %3938 = vmatpush.msrb.mxu0 %v12786_v57  ;;  %4138 = vmatpush.msrb.mxu3 %v12792_v25 }
 0x884   :  { %4029 = vmatpush.msrb.mxu1 %v12793_v19  ;;  %4097 = vmatpush.msrb.mxu2 %v12794_v29  ;;  %v12802_v19 = vld [vmem:[#allocation169_spill] sm:$0xff] }
 0x885   :  { %3940 = vmatpush.msrb.mxu0 %v12789_v5  ;;  %4140 = vmatpush.msrb.mxu3 %v12795_v24  ;;  %v12803_v29 = vld [vmem:[#allocation205_spill] sm:$0xff] }
 0x886   :  { %4035 = vmatpush.msrb.mxu1 %v12797_v40  ;;  %4100 = vmatpush.msrb.mxu2 %v12798_v35  ;;  %v10173_v40 = vand.u32 4294901760, %v10160_v0  ;;  %v12805_v35 = vld [vmem:[#allocation173_spill] sm:$0xff] }
 0x887   :  { %3942 = vmatpush.msrb.mxu0 %v12792_v25  ;;  %4142 = vmatpush.msrb.mxu3 %v12799_v13 }
 0x888   :  { %4041 = vmatpush.msrb.mxu1 %v12800_v1  ;;  %4103 = vmatpush.msrb.mxu2 %v12801_v17  ;;  %v12807_v1 = vld [vmem:[#allocation188_spill] sm:$0xff]  ;;  %v12808_v17 = vld [vmem:[#allocation177_spill] sm:$0xff] }
 0x889   :  { %3944 = vmatpush.msrb.mxu0 %v12795_v24  ;;  %4144 = vmatpush.msrb.mxu3 %v12802_v19 }
 0x88a   :  { %4047 = vmatpush.msrb.mxu1 %v12803_v29  ;;  %4106 = vmatpush.msrb.mxu2 %v12804_v36  ;;  %v12810_v29 = vld [vmem:[#allocation192_spill] sm:$0xff]  ;;  %v3962_v36 = vsub.f32 %v10160_v0, %v10173_v40  ;;  %v12816_v0 = vld [vmem:[#allocation189_spill] sm:$0xff] }
 0x88b   :  { %3946 = vmatpush.msrb.mxu0 %v12799_v13  ;;  %4146 = vmatpush.msrb.mxu3 %v12805_v35 }
 0x88c   :  { %4053 = vmatpush.msrb.mxu1 %v12806_v43  ;;  %4109 = vmatpush.msrb.mxu2 %v12807_v1  ;;  %v12813_v43 = vld [vmem:[#allocation196_spill] sm:$0xff]  ;;  %v12814_v1 = vld [vmem:[#allocation185_spill] sm:$0xff] }
 0x88d   :  { %3948 = vmatpush.msrb.mxu0 %v12802_v19  ;;  %4148 = vmatpush.msrb.mxu3 %v12808_v17 }
 0x88e   :  { %4059 = vmatpush.msrb.mxu1 %v12809_v50  ;;  %4112 = vmatpush.msrb.mxu2 %v12810_v29  ;;  %v12815_v50 = vld [vmem:[#allocation199_spill] sm:$0xff]  ;;  %v3963_v29 = vand.u32 4294901760, %v3962_v36 }
 0x88f   :  { %3950 = vmatpush.msrb.mxu0 %v12805_v35  ;;  %4150 = vmatpush.msrb.mxu3 %v12811_v56 }
 0x890   :  { %4065 = vmatpush.msrb.mxu1 %v12812_v32  ;;  %4115 = vmatpush.msrb.mxu2 %v12813_v43  ;;  %v12817_v32 = vld [vmem:[#allocation203_spill] sm:$0xff]  ;;  %v12818_v43 = vld [vmem:[#allocation193_spill] sm:$0xff]  ;;  %v3964_v44 = vsub.f32 %v3962_v36, %v3963_v29 }
 0x891   :  { %3952 = vmatpush.msrb.mxu0 %v12808_v17  ;;  %4152 = vmatpush.msrb.mxu3 %v12814_v1 }
 0x892   :  { %4067 = vmatmul.f32.vlgmr.msrb.gmra.mxu1 %v10173_v40  ;;  %4118 = vmatpush.msrb.mxu2 %v12815_v50  ;;  %v12819_v50 = vld [vmem:[#allocation206_spill] sm:$0xff]  ;;  %v3965_v14 = vand.u32 4294901760, %v3964_v44 }
 0x893   :  { %4234 = vmatpush.msra.mxu1 %v12538_v15  ;;  %3954 = vmatpush.msrb.mxu0 %v12811_v56  ;;  %v12820_v15 = vld [vmem:[#allocation226_spill] sm:$0xff] }
 0x894   :  { %4154 = vmatpush.msrb.mxu3 %v12816_v0  ;;  %4121 = vmatmul.f32.vlgmr.msrb.gmra.mxu2 %v3962_v36  ;;  %v12823_v36 = vld [vmem:[#allocation212_spill] sm:$0xff]  ;;  %v12828_v44 = vld [vmem:[#allocation238_spill] sm:$0xff] }
 0x895   :  { %4236 = vmatpush.msra.mxu1 %v12776_v21  ;;  %4271 = vmatpush.msra.mxu2 %v12817_v32  ;;  %v12822_v21 = vld [vmem:[#allocation230_spill] sm:$0xff] }
 0x896   :  { %3956 = vmatpush.msrb.mxu0 %v12814_v1  ;;  %4156 = vmatpush.msrb.mxu3 %v12818_v43 }
 0x897   :  { %4160 = vmatmul.f32.vlgmr.msrb.gmra.mxu3 %v3963_v29  ;;  %4238 = vmatpush.msra.mxu1 %v12780_v46  ;;  %v3240_v29 = vmax.f32 %v10037_v41, 0.0  ;;  %v12824_v46 = vld [vmem:[#allocation151_spill] sm:$0xff]  ;;  %v12830_v41 = vld [vmem:[#allocation218_spill] sm:$0xff] }
 0x898   :  { %4273 = vmatpush.msra.mxu2 %v12819_v50  ;;  %4316 = vmatpush.msra.mxu3 %v12820_v15  ;;  %v12825_v15 = vld [vmem:[#allocation234_spill] sm:$0xff] }
 0x899   :  { %3958 = vmatpush.msrb.mxu0 %v12816_v0  ;;  %4240 = vmatpush.msra.mxu1 %v12783_v52  ;;  %v12826_v52 = vld [vmem:[#allocation215_spill] sm:$0xff] }
 0x89a   :  { %4275 = vmatpush.msra.mxu2 %v12821_v28  ;;  %4322 = vmatpush.msra.mxu3 %v12822_v21  ;;  %v10217_v21 = vmin.f32 %v3240_v29, 1.0  ;;  %v12836_v29 = vld [vmem:[#allocation225_spill] sm:$0xff] }
 0x89b   :  { %3960 = vmatpush.msrb.mxu0 %v12818_v43  ;;  %4242 = vmatpush.msra.mxu1 %v12786_v57  ;;  %v12832_v57 = vld [vmem:[#allocation242_spill] sm:$0xff] }
 0x89c   :  { %3966 = vmatmul.f32.vlgmr.msrb.gmra.mxu0 %v3965_v14  ;;  %4277 = vmatpush.msra.mxu2 %v12823_v36  ;;  %12829 = vst [vmem:[#allocation79_spill] sm:$0xff] %v10217_v21  ;;  %v12831_v14 = vld [vmem:[#allocation157_spill] sm:$0xff] }
 0x89d   :  { %4167 = vmatpush.msra.mxu0 %v12824_v46  ;;  %4328 = vmatpush.msra.mxu3 %v12825_v15  ;;  %v12833_v15 = vld [vmem:[#allocation222_spill] sm:$0xff]  ;;  %v12834_v46 = vld [vmem:[#allocation16_spill] sm:$0xff] }
 0x89e   :  { %4244 = vmatpush.msra.mxu1 %v12789_v5  ;;  %4279 = vmatpush.msra.mxu2 %v12826_v52  ;;  %v12835_v5 = vld [vmem:[#allocation246_spill] sm:$0xff] }
 0x89f   :  { %4171 = vmatpush.msra.mxu0 %v12827_v62  ;;  %4334 = vmatpush.msra.mxu3 %v12828_v44  ;;  %v10228_v44 = vand.u32 4294901760, %v10217_v21  ;;  %v12837_v62 = vld [vmem:[#allocation163_spill] sm:$0xff] }
 0x8a0   :  { %4246 = vmatpush.msra.mxu1 %v12792_v25  ;;  %4281 = vmatpush.msra.mxu2 %v12830_v41  ;;  %v12843_v25 = vld [vmem:[#allocation171_spill] sm:$0xff] }
 0x8a1   :  { %4175 = vmatpush.msra.mxu0 %v12831_v14  ;;  %4340 = vmatpush.msra.mxu3 %v12832_v57  ;;  %v12838_v14 = vld [vmem:[#allocation251_spill] sm:$0xff]  ;;  %v12839_v57 = vld [vmem:[#allocation229_spill] sm:$0xff] }
 0x8a2   :  { %4248 = vmatpush.msra.mxu1 %v12795_v24  ;;  %4283 = vmatpush.msra.mxu2 %v12833_v15  ;;  %v12840_v24 = vld [vmem:[#allocation168_spill] sm:$0xff] }
 0x8a3   :  { %4179 = vmatpush.msra.mxu0 %v12834_v46  ;;  %4346 = vmatpush.msra.mxu3 %v12835_v5  ;;  %v12841_v46 = vld [vmem:[#allocation255_spill] sm:$0xff]  ;;  %v10240_v5 = vsub.f32 %v10217_v21, %v10228_v44  ;;  %v12848_v21 = vld [vmem:[#allocation241_spill] sm:$0xff] }
 0x8a4   :  { %4250 = vmatpush.msra.mxu1 %v12799_v13  ;;  %4285 = vmatpush.msra.mxu2 %v12836_v29  ;;  %v12842_v13 = vld [vmem:[#allocation233_spill] sm:$0xff] }
 0x8a5   :  { %4183 = vmatpush.msra.mxu0 %v12837_v62  ;;  %4352 = vmatpush.msra.mxu3 %v12838_v14  ;;  %v12844_v62 = vld [vmem:[#allocation259_spill] sm:$0xff]  ;;  %v12845_v14 = vld [vmem:[#allocation237_spill] sm:$0xff] }
 0x8a6   :  { %4252 = vmatpush.msra.mxu1 %v12802_v19  ;;  %4287 = vmatpush.msra.mxu2 %v12839_v57  ;;  %v12846_v19 = vld [vmem:[#allocation175_spill] sm:$0xff] }
 0x8a7   :  { %4187 = vmatpush.msra.mxu0 %v12840_v24  ;;  %4358 = vmatpush.msra.mxu3 %v12841_v46  ;;  %v12847_v24 = vld [vmem:[#allocation262_spill] sm:$0xff]  ;;  %v12017_v46 = vand.u32 4294901760, %v10240_v5 }
 0x8a8   :  { %4254 = vmatpush.msra.mxu1 %v12805_v35  ;;  %4289 = vmatpush.msra.mxu2 %v12842_v13  ;;  %v12849_v35 = vld [vmem:[#allocation179_spill] sm:$0xff] }
 0x8a9   :  { %4191 = vmatpush.msra.mxu0 %v12843_v25  ;;  %4364 = vmatpush.msra.mxu3 %v12844_v62  ;;  %v12851_v62 = vld [vmem:[#allocation245_spill] sm:$0xff]  ;;  %v12852_v25 = vld [vmem:[#allocation183_spill] sm:$0xff] }
 0x8aa   :  { %4256 = vmatpush.msra.mxu1 %v12808_v17  ;;  %4291 = vmatpush.msra.mxu2 %v12845_v14  ;;  %v12853_v17 = vld [vmem:[#allocation267_spill] sm:$0xff] }
 0x8ab   :  { %4195 = vmatpush.msra.mxu0 %v12846_v19  ;;  %4370 = vmatpush.msra.mxu3 %v12847_v24  ;;  %v12854_v24 = vld [vmem:[#allocation249_spill] sm:$0xff]  ;;  %v4305_v19 = vsub.f32 %v10240_v5, %v12017_v46  ;;  %v12861_v46 = vld [vmem:[#allocation195_spill] sm:$0xff] }
 0x8ac   :  { %4258 = vmatpush.msra.mxu1 %v12811_v56  ;;  %4293 = vmatpush.msra.mxu2 %v12848_v21  ;;  %v12855_v56 = vld [vmem:[#allocation187_spill] sm:$0xff] }
 0x8ad   :  { %4199 = vmatpush.msra.mxu0 %v12849_v35  ;;  %4376 = vmatpush.msra.mxu3 %v12850_v2  ;;  %v12856_v35 = vld [vmem:[#allocation269_spill] sm:$0xff]  ;;  %v12857_v2 = vld [vmem:[#allocation254_spill] sm:$0xff] }
 0x8ae   :  { %4260 = vmatpush.msra.mxu1 %v12814_v1  ;;  %4295 = vmatpush.msra.mxu2 %v12851_v62  ;;  %v12858_v1 = vld [vmem:[#allocation191_spill] sm:$0xff] }
 0x8af   :  { %4203 = vmatpush.msra.mxu0 %v12852_v25  ;;  %4382 = vmatpush.msra.mxu3 %v12853_v17  ;;  %v12859_v25 = vld [vmem:[#allocation270_spill] sm:$0xff] }
 0x8b0   :  { %4262 = vmatpush.msra.mxu1 %v12816_v0  ;;  %4297 = vmatpush.msra.mxu2 %v12854_v24  ;;  %v12860_v17 = vld [vmem:[#allocation258_spill] sm:$0xff]  ;;  %v4306_v0 = vand.u32 4294901760, %v4305_v19  ;;  %v12866_v19 = vld [vmem:[#allocation217_spill] sm:$0xff] }
 0x8b1   :  { %4207 = vmatpush.msra.mxu0 %v12855_v56  ;;  %4388 = vmatpush.msra.mxu3 %v12856_v35  ;;  %v12862_v56 = vld [vmem:[#allocation271_spill] sm:$0xff]  ;;  %v12863_v35 = vld [vmem:[#allocation214_spill] sm:$0xff] }
 0x8b2   :  { %4264 = vmatpush.msra.mxu1 %v12818_v43  ;;  %4299 = vmatpush.msra.mxu2 %v12857_v2  ;;  %v12864_v43 = vld [vmem:[#allocation198_spill] sm:$0xff] }
 0x8b3   :  { %4211 = vmatpush.msra.mxu0 %v12858_v1  ;;  %4394 = vmatpush.msra.mxu3 %v12859_v25  ;;  %v12865_v1 = vld [vmem:[#allocation272_spill] sm:$0xff]  ;;  %v12867_v25 = vld [vmem:[#allocation201_spill] sm:$0xff] }
 0x8b4   :  { %4266 = vmatmul.f32.vlgmr.msra.gmra.mxu1 %v10173_v40  ;;  %4301 = vmatpush.msra.mxu2 %v12860_v17 }
 0x8b5   :  { %4467 = vmatpush.msrb.mxu1 %v12817_v32  ;;  %4215 = vmatpush.msra.mxu0 %v12861_v46  ;;  %v12922_v46 = vld [vmem:[#allocation40_spill] sm:$0xff] }
 0x8b6   :  { %4400 = vmatpush.msra.mxu3 %v12862_v56  ;;  %4307 = vmatmul.f32.vlgmr.msra.gmra.mxu2 %v4306_v0  ;;  %v12868_v0 = vld [vmem:[#allocation221_spill] sm:$0xff]  ;;  %v12871_v56 = vld [vmem:[#allocation208_spill] sm:$0xff] }
 0x8b7   :  { %4469 = vmatpush.msrb.mxu1 %v12819_v50  ;;  %4508 = vmatpush.msrb.mxu2 %v12863_v35  ;;  %v12869_v35 = vld [vmem:[#allocation202_spill] sm:$0xff] }
 0x8b8   :  { %4219 = vmatpush.msra.mxu0 %v12864_v43  ;;  %4406 = vmatpush.msra.mxu3 %v12865_v1  ;;  %v12870_v1 = vld [vmem:[#allocation224_spill] sm:$0xff]  ;;  %v12904_v43 = vld [vmem:[#allocation27_spill] sm:$0xff] }
 0x8b9   :  { %4408 = vmatmul.f32.vlgmr.msra.gmra.mxu3 %v10228_v44  ;;  %4471 = vmatpush.msrb.mxu1 %v12821_v28 }
 0x8ba   :  { %4512 = vmatpush.msrb.mxu2 %v12866_v19  ;;  %4575 = vmatpush.msrb.mxu3 %v12817_v32  ;;  %v12872_v19 = vld [vmem:[#allocation227_spill] sm:$0xff] }
 0x8bb   :  { %4223 = vmatpush.msra.mxu0 %v12867_v25  ;;  %4473 = vmatpush.msrb.mxu1 %v12823_v36  ;;  %v12873_v25 = vld [vmem:[#allocation211_spill] sm:$0xff] }
 0x8bc   :  { %4516 = vmatpush.msrb.mxu2 %v12868_v0  ;;  %4577 = vmatpush.msrb.mxu3 %v12819_v50  ;;  %v12874_v0 = vld [vmem:[#allocation231_spill] sm:$0xff] }
 0x8bd   :  { %4227 = vmatpush.msra.mxu0 %v12869_v35  ;;  %4475 = vmatpush.msrb.mxu1 %v12826_v52  ;;  %v12875_v35 = vld [vmem:[#allocation216_spill] sm:$0xff] }
 0x8be   :  { %4229 = vmatmul.f32.vlgmr.msra.gmra.mxu0 %v10173_v40  ;;  %4520 = vmatpush.msrb.mxu2 %v12870_v1  ;;  %v12876_v40 = vld [vmem:[#allocation235_spill] sm:$0xff] }
 0x8bf   :  { %4414 = vmatpush.msrb.mxu0 %v12871_v56  ;;  %4579 = vmatpush.msrb.mxu3 %v12821_v28  ;;  %v12877_v1 = vld [vmem:[#allocation219_spill] sm:$0xff]  ;;  %v12896_v56 = vld [vmem:[#allocation253_spill] sm:$0xff] }
 0x8c0   :  { %4477 = vmatpush.msrb.mxu1 %v12830_v41  ;;  %4524 = vmatpush.msrb.mxu2 %v12872_v19  ;;  %v12878_v19 = vld [vmem:[#allocation239_spill] sm:$0xff] }
 0x8c1   :  { %4417 = vmatpush.msrb.mxu0 %v12873_v25  ;;  %4581 = vmatpush.msrb.mxu3 %v12823_v36  ;;  %v12879_v25 = vld [vmem:[#allocation220_spill] sm:$0xff] }
 0x8c2   :  { %4479 = vmatpush.msrb.mxu1 %v12833_v15  ;;  %4528 = vmatpush.msrb.mxu2 %v12874_v0  ;;  %v12880_v0 = vld [vmem:[#allocation243_spill] sm:$0xff]  ;;  %v12948_v36 = vld [vmem:[#allocation100_spill] sm:$0xff] }
 0x8c3   :  { %4420 = vmatpush.msrb.mxu0 %v12875_v35  ;;  %4583 = vmatpush.msrb.mxu3 %v12826_v52  ;;  %v12881_v35 = vld [vmem:[#allocation223_spill] sm:$0xff] }
 0x8c4   :  { %4481 = vmatpush.msrb.mxu1 %v12836_v29  ;;  %4532 = vmatpush.msrb.mxu2 %v12876_v40  ;;  %v12882_v40 = vld [vmem:[#allocation247_spill] sm:$0xff] }
 0x8c5   :  { %4423 = vmatpush.msrb.mxu0 %v12877_v1  ;;  %4585 = vmatpush.msrb.mxu3 %v12830_v41  ;;  %v12883_v1 = vld [vmem:[#allocation228_spill] sm:$0xff]  ;;  %v12945_v41 = vld [vmem:[#allocation110_spill] sm:$0xff] }
 0x8c6   :  { %4483 = vmatpush.msrb.mxu1 %v12839_v57  ;;  %4536 = vmatpush.msrb.mxu2 %v12878_v19  ;;  %v12884_v19 = vld [vmem:[#allocation252_spill] sm:$0xff] }
 0x8c7   :  { %4426 = vmatpush.msrb.mxu0 %v12879_v25  ;;  %4587 = vmatpush.msrb.mxu3 %v12833_v15  ;;  %v12885_v25 = vld [vmem:[#allocation232_spill] sm:$0xff]  ;;  %v12943_v15 = vld [vmem:[#allocation75_spill] sm:$0xff] }
 0x8c8   :  { %4485 = vmatpush.msrb.mxu1 %v12842_v13  ;;  %4540 = vmatpush.msrb.mxu2 %v12880_v0  ;;  %v12886_v0 = vld [vmem:[#allocation256_spill] sm:$0xff] }
 0x8c9   :  { %4429 = vmatpush.msrb.mxu0 %v12881_v35  ;;  %4589 = vmatpush.msrb.mxu3 %v12836_v29  ;;  %v12887_v35 = vld [vmem:[#allocation236_spill] sm:$0xff] }
 0x8ca   :  { %4487 = vmatpush.msrb.mxu1 %v12845_v14  ;;  %4544 = vmatpush.msrb.mxu2 %v12882_v40  ;;  %v12888_v40 = vld [vmem:[#allocation260_spill] sm:$0xff]  ;;  %v3386_v52 = vpop.f32.mrf.mxu1 }
 0x8cb   :  { %4432 = vmatpush.msrb.mxu0 %v12883_v1  ;;  %4591 = vmatpush.msrb.mxu3 %v12839_v57  ;;  %v12889_v1 = vld [vmem:[#allocation240_spill] sm:$0xff] }
 0x8cc   :  { %4489 = vmatpush.msrb.mxu1 %v12848_v21  ;;  %4548 = vmatpush.msrb.mxu2 %v12884_v19  ;;  %v12890_v19 = vld [vmem:[#allocation263_spill] sm:$0xff]  ;;  %v12940_v57 = vld [vmem:[#allocation64_spill] sm:$0xff] }
 0x8cd   :  { %4435 = vmatpush.msrb.mxu0 %v12885_v25  ;;  %4593 = vmatpush.msrb.mxu3 %v12842_v13  ;;  %v12891_v25 = vld [vmem:[#allocation244_spill] sm:$0xff] }
 0x8ce   :  { %4491 = vmatpush.msrb.mxu1 %v12851_v62  ;;  %4552 = vmatpush.msrb.mxu2 %v12886_v0  ;;  %v12892_v0 = vld [vmem:[#allocation266_spill] sm:$0xff]  ;;  %v12937_v13 = vld [vmem:[#allocation60_spill] sm:$0xff] }
 0x8cf   :  { %4438 = vmatpush.msrb.mxu0 %v12887_v35  ;;  %4595 = vmatpush.msrb.mxu3 %v12845_v14  ;;  %v12893_v35 = vld [vmem:[#allocation248_spill] sm:$0xff]  ;;  %v12934_v14 = vld [vmem:[#allocation59_spill] sm:$0xff] }
 0x8d0   :  { %4493 = vmatpush.msrb.mxu1 %v12854_v24  ;;  %4556 = vmatpush.msrb.mxu2 %v12888_v40  ;;  %v12894_v40 = vand.u32 4294901760, %v10240_v5 }
 0x8d1   :  { %4441 = vmatpush.msrb.mxu0 %v12889_v1  ;;  %4597 = vmatpush.msrb.mxu3 %v12848_v21  ;;  %v12895_v1 = vld [vmem:[#allocation268_spill] sm:$0xff]  ;;  %v12931_v21 = vld [vmem:[#allocation55_spill] sm:$0xff] }
 0x8d2   :  { %4495 = vmatpush.msrb.mxu1 %v12857_v2  ;;  %4560 = vmatpush.msrb.mxu2 %v12890_v19  ;;  %v12897_v19 = vld [vmem:[#allocation41_spill] sm:$0xff]  ;;  %v3285_v29 = vpop.f32.mrf.mxu0  ;;  %v3440_v28 = vpop.f32.mrf.mxu2 }
 0x8d3   :  { %4444 = vmatpush.msrb.mxu0 %v12891_v25  ;;  %4599 = vmatpush.msrb.mxu3 %v12851_v62  ;;  %v12898_v25 = vld [vmem:[#allocation257_spill] sm:$0xff]  ;;  %v12928_v62 = vld [vmem:[#allocation54_spill] sm:$0xff] }
 0x8d4   :  { %4497 = vmatpush.msrb.mxu1 %v12860_v17  ;;  %4564 = vmatpush.msrb.mxu2 %v12892_v0  ;;  %v12899_v0 = vld [vmem:[#allocation26_spill] sm:$0xff] }
 0x8d5   :  { %4447 = vmatpush.msrb.mxu0 %v12893_v35  ;;  %4601 = vmatpush.msrb.mxu3 %v12854_v24  ;;  %v12900_v35 = vld [vmem:[#allocation261_spill] sm:$0xff] }
 0x8d6   :  { %4501 = vmatmul.f32.vlgmr.msrb.gmra.mxu1 %v12894_v40  ;;  %4568 = vmatpush.msrb.mxu2 %v12895_v1  ;;  %v12901_v40 = vld [vmem:[#allocation20_spill] sm:$0xff]  ;;  %v12902_v1 = vld [vmem:[#allocation42_spill] sm:$0xff]  ;;  %v12925_v24 = vld [vmem:[#allocation53_spill] sm:$0xff] }
 0x8d7   :  { %4450 = vmatpush.msrb.mxu0 %v12896_v56  ;;  %4603 = vmatpush.msrb.mxu3 %v12857_v2  ;;  %v12903_v56 = vld [vmem:[#allocation264_spill] sm:$0xff]  ;;  %v12919_v2 = vld [vmem:[#allocation38_spill] sm:$0xff] }
 0x8d8   :  { %4570 = vmatmul.f32.vlgmr.msrb.gmra.mxu2 %v10228_v44  ;;  %4680 = vmatpush.xpose.msra.mxu1 %v12897_v19  ;;  %v12905_v19 = vld [vmem:[#allocation21_spill] sm:$0xff] }
 0x8d9   :  { %4453 = vmatpush.msrb.mxu0 %v12898_v25  ;;  %4605 = vmatpush.msrb.mxu3 %v12860_v17  ;;  %v12906_v25 = vld [vmem:[#allocation45_spill] sm:$0xff]  ;;  %v12916_v17 = vld [vmem:[#allocation35_spill] sm:$0xff] }
 0x8da   :  { %4607 = vmatmul.f32.vlgmr.msrb.gmra.mxu3 %v10228_v44  ;;  %4778 = vmatpush.xpose.msra.mxu2 %v12899_v0  ;;  %v12907_v44 = vld [vmem:[#allocation28_spill] sm:$0xff] }
 0x8db   :  { %4456 = vmatpush.msrb.mxu0 %v12900_v35  ;;  %4831 = vmatpush.xpose.msra.mxu3 %v12901_v40  ;;  %v12908_v35 = vld [vmem:[#allocation22_spill] sm:$0xff]  ;;  %v12909_v0 = vld [vmem:[#allocation52_spill] sm:$0xff] }
 0x8dc   :  { %4686 = vmatpush.xpose.msra.mxu1 %v12902_v1  ;;  %v12910_v1 = vld [vmem:[#allocation30_spill] sm:$0xff] }
 0x8dd   :  { %4459 = vmatpush.msrb.mxu0 %v12903_v56  ;;  %v12912_v56 = vld [vmem:[#allocation57_spill] sm:$0xff] }
 0x8de   :  { %4462 = vmatmul.f32.vlgmr.msrb.gmra.mxu0 %v10240_v5  ;;  %4781 = vmatpush.xpose.msra.mxu2 %v12904_v43  ;;  %v12911_v5 = vld [vmem:[#allocation23_spill] sm:$0xff] }
 0x8df   :  { %4635 = vmatpush.xpose.msra.mxu0 %v12901_v40  ;;  %4833 = vmatpush.xpose.msra.mxu3 %v12905_v19  ;;  %v12913_v43 = vld [vmem:[#allocation31_spill] sm:$0xff] }
 0x8e0   :  { %4692 = vmatpush.xpose.msra.mxu1 %v12906_v25  ;;  %v12914_v25 = vld [vmem:[#allocation24_spill] sm:$0xff] }
 0x8e2   :  { %4784 = vmatpush.xpose.msra.mxu2 %v12907_v44  ;;  %v12915_v44 = vld [vmem:[#allocation61_spill] sm:$0xff] }
 0x8e3   :  { %4637 = vmatpush.xpose.msra.mxu0 %v12905_v19  ;;  %4835 = vmatpush.xpose.msra.mxu3 %v12908_v35 }
 0x8e4   :  { %4698 = vmatpush.xpose.msra.mxu1 %v12909_v0  ;;  %v12917_v0 = vld [vmem:[#allocation25_spill] sm:$0xff] }
 0x8e6   :  { %4787 = vmatpush.xpose.msra.mxu2 %v12910_v1  ;;  %v12918_v1 = vld [vmem:[#allocation66_spill] sm:$0xff] }
 0x8e7   :  { %4639 = vmatpush.xpose.msra.mxu0 %v12908_v35  ;;  %4837 = vmatpush.xpose.msra.mxu3 %v12911_v5 }
 0x8e8   :  { %4704 = vmatpush.xpose.msra.mxu1 %v12912_v56  ;;  %v12920_v56 = vld [vmem:[#allocation29_spill] sm:$0xff] }
 0x8ea   :  { %4790 = vmatpush.xpose.msra.mxu2 %v12913_v43  ;;  %v12921_v43 = vld [vmem:[#allocation67_spill] sm:$0xff] }
 0x8eb   :  { %4641 = vmatpush.xpose.msra.mxu0 %v12911_v5  ;;  %4839 = vmatpush.xpose.msra.mxu3 %v12914_v25 }
 0x8ec   :  { %4710 = vmatpush.xpose.msra.mxu1 %v12915_v44  ;;  %v12923_v44 = vld [vmem:[#allocation39_spill] sm:$0xff] }
 0x8ee   :  { %4793 = vmatpush.xpose.msra.mxu2 %v12916_v17  ;;  %v12924_v17 = vld [vmem:[#allocation76_spill] sm:$0xff] }
 0x8ef   :  { %4643 = vmatpush.xpose.msra.mxu0 %v12914_v25  ;;  %4841 = vmatpush.xpose.msra.mxu3 %v12917_v0 }
 0x8f0   :  { %4716 = vmatpush.xpose.msra.mxu1 %v12918_v1  ;;  %v12926_v1 = vld [vmem:[#allocation46_spill] sm:$0xff] }
 0x8f2   :  { %4796 = vmatpush.xpose.msra.mxu2 %v12919_v2  ;;  %v12927_v2 = vld [vmem:[#allocation81_spill] sm:$0xff] }
 0x8f3   :  { %4645 = vmatpush.xpose.msra.mxu0 %v12917_v0  ;;  %4843 = vmatpush.xpose.msra.mxu3 %v12920_v56 }
 0x8f4   :  { %4722 = vmatpush.xpose.msra.mxu1 %v12921_v43  ;;  %v12929_v43 = vld [vmem:[#allocation47_spill] sm:$0xff] }
 0x8f6   :  { %4799 = vmatpush.xpose.msra.mxu2 %v12922_v46  ;;  %v12930_v46 = vld [vmem:[#allocation87_spill] sm:$0xff] }
 0x8f7   :  { %4647 = vmatpush.xpose.msra.mxu0 %v12920_v56  ;;  %4845 = vmatpush.xpose.msra.mxu3 %v12923_v44 }
 0x8f8   :  { %4728 = vmatpush.xpose.msra.mxu1 %v12924_v17  ;;  %v12932_v17 = vld [vmem:[#allocation48_spill] sm:$0xff] }
 0x8fa   :  { %4802 = vmatpush.xpose.msra.mxu2 %v12925_v24  ;;  %v12933_v24 = vld [vmem:[#allocation91_spill] sm:$0xff] }
 0x8fb   :  { %4649 = vmatpush.xpose.msra.mxu0 %v12923_v44  ;;  %4847 = vmatpush.xpose.msra.mxu3 %v12926_v1 }
 0x8fc   :  { %4734 = vmatpush.xpose.msra.mxu1 %v12927_v2  ;;  %v12935_v2 = vld [vmem:[#allocation50_spill] sm:$0xff] }
 0x8fe   :  { %4805 = vmatpush.xpose.msra.mxu2 %v12928_v62  ;;  %v12936_v62 = vld [vmem:[#allocation95_spill] sm:$0xff] }
 0x8ff   :  { %4651 = vmatpush.xpose.msra.mxu0 %v12926_v1  ;;  %4849 = vmatpush.xpose.msra.mxu3 %v12929_v43 }
 0x900   :  { %4740 = vmatpush.xpose.msra.mxu1 %v12930_v46  ;;  %v12938_v46 = vld [vmem:[#allocation51_spill] sm:$0xff] }
 0x902   :  { %4808 = vmatpush.xpose.msra.mxu2 %v12931_v21  ;;  %v12939_v21 = vld [vmem:[#allocation99_spill] sm:$0xff] }
 0x903   :  { %4653 = vmatpush.xpose.msra.mxu0 %v12929_v43  ;;  %4851 = vmatpush.xpose.msra.mxu3 %v12932_v17 }
 0x904   :  { %4746 = vmatpush.xpose.msra.mxu1 %v12933_v24  ;;  %v12941_v24 = vld [vmem:[#allocation56_spill] sm:$0xff] }
 0x906   :  { %4811 = vmatpush.xpose.msra.mxu2 %v12934_v14  ;;  %v12942_v14 = vld [vmem:[#allocation104_spill] sm:$0xff] }
 0x907   :  { %4655 = vmatpush.xpose.msra.mxu0 %v12932_v17  ;;  %4853 = vmatpush.xpose.msra.mxu3 %v12935_v2 }
 0x908   :  { %4752 = vmatpush.xpose.msra.mxu1 %v12936_v62  ;;  %v7637_v62 = vld [vmem:[%s11386_s2] ss:$0 sm:$0xff] }
 0x90a   :  { %4814 = vmatpush.xpose.msra.mxu2 %v12937_v13  ;;  %v12944_v13 = vld [vmem:[#allocation65_spill] sm:$0xff] }
 0x90b   :  { %4657 = vmatpush.xpose.msra.mxu0 %v12935_v2  ;;  %4855 = vmatpush.xpose.msra.mxu3 %v12938_v46 }
 0x90c   :  { %4758 = vmatpush.xpose.msra.mxu1 %v12939_v21  ;;  %v3286_v21 = vadd.f32 %v7637_v62, %v3285_v29  ;;  %v12949_v29 = vld [vmem:[#allocation32_spill] sm:$0xff] }
 0x90e   :  { %4817 = vmatpush.xpose.msra.mxu2 %v12940_v57  ;;  %v12946_v57 = vld [vmem:[#allocation82_spill] sm:$0xff] }
 0x90f   :  { %4659 = vmatpush.xpose.msra.mxu0 %v12938_v46  ;;  %4857 = vmatpush.xpose.msra.mxu3 %v12941_v24 }
 0x910   :  { %4764 = vmatpush.xpose.msra.mxu1 %v12942_v14  ;;  %v12947_v14 = vld [vmem:[#allocation70_spill] sm:$0xff] }
 0x912   :  { %4820 = vmatpush.xpose.msra.mxu2 %v12943_v15  ;;  %v3387_v15 = vadd.f32 %v3386_v52, %v3286_v21  ;;  %v12951_v52 = vld [vmem:[#allocation33_spill] sm:$0xff] }
 0x913   :  { %4661 = vmatpush.xpose.msra.mxu0 %v12941_v24  ;;  %4859 = vmatpush.xpose.msra.mxu3 %v12944_v13 }
 0x914   :  { %4770 = vmatpush.xpose.msra.mxu1 %v12945_v41  ;;  %v3441_v62 = vadd.f32 %v3440_v28, %v3387_v15  ;;  %v3479_v41 = vpop.f32.mrf.mxu3  ;;  %v12953_v28 = vld [vmem:[#allocation34_spill] sm:$0xff] }
 0x916   :  { %4823 = vmatpush.xpose.msra.mxu2 %v12946_v57  ;;  %v12950_v57 = vld [vmem:[#allocation105_spill] sm:$0xff]  ;;  %v3480_v21 = vadd.f32 %v3479_v41, %v3441_v62  ;;  %v12955_v62 = vld [vmem:[#allocation36_spill] sm:$0xff] }
 0x917   :  { %4663 = vmatpush.xpose.msra.mxu0 %v12944_v13  ;;  %4861 = vmatpush.xpose.msra.mxu3 %v12947_v14 }
 0x918   :  { %4939 = vmatpush.xpose.msrb.mxu1 %v12901_v40 }
 0x91a   :  { %4976 = vmatpush.xpose.msrb.mxu2 %v12455_v7 }
 0x91b   :  { %5021 = vmatpush.xpose.msrb.mxu3 %v12948_v36  ;;  %4665 = vmatpush.xpose.msra.mxu0 %v12947_v14  ;;  %v12952_v36 = vld [vmem:[#allocation109_spill] sm:$0xff] }
 0x91c   :  { %4941 = vmatpush.xpose.msrb.mxu1 %v12905_v19  ;;  %v3548_v19 = vpop.f32.mrf.mxu0 }
 0x91d   :  { %v3549_v15 = vadd.f32 %v3548_v19, %v3480_v21  ;;  %v12957_v21 = vld [vmem:[#allocation37_spill] sm:$0xff] }
 0x91e   :  { %4978 = vmatpush.xpose.msrb.mxu2 %v12458_v38 }
 0x91f   :  { %4872 = vmatpush.xpose.msrb.mxu0 %v12949_v29  ;;  %5027 = vmatpush.xpose.msrb.mxu3 %v12950_v57  ;;  %v12954_v29 = vld [vmem:[#allocation113_spill] sm:$0xff]  ;;  %v3585_v57 = vpop.f32.mrf.mxu1 }
 0x920   :  { %4943 = vmatpush.xpose.msrb.mxu1 %v12908_v35  ;;  %v3586_v41 = vadd.f32 %v3585_v57, %v3549_v15  ;;  %v12959_v15 = vld [vmem:[#allocation43_spill] sm:$0xff] }
 0x922   :  { %4980 = vmatpush.xpose.msrb.mxu2 %v12461_v39 }
 0x923   :  { %4876 = vmatpush.xpose.msrb.mxu0 %v12951_v52  ;;  %5033 = vmatpush.xpose.msrb.mxu3 %v12952_v36  ;;  %v12956_v52 = vld [vmem:[#allocation116_spill] sm:$0xff]  ;;  %v3626_v36 = vpop.f32.mrf.mxu2 }
 0x924   :  { %4945 = vmatpush.xpose.msrb.mxu1 %v12911_v5  ;;  %v3627_v19 = vadd.f32 %v3626_v36, %v3586_v41  ;;  %v12961_v36 = vld [vmem:[#allocation44_spill] sm:$0xff] }
 0x926   :  { %4982 = vmatpush.xpose.msrb.mxu2 %v12464_v61 }
 0x927   :  { %4880 = vmatpush.xpose.msrb.mxu0 %v12953_v28  ;;  %5039 = vmatpush.xpose.msrb.mxu3 %v12954_v29  ;;  %v12958_v28 = vld [vmem:[#allocation118_spill] sm:$0xff]  ;;  %v3727_v29 = vpop.f32.mrf.mxu3  ;;  %v3820_v41 = vpop.f32.mrf.mxu1 }
 0x928   :  { %4947 = vmatpush.xpose.msrb.mxu1 %v12914_v25  ;;  %v3781_v25 = vpop.f32.mrf.mxu0  ;;  %v3728_v57 = vadd.f32 %v3727_v29, %v3627_v19  ;;  %v12963_v29 = vld [vmem:[#allocation49_spill] sm:$0xff] }
 0x92a   :  { %4984 = vmatpush.xpose.msrb.mxu2 %v12467_v59 }
 0x92b   :  { %4884 = vmatpush.xpose.msrb.mxu0 %v12955_v62  ;;  %5045 = vmatpush.xpose.msrb.mxu3 %v12956_v52  ;;  %v12960_v62 = vld [vmem:[#allocation120_spill] sm:$0xff]  ;;  %v3782_v52 = vadd.f32 %v3781_v25, %v3728_v57  ;;  %v3889_v19 = vpop.f32.mrf.mxu2  ;;  %v12965_v57 = vld [vmem:[#allocation58_spill] sm:$0xff] }
 0x92c   :  { %4949 = vmatpush.xpose.msrb.mxu1 %v12917_v0 }
 0x92e   :  { %4986 = vmatpush.xpose.msrb.mxu2 %v12470_v9 }
 0x92f   :  { %4888 = vmatpush.xpose.msrb.mxu0 %v12957_v21  ;;  %5051 = vmatpush.xpose.msrb.mxu3 %v12958_v28  ;;  %v12962_v21 = vld [vmem:[#allocation121_spill] sm:$0xff]  ;;  %v3821_v28 = vadd.f32 %v3820_v41, %v3782_v52 }
 0x930   :  { %4951 = vmatpush.xpose.msrb.mxu1 %v12920_v56 }
 0x931   :  { %v3890_v25 = vadd.f32 %v3889_v19, %v3821_v28  ;;  %v4068_v28 = vpop.f32.mrf.mxu1 }
 0x932   :  { %4988 = vmatpush.xpose.msrb.mxu2 %v12473_v4 }
 0x933   :  { %4892 = vmatpush.xpose.msrb.mxu0 %v12959_v15  ;;  %5057 = vmatpush.xpose.msrb.mxu3 %v12960_v62  ;;  %v12964_v15 = vld [vmem:[#allocation122_spill] sm:$0xff]  ;;  %v3967_v62 = vpop.f32.mrf.mxu0 }
 0x934   :  { %4953 = vmatpush.xpose.msrb.mxu1 %v12923_v44 }
 0x936   :  { %4990 = vmatpush.xpose.msrb.mxu2 %v12476_v22 }
 0x937   :  { %4896 = vmatpush.xpose.msrb.mxu0 %v12961_v36  ;;  %5063 = vmatpush.xpose.msrb.mxu3 %v12962_v21  ;;  %v3926_v36 = vpop.f32.mrf.mxu3  ;;  %v12966_v21 = vld [vmem:[#allocation123_spill] sm:$0xff] }
 0x938   :  { %4955 = vmatpush.xpose.msrb.mxu1 %v12926_v1  ;;  %v3927_v52 = vadd.f32 %v3926_v36, %v3890_v25  ;;  %v4122_v36 = vpop.f32.mrf.mxu2  ;;  %v12971_v25 = vld [vmem:[#allocation68_spill] sm:$0xff] }
 0x93a   :  { %4992 = vmatpush.xpose.msrb.mxu2 %v12479_v45  ;;  %v3968_v41 = vadd.f32 %v3967_v62, %v3927_v52  ;;  %v12972_v52 = vld [vmem:[#allocation141_spill] sm:$0xff] }
 0x93b   :  { %4900 = vmatpush.xpose.msrb.mxu0 %v12963_v29  ;;  %5069 = vmatpush.xpose.msrb.mxu3 %v12964_v15  ;;  %v12967_v29 = vld [vmem:[#allocation62_spill] sm:$0xff]  ;;  %v12968_v15 = vld [vmem:[#allocation133_spill] sm:$0xff] }
 0x93c   :  { %4957 = vmatpush.xpose.msrb.mxu1 %v12929_v43  ;;  %v4069_v19 = vadd.f32 %v4068_v28, %v3968_v41  ;;  %v12973_v28 = vld [vmem:[#allocation69_spill] sm:$0xff] }
 0x93e   :  { %4994 = vmatpush.xpose.msrb.mxu2 %v12482_v16  ;;  %v4123_v62 = vadd.f32 %v4122_v36, %v4069_v19  ;;  %v12975_v19 = vld [vmem:[#allocation74_spill] sm:$0xff]  ;;  %v4267_v36 = vpop.f32.mrf.mxu1 }
 0x93f   :  { %4904 = vmatpush.xpose.msrb.mxu0 %v12965_v57  ;;  %5075 = vmatpush.xpose.msrb.mxu3 %v12966_v21  ;;  %v12969_v57 = vld [vmem:[#allocation63_spill] sm:$0xff] }
 0x940   :  { %4959 = vmatpush.xpose.msrb.mxu1 %v12932_v17  ;;  %v12970_v17 = vld [vmem:[#allocation137_spill] sm:$0xff] }
 0x942   :  { %4996 = vmatpush.xpose.msrb.mxu2 %v12485_v12 }
 0x943   :  { %4908 = vmatpush.xpose.msrb.mxu0 %v12967_v29  ;;  %5081 = vmatpush.xpose.msrb.mxu3 %v12968_v15  ;;  %v4161_v29 = vpop.f32.mrf.mxu3  ;;  %v4230_v15 = vpop.f32.mrf.mxu0 }
 0x944   :  { %4961 = vmatpush.xpose.msrb.mxu1 %v12935_v2  ;;  %v4162_v41 = vadd.f32 %v4161_v29, %v4123_v62  ;;  %v12977_v29 = vld [vmem:[#allocation85_spill] sm:$0xff]  ;;  %v4308_v62 = vpop.f32.mrf.mxu2 }
 0x946   :  { %4998 = vmatpush.xpose.msrb.mxu2 %v12488_v60 }
 0x947   :  { %4912 = vmatpush.xpose.msrb.mxu0 %v12969_v57  ;;  %5087 = vmatpush.xpose.msrb.mxu3 %v12970_v17  ;;  %v12974_v57 = vld [vmem:[#allocation144_spill] sm:$0xff]  ;;  %v4231_v17 = vadd.f32 %v4230_v15, %v4162_v41 }
 0x948   :  { %4963 = vmatpush.xpose.msrb.mxu1 %v12938_v46 }
 0x94a   :  { %5000 = vmatpush.xpose.msrb.mxu2 %v12491_v30 }
 0x94b   :  { %4916 = vmatpush.xpose.msrb.mxu0 %v12971_v25  ;;  %5093 = vmatpush.xpose.msrb.mxu3 %v12972_v52  ;;  %v12976_v25 = vld [vmem:[#allocation146_spill] sm:$0xff]  ;;  %v4268_v52 = vadd.f32 %v4267_v36, %v4231_v17  ;;  %v4409_v15 = vpop.f32.mrf.mxu3 }
 0x94c   :  { %4965 = vmatpush.xpose.msrb.mxu1 %v12941_v24 }
 0x94d   :  { %v4309_v21 = vadd.f32 %v4308_v62, %v4268_v52 }
 0x94e   :  { %5002 = vmatpush.xpose.msrb.mxu2 %v12494_v33 }
 0x94f   :  { %4920 = vmatpush.xpose.msrb.mxu0 %v12973_v28  ;;  %5099 = vmatpush.xpose.msrb.mxu3 %v12974_v57  ;;  %v12978_v28 = vld [vmem:[#allocation14_spill] sm:$0xff]  ;;  %v12979_v57 = vld [vmem:[#allocation92_spill] sm:$0xff]  ;;  %v4410_v41 = vadd.f32 %v4409_v15, %v4309_v21 }
 0x950   :  { %4967 = vmatpush.xpose.msrb.mxu1 %v12944_v13 }
 0x952   :  { %5004 = vmatpush.xpose.msrb.mxu2 %v12497_v42 }
 0x953   :  { %4924 = vmatpush.xpose.msrb.mxu0 %v12975_v19  ;;  %5105 = vmatpush.xpose.msrb.mxu3 %v12976_v25  ;;  %v4502_v24 = vpop.f32.mrf.mxu1 }
 0x954   :  { %4969 = vmatpush.xpose.msrb.mxu1 %v12947_v14 }
 0x956   :  { %5006 = vmatpush.xpose.msrb.mxu2 %v12709_v6 }
 0x957   :  { %4928 = vmatpush.xpose.msrb.mxu0 %v12977_v29  ;;  %5111 = vmatpush.xpose.msrb.mxu3 %v12978_v28 }
 0x95b   :  { %4932 = vmatpush.xpose.msrb.mxu0 %v12979_v57  ;;  %v4463_v13 = vpop.f32.mrf.mxu0  ;;  %v4571_v14 = vpop.f32.mrf.mxu2 }
 0x95c   :  { %v4464_v19 = vadd.f32 %v4463_v13, %v4410_v41 }
 0x95d   :  { %v4608_v25 = vpop.f32.mrf.mxu3 }
 0x95e   :  { %v4503_v46 = vadd.f32 %v4502_v24, %v4464_v19 }
 0x960   :  { %v4572_v2 = vadd.f32 %v4571_v14, %v4503_v46 }
 0x962   :  { %v4609_v17 = vadd.f32 %v4608_v25, %v4572_v2  ;;  %v7638_v25 = vld [vmem:[%s11387_s3] sm:$0xff]  ;;  %s7586_s3 = sshll.u32 %s11390_s6, 4  ;;  %s7587_s3 = int_to_ptr.hbm [resolvable:$true] %s7586_s3 }
 0x964   :  { %4611 = vmax.xlane.f32.xlu2 %v4609_v17 }
 0x9d7   :  { %v4612_v36 = vpop.xlane.xlu2 %4611 }
 0x9d8   :  { %v4613_v43 = vsub.f32 %v4609_v17, %v4612_v36 }
 0x9da   :  { %v4614_v29 = vmul.f32 1.442695, %v4613_v43 }
 0x9dc   :  { %7625 = vpow2.f32 %v4614_v29 }
 0x9e2   :  { %v7626_v1 = vpop.eup %7625 }
 0x9e3   :  { %4616 = vadd.xlane.f32.xlu1 %v7626_v1 }
 0xa56   :  { %v4617_v52 = vpop.xlane.xlu1 %4616 }
 0xa57   :  { %7627 = vrcp.f32 %v4617_v52  ;;  %v4629_v15 = vand.u32 2147483648, %v4617_v52  ;;  %v4627_v24 = vand.u32 2147483647, %v4617_v52  ;;  %vm4623_vm3 = vweird.f32 %v4617_v52 }
 0xa59   :  { %v4630_v46 = vor.u32 1.1754944e-38, %v4629_v15  ;;  %vm4628_vm5 = vcmp.eq.f32.partialorder %v4627_v24, 8.507059e+37  ;;  %v12983_v15 = vld [vmem:[#allocation129_spill] sm:$0xff]  ;;  %v12985_v24 = vld [vmem:[#allocation132_spill] sm:$0xff] }
 0xa5d   :  { %v7628_v62 = vpop.eup %7627 }
 0xa5e   :  { %v4619_v57 = vmul.f32 %v7628_v62, %v4617_v52  ;;  %vm4624_vm2 = vweird.f32 %v7628_v62  ;;  %v12980_v52 = vld [vmem:[#allocation130_spill] sm:$0xff] }
 0xa5f   :  { %vm4625_vm4 = vmor %vm4623_vm3, %vm4624_vm2 }
 0xa60   :  { %v4620_v21 = vsub.f32 1.0, %v4619_v57 }
 0xa62   :  { %v4621_v13 = vmul.f32 %v7628_v62, %v4620_v21  ;;  %v12982_v21 = vld [vmem:[#allocation134_spill] sm:$0xff] }
 0xa64   :  { %v4622_v19 = vadd.f32 %v7628_v62, %v4621_v13  ;;  %v12984_v13 = vld [vmem:[#allocation138_spill] sm:$0xff] }
 0xa66   :  { %v4626_v2 = vsel %vm4625_vm4, %v7628_v62, %v4622_v19  ;;  %v12981_v62 = vld [vmem:[#allocation126_spill] sm:$0xff] }
 0xa67   :  { %v4631_v14 = vsel %vm4628_vm5, %v4630_v46, %v4626_v2  ;;  %v12986_v19 = vld [vmem:[#allocation142_spill] sm:$0xff]  ;;  %v12987_v46 = vld [vmem:[#allocation136_spill] sm:$0xff] }
 0xa68   :  { %v4632_v43 = vmul.f32 %v7626_v1, %v4631_v14  ;;  %v12988_v2 = vld [vmem:[#allocation162_spill] sm:$0xff]  ;;  %v12989_v14 = vld [vmem:[#allocation145_spill] sm:$0xff] }
 0xa6a   :  { %v4633_v29 = vsub.f32 %v4632_v43, %v7638_v25  ;;  %v12990_v43 = vld [vmem:[#allocation147_spill] sm:$0xff]  ;;  %v12991_v25 = vld [vmem:[#allocation140_spill] sm:$0xff] }
 0xa6c   :  { %v10483_v41 = vand.u32 4294901760, %v4633_v29 }
 0xa6e   :  { %v10486_v57 = vsub.f32 %v4633_v29, %v10483_v41  ;;  %4772 = vmatmul.f32.vlgmr.msra.gmra.mxu1 %v10483_v41  ;;  %v12992_v29 = vld [vmem:[#allocation166_spill] sm:$0xff] }
 0xa6f   :  { %5172 = vmatpush.xpose.msra.mxu1 %v12455_v7 }
 0xa70   :  { %4826 = vmatmul.f32.vlgmr.msra.gmra.mxu2 %v10486_v57  ;;  %v10492_v17 = vand.u32 4294901760, %v10486_v57 }
 0xa71   :  { %5213 = vmatpush.xpose.msra.mxu2 %v12738_v23 }
 0xa72   :  { %4865 = vmatmul.f32.vlgmr.msra.gmra.mxu3 %v10492_v17  ;;  %v4669_v1 = vsub.f32 %v10486_v57, %v10492_v17 }
 0xa73   :  { %5174 = vmatpush.xpose.msra.mxu1 %v12458_v38  ;;  %5280 = vmatpush.xpose.msra.mxu3 %v12455_v7 }
 0xa74   :  { %v10500_v36 = vand.u32 4294901760, %v4669_v1  ;;  %v12993_v1 = vld [vmem:[#allocation6_spill] sm:$0xff] }
 0xa75   :  { %5217 = vmatpush.xpose.msra.mxu2 %v12739_v54 }
 0xa76   :  { %4671 = vmatmul.f32.vlgmr.msra.gmra.mxu0 %v10500_v36  ;;  %4971 = vmatmul.f32.vlgmr.msrb.gmra.mxu1 %v10483_v41 }
 0xa77   :  { %5119 = vmatpush.xpose.msra.mxu0 %v12741_v63  ;;  %5176 = vmatpush.xpose.msra.mxu1 %v12461_v39 }
 0xa78   :  { %5282 = vmatpush.xpose.msra.mxu3 %v12458_v38  ;;  %5012 = vmatmul.f32.vlgmr.msrb.gmra.mxu2 %v10500_v36 }
 0xa79   :  { %5221 = vmatpush.xpose.msra.mxu2 %v12740_v31 }
 0xa7a   :  { %5113 = vmatmul.f32.vlgmr.msrb.gmra.mxu3 %v10483_v41 }
 0xa7b   :  { %5122 = vmatpush.xpose.msra.mxu0 %v12743_v55  ;;  %5178 = vmatpush.xpose.msra.mxu1 %v12464_v61 }
 0xa7c   :  { %5284 = vmatpush.xpose.msra.mxu3 %v12461_v39 }
 0xa7d   :  { %5225 = vmatpush.xpose.msra.mxu2 %v12742_v34 }
 0xa7e   :  { %4934 = vmatmul.f32.vlgmr.msrb.gmra.mxu0 %v10483_v41 }
 0xa7f   :  { %5125 = vmatpush.xpose.msra.mxu0 %v12745_v3  ;;  %5180 = vmatpush.xpose.msra.mxu1 %v12467_v59 }
 0xa80   :  { %5286 = vmatpush.xpose.msra.mxu3 %v12464_v61 }
 0xa81   :  { %5229 = vmatpush.xpose.msra.mxu2 %v12744_v11 }
 0xa83   :  { %5128 = vmatpush.xpose.msra.mxu0 %v12747_v48  ;;  %5182 = vmatpush.xpose.msra.mxu1 %v12470_v9 }
 0xa84   :  { %5288 = vmatpush.xpose.msra.mxu3 %v12467_v59 }
 0xa85   :  { %5233 = vmatpush.xpose.msra.mxu2 %v12746_v20 }
 0xa87   :  { %5131 = vmatpush.xpose.msra.mxu0 %v12749_v10  ;;  %5184 = vmatpush.xpose.msra.mxu1 %v12473_v4 }
 0xa88   :  { %5290 = vmatpush.xpose.msra.mxu3 %v12470_v9 }
 0xa89   :  { %5237 = vmatpush.xpose.msra.mxu2 %v12748_v26 }
 0xa8b   :  { %5134 = vmatpush.xpose.msra.mxu0 %v12751_v27  ;;  %5186 = vmatpush.xpose.msra.mxu1 %v12476_v22  ;;  %v13050_v27 = vld [vmem:[#allocation242_spill] sm:$0xff] }
 0xa8c   :  { %5292 = vmatpush.xpose.msra.mxu3 %v12473_v4 }
 0xa8d   :  { %5241 = vmatpush.xpose.msra.mxu2 %v12750_v58 }
 0xa8f   :  { %5137 = vmatpush.xpose.msra.mxu0 %v12753_v53  ;;  %5188 = vmatpush.xpose.msra.mxu1 %v12479_v45  ;;  %v13034_v53 = vld [vmem:[#allocation196_spill] sm:$0xff] }
 0xa90   :  { %5294 = vmatpush.xpose.msra.mxu3 %v12476_v22 }
 0xa91   :  { %5245 = vmatpush.xpose.msra.mxu2 %v12752_v47  ;;  %v13046_v47 = vld [vmem:[#allocation157_spill] sm:$0xff] }
 0xa93   :  { %5140 = vmatpush.xpose.msra.mxu0 %v12755_v8  ;;  %5190 = vmatpush.xpose.msra.mxu1 %v12482_v16  ;;  %v13028_v8 = vld [vmem:[#allocation188_spill] sm:$0xff] }
 0xa94   :  { %5296 = vmatpush.xpose.msra.mxu3 %v12479_v45 }
 0xa95   :  { %5249 = vmatpush.xpose.msra.mxu2 %v12754_v37  ;;  %v13031_v37 = vld [vmem:[#allocation192_spill] sm:$0xff] }
 0xa97   :  { %5143 = vmatpush.xpose.msra.mxu0 %v12757_v18  ;;  %5192 = vmatpush.xpose.msra.mxu1 %v12485_v12  ;;  %v13022_v18 = vld [vmem:[#allocation180_spill] sm:$0xff] }
 0xa98   :  { %5298 = vmatpush.xpose.msra.mxu3 %v12482_v16 }
 0xa99   :  { %5253 = vmatpush.xpose.msra.mxu2 %v12756_v49  ;;  %v13025_v49 = vld [vmem:[#allocation184_spill] sm:$0xff] }
 0xa9b   :  { %5146 = vmatpush.xpose.msra.mxu0 %v12759_v51  ;;  %5194 = vmatpush.xpose.msra.mxu1 %v12488_v60  ;;  %v13016_v51 = vld [vmem:[#allocation172_spill] sm:$0xff] }
 0xa9c   :  { %5300 = vmatpush.xpose.msra.mxu3 %v12485_v12 }
 0xa9d   :  { %5257 = vmatpush.xpose.msra.mxu2 %v12980_v52  ;;  %v13019_v52 = vld [vmem:[#allocation176_spill] sm:$0xff] }
 0xa9f   :  { %5149 = vmatpush.xpose.msra.mxu0 %v12981_v62  ;;  %5196 = vmatpush.xpose.msra.mxu1 %v12491_v30  ;;  %v13010_v62 = vld [vmem:[#allocation164_spill] sm:$0xff] }
 0xaa0   :  { %5302 = vmatpush.xpose.msra.mxu3 %v12488_v60 }
 0xaa1   :  { %5261 = vmatpush.xpose.msra.mxu2 %v12982_v21  ;;  %v13013_v21 = vld [vmem:[#allocation167_spill] sm:$0xff] }
 0xaa3   :  { %5152 = vmatpush.xpose.msra.mxu0 %v12983_v15  ;;  %5198 = vmatpush.xpose.msra.mxu1 %v12494_v33  ;;  %v13005_v15 = vld [vmem:[#allocation182_spill] sm:$0xff] }
 0xaa4   :  { %5304 = vmatpush.xpose.msra.mxu3 %v12491_v30 }
 0xaa5   :  { %5265 = vmatpush.xpose.msra.mxu2 %v12984_v13  ;;  %v13007_v13 = vld [vmem:[#allocation161_spill] sm:$0xff] }
 0xaa7   :  { %5155 = vmatpush.xpose.msra.mxu0 %v12985_v24  ;;  %5200 = vmatpush.xpose.msra.mxu1 %v12497_v42  ;;  %v13000_v24 = vld [vmem:[#allocation148_spill] sm:$0xff] }
 0xaa8   :  { %5306 = vmatpush.xpose.msra.mxu3 %v12494_v33 }
 0xaa9   :  { %5269 = vmatpush.xpose.msra.mxu2 %v12986_v19  ;;  %v13003_v19 = vld [vmem:[#allocation150_spill] sm:$0xff] }
 0xaab   :  { %5158 = vmatpush.xpose.msra.mxu0 %v12987_v46  ;;  %5202 = vmatpush.xpose.msra.mxu1 %v12709_v6  ;;  %v12994_v46 = vld [vmem:[#allocation149_spill] sm:$0xff] }
 0xaac   :  { %5308 = vmatpush.xpose.msra.mxu3 %v12497_v42 }
 0xaad   :  { %5273 = vmatpush.xpose.msra.mxu2 %v12989_v14  ;;  %v12996_v14 = vld [vmem:[#allocation170_spill] sm:$0xff] }
 0xaae   :  { %5206 = vmatmul.f32.vlgmr.msra.gmra.mxu1 %v10492_v17 }
 0xaaf   :  { %5362 = vmatpush.xpose.msrb.mxu1 %v12988_v2  ;;  %5161 = vmatpush.xpose.msra.mxu0 %v12991_v25  ;;  %v12995_v2 = vld [vmem:[#allocation143_spill] sm:$0xff]  ;;  %v12998_v25 = vld [vmem:[#allocation152_spill] sm:$0xff] }
 0xab0   :  { %5310 = vmatpush.xpose.msra.mxu3 %v12709_v6  ;;  %5275 = vmatmul.f32.vlgmr.msra.gmra.mxu2 %v10483_v41 }
 0xab1   :  { %5460 = vmatpush.xpose.msrb.mxu2 %v12990_v43  ;;  %v12997_v43 = vld [vmem:[#allocation19_spill] sm:$0xff] }
 0xab3   :  { %5368 = vmatpush.xpose.msrb.mxu1 %v12992_v29  ;;  %5312 = vmatmul.f32.vlgmr.msra.gmra.mxu3 %v10483_v41  ;;  %v12999_v29 = vld [vmem:[#allocation174_spill] sm:$0xff] }
 0xab4   :  { %5513 = vmatpush.xpose.msrb.mxu3 %v12993_v1  ;;  %5164 = vmatpush.xpose.msra.mxu0 %v12995_v2  ;;  %v13002_v2 = vld [vmem:[#allocation178_spill] sm:$0xff] }
 0xab5   :  { %5463 = vmatpush.xpose.msrb.mxu2 %v12994_v46  ;;  %v13001_v46 = vld [vmem:[#allocation155_spill] sm:$0xff] }
 0xab7   :  { %5374 = vmatpush.xpose.msrb.mxu1 %v12996_v14  ;;  %5167 = vmatmul.f32.vlgmr.msra.gmra.mxu0 %v10486_v57  ;;  %v13004_v14 = vld [vmem:[#allocation158_spill] sm:$0xff] }
 0xab8   :  { %5317 = vmatpush.xpose.msrb.mxu0 %v12993_v1  ;;  %5515 = vmatpush.xpose.msrb.mxu3 %v12997_v43 }
 0xab9   :  { %5466 = vmatpush.xpose.msrb.mxu2 %v12998_v25  ;;  %v13006_v25 = vld [vmem:[#allocation153_spill] sm:$0xff] }
 0xabb   :  { %5380 = vmatpush.xpose.msrb.mxu1 %v12999_v29  ;;  %v13008_v29 = vld [vmem:[#allocation186_spill] sm:$0xff] }
 0xabc   :  { %5319 = vmatpush.xpose.msrb.mxu0 %v12997_v43  ;;  %5517 = vmatpush.xpose.msrb.mxu3 %v13000_v24 }
 0xabd   :  { %5469 = vmatpush.xpose.msrb.mxu2 %v13001_v46  ;;  %v13009_v46 = vld [vmem:[#allocation156_spill] sm:$0xff] }
 0xabf   :  { %5386 = vmatpush.xpose.msrb.mxu1 %v13002_v2  ;;  %v13011_v2 = vld [vmem:[#allocation190_spill] sm:$0xff] }
 0xac0   :  { %5321 = vmatpush.xpose.msrb.mxu0 %v13000_v24  ;;  %5519 = vmatpush.xpose.msrb.mxu3 %v13003_v19 }
 0xac1   :  { %5472 = vmatpush.xpose.msrb.mxu2 %v13004_v14  ;;  %v13012_v14 = vld [vmem:[#allocation159_spill] sm:$0xff] }
 0xac3   :  { %5392 = vmatpush.xpose.msrb.mxu1 %v13005_v15  ;;  %v13014_v15 = vld [vmem:[#allocation194_spill] sm:$0xff] }
 0xac4   :  { %5323 = vmatpush.xpose.msrb.mxu0 %v13003_v19  ;;  %5521 = vmatpush.xpose.msrb.mxu3 %v13006_v25 }
 0xac5   :  { %5475 = vmatpush.xpose.msrb.mxu2 %v13007_v13  ;;  %v13015_v13 = vld [vmem:[#allocation160_spill] sm:$0xff] }
 0xac7   :  { %5398 = vmatpush.xpose.msrb.mxu1 %v13008_v29  ;;  %v13017_v29 = vld [vmem:[#allocation197_spill] sm:$0xff] }
 0xac8   :  { %5325 = vmatpush.xpose.msrb.mxu0 %v13006_v25  ;;  %5523 = vmatpush.xpose.msrb.mxu3 %v13009_v46 }
 0xac9   :  { %5478 = vmatpush.xpose.msrb.mxu2 %v13010_v62  ;;  %v13018_v62 = vld [vmem:[#allocation165_spill] sm:$0xff] }
 0xacb   :  { %5404 = vmatpush.xpose.msrb.mxu1 %v13011_v2  ;;  %v13020_v2 = vld [vmem:[#allocation200_spill] sm:$0xff] }
 0xacc   :  { %5327 = vmatpush.xpose.msrb.mxu0 %v13009_v46  ;;  %5525 = vmatpush.xpose.msrb.mxu3 %v13012_v14 }
 0xacd   :  { %5481 = vmatpush.xpose.msrb.mxu2 %v13013_v21  ;;  %v13021_v21 = vld [vmem:[#allocation169_spill] sm:$0xff] }
 0xacf   :  { %5410 = vmatpush.xpose.msrb.mxu1 %v13014_v15  ;;  %v13023_v15 = vld [vmem:[#allocation18_spill] sm:$0xff] }
 0xad0   :  { %5329 = vmatpush.xpose.msrb.mxu0 %v13012_v14  ;;  %5527 = vmatpush.xpose.msrb.mxu3 %v13015_v13 }
 0xad1   :  { %5484 = vmatpush.xpose.msrb.mxu2 %v13016_v51  ;;  %v13024_v51 = vld [vmem:[#allocation173_spill] sm:$0xff] }
 0xad3   :  { %5416 = vmatpush.xpose.msrb.mxu1 %v13017_v29  ;;  %v13026_v29 = vld [vmem:[#allocation205_spill] sm:$0xff] }
 0xad4   :  { %5331 = vmatpush.xpose.msrb.mxu0 %v13015_v13  ;;  %5529 = vmatpush.xpose.msrb.mxu3 %v13018_v62 }
 0xad5   :  { %5487 = vmatpush.xpose.msrb.mxu2 %v13019_v52  ;;  %v13027_v52 = vld [vmem:[#allocation177_spill] sm:$0xff] }
 0xad7   :  { %5422 = vmatpush.xpose.msrb.mxu1 %v13020_v2  ;;  %v13029_v2 = vld [vmem:[#allocation207_spill] sm:$0xff] }
 0xad8   :  { %5333 = vmatpush.xpose.msrb.mxu0 %v13018_v62  ;;  %5531 = vmatpush.xpose.msrb.mxu3 %v13021_v21 }
 0xad9   :  { %5490 = vmatpush.xpose.msrb.mxu2 %v13022_v18  ;;  %v13030_v18 = vld [vmem:[#allocation181_spill] sm:$0xff] }
 0xadb   :  { %5428 = vmatpush.xpose.msrb.mxu1 %v13023_v15  ;;  %v13032_v15 = vld [vmem:[#allocation210_spill] sm:$0xff] }
 0xadc   :  { %5335 = vmatpush.xpose.msrb.mxu0 %v13021_v21  ;;  %5533 = vmatpush.xpose.msrb.mxu3 %v13024_v51 }
 0xadd   :  { %5493 = vmatpush.xpose.msrb.mxu2 %v13025_v49  ;;  %v13033_v49 = vld [vmem:[#allocation185_spill] sm:$0xff] }
 0xadf   :  { %5434 = vmatpush.xpose.msrb.mxu1 %v13026_v29  ;;  %v13035_v29 = vld [vmem:[#allocation213_spill] sm:$0xff] }
 0xae0   :  { %5337 = vmatpush.xpose.msrb.mxu0 %v13024_v51  ;;  %5535 = vmatpush.xpose.msrb.mxu3 %v13027_v52 }
 0xae1   :  { %5496 = vmatpush.xpose.msrb.mxu2 %v13028_v8  ;;  %v13036_v8 = vld [vmem:[#allocation189_spill] sm:$0xff] }
 0xae3   :  { %5440 = vmatpush.xpose.msrb.mxu1 %v13029_v2  ;;  %v13037_v2 = vld [vmem:[#allocation199_spill] sm:$0xff] }
 0xae4   :  { %5339 = vmatpush.xpose.msrb.mxu0 %v13027_v52  ;;  %5537 = vmatpush.xpose.msrb.mxu3 %v13030_v18 }
 0xae5   :  { %5499 = vmatpush.xpose.msrb.mxu2 %v13031_v37  ;;  %v13038_v37 = vld [vmem:[#allocation193_spill] sm:$0xff] }
 0xae7   :  { %5446 = vmatpush.xpose.msrb.mxu1 %v13032_v15  ;;  %v13042_v15 = vld [vmem:[#allocation209_spill] sm:$0xff] }
 0xae8   :  { %5341 = vmatpush.xpose.msrb.mxu0 %v13030_v18  ;;  %5539 = vmatpush.xpose.msrb.mxu3 %v13033_v49 }
 0xae9   :  { %5502 = vmatpush.xpose.msrb.mxu2 %v13034_v53  ;;  %v13039_v53 = vld [vmem:[#allocation226_spill] sm:$0xff] }
 0xaeb   :  { %5452 = vmatpush.xpose.msrb.mxu1 %v13035_v29  ;;  %v13041_v29 = vld [vmem:[#allocation230_spill] sm:$0xff] }
 0xaec   :  { %5343 = vmatpush.xpose.msrb.mxu0 %v13033_v49  ;;  %5541 = vmatpush.xpose.msrb.mxu3 %v13036_v8 }
 0xaed   :  { %5505 = vmatpush.xpose.msrb.mxu2 %v13037_v2  ;;  %v13040_v2 = vld [vmem:[#allocation151_spill] sm:$0xff] }
 0xaee   :  { %5454 = vmatmul.f32.vlgmr.msrb.gmra.mxu1 %v10483_v41 }
 0xaef   :  { %5621 = vmatpush.xpose.msra.mxu1 %v12993_v1  ;;  %v13043_v1 = vld [vmem:[#allocation154_spill] sm:$0xff] }
 0xaf0   :  { %5345 = vmatpush.xpose.msrb.mxu0 %v13036_v8  ;;  %5543 = vmatpush.xpose.msrb.mxu3 %v13038_v37 }
 0xaf1   :  { %5658 = vmatpush.xpose.msra.mxu2 %v12817_v32 }
 0xaf2   :  { %5508 = vmatmul.f32.vlgmr.msrb.gmra.mxu2 %v10486_v57 }
 0xaf3   :  { %5623 = vmatpush.xpose.msra.mxu1 %v12997_v43  ;;  %5547 = vmatmul.f32.vlgmr.msrb.gmra.mxu3 %v10492_v17  ;;  %v13045_v43 = vld [vmem:[#allocation212_spill] sm:$0xff] }
 0xaf4   :  { %5703 = vmatpush.xpose.msra.mxu3 %v13039_v53  ;;  %5347 = vmatpush.xpose.msrb.mxu0 %v13038_v37  ;;  %v13044_v53 = vld [vmem:[#allocation234_spill] sm:$0xff] }
 0xaf5   :  { %5660 = vmatpush.xpose.msra.mxu2 %v12819_v50 }
 0xaf7   :  { %5625 = vmatpush.xpose.msra.mxu1 %v13000_v24  ;;  %5353 = vmatmul.f32.vlgmr.msrb.gmra.mxu0 %v10500_v36  ;;  %v13048_v24 = vld [vmem:[#allocation215_spill] sm:$0xff] }
 0xaf8   :  { %5554 = vmatpush.xpose.msra.mxu0 %v13040_v2  ;;  %5709 = vmatpush.xpose.msra.mxu3 %v13041_v29  ;;  %v13047_v2 = vld [vmem:[#allocation238_spill] sm:$0xff]  ;;  %v13049_v29 = vld [vmem:[#allocation16_spill] sm:$0xff] }
 0xaf9   :  { %5662 = vmatpush.xpose.msra.mxu2 %v13042_v15 }
 0xafb   :  { %5627 = vmatpush.xpose.msra.mxu1 %v13003_v19  ;;  %v13052_v19 = vld [vmem:[#allocation163_spill] sm:$0xff] }
 0xafc   :  { %5558 = vmatpush.xpose.msra.mxu0 %v13043_v1  ;;  %5715 = vmatpush.xpose.msra.mxu3 %v13044_v53  ;;  %v13051_v1 = vld [vmem:[#allocation218_spill] sm:$0xff] }
 0xafd   :  { %5664 = vmatpush.xpose.msra.mxu2 %v13045_v43  ;;  %v13053_v53 = vld [vmem:[#allocation246_spill] sm:$0xff] }
 0xaff   :  { %5629 = vmatpush.xpose.msra.mxu1 %v13006_v25  ;;  %v13055_v25 = vld [vmem:[#allocation168_spill] sm:$0xff] }
 0xb00   :  { %5562 = vmatpush.xpose.msra.mxu0 %v13046_v47  ;;  %5721 = vmatpush.xpose.msra.mxu3 %v13047_v2  ;;  %v13054_v47 = vld [vmem:[#allocation222_spill] sm:$0xff]  ;;  %v13056_v2 = vld [vmem:[#allocation251_spill] sm:$0xff] }
 0xb01   :  { %5666 = vmatpush.xpose.msra.mxu2 %v13048_v24 }
 0xb03   :  { %5631 = vmatpush.xpose.msra.mxu1 %v13009_v46  ;;  %v13058_v46 = vld [vmem:[#allocation171_spill] sm:$0xff] }
 0xb04   :  { %5566 = vmatpush.xpose.msra.mxu0 %v13049_v29  ;;  %5727 = vmatpush.xpose.msra.mxu3 %v13050_v27  ;;  %v13057_v29 = vld [vmem:[#allocation225_spill] sm:$0xff]  ;;  %v13059_v27 = vld [vmem:[#allocation255_spill] sm:$0xff] }
 0xb05   :  { %5668 = vmatpush.xpose.msra.mxu2 %v13051_v1 }
 0xb07   :  { %5633 = vmatpush.xpose.msra.mxu1 %v13012_v14  ;;  %v13061_v14 = vld [vmem:[#allocation175_spill] sm:$0xff] }
 0xb08   :  { %5570 = vmatpush.xpose.msra.mxu0 %v13052_v19  ;;  %5733 = vmatpush.xpose.msra.mxu3 %v13053_v53  ;;  %v13060_v19 = vld [vmem:[#allocation229_spill] sm:$0xff]  ;;  %v13062_v53 = vld [vmem:[#allocation259_spill] sm:$0xff] }
 0xb09   :  { %5670 = vmatpush.xpose.msra.mxu2 %v13054_v47 }
 0xb0b   :  { %5635 = vmatpush.xpose.msra.mxu1 %v13015_v13  ;;  %v13064_v13 = vld [vmem:[#allocation179_spill] sm:$0xff] }
 0xb0c   :  { %5574 = vmatpush.xpose.msra.mxu0 %v13055_v25  ;;  %5739 = vmatpush.xpose.msra.mxu3 %v13056_v2  ;;  %v13063_v25 = vld [vmem:[#allocation233_spill] sm:$0xff]  ;;  %v13065_v2 = vld [vmem:[#allocation262_spill] sm:$0xff] }
 0xb0d   :  { %5672 = vmatpush.xpose.msra.mxu2 %v13057_v29 }
 0xb0f   :  { %5637 = vmatpush.xpose.msra.mxu1 %v13018_v62  ;;  %v13067_v62 = vld [vmem:[#allocation183_spill] sm:$0xff] }
 0xb10   :  { %5578 = vmatpush.xpose.msra.mxu0 %v13058_v46  ;;  %5745 = vmatpush.xpose.msra.mxu3 %v13059_v27  ;;  %v13066_v46 = vld [vmem:[#allocation237_spill] sm:$0xff] }
 0xb11   :  { %5674 = vmatpush.xpose.msra.mxu2 %v13060_v19  ;;  %v13068_v27 = vld [vmem:[#allocation265_spill] sm:$0xff] }
 0xb13   :  { %5639 = vmatpush.xpose.msra.mxu1 %v13021_v21  ;;  %v13070_v21 = vld [vmem:[#allocation187_spill] sm:$0xff] }
 0xb14   :  { %5582 = vmatpush.xpose.msra.mxu0 %v13061_v14  ;;  %5751 = vmatpush.xpose.msra.mxu3 %v13062_v53  ;;  %v13069_v14 = vld [vmem:[#allocation241_spill] sm:$0xff]  ;;  %v13071_v53 = vld [vmem:[#allocation267_spill] sm:$0xff] }
 0xb15   :  { %5676 = vmatpush.xpose.msra.mxu2 %v13063_v25 }
 0xb17   :  { %5641 = vmatpush.xpose.msra.mxu1 %v13024_v51  ;;  %v13073_v51 = vld [vmem:[#allocation191_spill] sm:$0xff] }
 0xb18   :  { %5586 = vmatpush.xpose.msra.mxu0 %v13064_v13  ;;  %5757 = vmatpush.xpose.msra.mxu3 %v13065_v2  ;;  %v13072_v13 = vld [vmem:[#allocation245_spill] sm:$0xff] }
 0xb19   :  { %5678 = vmatpush.xpose.msra.mxu2 %v13066_v46  ;;  %v13074_v2 = vld [vmem:[#allocation269_spill] sm:$0xff] }
 0xb1b   :  { %5643 = vmatpush.xpose.msra.mxu1 %v13027_v52  ;;  %v13076_v52 = vld [vmem:[#allocation195_spill] sm:$0xff] }
 0xb1c   :  { %5590 = vmatpush.xpose.msra.mxu0 %v13067_v62  ;;  %5763 = vmatpush.xpose.msra.mxu3 %v13068_v27  ;;  %v13075_v62 = vld [vmem:[#allocation249_spill] sm:$0xff]  ;;  %v13077_v27 = vld [vmem:[#allocation270_spill] sm:$0xff] }
 0xb1d   :  { %5680 = vmatpush.xpose.msra.mxu2 %v13069_v14 }
 0xb1f   :  { %5645 = vmatpush.xpose.msra.mxu1 %v13030_v18  ;;  %v13079_v18 = vld [vmem:[#allocation198_spill] sm:$0xff] }
 0xb20   :  { %5594 = vmatpush.xpose.msra.mxu0 %v13070_v21  ;;  %5769 = vmatpush.xpose.msra.mxu3 %v13071_v53  ;;  %v13078_v21 = vld [vmem:[#allocation254_spill] sm:$0xff]  ;;  %v13080_v53 = vld [vmem:[#allocation271_spill] sm:$0xff] }
 0xb21   :  { %5682 = vmatpush.xpose.msra.mxu2 %v13072_v13 }
 0xb23   :  { %5647 = vmatpush.xpose.msra.mxu1 %v13033_v49 }
 0xb24   :  { %5598 = vmatpush.xpose.msra.mxu0 %v13073_v51  ;;  %5775 = vmatpush.xpose.msra.mxu3 %v13074_v2  ;;  %v13081_v51 = vld [vmem:[#allocation258_spill] sm:$0xff] }
 0xb25   :  { %5684 = vmatpush.xpose.msra.mxu2 %v13075_v62  ;;  %v13082_v2 = vld [vmem:[#allocation214_spill] sm:$0xff] }
 0xb27   :  { %5649 = vmatpush.xpose.msra.mxu1 %v13036_v8  ;;  %v13084_v8 = vld [vmem:[#allocation272_spill] sm:$0xff] }
 0xb28   :  { %5602 = vmatpush.xpose.msra.mxu0 %v13076_v52  ;;  %5781 = vmatpush.xpose.msra.mxu3 %v13077_v27  ;;  %v13083_v52 = vld [vmem:[#allocation201_spill] sm:$0xff]  ;;  %v13087_v27 = vld [vmem:[#allocation208_spill] sm:$0xff] }
 0xb29   :  { %5686 = vmatpush.xpose.msra.mxu2 %v13078_v21 }
 0xb2b   :  { %5651 = vmatpush.xpose.msra.mxu1 %v13038_v37 }
 0xb2c   :  { %5606 = vmatpush.xpose.msra.mxu0 %v13079_v18  ;;  %5787 = vmatpush.xpose.msra.mxu3 %v13080_v53  ;;  %v13085_v18 = vld [vmem:[#allocation217_spill] sm:$0xff]  ;;  %v13086_v53 = vld [vmem:[#allocation202_spill] sm:$0xff] }
 0xb2d   :  { %5688 = vmatpush.xpose.msra.mxu2 %v13081_v51 }
 0xb2e   :  { %5653 = vmatmul.f32.vlgmr.msra.gmra.mxu1 %v10483_v41 }
 0xb2f   :  { %5854 = vmatpush.xpose.msrb.mxu1 %v12817_v32 }
 0xb30   :  { %5610 = vmatpush.xpose.msra.mxu0 %v13083_v52  ;;  %5793 = vmatpush.xpose.msra.mxu3 %v13084_v8  ;;  %v13088_v52 = vld [vmem:[#allocation221_spill] sm:$0xff]  ;;  %v13091_v8 = vld [vmem:[#allocation216_spill] sm:$0xff] }
 0xb31   :  { %5895 = vmatpush.xpose.msrb.mxu2 %v13082_v2  ;;  %v13116_v2 = vld [vmem:[#allocation26_spill] sm:$0xff] }
 0xb32   :  { %5694 = vmatmul.f32.vlgmr.msra.gmra.mxu2 %v10500_v36  ;;  %v13089_v36 = vld [vmem:[#allocation211_spill] sm:$0xff] }
 0xb33   :  { %5856 = vmatpush.xpose.msrb.mxu1 %v12819_v50  ;;  %5795 = vmatmul.f32.vlgmr.msra.gmra.mxu3 %v10483_v41 }
 0xb34   :  { %5962 = vmatpush.xpose.msrb.mxu3 %v12817_v32  ;;  %5614 = vmatpush.xpose.msra.mxu0 %v13086_v53  ;;  %v13093_v53 = vld [vmem:[#allocation219_spill] sm:$0xff] }
 0xb35   :  { %5899 = vmatpush.xpose.msrb.mxu2 %v13085_v18  ;;  %v13090_v18 = vld [vmem:[#allocation224_spill] sm:$0xff] }
 0xb37   :  { %5858 = vmatpush.xpose.msrb.mxu1 %v13042_v15  ;;  %5616 = vmatmul.f32.vlgmr.msra.gmra.mxu0 %v10483_v41 }
 0xb38   :  { %5801 = vmatpush.xpose.msrb.mxu0 %v13087_v27  ;;  %5964 = vmatpush.xpose.msrb.mxu3 %v12819_v50  ;;  %v13092_v27 = vld [vmem:[#allocation227_spill] sm:$0xff] }
 0xb39   :  { %5903 = vmatpush.xpose.msrb.mxu2 %v13088_v52  ;;  %v13095_v52 = vld [vmem:[#allocation220_spill] sm:$0xff] }
 0xb3b   :  { %5860 = vmatpush.xpose.msrb.mxu1 %v13045_v43 }
 0xb3c   :  { %5804 = vmatpush.xpose.msrb.mxu0 %v13089_v36  ;;  %5966 = vmatpush.xpose.msrb.mxu3 %v13042_v15  ;;  %v13094_v36 = vld [vmem:[#allocation231_spill] sm:$0xff] }
 0xb3d   :  { %5907 = vmatpush.xpose.msrb.mxu2 %v13090_v18  ;;  %v13097_v18 = vld [vmem:[#allocation223_spill] sm:$0xff] }
 0xb3f   :  { %5862 = vmatpush.xpose.msrb.mxu1 %v13048_v24 }
 0xb40   :  { %5807 = vmatpush.xpose.msrb.mxu0 %v13091_v8  ;;  %5968 = vmatpush.xpose.msrb.mxu3 %v13045_v43  ;;  %v13096_v8 = vld [vmem:[#allocation235_spill] sm:$0xff] }
 0xb41   :  { %5911 = vmatpush.xpose.msrb.mxu2 %v13092_v27  ;;  %v13099_v27 = vld [vmem:[#allocation228_spill] sm:$0xff] }
 0xb43   :  { %5864 = vmatpush.xpose.msrb.mxu1 %v13051_v1 }
 0xb44   :  { %5810 = vmatpush.xpose.msrb.mxu0 %v13093_v53  ;;  %5970 = vmatpush.xpose.msrb.mxu3 %v13048_v24  ;;  %v13098_v53 = vld [vmem:[#allocation239_spill] sm:$0xff] }
 0xb45   :  { %5915 = vmatpush.xpose.msrb.mxu2 %v13094_v36  ;;  %v13101_v36 = vld [vmem:[#allocation232_spill] sm:$0xff] }
 0xb47   :  { %5866 = vmatpush.xpose.msrb.mxu1 %v13054_v47 }
 0xb48   :  { %5813 = vmatpush.xpose.msrb.mxu0 %v13095_v52  ;;  %5972 = vmatpush.xpose.msrb.mxu3 %v13051_v1  ;;  %v13100_v52 = vld [vmem:[#allocation243_spill] sm:$0xff] }
 0xb49   :  { %5919 = vmatpush.xpose.msrb.mxu2 %v13096_v8  ;;  %v13103_v8 = vld [vmem:[#allocation236_spill] sm:$0xff] }
 0xb4b   :  { %5868 = vmatpush.xpose.msrb.mxu1 %v13057_v29 }
 0xb4c   :  { %5816 = vmatpush.xpose.msrb.mxu0 %v13097_v18  ;;  %5974 = vmatpush.xpose.msrb.mxu3 %v13054_v47  ;;  %v13102_v18 = vld [vmem:[#allocation247_spill] sm:$0xff] }
 0xb4d   :  { %5923 = vmatpush.xpose.msrb.mxu2 %v13098_v53  ;;  %v13105_v53 = vld [vmem:[#allocation240_spill] sm:$0xff] }
 0xb4f   :  { %5870 = vmatpush.xpose.msrb.mxu1 %v13060_v19 }
 0xb50   :  { %5819 = vmatpush.xpose.msrb.mxu0 %v13099_v27  ;;  %5976 = vmatpush.xpose.msrb.mxu3 %v13057_v29  ;;  %v13104_v27 = vld [vmem:[#allocation252_spill] sm:$0xff] }
 0xb51   :  { %5927 = vmatpush.xpose.msrb.mxu2 %v13100_v52  ;;  %v13107_v52 = vld [vmem:[#allocation244_spill] sm:$0xff] }
 0xb53   :  { %5872 = vmatpush.xpose.msrb.mxu1 %v13063_v25 }
 0xb54   :  { %5822 = vmatpush.xpose.msrb.mxu0 %v13101_v36  ;;  %5978 = vmatpush.xpose.msrb.mxu3 %v13060_v19  ;;  %v13106_v36 = vld [vmem:[#allocation256_spill] sm:$0xff] }
 0xb55   :  { %5931 = vmatpush.xpose.msrb.mxu2 %v13102_v18  ;;  %v13109_v18 = vld [vmem:[#allocation248_spill] sm:$0xff] }
 0xb57   :  { %5874 = vmatpush.xpose.msrb.mxu1 %v13066_v46 }
 0xb58   :  { %5825 = vmatpush.xpose.msrb.mxu0 %v13103_v8  ;;  %5980 = vmatpush.xpose.msrb.mxu3 %v13063_v25  ;;  %v13108_v8 = vld [vmem:[#allocation260_spill] sm:$0xff] }
 0xb59   :  { %5935 = vmatpush.xpose.msrb.mxu2 %v13104_v27  ;;  %v13111_v27 = vld [vmem:[#allocation253_spill] sm:$0xff] }
 0xb5b   :  { %5876 = vmatpush.xpose.msrb.mxu1 %v13069_v14 }
 0xb5c   :  { %5828 = vmatpush.xpose.msrb.mxu0 %v13105_v53  ;;  %5982 = vmatpush.xpose.msrb.mxu3 %v13066_v46  ;;  %v13110_v53 = vld [vmem:[#allocation263_spill] sm:$0xff] }
 0xb5d   :  { %5939 = vmatpush.xpose.msrb.mxu2 %v13106_v36  ;;  %v13113_v36 = vld [vmem:[#allocation257_spill] sm:$0xff] }
 0xb5f   :  { %5878 = vmatpush.xpose.msrb.mxu1 %v13072_v13 }
 0xb60   :  { %5831 = vmatpush.xpose.msrb.mxu0 %v13107_v52  ;;  %5984 = vmatpush.xpose.msrb.mxu3 %v13069_v14  ;;  %v13112_v52 = vld [vmem:[#allocation266_spill] sm:$0xff] }
 0xb61   :  { %5943 = vmatpush.xpose.msrb.mxu2 %v13108_v8  ;;  %v13115_v8 = vld [vmem:[#allocation41_spill] sm:$0xff] }
 0xb63   :  { %5880 = vmatpush.xpose.msrb.mxu1 %v13075_v62 }
 0xb64   :  { %5834 = vmatpush.xpose.msrb.mxu0 %v13109_v18  ;;  %5986 = vmatpush.xpose.msrb.mxu3 %v13072_v13  ;;  %v13114_v18 = vld [vmem:[#allocation268_spill] sm:$0xff]  ;;  %v13155_v13 = vld [vmem:[#allocation110_spill] sm:$0xff] }
 0xb65   :  { %5947 = vmatpush.xpose.msrb.mxu2 %v13110_v53  ;;  %v13143_v53 = vld [vmem:[#allocation91_spill] sm:$0xff] }
 0xb67   :  { %5882 = vmatpush.xpose.msrb.mxu1 %v13078_v21 }
 0xb68   :  { %5837 = vmatpush.xpose.msrb.mxu0 %v13111_v27  ;;  %5988 = vmatpush.xpose.msrb.mxu3 %v13075_v62  ;;  %v13117_v27 = vld [vmem:[#allocation261_spill] sm:$0xff]  ;;  %v13152_v62 = vld [vmem:[#allocation104_spill] sm:$0xff] }
 0xb69   :  { %5951 = vmatpush.xpose.msrb.mxu2 %v13112_v52  ;;  %v13118_v52 = vld [vmem:[#allocation42_spill] sm:$0xff] }
 0xb6b   :  { %5884 = vmatpush.xpose.msrb.mxu1 %v13081_v51 }
 0xb6c   :  { %5840 = vmatpush.xpose.msrb.mxu0 %v13113_v36  ;;  %5990 = vmatpush.xpose.msrb.mxu3 %v13078_v21  ;;  %v13119_v36 = vld [vmem:[#allocation27_spill] sm:$0xff] }
 0xb6d   :  { %5955 = vmatpush.xpose.msrb.mxu2 %v13114_v18  ;;  %v13120_v18 = vld [vmem:[#allocation264_spill] sm:$0xff]  ;;  %v13149_v21 = vld [vmem:[#allocation99_spill] sm:$0xff] }
 0xb6e   :  { %5888 = vmatmul.f32.vlgmr.msrb.gmra.mxu1 %v10492_v17  ;;  %v13123_v17 = vld [vmem:[#allocation21_spill] sm:$0xff] }
 0xb6f   :  { %6256 = vmatpush.msra.mxu1 %v13115_v8  ;;  %v13121_v8 = vld [vmem:[#allocation45_spill] sm:$0xff] }
 0xb70   :  { %5843 = vmatpush.xpose.msrb.mxu0 %v13117_v27  ;;  %5992 = vmatpush.xpose.msrb.mxu3 %v13081_v51  ;;  %v13124_v27 = vld [vmem:[#allocation52_spill] sm:$0xff]  ;;  %v13146_v51 = vld [vmem:[#allocation95_spill] sm:$0xff] }
 0xb71   :  { %6354 = vmatpush.msra.mxu2 %v13116_v2  ;;  %6262 = vmatpush.msra.mxu1 %v13118_v52  ;;  %v13122_v2 = vld [vmem:[#allocation28_spill] sm:$0xff]  ;;  %v13125_v52 = vld [vmem:[#allocation30_spill] sm:$0xff] }
 0xb72   :  { %5957 = vmatmul.f32.vlgmr.msrb.gmra.mxu2 %v10483_v41 }
 0xb73   :  { %6357 = vmatpush.msra.mxu2 %v13119_v36  ;;  %5994 = vmatmul.f32.vlgmr.msrb.gmra.mxu3 %v10483_v41  ;;  %v13126_v36 = vld [vmem:[#allocation57_spill] sm:$0xff]  ;;  %v13127_v41 = vld [vmem:[#allocation31_spill] sm:$0xff] }
 0xb74   :  { %6407 = vmatpush.msra.mxu3 %v12901_v40  ;;  %5846 = vmatpush.xpose.msrb.mxu0 %v13120_v18  ;;  %v13140_v18 = vld [vmem:[#allocation87_spill] sm:$0xff] }
 0xb75   :  { %6268 = vmatpush.msra.mxu1 %v13121_v8  ;;  %6360 = vmatpush.msra.mxu2 %v13122_v2  ;;  %v13128_v8 = vld [vmem:[#allocation61_spill] sm:$0xff]  ;;  %v13129_v2 = vld [vmem:[#allocation35_spill] sm:$0xff] }
 0xb76   :  { %6409 = vmatpush.msra.mxu3 %v13123_v17 }
 0xb77   :  { %5849 = vmatmul.f32.vlgmr.msrb.gmra.mxu0 %v10486_v57  ;;  %6274 = vmatpush.msra.mxu1 %v13124_v27  ;;  %v13130_v57 = vld [vmem:[#allocation24_spill] sm:$0xff]  ;;  %v13131_v27 = vld [vmem:[#allocation66_spill] sm:$0xff] }
 0xb78   :  { %6211 = vmatpush.msra.mxu0 %v12901_v40  ;;  %6363 = vmatpush.msra.mxu2 %v13125_v52  ;;  %v13132_v52 = vld [vmem:[#allocation38_spill] sm:$0xff] }
 0xb79   :  { %6411 = vmatpush.msra.mxu3 %v12908_v35  ;;  %6280 = vmatpush.msra.mxu1 %v13126_v36  ;;  %v13133_v36 = vld [vmem:[#allocation67_spill] sm:$0xff] }
 0xb7a   :  { %6213 = vmatpush.msra.mxu0 %v13123_v17  ;;  %6366 = vmatpush.msra.mxu2 %v13127_v41  ;;  %v13134_v41 = vld [vmem:[#allocation40_spill] sm:$0xff] }
 0xb7b   :  { %6413 = vmatpush.msra.mxu3 %v12911_v5  ;;  %6286 = vmatpush.msra.mxu1 %v13128_v8  ;;  %v13135_v8 = vld [vmem:[#allocation76_spill] sm:$0xff] }
 0xb7c   :  { %6215 = vmatpush.msra.mxu0 %v12908_v35  ;;  %6369 = vmatpush.msra.mxu2 %v13129_v2  ;;  %v13136_v2 = vld [vmem:[#allocation53_spill] sm:$0xff] }
 0xb7d   :  { %6415 = vmatpush.msra.mxu3 %v13130_v57  ;;  %6292 = vmatpush.msra.mxu1 %v13131_v27  ;;  %v13137_v27 = vld [vmem:[#allocation81_spill] sm:$0xff] }
 0xb7e   :  { %6217 = vmatpush.msra.mxu0 %v12911_v5  ;;  %6372 = vmatpush.msra.mxu2 %v13132_v52  ;;  %v13138_v52 = vld [vmem:[#allocation54_spill] sm:$0xff] }
 0xb7f   :  { %6417 = vmatpush.msra.mxu3 %v12917_v0  ;;  %6298 = vmatpush.msra.mxu1 %v13133_v36  ;;  %v13139_v36 = vld [vmem:[#allocation46_spill] sm:$0xff] }
 0xb80   :  { %6219 = vmatpush.msra.mxu0 %v13130_v57  ;;  %6375 = vmatpush.msra.mxu2 %v13134_v41  ;;  %v13141_v41 = vld [vmem:[#allocation55_spill] sm:$0xff] }
 0xb81   :  { %6419 = vmatpush.msra.mxu3 %v12920_v56  ;;  %6304 = vmatpush.msra.mxu1 %v13135_v8  ;;  %v13142_v8 = vld [vmem:[#allocation47_spill] sm:$0xff] }
 0xb82   :  { %6221 = vmatpush.msra.mxu0 %v12917_v0  ;;  %6378 = vmatpush.msra.mxu2 %v13136_v2  ;;  %v13144_v2 = vld [vmem:[#allocation59_spill] sm:$0xff] }
 0xb83   :  { %6421 = vmatpush.msra.mxu3 %v12923_v44  ;;  %6310 = vmatpush.msra.mxu1 %v13137_v27  ;;  %v13145_v27 = vld [vmem:[#allocation48_spill] sm:$0xff] }
 0xb84   :  { %6223 = vmatpush.msra.mxu0 %v12920_v56  ;;  %6381 = vmatpush.msra.mxu2 %v13138_v52  ;;  %v13147_v52 = vld [vmem:[#allocation60_spill] sm:$0xff] }
 0xb85   :  { %6423 = vmatpush.msra.mxu3 %v13139_v36  ;;  %6316 = vmatpush.msra.mxu1 %v13140_v18  ;;  %v13148_v18 = vld [vmem:[#allocation50_spill] sm:$0xff] }
 0xb86   :  { %6225 = vmatpush.msra.mxu0 %v12923_v44  ;;  %6384 = vmatpush.msra.mxu2 %v13141_v41  ;;  %v13150_v41 = vld [vmem:[#allocation64_spill] sm:$0xff] }
 0xb87   :  { %6425 = vmatpush.msra.mxu3 %v13142_v8  ;;  %6322 = vmatpush.msra.mxu1 %v13143_v53  ;;  %v13151_v53 = vld [vmem:[#allocation51_spill] sm:$0xff] }
 0xb88   :  { %6227 = vmatpush.msra.mxu0 %v13139_v36  ;;  %6387 = vmatpush.msra.mxu2 %v13144_v2  ;;  %v13153_v2 = vld [vmem:[#allocation75_spill] sm:$0xff] }
 0xb89   :  { %6427 = vmatpush.msra.mxu3 %v13145_v27  ;;  %6328 = vmatpush.msra.mxu1 %v13146_v51  ;;  %v13154_v51 = vld [vmem:[#allocation56_spill] sm:$0xff] }
 0xb8a   :  { %6229 = vmatpush.msra.mxu0 %v13142_v8  ;;  %6390 = vmatpush.msra.mxu2 %v13147_v52  ;;  %v13157_v52 = vld [vmem:[#allocation65_spill] sm:$0xff] }
 0xb8b   :  { %6429 = vmatpush.msra.mxu3 %v13148_v18  ;;  %6334 = vmatpush.msra.mxu1 %v13149_v21  ;;  %v13156_v21 = vld [vmem:[#allocation82_spill] sm:$0xff] }
 0xb8c   :  { %6231 = vmatpush.msra.mxu0 %v13145_v27  ;;  %6393 = vmatpush.msra.mxu2 %v13150_v41  ;;  %v13162_v41 = vld [vmem:[#allocation109_spill] sm:$0xff] }
 0xb8d   :  { %6431 = vmatpush.msra.mxu3 %v13151_v53  ;;  %6340 = vmatpush.msra.mxu1 %v13152_v62  ;;  %v13158_v62 = vld [vmem:[#allocation70_spill] sm:$0xff] }
 0xb8e   :  { %6233 = vmatpush.msra.mxu0 %v13148_v18  ;;  %6396 = vmatpush.msra.mxu2 %v13153_v2  ;;  %v13164_v2 = vld [vmem:[#allocation113_spill] sm:$0xff] }
 0xb8f   :  { %6433 = vmatpush.msra.mxu3 %v13154_v51  ;;  %6346 = vmatpush.msra.mxu1 %v13155_v13  ;;  %v13159_v13 = vld [vmem:[#allocation100_spill] sm:$0xff] }
 0xb90   :  { %6235 = vmatpush.msra.mxu0 %v13151_v53  ;;  %6399 = vmatpush.msra.mxu2 %v13156_v21  ;;  %v13166_v21 = vld [vmem:[#allocation116_spill] sm:$0xff] }
 0xb91   :  { %6515 = vmatpush.msrb.mxu1 %v12901_v40  ;;  %6435 = vmatpush.msra.mxu3 %v13157_v52  ;;  %v13160_v40 = vld [vmem:[#allocation105_spill] sm:$0xff] }
 0xb92   :  { %6552 = vmatpush.msrb.mxu2 %v12455_v7  ;;  %6237 = vmatpush.msra.mxu0 %v13154_v51 }
 0xb93   :  { %6517 = vmatpush.msrb.mxu1 %v13123_v17  ;;  %6437 = vmatpush.msra.mxu3 %v13158_v62  ;;  %v13161_v17 = vld [vmem:[#allocation32_spill] sm:$0xff] }
 0xb94   :  { %6554 = vmatpush.msrb.mxu2 %v12458_v38  ;;  %6239 = vmatpush.msra.mxu0 %v13157_v52 }
 0xb95   :  { %6519 = vmatpush.msrb.mxu1 %v12908_v35  ;;  %6597 = vmatpush.msrb.mxu3 %v13159_v13  ;;  %v13163_v35 = vld [vmem:[#allocation33_spill] sm:$0xff]  ;;  %v13168_v13 = vld [vmem:[#allocation118_spill] sm:$0xff] }
 0xb96   :  { %6556 = vmatpush.msrb.mxu2 %v12461_v39  ;;  %6241 = vmatpush.msra.mxu0 %v13158_v62 }
 0xb97   :  { %6521 = vmatpush.msrb.mxu1 %v12911_v5  ;;  %6603 = vmatpush.msrb.mxu3 %v13160_v40  ;;  %v13165_v5 = vld [vmem:[#allocation34_spill] sm:$0xff]  ;;  %v13170_v40 = vld [vmem:[#allocation120_spill] sm:$0xff] }
 0xb98   :  { %6558 = vmatpush.msrb.mxu2 %v12464_v61  ;;  %6448 = vmatpush.msrb.mxu0 %v13161_v17  ;;  %v13172_v17 = vld [vmem:[#allocation121_spill] sm:$0xff] }
 0xb99   :  { %6523 = vmatpush.msrb.mxu1 %v13130_v57  ;;  %6609 = vmatpush.msrb.mxu3 %v13162_v41  ;;  %v13167_v57 = vld [vmem:[#allocation36_spill] sm:$0xff]  ;;  %v13174_v41 = vld [vmem:[#allocation122_spill] sm:$0xff] }
 0xb9a   :  { %6560 = vmatpush.msrb.mxu2 %v12467_v59  ;;  %6452 = vmatpush.msrb.mxu0 %v13163_v35  ;;  %v13176_v35 = vld [vmem:[#allocation123_spill] sm:$0xff] }
 0xb9b   :  { %6525 = vmatpush.msrb.mxu1 %v12917_v0  ;;  %6615 = vmatpush.msrb.mxu3 %v13164_v2  ;;  %v13169_v0 = vld [vmem:[#allocation37_spill] sm:$0xff] }
 0xb9c   :  { %6562 = vmatpush.msrb.mxu2 %v12470_v9  ;;  %6456 = vmatpush.msrb.mxu0 %v13165_v5  ;;  %v13178_v2 = vld [vmem:[#allocation133_spill] sm:$0xff] }
 0xb9d   :  { %6527 = vmatpush.msrb.mxu1 %v12920_v56  ;;  %6621 = vmatpush.msrb.mxu3 %v13166_v21  ;;  %v13171_v56 = vld [vmem:[#allocation43_spill] sm:$0xff]  ;;  %v13180_v5 = vld [vmem:[#allocation137_spill] sm:$0xff] }
 0xb9e   :  { %6564 = vmatpush.msrb.mxu2 %v12473_v4  ;;  %6460 = vmatpush.msrb.mxu0 %v13167_v57  ;;  %v13182_v21 = vld [vmem:[#allocation141_spill] sm:$0xff]  ;;  %v13184_v57 = vld [vmem:[#allocation144_spill] sm:$0xff] }
 0xb9f   :  { %6529 = vmatpush.msrb.mxu1 %v12923_v44  ;;  %6627 = vmatpush.msrb.mxu3 %v13168_v13  ;;  %v13173_v44 = vld [vmem:[#allocation44_spill] sm:$0xff]  ;;  %v13186_v13 = vld [vmem:[#allocation146_spill] sm:$0xff] }
 0xba0   :  { %6566 = vmatpush.msrb.mxu2 %v12476_v22  ;;  %6464 = vmatpush.msrb.mxu0 %v13169_v0  ;;  %v13187_v0 = vld [vmem:[#allocation74_spill] sm:$0xff] }
 0xba1   :  { %6531 = vmatpush.msrb.mxu1 %v13139_v36  ;;  %6633 = vmatpush.msrb.mxu3 %v13170_v40  ;;  %v13175_v36 = vld [vmem:[#allocation49_spill] sm:$0xff]  ;;  %v13189_v40 = vld [vmem:[#allocation92_spill] sm:$0xff] }
 0xba2   :  { %6568 = vmatpush.msrb.mxu2 %v12479_v45  ;;  %6468 = vmatpush.msrb.mxu0 %v13171_v56  ;;  %v4672_v56 = vpop.f32.mrf.mxu0 }
 0xba3   :  { %6533 = vmatpush.msrb.mxu1 %v13142_v8  ;;  %6639 = vmatpush.msrb.mxu3 %v13172_v17  ;;  %v13177_v8 = vld [vmem:[#allocation58_spill] sm:$0xff]  ;;  %v4773_v17 = vpop.f32.mrf.mxu1 }
 0xba4   :  { %6570 = vmatpush.msrb.mxu2 %v12482_v16  ;;  %6472 = vmatpush.msrb.mxu0 %v13173_v44  ;;  %v4827_v44 = vpop.f32.mrf.mxu2 }
 0xba5   :  { %6535 = vmatpush.msrb.mxu1 %v13145_v27  ;;  %6645 = vmatpush.msrb.mxu3 %v13174_v41  ;;  %v13179_v27 = vld [vmem:[#allocation62_spill] sm:$0xff] }
 0xba6   :  { %6572 = vmatpush.msrb.mxu2 %v12485_v12  ;;  %6476 = vmatpush.msrb.mxu0 %v13175_v36 }
 0xba7   :  { %6537 = vmatpush.msrb.mxu1 %v13148_v18  ;;  %6651 = vmatpush.msrb.mxu3 %v13176_v35  ;;  %v13181_v18 = vld [vmem:[#allocation63_spill] sm:$0xff] }
 0xba8   :  { %6574 = vmatpush.msrb.mxu2 %v12488_v60  ;;  %6480 = vmatpush.msrb.mxu0 %v13177_v8 }
 0xba9   :  { %6539 = vmatpush.msrb.mxu1 %v13151_v53  ;;  %6657 = vmatpush.msrb.mxu3 %v13178_v2  ;;  %v13183_v53 = vld [vmem:[#allocation68_spill] sm:$0xff] }
 0xbaa   :  { %6576 = vmatpush.msrb.mxu2 %v12491_v30  ;;  %6484 = vmatpush.msrb.mxu0 %v13179_v27  ;;  %v4935_v41 = vpop.f32.mrf.mxu0 }
 0xbab   :  { %6541 = vmatpush.msrb.mxu1 %v13154_v51  ;;  %6663 = vmatpush.msrb.mxu3 %v13180_v5  ;;  %v13185_v51 = vld [vmem:[#allocation69_spill] sm:$0xff]  ;;  %v4972_v36 = vpop.f32.mrf.mxu1 }
 0xbac   :  { %6578 = vmatpush.msrb.mxu2 %v12494_v33  ;;  %6488 = vmatpush.msrb.mxu0 %v13181_v18  ;;  %v5013_v35 = vpop.f32.mrf.mxu2 }
 0xbad   :  { %6543 = vmatpush.msrb.mxu1 %v13157_v52  ;;  %6669 = vmatpush.msrb.mxu3 %v13182_v21  ;;  %v13188_v52 = vld [vmem:[#allocation85_spill] sm:$0xff] }
 0xbae   :  { %6580 = vmatpush.msrb.mxu2 %v12497_v42  ;;  %6492 = vmatpush.msrb.mxu0 %v13183_v53 }
 0xbaf   :  { %6545 = vmatpush.msrb.mxu1 %v13158_v62  ;;  %6675 = vmatpush.msrb.mxu3 %v13184_v57  ;;  %v4866_v62 = vpop.f32.mrf.mxu3 }
 0xbb0   :  { %6582 = vmatpush.msrb.mxu2 %v12709_v6  ;;  %6496 = vmatpush.msrb.mxu0 %v13185_v51 }
 0xbb1   :  { %6681 = vmatpush.msrb.mxu3 %v13186_v13 }
 0xbb2   :  { %6500 = vmatpush.msrb.mxu0 %v13187_v0  ;;  %v5168_v2 = vpop.f32.mrf.mxu0 }
 0xbb3   :  { %6687 = vmatpush.msrb.mxu3 %v12978_v28  ;;  %v5207_v27 = vpop.f32.mrf.mxu1  ;;  %v4774_v28 = vadd.f32 %v4773_v17, %v4672_v56 }
 0xbb4   :  { %6504 = vmatpush.msrb.mxu0 %v13188_v52  ;;  %v5276_v5 = vpop.f32.mrf.mxu2 }
 0xbb6   :  { %6508 = vmatpush.msrb.mxu0 %v13189_v40  ;;  %v4828_v40 = vadd.f32 %v4827_v44, %v4774_v28 }
 0xbb7   :  { %v5114_v8 = vpop.f32.mrf.mxu3 }
 0xbb8   :  { %v5115_v53 = vadd.f32 %v5114_v8, %v5013_v35  ;;  %v4867_v29 = vadd.f32 %v4866_v62, %v4828_v40 }
 0xbba   :  { %v5354_v21 = vpop.f32.mrf.mxu0  ;;  %v5169_v51 = vadd.f32 %v5168_v2, %v5115_v53  ;;  %v4936_v15 = vadd.f32 %v4935_v41, %v4867_v29 }
 0xbbb   :  { %v5455_v57 = vpop.f32.mrf.mxu1 }
 0xbbc   :  { %v5456_v13 = vadd.f32 %v5455_v57, %v5354_v21  ;;  %v5509_v0 = vpop.f32.mrf.mxu2  ;;  %v5208_v14 = vadd.f32 %v5207_v27, %v5169_v51  ;;  %v4973_v56 = vadd.f32 %v4972_v36, %v4936_v15 }
 0xbbe   :  { %v5510_v46 = vadd.f32 %v5509_v0, %v5456_v13  ;;  %v5277_v47 = vadd.f32 %v5276_v5, %v5208_v14  ;;  %v5998_v57 = vand.u32 2147483647, %v4973_v56 }
 0xbbf   :  { %v5313_v18 = vpop.f32.mrf.mxu3 }
 0xbc0   :  { %v5314_v37 = vadd.f32 %v5313_v18, %v5277_v47 }
 0xbc2   :  { %v5617_v25 = vpop.f32.mrf.mxu0  ;;  %v5999_v53 = vand.u32 2147483647, %v5314_v37 }
 0xbc3   :  { %v5654_v19 = vpop.f32.mrf.mxu1 }
 0xbc4   :  { %v5695_v24 = vpop.f32.mrf.mxu2  ;;  %v6002_v14 = vadd.f32 %v5999_v53, %v5998_v57 }
 0xbc7   :  { %v5548_v52 = vpop.f32.mrf.mxu3 }
 0xbc8   :  { %v5549_v1 = vadd.f32 %v5548_v52, %v5510_v46 }
 0xbca   :  { %v5618_v50 = vadd.f32 %v5617_v25, %v5549_v1  ;;  %v7605_v25 = vld [vmem:[%s11389_s5 + $0x30] sm:$0xff]  ;;  %v7606_v1 = vld [vmem:[%s11389_s5 + $0x38] sm:$0xff] }
 0xbcb   :  { %v7609_v52 = vadd.f32 -0.5, %v7605_v25 }
 0xbcc   :  { %v5655_v17 = vadd.f32 %v5654_v19, %v5618_v50  ;;  %v7603_v50 = vld [vmem:[%s11389_s5 + $0x20] sm:$0xff]  ;;  %v7604_v19 = vld [vmem:[%s11389_s5 + $0x28] sm:$0xff] }
 0xbcd   :  { %v7607_v36 = vadd.f32 -0.5, %v7603_v50  ;;  %v7608_v18 = vadd.f32 -0.5, %v7604_v19  ;;  %v13191_v50 = vld [vmem:[#allocation72_spill] sm:$0xff] }
 0xbce   :  { %v6000_v28 = vand.u32 2147483647, %v5655_v17 }
 0xbcf   :  { %v5796_v43 = vpop.f32.mrf.mxu3  ;;  %v6031_v53 = vmul.f32 1e-12, %v7608_v18 }
 0xbd0   :  { %v5797_v35 = vadd.f32 %v5796_v43, %v5695_v24  ;;  %v6003_v13 = vadd.f32 %v6002_v14, %v6000_v28 }
 0xbd1   :  { %v6035_v19 = vadd.f32 %v6031_v53, %v13191_v50  ;;  %v13196_v50 = vld [vmem:[#allocation11_spill] sm:$0xff] }
 0xbeb   :  { %v5889_v21 = vpop.f32.mrf.mxu1 }
 0xbf4   :  { %v5850_v8 = vpop.f32.mrf.mxu0 }
 0xbf5   :  { %v5851_v2 = vadd.f32 %v5850_v8, %v5797_v35  ;;  %v5958_v27 = vpop.f32.mrf.mxu2  ;;  %v7610_v8 = vadd.f32 -0.5, %v7606_v1 }
 0xbf6   :  { %v5995_v62 = vpop.f32.mrf.mxu3 }
 0xbf7   :  { %v5890_v44 = vadd.f32 %v5889_v21, %v5851_v2  ;;  %v6030_v21 = vmul.f32 1e-12, %v7607_v36  ;;  %v6033_v28 = vmul.f32 1e-12, %v7610_v8  ;;  %v13193_v36 = vld [vmem:[#allocation79_spill] sm:$0xff]  ;;  %v10922_v8 = vld [vmem:[%s11384_s0] sm:$0xff] }
 0xbf9   :  { %v5959_v51 = vadd.f32 %v5958_v27, %v5890_v44  ;;  %v6032_v27 = vmul.f32 1e-12, %v7609_v52  ;;  %v6037_v18 = vadd.f32 %v6033_v28, %v13193_v36  ;;  %v13199_v36 = vld [vmem:[#allocation8_spill] sm:$0xff] }
 0xbfb   :  { %v5996_v46 = vadd.f32 %v5995_v62, %v5959_v51 }
 0xbfd   :  { %v6001_v5 = vand.u32 2147483647, %v5996_v46 }
 0xbff   :  { %v6004_v29 = vadd.f32 %v6003_v13, %v6001_v5 }
 0xc01   :  { %6005 = vadd.xlane.f32.xlu0 %v6004_v29  ;;  %v13190_v29 = vld [vmem:[#allocation71_spill] sm:$0xff] }
 0xc74   :  { %v6006_v47 = vpop.xlane.xlu0 %6005 }
 0xc75   :  { %v6007_v24 = vadd.f32 1e-10, %v6006_v47  ;;  %v6034_v47 = vadd.f32 %v6030_v21, %v13190_v29  ;;  %v10930_v21 = vld [vmem:[%s11384_s0 + $0x8] sm:$0xff]  ;;  %v13195_v29 = vld [vmem:[#allocation10_spill] sm:$0xff] }
 0xc77   :  { %7629 = vrcp.f32 %v6007_v24  ;;  %v6019_v0 = vand.u32 2147483648, %v6007_v24  ;;  %v6017_v35 = vand.u32 2147483647, %v6007_v24  ;;  %vm6013_vm7 = vweird.f32 %v6007_v24 }
 0xc79   :  { %v6020_v44 = vor.u32 1.1754944e-38, %v6019_v0  ;;  %vm6018_vm9 = vcmp.eq.f32.partialorder %v6017_v35, 8.507059e+37 }
 0xc7d   :  { %v7630_v15 = vpop.eup %7629 }
 0xc7e   :  { %v6009_v43 = vmul.f32 %v7630_v15, %v6007_v24  ;;  %vm6014_vm6 = vweird.f32 %v7630_v15 }
 0xc7f   :  { %vm6015_vm8 = vmor %vm6013_vm7, %vm6014_vm6 }
 0xc80   :  { %v6010_v41 = vsub.f32 1.0, %v6009_v43  ;;  %v13192_v43 = vld [vmem:[#allocation73_spill] sm:$0xff] }
 0xc81   :  { %v6036_v25 = vadd.f32 %v6032_v27, %v13192_v43  ;;  %v13197_v43 = vld [vmem:[#allocation12_spill] sm:$0xff] }
 0xc82   :  { %v6011_v40 = vmul.f32 %v7630_v15, %v6010_v41 }
 0xc84   :  { %v6012_v2 = vadd.f32 %v7630_v15, %v6011_v40 }
 0xc86   :  { %v6016_v57 = vsel %vm6015_vm8, %v7630_v15, %v6012_v2 }
 0xc87   :  { %v6021_v51 = vsel %vm6018_vm9, %v6020_v44, %v6016_v57  ;;  %v10938_v44 = vld [vmem:[%s11384_s0 + $0x10] sm:$0xff]  ;;  %v10946_v57 = vld [vmem:[%s11384_s0 + $0x18] sm:$0xff] }
 0xc88   :  { %v6022_v62 = vmul.f32 %v6021_v51, %v4973_v56  ;;  %v6023_v14 = vmul.f32 %v6021_v51, %v5314_v37  ;;  %v6024_v5 = vmul.f32 %v6021_v51, %v5655_v17  ;;  %v6025_v13 = vmul.f32 %v6021_v51, %v5996_v46 }
 0xc8a   :  { %v6038_v24 = vmul.f32 0.05, %v6022_v62  ;;  %v6039_v1 = vmul.f32 0.05, %v6023_v14  ;;  %v6040_v41 = vmul.f32 0.05, %v6024_v5 }
 0xc8b   :  { %v6041_v0 = vmul.f32 0.05, %v6025_v13  ;;  %v13194_v14 = vld [vmem:[#allocation9_spill] sm:$0xff] }
 0xc8c   :  { %v6042_v15 = vadd.f32 %v6038_v24, %v6034_v47  ;;  %v6043_v52 = vadd.f32 %v6039_v1, %v6035_v19  ;;  %v6044_v40 = vadd.f32 %v6040_v41, %v6036_v25  ;;  %v13198_v1 = vld [vmem:[#allocation7_spill] sm:$0xff] }
 0xc8d   :  { %v6045_v35 = vadd.f32 %v6041_v0, %v6037_v18  ;;  %v13200_v0 = vld [vmem:[#allocation13_spill] sm:$0xff] }
 0xc8e   :  { %v6046_v56 = vadd.f32 0.1, %v6042_v15  ;;  %v6047_v37 = vadd.f32 0.1, %v6043_v52  ;;  %v6048_v17 = vadd.f32 0.1, %v6044_v40 }
 0xc8f   :  { %v6049_v46 = vadd.f32 0.1, %v6045_v35  ;;  %v13201_v40 = vld [vmem:[#allocation17_spill] sm:$0xff] }
 0xc90   :  { %v10925_v2 = vsub.f32 %v6046_v56, %v10922_v8  ;;  %v10933_v53 = vsub.f32 %v6047_v37, %v10930_v21  ;;  %v10941_v27 = vsub.f32 %v6048_v17, %v10938_v44 }
 0xc91   :  { %v10949_v28 = vsub.f32 %v6049_v46, %v10946_v57 }
 0xc92   :  { %v6054_v51 = vmul.f32 %v10925_v2, %v10925_v2  ;;  %v6055_v62 = vmul.f32 %v10933_v53, %v10933_v53  ;;  %v6061_v5 = vsub.f32 %v13194_v14, %v10925_v2  ;;  %v6056_v13 = vmul.f32 %v10941_v27, %v10941_v27 }
 0xc93   :  { %v6062_v47 = vsub.f32 %v13195_v29, %v10933_v53  ;;  %v6063_v19 = vsub.f32 %v13196_v50, %v10941_v27  ;;  %v6064_v25 = vsub.f32 %v13197_v43, %v10949_v28  ;;  %v6065_v41 = vsub.f32 %v10925_v2, %v13198_v1 }
 0xc94   :  { %v6058_v24 = vadd.f32 %v6055_v62, %v6054_v51  ;;  %v6066_v18 = vsub.f32 %v10933_v53, %v13199_v36  ;;  %v6067_v15 = vsub.f32 %v10941_v27, %v13200_v0  ;;  %v6057_v52 = vmul.f32 %v10949_v28, %v10949_v28 }
 0xc95   :  { %v6068_v35 = vsub.f32 %v10949_v28, %v13201_v40  ;;  %v6069_v37 = vmin.f32 %v6061_v5, %v6065_v41  ;;  %vm6154_vm10 = vcmp.le.f32.partialorder %v13198_v1, %v10925_v2  ;;  %vm6158_vm11 = vcmp.le.f32.partialorder %v10925_v2, %v13194_v14 }
 0xc96   :  { %v6059_v56 = vadd.f32 %v6058_v24, %v6056_v13  ;;  %v6070_v17 = vmin.f32 %v6062_v47, %v6066_v18  ;;  %v6071_v46 = vmin.f32 %v6063_v19, %v6067_v15  ;;  %vm6155_vm12 = vcmp.le.f32.partialorder %v13199_v36, %v10933_v53  ;;  %vm11003_vm2 = vmand %vm6154_vm10, %vm6158_vm11 }
 0xc97   :  { %v6072_v51 = vmin.f32 %v6064_v25, %v6068_v35  ;;  %v6073_v32 = vrot.slane %v6069_v37, 4  ;;  %vm6159_vm13 = vcmp.le.f32.partialorder %v10933_v53, %v13195_v29  ;;  %vm6156_vm14 = vcmp.le.f32.partialorder %v13200_v0, %v10941_v27 }
 0xc98   :  { %v6060_v62 = vadd.f32 %v6059_v56, %v6057_v52  ;;  %v6079_v49 = vrot.slane %v6070_v17, 4  ;;  %v6085_v6 = vrot.slane %v6071_v46, 4  ;;  %vm6160_vm15 = vcmp.le.f32.partialorder %v10941_v27, %v13196_v50  ;;  %vm11007_vm3 = vmand %vm6155_vm12, %vm6159_vm13 }
 0xc99   :  { %v6091_v42 = vrot.slane %v6072_v51, 4  ;;  %v6074_v33 = vmin.f32 %v6069_v37, %v6073_v32  ;;  %vm6157_vm0 = vcmp.le.f32.partialorder %v13201_v40, %v10949_v28  ;;  %vm6161_vm1 = vcmp.le.f32.partialorder %v10949_v28, %v13197_v43  ;;  %vm11011_vm4 = vmand %vm6156_vm14, %vm6160_vm15 }
 0xc9a   :  { %v6080_v30 = vmin.f32 %v6070_v17, %v6079_v49  ;;  %v6086_v60 = vmin.f32 %v6071_v46, %v6085_v6  ;;  %vm11015_vm5 = vmand %vm6157_vm0, %vm6161_vm1  ;;  %vm6170_vm6 = vcmp.gt.f32.partialorder %v10925_v2, %v13198_v1  ;;  %vm6171_vm7 = vcmp.gt.f32.partialorder %v10933_v53, %v13199_v36 }
 0xc9b   :  { %v6092_v12 = vmin.f32 %v6072_v51, %v6091_v42  ;;  %v6075_v16 = vrot.slane %v6074_v33, 2  ;;  %vm6172_vm8 = vcmp.gt.f32.partialorder %v10941_v27, %v13200_v0  ;;  %vm6173_vm9 = vcmp.gt.f32.partialorder %v10949_v28, %v13201_v40 }
 0xc9c   :  { %v6081_v58 = vrot.slane %v6080_v30, 2  ;;  %v6087_v45 = vrot.slane %v6086_v60, 2  ;;  %vm6182_vm10 = vcmp.gt.f32.partialorder %v13194_v14, %v10925_v2  ;;  %vm6183_vm11 = vcmp.gt.f32.partialorder %v13195_v29, %v10933_v53 }
 0xc9d   :  { %v6093_v10 = vrot.slane %v6092_v12, 2  ;;  %v6076_v26 = vmin.f32 %v6074_v33, %v6075_v16  ;;  %vm6184_vm12 = vcmp.gt.f32.partialorder %v13196_v50, %v10941_v27  ;;  %vm6185_vm13 = vcmp.gt.f32.partialorder %v13197_v43, %v10949_v28 }
 0xc9e   :  { %v6082_v22 = vmin.f32 %v6080_v30, %v6081_v58  ;;  %v6088_v13 = vmin.f32 %v6086_v60, %v6087_v45 }
 0xc9f   :  { %v6094_v5 = vmin.f32 %v6092_v12, %v6093_v10  ;;  %v6077_v47 = vrot.slane %v6076_v26, 1 }
 0xca0   :  { %v6083_v19 = vrot.slane %v6082_v22, 1  ;;  %v6089_v25 = vrot.slane %v6088_v13, 1 }
 0xca1   :  { %v6095_v24 = vrot.slane %v6094_v5, 1  ;;  %v6078_v41 = vmin.f32 %v6076_v26, %v6077_v47 }
 0xca2   :  { %v6084_v18 = vmin.f32 %v6082_v22, %v6083_v19  ;;  %v6090_v15 = vmin.f32 %v6088_v13, %v6089_v25 }
 0xca3   :  { %v6096_v52 = vmin.f32 %v6094_v5, %v6095_v24  ;;  %v6097_v32 = vmul.f32 %v6078_v41, %v6078_v41 }
 0xca4   :  { %v6098_v49 = vmul.f32 %v6084_v18, %v6084_v18  ;;  %v6099_v6 = vmul.f32 %v6090_v15, %v6090_v15 }
 0xca5   :  { %v6100_v35 = vmul.f32 %v6096_v52, %v6096_v52 }
 0xca6   :  { %v6101_v42 = vadd.f32 %v6098_v49, %v6097_v32 }
 0xca8   :  { %v6102_v56 = vadd.f32 %v6101_v42, %v6099_v6  ;;  %v6166_v42 = vsel %vm11003_vm2, %v10925_v2, 0.0  ;;  %v13226_v6 = vld [vmem:[#allocation130_spill] sm:$0xff] }
 0xcaa   :  { %v6103_v37 = vadd.f32 %v6102_v56, %v6100_v35  ;;  %v6167_v35 = vsel %vm11007_vm3, %v10933_v53, 0.0  ;;  %v6168_v56 = vsel %vm11011_vm4, %v10941_v27, 0.0 }
 0xcac   :  { %v10975_v17 = vsub.f32 %v6060_v62, %v6103_v37  ;;  %v6169_v37 = vsel %vm11015_vm5, %v10949_v28, 0.0 }
 0xcae   :  { %6106 = vrot.lane.b32.xlu2 %v10975_v17, %s7670_s4 }
 0xd08   :  { %v6107_v33 = vpop.permute.xlu2 %6106 }
 0xd09   :  { %v6109_v45 = vmin.f32 %v10975_v17, %v6107_v33  ;;  %v6110_v16 = vmax.f32 %v10975_v17, %v6107_v33  ;;  %v6174_v33 = vsel %vm6170_vm6, %v13198_v1, 0.0  ;;  %v6186_v1 = vsel %vm6182_vm10, %v13194_v14, 0.0 }
 0xd0b   :  { %6118 = vrot.lane.b32.xlu0 %v6110_v16, %s7671_s17  ;;  %6112 = vrot.lane.b32.xlu1 %v6109_v45, %s7671_s17 }
 0xd7d   :  { %v6119_v22 = vpop.permute.xlu0 %6118  ;;  %v6113_v12 = vpop.permute.xlu1 %6112 }
 0xd7e   :  { %v6121_v60 = vmin.f32 %v6110_v16, %v6119_v22  ;;  %v6122_v30 = vmax.f32 %v6110_v16, %v6119_v22  ;;  %v6115_v26 = vmin.f32 %v6109_v45, %v6113_v12  ;;  %v6116_v10 = vmax.f32 %v6109_v45, %v6113_v12 }
 0xd7f   :  { %v6175_v45 = vsel %vm6171_vm7, %v13199_v36, 0.0  ;;  %v6176_v16 = vsel %vm6172_vm8, %v13200_v0, 0.0  ;;  %v6177_v22 = vsel %vm6173_vm9, %v13201_v40, 0.0  ;;  %v6178_v12 = vadd.f32 %v6174_v33, %v6166_v42  ;;  %v13227_v42 = vld [vmem:[#allocation115_spill] sm:$0xff] }
 0xd80   :  { %v6124_v58 = vmax.f32 %v6121_v60, %v6116_v10  ;;  %6142 = vrot.lane.b32.xlu0 %v6122_v30, %s7672_s18  ;;  %6126 = vrot.lane.b32.xlu2 %v6115_v26, %s7672_s18  ;;  %v6123_v46 = vmin.f32 %v6121_v60, %v6116_v10  ;;  %v6179_v60 = vadd.f32 %v6175_v45, %v6167_v35  ;;  %v6187_v36 = vsel %vm6183_vm11, %v13195_v29, 0.0  ;;  %v13228_v35 = vld [vmem:[#allocation131_spill] sm:$0xff]  ;;  %v13232_v45 = vld [vmem:[#allocation138_spill] sm:$0xff] }
 0xd81   :  { %v6188_v0 = vsel %vm6184_vm12, %v13196_v50, 0.0  ;;  %v6189_v40 = vsel %vm6185_vm13, %v13197_v43, 0.0  ;;  %v6190_v10 = vadd.f32 %v6186_v1, %v6178_v12  ;;  %v13231_v33 = vld [vmem:[#allocation135_spill] sm:$0xff]  ;;  %v13235_v12 = vld [vmem:[#allocation142_spill] sm:$0xff] }
 0xd82   :  { %6131 = vrot.lane.b32.xlu1 %v6124_v58, %s7672_s18  ;;  %v13239_v1 = vld [vmem:[#allocation166_spill] sm:$0xff] }
 0xd83   :  { %v6194_v53 = vadd.f32 %v10922_v8, %v6190_v10  ;;  %v13243_v10 = vld [vmem:[#allocation149_spill] sm:$0xff] }
 0xd88   :  { %6137 = vrot.lane.b32.xlu2 %v6123_v46, %s7672_s18 }
 0xdda   :  { %v6127_v51 = vpop.permute.xlu2 %6126 }
 0xddb   :  { %v6129_v19 = vmax.f32 %v6115_v26, %v6127_v51  ;;  %v6181_v26 = vadd.f32 %v6177_v22, %v6169_v37  ;;  %v13230_v37 = vld [vmem:[#allocation126_spill] sm:$0xff]  ;;  %v13234_v22 = vld [vmem:[#allocation139_spill] sm:$0xff] }
 0xde2   :  { %v6138_v62 = vpop.permute.xlu2 %6137 }
 0xde3   :  { %v6140_v25 = vmax.f32 %v6123_v46, %v6138_v62  ;;  %v6193_v46 = vadd.f32 %v6189_v40, %v6181_v26  ;;  %v13238_v26 = vld [vmem:[#allocation145_spill] sm:$0xff]  ;;  %v13242_v40 = vld [vmem:[#allocation170_spill] sm:$0xff] }
 0xde5   :  { %v6206_v28 = vadd.f32 %v10946_v57, %v6193_v46  ;;  %v13246_v46 = vld [vmem:[#allocation174_spill] sm:$0xff] }
 0xdf2   :  { %v6143_v13 = vpop.permute.xlu0 %6142 }
 0xdf3   :  { %v6145_v5 = vmin.f32 %v6122_v30, %v6143_v13  ;;  %v6180_v30 = vadd.f32 %v6176_v16, %v6168_v56  ;;  %v13229_v56 = vld [vmem:[#allocation134_spill] sm:$0xff]  ;;  %v13233_v16 = vld [vmem:[#allocation129_spill] sm:$0xff] }
 0xdf4   :  { %v6132_v47 = vpop.permute.xlu1 %6131 }
 0xdf5   :  { %v6134_v24 = vmin.f32 %v6124_v58, %v6132_v47  ;;  %v6146_v41 = vmin.f32 %v6145_v5, %v6140_v25  ;;  %v6191_v58 = vadd.f32 %v6187_v36, %v6179_v60  ;;  %v6192_v2 = vadd.f32 %v6188_v0, %v6180_v30  ;;  %v13236_v60 = vld [vmem:[#allocation132_spill] sm:$0xff]  ;;  %v13237_v30 = vld [vmem:[#allocation162_spill] sm:$0xff]  ;;  %v13240_v36 = vld [vmem:[#allocation147_spill] sm:$0xff] }
 0xdf6   :  { %v13241_v0 = vld [vmem:[#allocation136_spill] sm:$0xff] }
 0xdf7   :  { %v6135_v18 = vmax.f32 %v6134_v24, %v6129_v19  ;;  %v6198_v51 = vadd.f32 %v10930_v21, %v6191_v58  ;;  %v6202_v27 = vadd.f32 %v10938_v44, %v6192_v2  ;;  %v13244_v58 = vld [vmem:[#allocation6_spill] sm:$0xff]  ;;  %v13245_v2 = vld [vmem:[#allocation140_spill] sm:$0xff] }
 0xdf9   :  { %v6147_v15 = vmax.f32 %v6146_v41, %v6135_v18 }
 0xdfb   :  { %6150 = vperm.xlu1 %7616, %v6147_v15  }
 0xe6d   :  { %v6151_v62 = vpop.permute.xlu1 %6150 }
 0xe6e   :  { %vm6153_vm14 = vcmp.ge.f32.partialorder %v10975_v17, %v6151_v62  ;;  %v13251_v62 = vld [vmem:[#allocation155_spill] sm:$0xff] }
 0xe6f   :  { %v6195_v14 = vsel %vm6153_vm14, %v6194_v53, %v10922_v8  ;;  %v6199_v29 = vsel %vm6153_vm14, %v6198_v51, %v10930_v21  ;;  %v6203_v50 = vsel %vm6153_vm14, %v6202_v27, %v10938_v44  ;;  %v6207_v43 = vsel %vm6153_vm14, %v6206_v28, %v10946_v57  ;;  %v13247_v53 = vld [vmem:[#allocation152_spill] sm:$0xff]  ;;  %v13248_v51 = vld [vmem:[#allocation19_spill] sm:$0xff]  ;;  %v13250_v28 = vld [vmem:[#allocation178_spill] sm:$0xff] }
 0xe70   :  { %v6196_v13 = vmax.f32 %v6195_v14, 0.0  ;;  %v6200_v5 = vmax.f32 %v6199_v29, 0.0  ;;  %v6204_v47 = vmax.f32 %v6203_v50, 0.0  ;;  %v6208_v19 = vmax.f32 %v6207_v43, 0.0  ;;  %v13249_v27 = vld [vmem:[#allocation143_spill] sm:$0xff]  ;;  %v13252_v14 = vld [vmem:[#allocation148_spill] sm:$0xff] }
 0xe71   :  { %v13253_v29 = vld [vmem:[#allocation182_spill] sm:$0xff] }
 0xe72   :  { %v6197_v25 = vmin.f32 %v6196_v13, 1.0  ;;  %v6201_v24 = vmin.f32 %v6200_v5, 1.0  ;;  %v11064_v41 = vmin.f32 %v6204_v47, 1.0  ;;  %v11066_v18 = vmin.f32 %v6208_v19, 1.0  ;;  %v13254_v50 = vld [vmem:[#allocation158_spill] sm:$0xff]  ;;  %v13257_v5 = vld [vmem:[#allocation161_spill] sm:$0xff] }
 0xe73   :  { %v13255_v43 = vld [vmem:[#allocation150_spill] sm:$0xff]  ;;  %v13258_v47 = vld [vmem:[#allocation153_spill] sm:$0xff] }
 0xe74   :  { %v6242_v15 = vand.u32 4294901760, %v6197_v25  ;;  %v11068_v17 = vand.u32 4294901760, %v6201_v24  ;;  %7575 = vst [vmem:[%s11391_s7] sm:$0xff] %v6197_v25  ;;  %v13256_v13 = vld [vmem:[#allocation186_spill] sm:$0xff] }
 0xe75   :  { %7576 = vst [vmem:[%s11391_s7 + $0x8] sm:$0xff] %v6201_v24  ;;  %v13259_v19 = vld [vmem:[#allocation190_spill] sm:$0xff] }
 0xe76   :  { %v6243_v8 = vsub.f32 %v6197_v25, %v6242_v15  ;;  %v11077_v21 = vsub.f32 %v6201_v24, %v11068_v17  ;;  %7577 = vst [vmem:[%s11391_s7 + $0x10] sm:$0xff] %v11064_v41  ;;  %6348 = vmatmul.f32.vlgmr.msra.gmra.mxu1 %v6242_v15  ;;  %v13260_v25 = vld [vmem:[#allocation164_spill] sm:$0xff] }
 0xe77   :  { %7578 = vst [vmem:[%s11391_s7 + $0x18] sm:$0xff] %v11066_v18  ;;  %6748 = vmatpush.msra.mxu1 %v12455_v7  ;;  %v13261_v24 = vld [vmem:[#allocation156_spill] sm:$0xff] }
 0xe78   :  { %v6585_v44 = vand.u32 4294901760, %v11077_v21  ;;  %6402 = vmatmul.f32.vlgmr.msra.gmra.mxu2 %v6243_v8  ;;  %v6244_v57 = vand.u32 4294901760, %v6243_v8 }
 0xe79   :  { %6789 = vmatpush.msra.mxu2 %v12738_v23  ;;  %6750 = vmatpush.msra.mxu1 %v12458_v38 }
 0xe7a   :  { %6441 = vmatmul.f32.vlgmr.msra.gmra.mxu3 %v6244_v57  ;;  %v6245_v52 = vsub.f32 %v6243_v8, %v6244_v57  ;;  %v6586_v32 = vsub.f32 %v11077_v21, %v6585_v44  ;;  %v13264_v8 = vld [vmem:[#allocation159_spill] sm:$0xff]  ;;  %v13267_v57 = vld [vmem:[#allocation160_spill] sm:$0xff] }
 0xe7b   :  { %6793 = vmatpush.msra.mxu2 %v12739_v54  ;;  %6856 = vmatpush.msra.mxu3 %v12455_v7  ;;  %v13210_v7 = vld [vmem:[#allocation98_spill] sm:$0xff] }
 0xe7c   :  { %6752 = vmatpush.msra.mxu1 %v12461_v39  ;;  %v6246_v49 = vand.u32 4294901760, %v6245_v52  ;;  %v6587_v23 = vand.u32 4294901760, %v6586_v32  ;;  %v13214_v54 = vld [vmem:[#allocation114_spill] sm:$0xff]  ;;  %v13268_v52 = vld [vmem:[#allocation200_spill] sm:$0xff] }
 0xe7d   :  { %6797 = vmatpush.msra.mxu2 %v12740_v31  ;;  %6858 = vmatpush.msra.mxu3 %v12458_v38  ;;  %v13211_v38 = vld [vmem:[#allocation111_spill] sm:$0xff]  ;;  %v13215_v31 = vld [vmem:[#allocation97_spill] sm:$0xff]  ;;  %v13269_v32 = vld [vmem:[#allocation176_spill] sm:$0xff] }
 0xe7e   :  { %6754 = vmatpush.msra.mxu1 %v12464_v61  ;;  %6247 = vmatmul.f32.vlgmr.msra.gmra.mxu0 %v6246_v49  ;;  %v13270_v49 = vld [vmem:[#allocation165_spill] sm:$0xff] }
 0xe7f   :  { %6547 = vmatmul.f32.vlgmr.msrb.gmra.mxu1 %v6242_v15  ;;  %6695 = vmatpush.msra.mxu0 %v12741_v63  ;;  %v13217_v63 = vld [vmem:[#allocation117_spill] sm:$0xff] }
 0xe80   :  { %6756 = vmatpush.msra.mxu1 %v12467_v59  ;;  %6801 = vmatpush.msra.mxu2 %v12742_v34  ;;  %v13218_v34 = vld [vmem:[#allocation102_spill] sm:$0xff] }
 0xe81   :  { %6860 = vmatpush.msra.mxu3 %v12461_v39  ;;  %6588 = vmatmul.f32.vlgmr.msrb.gmra.mxu2 %v6587_v23  ;;  %v13213_v39 = vld [vmem:[#allocation103_spill] sm:$0xff]  ;;  %v13271_v23 = vld [vmem:[#allocation18_spill] sm:$0xff] }
 0xe82   :  { %6698 = vmatpush.msra.mxu0 %v12743_v55  ;;  %6758 = vmatpush.msra.mxu1 %v12470_v9  ;;  %v13220_v55 = vld [vmem:[#allocation119_spill] sm:$0xff] }
 0xe83   :  { %6805 = vmatpush.msra.mxu2 %v12744_v11  ;;  %6862 = vmatpush.msra.mxu3 %v12464_v61  ;;  %v13212_v61 = vld [vmem:[#allocation93_spill] sm:$0xff]  ;;  %v13221_v11 = vld [vmem:[#allocation107_spill] sm:$0xff] }
 0xe84   :  { %6689 = vmatmul.f32.vlgmr.msrb.gmra.mxu3 %v11068_v17  ;;  %6701 = vmatpush.msra.mxu0 %v12745_v3  ;;  %v13222_v3 = vld [vmem:[#allocation125_spill] sm:$0xff] }
 0xe85   :  { %6760 = vmatpush.msra.mxu1 %v12473_v4  ;;  %6809 = vmatpush.msra.mxu2 %v12746_v20  ;;  %v13224_v20 = vld [vmem:[#allocation112_spill] sm:$0xff] }
 0xe86   :  { %6864 = vmatpush.msra.mxu3 %v12467_v59  ;;  %6704 = vmatpush.msra.mxu0 %v12747_v48  ;;  %v13216_v59 = vld [vmem:[#allocation108_spill] sm:$0xff] }
 0xe87   :  { %6762 = vmatpush.msra.mxu1 %v13210_v7  ;;  %6813 = vmatpush.msra.mxu2 %v13211_v38  ;;  %v13225_v48 = vld [vmem:[#allocation128_spill] sm:$0xff]  ;;  %v13273_v38 = vld [vmem:[#allocation169_spill] sm:$0xff] }
 0xe88   :  { %6866 = vmatpush.msra.mxu3 %v12470_v9  ;;  %6510 = vmatmul.f32.vlgmr.msrb.gmra.mxu0 %v6242_v15  ;;  %v13219_v9 = vld [vmem:[#allocation124_spill] sm:$0xff]  ;;  %v13262_v15 = vld [vmem:[#allocation194_spill] sm:$0xff] }
 0xe89   :  { %6707 = vmatpush.msra.mxu0 %v13212_v61  ;;  %6764 = vmatpush.msra.mxu1 %v13213_v39  ;;  %v11203_v61 = vand.u32 4294901760, %v11064_v41 }
 0xe8a   :  { %6817 = vmatpush.msra.mxu2 %v13214_v54  ;;  %6868 = vmatpush.msra.mxu3 %v12473_v4  ;;  %v13223_v4 = vld [vmem:[#allocation127_spill] sm:$0xff]  ;;  %v13275_v54 = vld [vmem:[#allocation184_spill] sm:$0xff] }
 0xe8b   :  { %6710 = vmatpush.msra.mxu0 %v13215_v31  ;;  %6766 = vmatpush.msra.mxu1 %v13216_v59  ;;  %v13276_v31 = vld [vmem:[#allocation173_spill] sm:$0xff] }
 0xe8c   :  { %6821 = vmatpush.msra.mxu2 %v13217_v63  ;;  %6870 = vmatpush.msra.mxu3 %v13210_v7  ;;  %v13272_v7 = vld [vmem:[#allocation180_spill] sm:$0xff] }
 0xe8d   :  { %6713 = vmatpush.msra.mxu0 %v13218_v34  ;;  %6768 = vmatpush.msra.mxu1 %v13219_v9  ;;  %v13278_v63 = vld [vmem:[#allocation188_spill] sm:$0xff]  ;;  %v13279_v34 = vld [vmem:[#allocation177_spill] sm:$0xff] }
 0xe8e   :  { %6825 = vmatpush.msra.mxu2 %v13220_v55  ;;  %6872 = vmatpush.msra.mxu3 %v13213_v39  ;;  %v13274_v39 = vld [vmem:[#allocation205_spill] sm:$0xff]  ;;  %v13280_v55 = vld [vmem:[#allocation210_spill] sm:$0xff] }
 0xe8f   :  { %6716 = vmatpush.msra.mxu0 %v13221_v11  ;;  %6770 = vmatpush.msra.mxu1 %v13222_v3  ;;  %v13281_v11 = vld [vmem:[#allocation192_spill] sm:$0xff] }
 0xe90   :  { %6829 = vmatpush.msra.mxu2 %v13223_v4  ;;  %6874 = vmatpush.msra.mxu3 %v13216_v59  ;;  %v13277_v59 = vld [vmem:[#allocation207_spill] sm:$0xff]  ;;  %v13283_v4 = vld [vmem:[#allocation213_spill] sm:$0xff] }
 0xe91   :  { %6719 = vmatpush.msra.mxu0 %v13224_v20  ;;  %6772 = vmatpush.msra.mxu1 %v13225_v48  ;;  %v13284_v20 = vld [vmem:[#allocation196_spill] sm:$0xff] }
 0xe92   :  { %6833 = vmatpush.msra.mxu2 %v13226_v6  ;;  %6876 = vmatpush.msra.mxu3 %v13219_v9  ;;  %v6925_v9 = vsub.f32 %v11064_v41, %v11203_v61  ;;  %v13286_v6 = vld [vmem:[#allocation199_spill] sm:$0xff] }
 0xe93   :  { %6722 = vmatpush.msra.mxu0 %v13227_v42  ;;  %6774 = vmatpush.msra.mxu1 %v13228_v35  ;;  %v13287_v42 = vld [vmem:[#allocation189_spill] sm:$0xff] }
 0xe94   :  { %6837 = vmatpush.msra.mxu2 %v13229_v56  ;;  %6878 = vmatpush.msra.mxu3 %v13222_v3  ;;  %v13282_v3 = vld [vmem:[#allocation181_spill] sm:$0xff]  ;;  %v6926_v41 = vand.u32 4294901760, %v6925_v9 }
 0xe95   :  { %6725 = vmatpush.msra.mxu0 %v13230_v37  ;;  %6776 = vmatpush.msra.mxu1 %v13231_v33  ;;  %v13289_v56 = vld [vmem:[#allocation193_spill] sm:$0xff] }
 0xe96   :  { %6841 = vmatpush.msra.mxu2 %v13232_v45  ;;  %6880 = vmatpush.msra.mxu3 %v13225_v48  ;;  %v13285_v48 = vld [vmem:[#allocation185_spill] sm:$0xff]  ;;  %v6927_v37 = vsub.f32 %v6925_v9, %v6926_v41  ;;  %v13291_v45 = vld [vmem:[#allocation226_spill] sm:$0xff] }
 0xe97   :  { %6728 = vmatpush.msra.mxu0 %v13233_v16  ;;  %6778 = vmatpush.msra.mxu1 %v13234_v22  ;;  %v13292_v16 = vld [vmem:[#allocation209_spill] sm:$0xff] }
 0xe98   :  { %6845 = vmatpush.msra.mxu2 %v13235_v12  ;;  %6882 = vmatpush.msra.mxu3 %v13228_v35  ;;  %v13288_v35 = vld [vmem:[#allocation203_spill] sm:$0xff]  ;;  %v6928_v12 = vand.u32 4294901760, %v6927_v37 }
 0xe99   :  { %6782 = vmatmul.f32.vlgmr.msra.gmra.mxu1 %v6585_v44  ;;  %6731 = vmatpush.msra.mxu0 %v13236_v60  ;;  %v13266_v44 = vld [vmem:[#allocation172_spill] sm:$0xff]  ;;  %v13347_v37 = vld [vmem:[#allocation219_spill] sm:$0xff] }
 0xe9a   :  { %6938 = vmatpush.msrb.mxu1 %v13237_v30  ;;  %6849 = vmatpush.msra.mxu2 %v13238_v26  ;;  %v13294_v60 = vld [vmem:[#allocation212_spill] sm:$0xff]  ;;  %v13295_v30 = vld [vmem:[#allocation151_spill] sm:$0xff]  ;;  %v13296_v26 = vld [vmem:[#allocation234_spill] sm:$0xff] }
 0xe9b   :  { %6884 = vmatpush.msra.mxu3 %v13231_v33  ;;  %6851 = vmatmul.f32.vlgmr.msra.gmra.mxu2 %v11068_v17  ;;  %v13290_v33 = vld [vmem:[#allocation206_spill] sm:$0xff] }
 0xe9c   :  { %6944 = vmatpush.msrb.mxu1 %v13239_v1  ;;  %7036 = vmatpush.msrb.mxu2 %v13240_v36  ;;  %v13297_v1 = vld [vmem:[#allocation215_spill] sm:$0xff]  ;;  %v13298_v36 = vld [vmem:[#allocation154_spill] sm:$0xff] }
 0xe9d   :  { %6734 = vmatpush.msra.mxu0 %v13241_v0  ;;  %6886 = vmatpush.msra.mxu3 %v13234_v22  ;;  %v13293_v22 = vld [vmem:[#allocation230_spill] sm:$0xff] }
 0xe9e   :  { %6888 = vmatmul.f32.vlgmr.msra.gmra.mxu3 %v11068_v17  ;;  %6950 = vmatpush.msrb.mxu1 %v13242_v40  ;;  %v13263_v17 = vld [vmem:[#allocation167_spill] sm:$0xff]  ;;  %v13299_v0 = vld [vmem:[#allocation238_spill] sm:$0xff] }
 0xe9f   :  { %7039 = vmatpush.msrb.mxu2 %v13243_v10  ;;  %7089 = vmatpush.msrb.mxu3 %v13244_v58  ;;  %v13300_v40 = vld [vmem:[#allocation218_spill] sm:$0xff]  ;;  %v13301_v10 = vld [vmem:[#allocation157_spill] sm:$0xff] }
 0xea0   :  { %6737 = vmatpush.msra.mxu0 %v13245_v2  ;;  %6956 = vmatpush.msrb.mxu1 %v13246_v46  ;;  %v13303_v2 = vld [vmem:[#allocation222_spill] sm:$0xff]  ;;  %v13304_v46 = vld [vmem:[#allocation16_spill] sm:$0xff] }
 0xea1   :  { %7042 = vmatpush.msrb.mxu2 %v13247_v53  ;;  %7091 = vmatpush.msrb.mxu3 %v13248_v51  ;;  %v13305_v53 = vld [vmem:[#allocation246_spill] sm:$0xff] }
 0xea2   :  { %6740 = vmatpush.msra.mxu0 %v13249_v27  ;;  %6962 = vmatpush.msrb.mxu1 %v13250_v28  ;;  %v13306_v27 = vld [vmem:[#allocation225_spill] sm:$0xff]  ;;  %v13307_v28 = vld [vmem:[#allocation163_spill] sm:$0xff] }
 0xea3   :  { %6743 = vmatmul.f32.vlgmr.msra.gmra.mxu0 %v11077_v21  ;;  %7045 = vmatpush.msrb.mxu2 %v13251_v62  ;;  %v13265_v21 = vld [vmem:[#allocation197_spill] sm:$0xff]  ;;  %v13308_v62 = vld [vmem:[#allocation251_spill] sm:$0xff] }
 0xea4   :  { %6893 = vmatpush.msrb.mxu0 %v13244_v58  ;;  %7093 = vmatpush.msrb.mxu3 %v13252_v14 }
 0xea5   :  { %6968 = vmatpush.msrb.mxu1 %v13253_v29  ;;  %7048 = vmatpush.msrb.mxu2 %v13254_v50  ;;  %v13310_v29 = vld [vmem:[#allocation168_spill] sm:$0xff]  ;;  %v13311_v50 = vld [vmem:[#allocation255_spill] sm:$0xff] }
 0xea6   :  { %6895 = vmatpush.msrb.mxu0 %v13248_v51  ;;  %7095 = vmatpush.msrb.mxu3 %v13255_v43 }
 0xea7   :  { %6974 = vmatpush.msrb.mxu1 %v13256_v13  ;;  %7051 = vmatpush.msrb.mxu2 %v13257_v5  ;;  %v13312_v13 = vld [vmem:[#allocation233_spill] sm:$0xff]  ;;  %v13313_v5 = vld [vmem:[#allocation171_spill] sm:$0xff] }
 0xea8   :  { %6897 = vmatpush.msrb.mxu0 %v13252_v14  ;;  %7097 = vmatpush.msrb.mxu3 %v13258_v47 }
 0xea9   :  { %6980 = vmatpush.msrb.mxu1 %v13259_v19  ;;  %7054 = vmatpush.msrb.mxu2 %v13260_v25  ;;  %v13315_v19 = vld [vmem:[#allocation237_spill] sm:$0xff]  ;;  %v13316_v25 = vld [vmem:[#allocation175_spill] sm:$0xff] }
 0xeaa   :  { %6899 = vmatpush.msrb.mxu0 %v13255_v43  ;;  %7099 = vmatpush.msrb.mxu3 %v13261_v24 }
 0xeab   :  { %6986 = vmatpush.msrb.mxu1 %v13262_v15  ;;  %7057 = vmatpush.msrb.mxu2 %v13263_v17  ;;  %v13319_v17 = vld [vmem:[#allocation179_spill] sm:$0xff] }
 0xeac   :  { %6901 = vmatpush.msrb.mxu0 %v13258_v47  ;;  %7101 = vmatpush.msrb.mxu3 %v13264_v8 }
 0xead   :  { %6992 = vmatpush.msrb.mxu1 %v13265_v21  ;;  %7060 = vmatpush.msrb.mxu2 %v13266_v44  ;;  %v13321_v21 = vld [vmem:[#allocation245_spill] sm:$0xff]  ;;  %v13322_v44 = vld [vmem:[#allocation183_spill] sm:$0xff] }
 0xeae   :  { %6903 = vmatpush.msrb.mxu0 %v13261_v24  ;;  %7103 = vmatpush.msrb.mxu3 %v13267_v57 }
 0xeaf   :  { %6998 = vmatpush.msrb.mxu1 %v13268_v52  ;;  %7063 = vmatpush.msrb.mxu2 %v13269_v32  ;;  %v13324_v52 = vld [vmem:[#allocation249_spill] sm:$0xff] }
 0xeb0   :  { %6905 = vmatpush.msrb.mxu0 %v13264_v8  ;;  %7105 = vmatpush.msrb.mxu3 %v13270_v49 }
 0xeb1   :  { %7004 = vmatpush.msrb.mxu1 %v13271_v23  ;;  %7066 = vmatpush.msrb.mxu2 %v13272_v7  ;;  %v13326_v23 = vld [vmem:[#allocation269_spill] sm:$0xff]  ;;  %v13327_v7 = vld [vmem:[#allocation254_spill] sm:$0xff] }
 0xeb2   :  { %6907 = vmatpush.msrb.mxu0 %v13267_v57  ;;  %7107 = vmatpush.msrb.mxu3 %v13273_v38 }
 0xeb3   :  { %7010 = vmatpush.msrb.mxu1 %v13274_v39  ;;  %7069 = vmatpush.msrb.mxu2 %v13275_v54  ;;  %v13329_v39 = vld [vmem:[#allocation270_spill] sm:$0xff] }
 0xeb4   :  { %6909 = vmatpush.msrb.mxu0 %v13270_v49  ;;  %7109 = vmatpush.msrb.mxu3 %v13276_v31  ;;  %v13330_v54 = vld [vmem:[#allocation258_spill] sm:$0xff] }
 0xeb5   :  { %7016 = vmatpush.msrb.mxu1 %v13277_v59  ;;  %7072 = vmatpush.msrb.mxu2 %v13278_v63  ;;  %v13331_v59 = vld [vmem:[#allocation195_spill] sm:$0xff] }
 0xeb6   :  { %6911 = vmatpush.msrb.mxu0 %v13273_v38  ;;  %7111 = vmatpush.msrb.mxu3 %v13279_v34  ;;  %v13332_v63 = vld [vmem:[#allocation271_spill] sm:$0xff] }
 0xeb7   :  { %7022 = vmatpush.msrb.mxu1 %v13280_v55  ;;  %7075 = vmatpush.msrb.mxu2 %v13281_v11  ;;  %v13335_v55 = vld [vmem:[#allocation272_spill] sm:$0xff]  ;;  %v13336_v11 = vld [vmem:[#allocation217_spill] sm:$0xff] }
 0xeb8   :  { %6913 = vmatpush.msrb.mxu0 %v13276_v31  ;;  %7113 = vmatpush.msrb.mxu3 %v13282_v3 }
 0xeb9   :  { %7028 = vmatpush.msrb.mxu1 %v13283_v4  ;;  %7078 = vmatpush.msrb.mxu2 %v13284_v20  ;;  %v13338_v4 = vld [vmem:[#allocation221_spill] sm:$0xff]  ;;  %v13339_v20 = vld [vmem:[#allocation202_spill] sm:$0xff] }
 0xeba   :  { %6915 = vmatpush.msrb.mxu0 %v13279_v34  ;;  %7115 = vmatpush.msrb.mxu3 %v13285_v48 }
 0xebb   :  { %7030 = vmatmul.f32.vlgmr.msrb.gmra.mxu1 %v11203_v61  ;;  %7081 = vmatpush.msrb.mxu2 %v13286_v6  ;;  %v13341_v6 = vld [vmem:[#allocation208_spill] sm:$0xff] }
 0xebc   :  { %7197 = vmatpush.msra.mxu1 %v13244_v58  ;;  %6917 = vmatpush.msrb.mxu0 %v13282_v3  ;;  %v13302_v58 = vld [vmem:[#allocation242_spill] sm:$0xff] }
 0xebd   :  { %7117 = vmatpush.msrb.mxu3 %v13287_v42  ;;  %7084 = vmatmul.f32.vlgmr.msrb.gmra.mxu2 %v6925_v9  ;;  %v13334_v9 = vld [vmem:[#allocation198_spill] sm:$0xff] }
 0xebe   :  { %7199 = vmatpush.msra.mxu1 %v13248_v51  ;;  %7234 = vmatpush.msra.mxu2 %v13288_v35  ;;  %v11257_v51 = vand.u32 4294901760, %v11066_v18 }
 0xebf   :  { %6919 = vmatpush.msrb.mxu0 %v13285_v48  ;;  %7119 = vmatpush.msrb.mxu3 %v13289_v56 }
 0xec0   :  { %7123 = vmatmul.f32.vlgmr.msrb.gmra.mxu3 %v6926_v41  ;;  %7201 = vmatpush.msra.mxu1 %v13252_v14  ;;  %v13309_v14 = vld [vmem:[#allocation229_spill] sm:$0xff]  ;;  %v13342_v41 = vld [vmem:[#allocation227_spill] sm:$0xff] }
 0xec1   :  { %7236 = vmatpush.msra.mxu2 %v13290_v33  ;;  %7279 = vmatpush.msra.mxu3 %v13291_v45  ;;  %v13349_v45 = vld [vmem:[#allocation220_spill] sm:$0xff] }
 0xec2   :  { %6921 = vmatpush.msrb.mxu0 %v13287_v42  ;;  %7203 = vmatpush.msra.mxu1 %v13255_v43  ;;  %v11269_v43 = vsub.f32 %v11066_v18, %v11257_v51  ;;  %v13318_v18 = vld [vmem:[#allocation241_spill] sm:$0xff] }
 0xec3   :  { %7238 = vmatpush.msra.mxu2 %v13292_v16  ;;  %7285 = vmatpush.msra.mxu3 %v13293_v22  ;;  %v13351_v22 = vld [vmem:[#allocation223_spill] sm:$0xff] }
 0xec4   :  { %6923 = vmatpush.msrb.mxu0 %v13289_v56  ;;  %7205 = vmatpush.msra.mxu1 %v13258_v47  ;;  %v13314_v47 = vld [vmem:[#allocation259_spill] sm:$0xff]  ;;  %v7267_v15 = vand.u32 4294901760, %v11269_v43 }
 0xec5   :  { %6929 = vmatmul.f32.vlgmr.msrb.gmra.mxu0 %v6928_v12  ;;  %7240 = vmatpush.msra.mxu2 %v13294_v60  ;;  %v13352_v12 = vld [vmem:[#allocation247_spill] sm:$0xff] }
 0xec6   :  { %7130 = vmatpush.msra.mxu0 %v13295_v30  ;;  %7291 = vmatpush.msra.mxu3 %v13296_v26  ;;  %v7268_v32 = vsub.f32 %v11269_v43, %v7267_v15  ;;  %v13354_v30 = vld [vmem:[#allocation252_spill] sm:$0xff] }
 0xec7   :  { %7207 = vmatpush.msra.mxu1 %v13261_v24  ;;  %7242 = vmatpush.msra.mxu2 %v13297_v1  ;;  %v13317_v24 = vld [vmem:[#allocation262_spill] sm:$0xff]  ;;  %v13355_v26 = vld [vmem:[#allocation232_spill] sm:$0xff] }
 0xec8   :  { %7134 = vmatpush.msra.mxu0 %v13298_v36  ;;  %7297 = vmatpush.msra.mxu3 %v13299_v0  ;;  %v13357_v36 = vld [vmem:[#allocation236_spill] sm:$0xff] }
 0xec9   :  { %7209 = vmatpush.msra.mxu1 %v13264_v8  ;;  %7244 = vmatpush.msra.mxu2 %v13300_v40  ;;  %v13320_v8 = vld [vmem:[#allocation265_spill] sm:$0xff]  ;;  %v13358_v0 = vld [vmem:[#allocation260_spill] sm:$0xff] }
 0xeca   :  { %7138 = vmatpush.msra.mxu0 %v13301_v10  ;;  %7303 = vmatpush.msra.mxu3 %v13302_v58  ;;  %v13360_v10 = vld [vmem:[#allocation263_spill] sm:$0xff]  ;;  %v13361_v58 = vld [vmem:[#allocation244_spill] sm:$0xff] }
 0xecb   :  { %7211 = vmatpush.msra.mxu1 %v13267_v57  ;;  %7246 = vmatpush.msra.mxu2 %v13303_v2  ;;  %v13323_v57 = vld [vmem:[#allocation267_spill] sm:$0xff] }
 0xecc   :  { %7142 = vmatpush.msra.mxu0 %v13304_v46  ;;  %7309 = vmatpush.msra.mxu3 %v13305_v53  ;;  %v13363_v46 = vld [vmem:[#allocation248_spill] sm:$0xff] }
 0xecd   :  { %7213 = vmatpush.msra.mxu1 %v13270_v49  ;;  %7248 = vmatpush.msra.mxu2 %v13306_v27  ;;  %v13325_v49 = vld [vmem:[#allocation187_spill] sm:$0xff]  ;;  %v13364_v53 = vld [vmem:[#allocation268_spill] sm:$0xff] }
 0xece   :  { %7146 = vmatpush.msra.mxu0 %v13307_v28  ;;  %7315 = vmatpush.msra.mxu3 %v13308_v62  ;;  %v13366_v28 = vld [vmem:[#allocation257_spill] sm:$0xff] }
 0xecf   :  { %7215 = vmatpush.msra.mxu1 %v13273_v38  ;;  %7250 = vmatpush.msra.mxu2 %v13309_v14  ;;  %v13328_v38 = vld [vmem:[#allocation191_spill] sm:$0xff]  ;;  %v13367_v62 = vld [vmem:[#allocation261_spill] sm:$0xff] }
 0xed0   :  { %7150 = vmatpush.msra.mxu0 %v13310_v29  ;;  %7321 = vmatpush.msra.mxu3 %v13311_v50  ;;  %v7643_v50 = vld [vmem:[%s11386_s2] ss:$0 sm:$0xff]  ;;  %s7674_s2 = smov [#allocation2]  }
 0xed1   :  { %7217 = vmatpush.msra.mxu1 %v13276_v31  ;;  %7252 = vmatpush.msra.mxu2 %v13312_v13  ;;  %v7269_v31 = vand.u32 4294901760, %v7268_v32  ;;  %s7584_s24 = sshll.u32 %s7674_s2, 4  ;;  %s7585_s24 = int_to_ptr.vmem [resolvable:$true] %s7584_s24 }
 0xed2   :  { %7154 = vmatpush.msra.mxu0 %v13313_v5  ;;  %7327 = vmatpush.msra.mxu3 %v13314_v47 }
 0xed3   :  { %7219 = vmatpush.msra.mxu1 %v13279_v34  ;;  %7254 = vmatpush.msra.mxu2 %v13315_v19  ;;  %v13333_v34 = vld [vmem:[#allocation214_spill] sm:$0xff] }
 0xed4   :  { %7158 = vmatpush.msra.mxu0 %v13316_v25  ;;  %7333 = vmatpush.msra.mxu3 %v13317_v24 }
 0xed5   :  { %7221 = vmatpush.msra.mxu1 %v13282_v3  ;;  %7256 = vmatpush.msra.mxu2 %v13318_v18  ;;  %v13337_v3 = vld [vmem:[#allocation201_spill] sm:$0xff] }
 0xed6   :  { %7162 = vmatpush.msra.mxu0 %v13319_v17  ;;  %7339 = vmatpush.msra.mxu3 %v13320_v8 }
 0xed7   :  { %7223 = vmatpush.msra.mxu1 %v13285_v48  ;;  %7258 = vmatpush.msra.mxu2 %v13321_v21  ;;  %v13340_v48 = vld [vmem:[#allocation224_spill] sm:$0xff] }
 0xed8   :  { %7166 = vmatpush.msra.mxu0 %v13322_v44  ;;  %7345 = vmatpush.msra.mxu3 %v13323_v57 }
 0xed9   :  { %7225 = vmatpush.msra.mxu1 %v13287_v42  ;;  %7260 = vmatpush.msra.mxu2 %v13324_v52  ;;  %v13343_v42 = vld [vmem:[#allocation211_spill] sm:$0xff] }
 0xeda   :  { %7170 = vmatpush.msra.mxu0 %v13325_v49  ;;  %7351 = vmatpush.msra.mxu3 %v13326_v23 }
 0xedb   :  { %7227 = vmatpush.msra.mxu1 %v13289_v56  ;;  %7262 = vmatpush.msra.mxu2 %v13327_v7  ;;  %v13345_v56 = vld [vmem:[#allocation216_spill] sm:$0xff] }
 0xedc   :  { %7174 = vmatpush.msra.mxu0 %v13328_v38  ;;  %7357 = vmatpush.msra.mxu3 %v13329_v39 }
 0xedd   :  { %7229 = vmatmul.f32.vlgmr.msra.gmra.mxu1 %v11203_v61  ;;  %7264 = vmatpush.msra.mxu2 %v13330_v54 }
 0xede   :  { %7430 = vmatpush.msrb.mxu1 %v13288_v35  ;;  %7178 = vmatpush.msra.mxu0 %v13331_v59 }
 0xedf   :  { %7363 = vmatpush.msra.mxu3 %v13332_v63  ;;  %7270 = vmatmul.f32.vlgmr.msra.gmra.mxu2 %v7269_v31 }
 0xee0   :  { %7432 = vmatpush.msrb.mxu1 %v13290_v33  ;;  %7471 = vmatpush.msrb.mxu2 %v13333_v34 }
 0xee1   :  { %7182 = vmatpush.msra.mxu0 %v13334_v9  ;;  %7369 = vmatpush.msra.mxu3 %v13335_v55 }
 0xee2   :  { %7371 = vmatmul.f32.vlgmr.msra.gmra.mxu3 %v11257_v51  ;;  %7434 = vmatpush.msrb.mxu1 %v13292_v16 }
 0xee3   :  { %7475 = vmatpush.msrb.mxu2 %v13336_v11  ;;  %7538 = vmatpush.msrb.mxu3 %v13288_v35  ;;  %v13344_v35 = vld [vmem:[#allocation231_spill] sm:$0xff] }
 0xee4   :  { %7186 = vmatpush.msra.mxu0 %v13337_v3  ;;  %7436 = vmatpush.msrb.mxu1 %v13294_v60 }
 0xee5   :  { %7479 = vmatpush.msrb.mxu2 %v13338_v4  ;;  %7540 = vmatpush.msrb.mxu3 %v13290_v33  ;;  %v13348_v33 = vld [vmem:[#allocation239_spill] sm:$0xff] }
 0xee6   :  { %7190 = vmatpush.msra.mxu0 %v13339_v20  ;;  %7438 = vmatpush.msrb.mxu1 %v13297_v1 }
 0xee7   :  { %7192 = vmatmul.f32.vlgmr.msra.gmra.mxu0 %v11203_v61  ;;  %7483 = vmatpush.msrb.mxu2 %v13340_v48  ;;  %v13346_v61 = vld [vmem:[#allocation235_spill] sm:$0xff] }
 0xee8   :  { %7377 = vmatpush.msrb.mxu0 %v13341_v6  ;;  %7542 = vmatpush.msrb.mxu3 %v13292_v16  ;;  %v13350_v16 = vld [vmem:[#allocation243_spill] sm:$0xff] }
 0xee9   :  { %7440 = vmatpush.msrb.mxu1 %v13300_v40  ;;  %7487 = vmatpush.msrb.mxu2 %v13342_v41 }
 0xeea   :  { %7380 = vmatpush.msrb.mxu0 %v13343_v42  ;;  %7544 = vmatpush.msrb.mxu3 %v13294_v60  ;;  %v13353_v60 = vld [vmem:[#allocation228_spill] sm:$0xff] }
 0xeeb   :  { %7442 = vmatpush.msrb.mxu1 %v13303_v2  ;;  %7491 = vmatpush.msrb.mxu2 %v13344_v35 }
 0xeec   :  { %7383 = vmatpush.msrb.mxu0 %v13345_v56  ;;  %7546 = vmatpush.msrb.mxu3 %v13297_v1  ;;  %v13356_v1 = vld [vmem:[#allocation256_spill] sm:$0xff] }
 0xeed   :  { %7444 = vmatpush.msrb.mxu1 %v13306_v27  ;;  %7495 = vmatpush.msrb.mxu2 %v13346_v61 }
 0xeee   :  { %7386 = vmatpush.msrb.mxu0 %v13347_v37  ;;  %7548 = vmatpush.msrb.mxu3 %v13300_v40  ;;  %v13359_v40 = vld [vmem:[#allocation240_spill] sm:$0xff] }
 0xeef   :  { %7446 = vmatpush.msrb.mxu1 %v13309_v14  ;;  %7499 = vmatpush.msrb.mxu2 %v13348_v33 }
 0xef0   :  { %7389 = vmatpush.msrb.mxu0 %v13349_v45  ;;  %7550 = vmatpush.msrb.mxu3 %v13303_v2  ;;  %v13362_v2 = vld [vmem:[#allocation266_spill] sm:$0xff] }
 0xef1   :  { %7448 = vmatpush.msrb.mxu1 %v13312_v13  ;;  %7503 = vmatpush.msrb.mxu2 %v13350_v16 }
 0xef2   :  { %7392 = vmatpush.msrb.mxu0 %v13351_v22  ;;  %7552 = vmatpush.msrb.mxu3 %v13306_v27  ;;  %v13365_v27 = vld [vmem:[#allocation253_spill] sm:$0xff] }
 0xef3   :  { %7450 = vmatpush.msrb.mxu1 %v13315_v19  ;;  %7507 = vmatpush.msrb.mxu2 %v13352_v12  ;;  %v6349_v5 = vpop.f32.mrf.mxu1 }
 0xef4   :  { %7395 = vmatpush.msrb.mxu0 %v13353_v60  ;;  %7554 = vmatpush.msrb.mxu3 %v13309_v14  ;;  %v13368_v14 = vld [vmem:[#allocation264_spill] sm:$0xff] }
 0xef5   :  { %7452 = vmatpush.msrb.mxu1 %v13318_v18  ;;  %7511 = vmatpush.msrb.mxu2 %v13354_v30 }
 0xef6   :  { %7398 = vmatpush.msrb.mxu0 %v13355_v26  ;;  %7556 = vmatpush.msrb.mxu3 %v13312_v13 }
 0xef7   :  { %7454 = vmatpush.msrb.mxu1 %v13321_v21  ;;  %7515 = vmatpush.msrb.mxu2 %v13356_v1 }
 0xef8   :  { %7401 = vmatpush.msrb.mxu0 %v13357_v36  ;;  %7558 = vmatpush.msrb.mxu3 %v13315_v19 }
 0xef9   :  { %7456 = vmatpush.msrb.mxu1 %v13324_v52  ;;  %7519 = vmatpush.msrb.mxu2 %v13358_v0 }
 0xefa   :  { %7404 = vmatpush.msrb.mxu0 %v13359_v40  ;;  %7560 = vmatpush.msrb.mxu3 %v13318_v18 }
 0xefb   :  { %7458 = vmatpush.msrb.mxu1 %v13327_v7  ;;  %7523 = vmatpush.msrb.mxu2 %v13360_v10  ;;  %v6248_v29 = vpop.f32.mrf.mxu0  ;;  %v6403_v19 = vpop.f32.mrf.mxu2 }
 0xefc   :  { %7407 = vmatpush.msrb.mxu0 %v13361_v58  ;;  %7562 = vmatpush.msrb.mxu3 %v13321_v21  ;;  %v6249_v13 = vadd.f32 %v7643_v50, %v6248_v29  ;;  %v6548_v17 = vpop.f32.mrf.mxu1 }
 0xefd   :  { %7460 = vmatpush.msrb.mxu1 %v13330_v54  ;;  %7527 = vmatpush.msrb.mxu2 %v13362_v2  ;;  %v6442_v24 = vpop.f32.mrf.mxu3 }
 0xefe   :  { %7410 = vmatpush.msrb.mxu0 %v13363_v46  ;;  %7564 = vmatpush.msrb.mxu3 %v13324_v52  ;;  %v6350_v47 = vadd.f32 %v6349_v5, %v6249_v13 }
 0xeff   :  { %7464 = vmatmul.f32.vlgmr.msrb.gmra.mxu1 %v7267_v15  ;;  %7531 = vmatpush.msrb.mxu2 %v13364_v53 }
 0xf00   :  { %7413 = vmatpush.msrb.mxu0 %v13365_v27  ;;  %7566 = vmatpush.msrb.mxu3 %v13327_v7  ;;  %v6404_v25 = vadd.f32 %v6403_v19, %v6350_v47 }
 0xf01   :  { %7533 = vmatmul.f32.vlgmr.msrb.gmra.mxu2 %v11257_v51 }
 0xf02   :  { %7416 = vmatpush.msrb.mxu0 %v13366_v28  ;;  %7568 = vmatpush.msrb.mxu3 %v13330_v54  ;;  %v6443_v15 = vadd.f32 %v6442_v24, %v6404_v25 }
 0xf03   :  { %7570 = vmatmul.f32.vlgmr.msrb.gmra.mxu3 %v11257_v51 }
 0xf04   :  { %7419 = vmatpush.msrb.mxu0 %v13367_v62  ;;  %v6589_v21 = vpop.f32.mrf.mxu2 }
 0xf05   :  { %v6511_v18 = vpop.f32.mrf.mxu0 }
 0xf06   :  { %7422 = vmatpush.msrb.mxu0 %v13368_v14  ;;  %v6512_v51 = vadd.f32 %v6511_v18, %v6443_v15 }
 0xf07   :  { %7425 = vmatmul.f32.vlgmr.msrb.gmra.mxu0 %v11269_v43  ;;  %v6690_v57 = vpop.f32.mrf.mxu3 }
 0xf08   :  { %v6549_v8 = vadd.f32 %v6548_v17, %v6512_v51 }
 0xf0a   :  { %v6590_v44 = vadd.f32 %v6589_v21, %v6549_v8 }
 0xf0c   :  { %v6691_v52 = vadd.f32 %v6690_v57, %v6590_v44 }
 0xf16   :  { %v6783_v49 = vpop.f32.mrf.mxu1 }
 0xf1e   :  { %v6852_v7 = vpop.f32.mrf.mxu2 }
 0xf20   :  { %v6744_v43 = vpop.f32.mrf.mxu0 }
 0xf21   :  { %v6745_v32 = vadd.f32 %v6744_v43, %v6691_v52  ;;  %v6889_v39 = vpop.f32.mrf.mxu3 }
 0xf23   :  { %v6784_v23 = vadd.f32 %v6783_v49, %v6745_v32 }
 0xf25   :  { %v6853_v38 = vadd.f32 %v6852_v7, %v6784_v23 }
 0xf27   :  { %v6890_v31 = vadd.f32 %v6889_v39, %v6853_v38 }
 0xf38   :  { %v7031_v63 = vpop.f32.mrf.mxu1 }
 0xf40   :  { %v7085_v9 = vpop.f32.mrf.mxu2 }
 0xf42   :  { %v6930_v54 = vpop.f32.mrf.mxu0 }
 0xf43   :  { %v6931_v59 = vadd.f32 %v6930_v54, %v6890_v31  ;;  %v7124_v11 = vpop.f32.mrf.mxu3 }
 0xf45   :  { %v7032_v34 = vadd.f32 %v7031_v63, %v6931_v59 }
 0xf47   :  { %v7086_v55 = vadd.f32 %v7085_v9, %v7032_v34 }
 0xf49   :  { %v7125_v4 = vadd.f32 %v7124_v11, %v7086_v55 }
 0xf5a   :  { %v7230_v48 = vpop.f32.mrf.mxu1 }
 0xf62   :  { %v7271_v41 = vpop.f32.mrf.mxu2 }
 0xf64   :  { %v7193_v3 = vpop.f32.mrf.mxu0 }
 0xf65   :  { %v7194_v20 = vadd.f32 %v7193_v3, %v7125_v4  ;;  %v7372_v35 = vpop.f32.mrf.mxu3 }
 0xf67   :  { %v7231_v6 = vadd.f32 %v7230_v48, %v7194_v20 }
 0xf69   :  { %v7272_v42 = vadd.f32 %v7271_v41, %v7231_v6 }
 0xf6b   :  { %v7373_v56 = vadd.f32 %v7372_v35, %v7272_v42 }
 0xf7c   :  { %v7465_v33 = vpop.f32.mrf.mxu1 }
 0xf84   :  { %v7426_v61 = vpop.f32.mrf.mxu0  ;;  %v7534_v16 = vpop.f32.mrf.mxu2 }
 0xf85   :  { %v7427_v37 = vadd.f32 %v7426_v61, %v7373_v56 }
 0xf86   :  { %v7571_v12 = vpop.f32.mrf.mxu3 }
 0xf87   :  { %v7466_v45 = vadd.f32 %v7465_v33, %v7427_v37 }
 0xf89   :  { %v7535_v22 = vadd.f32 %v7534_v16, %v7466_v45 }
 0xf8b   :  { %v7572_v60 = vadd.f32 %v7571_v12, %v7535_v22 }
 0xf8d   :  { %7574 = vst [vmem:[#allocation2] sm:$0xff] %v7572_v60 }
 0xf8e   :  { %7589 = dma.vmem_to_hbm [thread:$0]  %s7585_s24, 128, %s7587_s3, [#allocation3]  }
 0xf8f   :  { %7668 = dma.done.wait [#allocation3], 128  }
 0xf90   :  { %7669 = vsyncadd [#allocation3], 4294967168 }
 0xf91   :  { %7598 = vsyncpa [#allocation3], 1 }

</bundles_post_ra>
